<compile_context>
chip_gen: v5e
topology: v5e:2x2
jax: 0.10.0
libtpu: 0.0.40
codegen_flags: <defaults>
</compile_context>

<pallas_src>
from functools import partial

import jax
import jax.numpy as jnp
import numpy as np
from jax.experimental import pallas as pl
from jax.experimental.pallas import tpu as pltpu

T = 0.01          # temperature (module default)
EPS = 1e-12       # torch.nn.functional.normalize eps


# --------------------------------------------------------------------------
# Helpers: hardware-aware tile selection
# --------------------------------------------------------------------------
def _vmem_capacity_bytes():
    try:
        return int(pltpu.get_tpu_info().vmem_capacity_bytes)
    except Exception:
        return 64 * 1024 * 1024      # conservative fallback (v7x per-TC VMEM)


def _pick_batch_tile(B, max_tile):
    """Batch tile that divides B when possible and yields >=2 grid blocks
    (so both v7x TensorCores get work on the 'parallel' axis)."""
    if B <= 1:
        return 1
    cap = max(1, min(max_tile, -(-B // 2)))       # <= ceil(B/2)  ->  >=2 blocks
    best = 1
    for t in range(cap, 0, -1):
        if B % t == 0:
            best = t
            break
    # If the only exact divisor is tiny but B is large, accept padding.
    if best * 4 < cap and B > cap:
        best = cap
    return best


def _select_seq_tile(b_tile, S, H, itemsize, seq_tile_max, vmem_budget):
    """Largest seq tile whose FULL per-step VMEM footprint fits the budget."""
    def footprint(ts):
        hid = 2 * b_tile * ts * H * itemsize      # double-buffered hidden tiles
        wgt = 2 * b_tile * ts * 4                 # double-buffered weight tiles
        out = 2 * b_tile * H * 4                  # resident f32 output block
        tmp = b_tile * ts * H * 4                 # in-kernel f32 upcast temporaries
        return hid + wgt + out + tmp

    if S <= seq_tile_max and footprint(S) <= vmem_budget:
        return S                                  # full-seq block (no (8,128) issue)
    ts = max((min(seq_tile_max, S) // 128) * 128, 128)
    while ts > 128 and footprint(ts) > vmem_budget:
        ts -= 128
    return ts


# --------------------------------------------------------------------------
# Kernel 1: encode = L2-normalize(last_hidden_state) + weighted seq pooling
# --------------------------------------------------------------------------
def encode_kernel(hid_ref, w_ref, out_ref):
    # hid_ref: (Tb, Ts, H)  native dtype (bf16/f32) -- base_model hidden states
    # w_ref  : (Tb, 1, Ts)  f32 pooling weights ((pos >= S-len)/len, 0 in pads)
    # out_ref: (Tb, 1, H)   f32 pooled reps (same block across the seq axis,
    #                       VMEM-resident -> used directly as accumulator)
    sj = pl.program_id(1)

    @pl.when(sj == 0)
    def _():
        out_ref[...] = jnp.zeros_like(out_ref)

    x = hid_ref[...]                                           # native dtype
    xf = x.astype(jnp.float32)
    sq = jnp.sum(xf * xf, axis=-1)                             # (Tb, Ts) f32
    # Fold pooling weight into the normalization scale:
    #   scale = w / max(||x||, eps)  ==  w * rsqrt(max(||x||^2, eps^2))
    scale = w_ref[...] * jax.lax.rsqrt(
        jnp.maximum(sq, EPS * EPS))[:, None, :]                # (Tb, 1, Ts) f32

    # Single native-dtype MXU pass with f32 accumulation:
    # (Tb,1,Ts) @ (Tb,Ts,H) -> (Tb,1,H)
    pooled = jnp.einsum('bqs,bsh->bqh', scale.astype(x.dtype), x,
                        preferred_element_type=jnp.float32)
    out_ref[...] += pooled


def pooled_encode(hidden, attention_mask, *, batch_tile=8, seq_tile=1024):
    """L2-normalize along H and mean-pool the last `len` tokens. -> (B, H) f32."""
    B, S, H = hidden.shape

    # Pooling weights computed once in the wrapper (tiny vs. the hidden tensor):
    # w[b, s] = (s >= S - len_b) / len_b  (NaN/inf if len_b == 0, matching PyTorch).
    lens = attention_mask.sum(axis=-1).astype(jnp.float32)            # (B,)
    pos = jnp.arange(S, dtype=jnp.float32)
    keep = (pos[None, :] >= (S - lens)[:, None]).astype(jnp.float32)  # (B, S)
    w = (keep / lens[:, None])[:, None, :]                            # (B, 1, S)
    # 3-D weights/output: only the LAST TWO block dims face the (8,128) rule,
    # so the batch tile is unconstrained (can divide B exactly).

    Tb = _pick_batch_tile(B, batch_tile)
    itemsize = jnp.dtype(hidden.dtype).itemsize
    vmem_cap = _vmem_capacity_bytes()
    vmem_limit = min(vmem_cap * 3 // 4, 100 * 1024 * 1024)
    budget = vmem_limit - 4 * 1024 * 1024          # headroom for compiler scratch
    Ts = _select_seq_tile(Tb, S, H, itemsize, seq_tile, budget)

    # Pad to tile multiples with zeros: zero hidden rows get scale = w*rsqrt = 0
    # (w is 0 there) and contribute nothing, so padding is exact.
    Bp = pl.cdiv(B, Tb) * Tb
    Sp = pl.cdiv(S, Ts) * Ts
    if (Bp, Sp) != (B, S):
        hidden = jnp.pad(hidden, ((0, Bp - B), (0, Sp - S), (0, 0)))
        w = jnp.pad(w, ((0, Bp - B), (0, 0), (0, Sp - S)))

    out = pl.pallas_call(
        encode_kernel,
        out_shape=jax.ShapeDtypeStruct((Bp, 1, H), jnp.float32),
        grid_spec=pltpu.PrefetchScalarGridSpec(
            num_scalar_prefetch=0,
            grid=(Bp // Tb, Sp // Ts),               # seq reduction axis last
            in_specs=[
                pl.BlockSpec((Tb, Ts, H), lambda b, s: (b, s, 0)),
                pl.BlockSpec((Tb, 1, Ts), lambda b, s: (b, 0, s)),
            ],
            out_specs=pl.BlockSpec((Tb, 1, H), lambda b, s: (b, 0, 0)),
        ),
        compiler_params=pltpu.CompilerParams(
            dimension_semantics=("parallel", "arbitrary"),
            vmem_limit_bytes=vmem_limit,
        ),
    )(hidden, w)
    return out[:B, 0, :]


# --------------------------------------------------------------------------
# Kernel 2: dot-product logits (exact f32) + log_softmax + KLDiv(batchmean)
# --------------------------------------------------------------------------
def kl_loss_kernel(q_ref, c_ref, t_ref, out_ref, *, inv_temp, inv_batch):
    # q_ref: (Tbk, H)  c_ref: (Tbk, N, H)  t_ref: (Tbk, N)  out_ref: (1, 1)
    b = pl.program_id(0)

    @pl.when(b == 0)
    def _():
        out_ref[...] = jnp.zeros_like(out_ref)

    q = q_ref[...].astype(jnp.float32)
    c = c_ref[...].astype(jnp.float32)
    t = t_ref[...].astype(jnp.float32)

    # logits = sum_h(q * c) / T as an exact-f32 VPU reduction (no bf16 operand
    # rounding on the MXU; 1/T = 100 would amplify it).
    logits = jnp.sum(q[:, None, :] * c, axis=-1) * inv_temp      # (Tbk, N)

    def log_softmax(z):
        m = jnp.max(z, axis=-1, keepdims=True)
        zs = z - m
        return zs - jnp.log(jnp.sum(jnp.exp(zs), axis=-1, keepdims=True))

    s_lp = log_softmax(logits)          # student log-probs
    t_lp = log_softmax(t)               # teacher log-probs
    # KLDivLoss(log_target=True, reduction='batchmean'); zero-padded batch rows
    # produce identical uniform distributions -> contribute exactly 0.
    partial_kl = jnp.sum(jnp.exp(t_lp) * (t_lp - s_lp)) * inv_batch
    out_ref[...] += partial_kl.reshape(1, 1)


def kl_div_loss(query_reps, context_reps, teacher_scores, *, batch_tile=8):
    B, N = teacher_scores.shape
    H = query_reps.shape[-1]
    c = context_reps.reshape(B, N, H)

    if B <= batch_tile:
        Tbk = B                         # single block: full-dim blocks are legal
    else:
        Tbk = batch_tile
        assert Tbk % 8 == 0, Tbk        # (8,128) rule for the 2-D q/t blocks

    Bp = pl.cdiv(B, Tbk) * Tbk
    q = query_reps
    t = teacher_scores
    if Bp != B:
        q = jnp.pad(q, ((0, Bp - B), (0, 0)))
        c = jnp.pad(c, ((0, Bp - B), (0, 0), (0, 0)))
        t = jnp.pad(t, ((0, Bp - B), (0, 0)))

    vmem_limit = min(_vmem_capacity_bytes() * 3 // 4, 100 * 1024 * 1024)
    kernel = partial(kl_loss_kernel, inv_temp=1.0 / T, inv_batch=1.0 / B)

    out = pl.pallas_call(
        kernel,
        out_shape=jax.ShapeDtypeStruct((1, 1), jnp.float32),
        grid_spec=pltpu.PrefetchScalarGridSpec(
            num_scalar_prefetch=0,
            grid=(Bp // Tbk,),
            in_specs=[
                pl.BlockSpec((Tbk, H), lambda b: (b, 0)),
                pl.BlockSpec((Tbk, N, H), lambda b: (b, 0, 0)),
                pl.BlockSpec((Tbk, N), lambda b: (b, 0)),
            ],
            out_specs=pl.BlockSpec((1, 1), lambda b: (0, 0)),
        ),
        compiler_params=pltpu.CompilerParams(
            dimension_semantics=("arbitrary",),
            vmem_limit_bytes=vmem_limit,
        ),
    )(q, c, t)
    return out[0, 0]


# --------------------------------------------------------------------------
# Full forward (glue in plain JAX, hot path in Pallas)
# --------------------------------------------------------------------------
@partial(jax.jit, static_argnames=("batch_tile", "seq_tile"))
def llama_bidense_kldiv_forward(query_hidden, query_mask,
                                context_hidden, context_mask,
                                teacher_scores, *,
                                batch_tile=8, seq_tile=1024):
    query_reps = pooled_encode(query_hidden, query_mask,
                               batch_tile=batch_tile, seq_tile=seq_tile)
    context_reps = pooled_encode(context_hidden, context_mask,
                                 batch_tile=batch_tile, seq_tile=seq_tile)
    return kl_div_loss(query_reps, context_reps, teacher_scores,
                       batch_tile=batch_tile)


# --------------------------------------------------------------------------
# Pure-JAX (exact f32) reference for validation
# --------------------------------------------------------------------------
def reference_encode(hidden, mask):
    h = hidden.astype(jnp.float32)
    lens = mask.sum(-1).astype(jnp.float32)
    hn = h / jnp.maximum(jnp.sqrt(jnp.sum(h * h, axis=-1, keepdims=True)), EPS)
    S = h.shape[1]
    pos = jnp.arange(S, dtype=jnp.float32)
    keep = (pos[None, :] >= (S - lens)[:, None]).astype(jnp.float32)
    return (hn * keep[..., None]).sum(1) / lens[:, None]


def reference_forward(query_hidden, query_mask, context_hidden, context_mask,
                      teacher_scores):
    q = reference_encode(query_hidden, query_mask)
    c = reference_encode(context_hidden, context_mask)
    B, N = teacher_scores.shape
    c = c.reshape(B, N, -1)
    logits = (q[:, None, :] * c).sum(-1) / T
    s_lp = jax.nn.log_softmax(logits, -1)
    t_lp = jax.nn.log_softmax(teacher_scores.astype(jnp.float32), -1)
    return jnp.sum(jnp.exp(t_lp) * (t_lp - s_lp)) / B


if __name__ == "__main__":
    # Small shapes, but chosen to exercise multi-block batch & seq grids and
    # the zero-padding path (S=200 with seq_tile=128; Bc=12 -> batch tile 6,
    # two "parallel" batch blocks per call -> both v7x TCs get work).
    Bq, N, S, H = 2, 6, 200, 128
    Bc = Bq * N

    key = jax.random.PRNGKey(0)
    k1, k2, k3 = jax.random.split(key, 3)

    # Hidden states kept in bf16 in HBM (kernel contracts the raw bf16 tile).
    query_hidden = jax.random.normal(k1, (Bq, S, H),
                                     dtype=jnp.float32).astype(jnp.bfloat16)
    context_hidden = jax.random.normal(k2, (Bc, S, H),
                                       dtype=jnp.float32).astype(jnp.bfloat16)
    teacher_scores = jax.random.normal(k3, (Bq, N), dtype=jnp.float32)

    # Left-padded attention masks (decoder-style), deterministic lengths.
    q_lens = jnp.array([50, 200], dtype=jnp.int32)
    c_lens = jnp.array([3, 200, 66, 4, 77, 128, 2, 5, 190, 31, 100, 9],
                       dtype=jnp.int32)
    pos = jnp.arange(S, dtype=jnp.int32)
    query_mask = (pos[None, :] >= (S - q_lens)[:, None]).astype(jnp.int32)
    context_mask = (pos[None, :] >= (S - c_lens)[:, None]).astype(jnp.int32)

    loss = llama_bidense_kldiv_forward(
        query_hidden, query_mask, context_hidden, context_mask, teacher_scores,
        batch_tile=8, seq_tile=128)
    loss = jax.block_until_ready(loss)

    # --- validation ---
    # Pooled reps: the folded scale is rounded to bf16 before the MXU
    # contraction (same operand precision as the default-precision matmul the
    # reference would use on TPU); accumulation is f32.
    q_reps = pooled_encode(query_hidden, query_mask, batch_tile=8, seq_tile=128)
    c_reps = pooled_encode(context_hidden, context_mask,
                           batch_tile=8, seq_tile=128)
    np.testing.assert_allclose(np.asarray(q_reps),
                               np.asarray(reference_encode(query_hidden,
                                                           query_mask)),
                               rtol=1e-2, atol=2e-3)
    np.testing.assert_allclose(np.asarray(c_reps),
                               np.asarray(reference_encode(context_hidden,
                                                           context_mask)),
                               rtol=1e-2, atol=2e-3)

    # Final KL loss. Logits are exact f32 in the kernel; the only remaining
    # divergence from the exact-f32 reference is the bf16 pooling scale, which
    # T=0.01 amplifies through the logits.
    ref = reference_forward(
        query_hidden, query_mask, context_hidden, context_mask, teacher_scores)
    np.testing.assert_allclose(np.asarray(loss), np.asarray(ref),
                               rtol=2e-2, atol=2e-2)
    print("KERNEL_OK")
</pallas_src>

<mosaic_0001>
module attributes {stable_mosaic.version = 11 : i64} {
  func.func @encode_kernel(%arg0: i32, %arg1: i32, %arg2: memref<6x128x128xbf16, #tpu.memory_space<vmem>>, %arg3: memref<6x1x128xf32, #tpu.memory_space<vmem>>, %arg4: memref<6x1x128xf32, #tpu.memory_space<vmem>>) attributes {dimension_semantics = [#tpu.dimension_semantics<parallel>, #tpu.dimension_semantics<arbitrary>], iteration_bounds = array<i64: 2, 2>, scalar_prefetch = 0 : i64, scratch_operands = 0 : i64, tpu.core_type = #tpu.core_type<tc>, window_params = [{transform_indices = @transform_0, window_bounds = array<i64: 6, 128, 128>}, {transform_indices = @transform_1, window_bounds = array<i64: 6, 1, 128>}, {transform_indices = @transform_2, window_bounds = array<i64: 6, 1, 128>}]} {
    %c0_i32 = arith.constant 0 : i32
    %0 = arith.cmpi eq, %arg1, %c0_i32 : i32
    %1 = arith.extui %0 : i1 to i32
    %c0_i32_0 = arith.constant 0 : i32
    %2 = arith.cmpi ne, %1, %c0_i32_0 : i32
    scf.if %2 {
      %cst_14 = arith.constant 0.000000e+00 : f32
      %18 = vector.broadcast %cst_14 : f32 to vector<6x1x128xf32>
      %c0_15 = arith.constant 0 : index
      %c0_16 = arith.constant 0 : index
      %c0_17 = arith.constant 0 : index
      %19 = vector.load %arg4[%c0_15, %c0_16, %c0_17] : memref<6x1x128xf32, #tpu.memory_space<vmem>>, vector<6x1x128xf32>
      tpu.vector_store %arg4[%c0_15, %c0_16, %c0_17], %18 {strides = array<i32>} : memref<6x1x128xf32, #tpu.memory_space<vmem>>, vector<6x1x128xf32>,
    } else {
    }
    %c0 = arith.constant 0 : index
    %c0_1 = arith.constant 0 : index
    %c0_2 = arith.constant 0 : index
    %3 = vector.load %arg2[%c0, %c0_1, %c0_2] : memref<6x128x128xbf16, #tpu.memory_space<vmem>>, vector<6x128x128xbf16>
    %4 = arith.extf %3 : vector<6x128x128xbf16> to vector<6x128x128xf32>
    %5 = arith.mulf %4, %4 : vector<6x128x128xf32>
    %cst = arith.constant dense<0.000000e+00> : vector<6x128xf32>
    %6 = vector.multi_reduction <add>, %5, %cst [2] : vector<6x128x128xf32> to vector<6x128xf32>
    %c0_3 = arith.constant 0 : index
    %c0_4 = arith.constant 0 : index
    %c0_5 = arith.constant 0 : index
    %7 = vector.load %arg3[%c0_3, %c0_4, %c0_5] : memref<6x1x128xf32, #tpu.memory_space<vmem>>, vector<6x1x128xf32>
    %cst_6 = arith.constant 1.000000e-24 : f32
    %8 = vector.broadcast %cst_6 : f32 to vector<6x128xf32>
    %9 = arith.maximumf %6, %8 : vector<6x128xf32>
    %10 = math.rsqrt %9 : vector<6x128xf32>
    %11 = vector.shape_cast %10 : vector<6x128xf32> to vector<6x1x128xf32>
    %12 = arith.mulf %7, %11 : vector<6x1x128xf32>
    %13 = arith.truncf %12 : vector<6x1x128xf32> to vector<6x1x128xbf16>
    "tpu.trace_start"() <{level = 10 : i32, message = "bqs,bsh->bqh"}> : () -> ()
    %cst_7 = arith.constant dense<0.000000e+00> : vector<6x1x128xf32>
    %14 = tpu.matmul %13, %3, %cst_7 {dimension_numbers = #tpu.dot_dimension_numbers<[2], [1], [1], [2], [0, 0, 0, 1, 1, 2], [0], [0]>} : vector<6x1x128xbf16>, vector<6x128x128xbf16>, vector<6x1x128xf32> -> vector<6x1x128xf32>
    "tpu.trace_stop"() : () -> ()
    %c0_8 = arith.constant 0 : index
    %c0_9 = arith.constant 0 : index
    %c0_10 = arith.constant 0 : index
    %15 = vector.load %arg4[%c0_8, %c0_9, %c0_10] : memref<6x1x128xf32, #tpu.memory_space<vmem>>, vector<6x1x128xf32>
    %16 = arith.addf %15, %14 : vector<6x1x128xf32>
    %c0_11 = arith.constant 0 : index
    %c0_12 = arith.constant 0 : index
    %c0_13 = arith.constant 0 : index
    %17 = vector.load %arg4[%c0_11, %c0_12, %c0_13] : memref<6x1x128xf32, #tpu.memory_space<vmem>>, vector<6x1x128xf32>
    tpu.vector_store %arg4[%c0_11, %c0_12, %c0_13], %16 {strides = array<i32>} : memref<6x1x128xf32, #tpu.memory_space<vmem>>, vector<6x1x128xf32>,
    return
  }
  func.func @transform_0(%arg0: i32, %arg1: i32) -> (i32, i32, i32) {
    %c0_i32 = arith.constant 0 : i32
    %c0_i32_0 = arith.constant 0 : i32
    return %arg0, %arg1, %c0_i32 : i32, i32, i32
  }
  func.func @transform_1(%arg0: i32, %arg1: i32) -> (i32, i32, i32) {
    %c0_i32 = arith.constant 0 : i32
    %c0_i32_0 = arith.constant 0 : i32
    return %arg0, %c0_i32, %arg1 : i32, i32, i32
  }
  func.func @transform_2(%arg0: i32, %arg1: i32) -> (i32, i32, i32) {
    %c0_i32 = arith.constant 0 : i32
    %c0_i32_0 = arith.constant 0 : i32
    %c0_i32_1 = arith.constant 0 : i32
    return %arg0, %c0_i32, %c0_i32_0 : i32, i32, i32
  }
}

module attributes {stable_mosaic.version = 11 : i64} {
  func.func @kl_loss_kernel(%arg0: i32, %arg1: memref<2x128xf32, #tpu.memory_space<vmem>>, %arg2: memref<2x6x128xf32, #tpu.memory_space<vmem>>, %arg3: memref<2x6xf32, #tpu.memory_space<vmem>>, %arg4: memref<1x1xf32, #tpu.memory_space<vmem>>) attributes {dimension_semantics = [#tpu.dimension_semantics<arbitrary>], iteration_bounds = array<i64: 1>, scalar_prefetch = 0 : i64, scratch_operands = 0 : i64, tpu.core_type = #tpu.core_type<tc>, window_params = [{transform_indices = @transform_0, window_bounds = array<i64: 2, 128>}, {transform_indices = @transform_1, window_bounds = array<i64: 2, 6, 128>}, {transform_indices = @transform_2, window_bounds = array<i64: 2, 6>}, {pipeline_mode = #tpu.pipeline_mode<synchronous>, transform_indices = @transform_3, window_bounds = array<i64: 1, 1>}]} {
    %c0_i32 = arith.constant 0 : i32
    %0 = arith.cmpi eq, %arg0, %c0_i32 : i32
    %1 = arith.extui %0 : i1 to i32
    %c0_i32_0 = arith.constant 0 : i32
    %2 = arith.cmpi ne, %1, %c0_i32_0 : i32
    scf.if %2 {
      %cst_18 = arith.constant 0.000000e+00 : f32
      %44 = vector.broadcast %cst_18 : f32 to vector<1x1xf32>
      %c0_19 = arith.constant 0 : index
      %c0_20 = arith.constant 0 : index
      %45 = vector.load %arg4[%c0_19, %c0_20] : memref<1x1xf32, #tpu.memory_space<vmem>>, vector<1x1xf32>
      tpu.vector_store %arg4[%c0_19, %c0_20], %44 {strides = array<i32>} : memref<1x1xf32, #tpu.memory_space<vmem>>, vector<1x1xf32>,
    } else {
    }
    %c0 = arith.constant 0 : index
    %c0_1 = arith.constant 0 : index
    %3 = vector.load %arg1[%c0, %c0_1] : memref<2x128xf32, #tpu.memory_space<vmem>>, vector<2x128xf32>
    %c0_2 = arith.constant 0 : index
    %c0_3 = arith.constant 0 : index
    %c0_4 = arith.constant 0 : index
    %4 = vector.load %arg2[%c0_2, %c0_3, %c0_4] : memref<2x6x128xf32, #tpu.memory_space<vmem>>, vector<2x6x128xf32>
    %c0_5 = arith.constant 0 : index
    %c0_6 = arith.constant 0 : index
    %5 = vector.load %arg3[%c0_5, %c0_6] : memref<2x6xf32, #tpu.memory_space<vmem>>, vector<2x6xf32>
    %6 = vector.shape_cast %3 : vector<2x128xf32> to vector<2x1x128xf32>
    %7 = vector.broadcast %6 : vector<2x1x128xf32> to vector<2x6x128xf32>
    %8 = arith.mulf %7, %4 : vector<2x6x128xf32>
    %cst = arith.constant dense<0.000000e+00> : vector<2x6xf32>
    %9 = vector.multi_reduction <add>, %8, %cst [2] : vector<2x6x128xf32> to vector<2x6xf32>
    %cst_7 = arith.constant 1.000000e+02 : f32
    %10 = vector.broadcast %cst_7 : f32 to vector<2x6xf32>
    %11 = arith.mulf %9, %10 : vector<2x6xf32>
    %cst_8 = arith.constant dense<0xFF800000> : vector<2xf32>
    %12 = vector.multi_reduction <maximumf>, %11, %cst_8 [1] : vector<2x6xf32> to vector<2xf32>
    %13 = vector.shape_cast %12 : vector<2xf32> to vector<2x1xf32>
    %14 = vector.broadcast %13 : vector<2x1xf32> to vector<2x6xf32>
    %15 = arith.subf %11, %14 : vector<2x6xf32>
    %16 = math.exp %15 : vector<2x6xf32>
    %cst_9 = arith.constant dense<0.000000e+00> : vector<2xf32>
    %17 = vector.multi_reduction <add>, %16, %cst_9 [1] : vector<2x6xf32> to vector<2xf32>
    %18 = vector.shape_cast %17 : vector<2xf32> to vector<2x1xf32>
    %19 = math.log %18 : vector<2x1xf32>
    %20 = vector.broadcast %19 : vector<2x1xf32> to vector<2x6xf32>
    %21 = arith.subf %15, %20 : vector<2x6xf32>
    %cst_10 = arith.constant dense<0xFF800000> : vector<2xf32>
    %22 = vector.multi_reduction <maximumf>, %5, %cst_10 [1] : vector<2x6xf32> to vector<2xf32>
    %23 = vector.shape_cast %22 : vector<2xf32> to vector<2x1xf32>
    %24 = vector.broadcast %23 : vector<2x1xf32> to vector<2x6xf32>
    %25 = arith.subf %5, %24 : vector<2x6xf32>
    %26 = math.exp %25 : vector<2x6xf32>
    %cst_11 = arith.constant dense<0.000000e+00> : vector<2xf32>
    %27 = vector.multi_reduction <add>, %26, %cst_11 [1] : vector<2x6xf32> to vector<2xf32>
    %28 = vector.shape_cast %27 : vector<2xf32> to vector<2x1xf32>
    %29 = math.log %28 : vector<2x1xf32>
    %30 = vector.broadcast %29 : vector<2x1xf32> to vector<2x6xf32>
    %31 = arith.subf %25, %30 : vector<2x6xf32>
    %32 = math.exp %31 : vector<2x6xf32>
    %33 = arith.subf %31, %21 : vector<2x6xf32>
    %34 = arith.mulf %32, %33 : vector<2x6xf32>
    %35 = vector.shape_cast %34 : vector<2x6xf32> to vector<1x2x6xf32>
    %cst_12 = arith.constant dense<0.000000e+00> : vector<1xf32>
    %36 = vector.multi_reduction <add>, %35, %cst_12 [1, 2] : vector<1x2x6xf32> to vector<1xf32>
    %37 = vector.shape_cast %36 : vector<1xf32> to vector<1x1x1xf32>
    %38 = vector.extract %37[0, 0, 0] : f32 from vector<1x1x1xf32>
    %cst_13 = arith.constant 5.000000e-01 : f32
    %39 = arith.mulf %38, %cst_13 : f32
    %c0_14 = arith.constant 0 : index
    %c0_15 = arith.constant 0 : index
    %40 = vector.load %arg4[%c0_14, %c0_15] : memref<1x1xf32, #tpu.memory_space<vmem>>, vector<1x1xf32>
    %41 = vector.broadcast %39 : f32 to vector<1x1xf32>
    %42 = arith.addf %40, %41 : vector<1x1xf32>
    %c0_16 = arith.constant 0 : index
    %c0_17 = arith.constant 0 : index
    %43 = vector.load %arg4[%c0_16, %c0_17] : memref<1x1xf32, #tpu.memory_space<vmem>>, vector<1x1xf32>
    tpu.vector_store %arg4[%c0_16, %c0_17], %42 {strides = array<i32>} : memref<1x1xf32, #tpu.memory_space<vmem>>, vector<1x1xf32>,
    return
  }
  func.func @transform_0(%arg0: i32) -> (i32, i32) {
    %c0_i32 = arith.constant 0 : i32
    %c0_i32_0 = arith.constant 0 : i32
    return %arg0, %c0_i32 : i32, i32
  }
  func.func @transform_1(%arg0: i32) -> (i32, i32, i32) {
    %c0_i32 = arith.constant 0 : i32
    %c0_i32_0 = arith.constant 0 : i32
    %c0_i32_1 = arith.constant 0 : i32
    return %arg0, %c0_i32, %c0_i32_0 : i32, i32, i32
  }
  func.func @transform_2(%arg0: i32) -> (i32, i32) {
    %c0_i32 = arith.constant 0 : i32
    %c0_i32_0 = arith.constant 0 : i32
    return %arg0, %c0_i32 : i32, i32
  }
  func.func @transform_3(%arg0: i32) -> (i32, i32) {
    %c0_i32 = arith.constant 0 : i32
    %c0_i32_0 = arith.constant 0 : i32
    %c0_i32_1 = arith.constant 0 : i32
    return %c0_i32, %c0_i32_0 : i32, i32
  }
}

module attributes {stable_mosaic.version = 11 : i64} {
  func.func @encode_kernel(%arg0: i32, %arg1: i32, %arg2: memref<1x128x128xbf16, #tpu.memory_space<vmem>>, %arg3: memref<1x1x128xf32, #tpu.memory_space<vmem>>, %arg4: memref<1x1x128xf32, #tpu.memory_space<vmem>>) attributes {dimension_semantics = [#tpu.dimension_semantics<parallel>, #tpu.dimension_semantics<arbitrary>], iteration_bounds = array<i64: 2, 2>, scalar_prefetch = 0 : i64, scratch_operands = 0 : i64, tpu.core_type = #tpu.core_type<tc>, window_params = [{transform_indices = @transform_0, window_bounds = array<i64: 1, 128, 128>}, {transform_indices = @transform_1, window_bounds = array<i64: 1, 1, 128>}, {transform_indices = @transform_2, window_bounds = array<i64: 1, 1, 128>}]} {
    %c0_i32 = arith.constant 0 : i32
    %0 = arith.cmpi eq, %arg1, %c0_i32 : i32
    %1 = arith.extui %0 : i1 to i32
    %c0_i32_0 = arith.constant 0 : i32
    %2 = arith.cmpi ne, %1, %c0_i32_0 : i32
    scf.if %2 {
      %cst_14 = arith.constant 0.000000e+00 : f32
      %18 = vector.broadcast %cst_14 : f32 to vector<1x1x128xf32>
      %c0_15 = arith.constant 0 : index
      %c0_16 = arith.constant 0 : index
      %c0_17 = arith.constant 0 : index
      %19 = vector.load %arg4[%c0_15, %c0_16, %c0_17] : memref<1x1x128xf32, #tpu.memory_space<vmem>>, vector<1x1x128xf32>
      tpu.vector_store %arg4[%c0_15, %c0_16, %c0_17], %18 {strides = array<i32>} : memref<1x1x128xf32, #tpu.memory_space<vmem>>, vector<1x1x128xf32>,
    } else {
    }
    %c0 = arith.constant 0 : index
    %c0_1 = arith.constant 0 : index
    %c0_2 = arith.constant 0 : index
    %3 = vector.load %arg2[%c0, %c0_1, %c0_2] : memref<1x128x128xbf16, #tpu.memory_space<vmem>>, vector<1x128x128xbf16>
    %4 = arith.extf %3 : vector<1x128x128xbf16> to vector<1x128x128xf32>
    %5 = arith.mulf %4, %4 : vector<1x128x128xf32>
    %cst = arith.constant dense<0.000000e+00> : vector<1x128xf32>
    %6 = vector.multi_reduction <add>, %5, %cst [2] : vector<1x128x128xf32> to vector<1x128xf32>
    %c0_3 = arith.constant 0 : index
    %c0_4 = arith.constant 0 : index
    %c0_5 = arith.constant 0 : index
    %7 = vector.load %arg3[%c0_3, %c0_4, %c0_5] : memref<1x1x128xf32, #tpu.memory_space<vmem>>, vector<1x1x128xf32>
    %cst_6 = arith.constant 1.000000e-24 : f32
    %8 = vector.broadcast %cst_6 : f32 to vector<1x128xf32>
    %9 = arith.maximumf %6, %8 : vector<1x128xf32>
    %10 = math.rsqrt %9 : vector<1x128xf32>
    %11 = vector.shape_cast %10 : vector<1x128xf32> to vector<1x1x128xf32>
    %12 = arith.mulf %7, %11 : vector<1x1x128xf32>
    %13 = arith.truncf %12 : vector<1x1x128xf32> to vector<1x1x128xbf16>
    "tpu.trace_start"() <{level = 10 : i32, message = "bqs,bsh->bqh"}> : () -> ()
    %cst_7 = arith.constant dense<0.000000e+00> : vector<1x1x128xf32>
    %14 = tpu.matmul %13, %3, %cst_7 {dimension_numbers = #tpu.dot_dimension_numbers<[2], [1], [1], [2], [0, 0, 0, 1, 1, 2], [0], [0]>} : vector<1x1x128xbf16>, vector<1x128x128xbf16>, vector<1x1x128xf32> -> vector<1x1x128xf32>
    "tpu.trace_stop"() : () -> ()
    %c0_8 = arith.constant 0 : index
    %c0_9 = arith.constant 0 : index
    %c0_10 = arith.constant 0 : index
    %15 = vector.load %arg4[%c0_8, %c0_9, %c0_10] : memref<1x1x128xf32, #tpu.memory_space<vmem>>, vector<1x1x128xf32>
    %16 = arith.addf %15, %14 : vector<1x1x128xf32>
    %c0_11 = arith.constant 0 : index
    %c0_12 = arith.constant 0 : index
    %c0_13 = arith.constant 0 : index
    %17 = vector.load %arg4[%c0_11, %c0_12, %c0_13] : memref<1x1x128xf32, #tpu.memory_space<vmem>>, vector<1x1x128xf32>
    tpu.vector_store %arg4[%c0_11, %c0_12, %c0_13], %16 {strides = array<i32>} : memref<1x1x128xf32, #tpu.memory_space<vmem>>, vector<1x1x128xf32>,
    return
  }
  func.func @transform_0(%arg0: i32, %arg1: i32) -> (i32, i32, i32) {
    %c0_i32 = arith.constant 0 : i32
    %c0_i32_0 = arith.constant 0 : i32
    return %arg0, %arg1, %c0_i32 : i32, i32, i32
  }
  func.func @transform_1(%arg0: i32, %arg1: i32) -> (i32, i32, i32) {
    %c0_i32 = arith.constant 0 : i32
    %c0_i32_0 = arith.constant 0 : i32
    return %arg0, %c0_i32, %arg1 : i32, i32, i32
  }
  func.func @transform_2(%arg0: i32, %arg1: i32) -> (i32, i32, i32) {
    %c0_i32 = arith.constant 0 : i32
    %c0_i32_0 = arith.constant 0 : i32
    %c0_i32_1 = arith.constant 0 : i32
    return %arg0, %c0_i32, %c0_i32_0 : i32, i32, i32
  }
}

</mosaic_0001>

<bundles_post_ra>
// kernel: squeeze.4
= control target key start
LH: loop header
LB: loop body
LE: loop exit
PB: predicated region body
PF: predicated region fallthrough
CT: control target
= control target key end

     0   :  { %s38_s0 = inlined_call_operand.vmem [shape: f32[12,128], index: 0, kind: input, shape index: {}]   ;;  %s39_s1 = inlined_call_operand.vmem [shape: f32[2,6,128], index: 1, kind: output, shape index: {}]  }
   0x1   :  { %v2_v0 = vld [vmem:[%s38_s0] sm:$0xff]   ;;  %v11_v1 = vld [vmem:[%s38_s0 + $0x8] sm:$0xf]  }
   0x2   :  { %3 = vst [vmem:[%s39_s1] sm:$0x3f] %v2_v0  }
   0x3   :  { %10 = vst [vmem:[%s39_s1 + $0x2] sm:$0xc0] %v2_v0  }
   0x4   :  { %12 = vst [vmem:[%s39_s1 + $0xa] sm:$0xf] %v11_v1  }

// kernel: llama_bidense_kldiv_forward.5
= control target key start
LH: loop header
LB: loop body
LE: loop exit
PB: predicated region body
PF: predicated region fallthrough
CT: control target
= control target key end

     0   :  { %s252_s0 = inlined_call_operand.vmem [shape: f32[2,128], index: 0, kind: input, shape index: {}]   ;;  %s253_s1 = inlined_call_operand.vmem [shape: f32[2,6,128], index: 1, kind: input, shape index: {}]   ;;  %s254_s2 = inlined_call_operand.vmem [shape: f32[2,6], index: 2, kind: input, shape index: {}]   ;;  %s255_s3 = inlined_call_operand.hbm [shape: f32[1,1], index: 3, kind: output, shape index: {}]  }
   0x1   :  { %v21_v0 = vld [vmem:[%s252_s0] sm:$0x3] }
   0x2   :  { %v22_v1 = vld [vmem:[%s253_s1] sm:$0x3f]  ;;  %v27_v2 = vperm.slane %v21_v0, 0  ;;  %v26_v3 = vrot.slane %v21_v0, 1 }
   0x3   :  { %8 = vsyncpa [#allocation3], 0  ;;  %vm33_vm0 = vcmask 1045504   ;;  %v23_v6 = vld [vmem:[%s253_s1 + $0x8] sm:$0x3f]  ;;  %v44_v11 = vlaneseq  ;;  %vm48_vm1 = vcmask 1041409  }
   0x4   :  { %v31_v4 = vmul.f32 %v27_v2, %v22_v1  ;;  %v28_v5 = vperm.slane %v26_v3, 0  ;;  %vm51_vm2 = vcmask 41984   ;;  %v196_v20 = vmov 0   ;;  %v24_v30 = vld [vmem:[%s254_s2] sm:$0x3]  ;;  %s198_s18 = smov [#allocation2]  }
   0x5   :  { %v228_v12 = vand.u32 127, %v44_v11  ;;  %156 = vset.pattern.permute.xlu2 %v196_v20  ;;  %155 = vset.pattern.permute.xlu1 %v196_v20  ;;  %v90_v31 = vsel %vm51_vm2, %v24_v30, -inf  ;;  %vm19_vm3 = vcmask 0   ;;  %v197_v0 = vmov 0.0   ;;  %s139_s19 = sshll.u32 %s198_s18, 4  ;;  %s141_s23 = sshll.u32 %s255_s3, 4  ;;  %s140_s19 = int_to_ptr.vmem [resolvable:$true] %s139_s19  ;;  %s142_s23 = int_to_ptr.hbm [resolvable:$true] %s141_s23 }
   0x6   :  { %v34_v7 = vsel %vm33_vm0, %v31_v4, 0.0  ;;  %v32_v8 = vmul.f32 %v28_v5, %v23_v6  ;;  %157 = vset.pattern.permute.xlu0 %v196_v20  ;;  %20 = vst.msk [vmem:[#allocation2] sm:$0x1] %vm19_vm3, %v197_v0 }
   0x7   :  { %35 = vadd.xlane.f32.xlu0 %v34_v7 }
   0x8   :  { %v37_v9 = vsel %vm33_vm0, %v32_v8, 0.0 }
   0xd   :  { %v129_v8 = vld [vmem:[#allocation2] sm:$0x1] }
   0xf   :  { %38 = vadd.xlane.f32.xlu0 %v37_v9 }
  0x7a   :  { %v36_v10 = vpop.xlane.xlu0 %35 }
  0x7b   :  { %v40_v13 = vmul.f32 100.0, %v36_v10 }
  0x7d   :  { %v46_v16 = vperm.slane %v40_v13, %v228_v12 }
  0x82   :  { %v39_v14 = vpop.xlane.xlu0 %38 }
  0x83   :  { %v41_v15 = vmul.f32 100.0, %v39_v14 }
  0x85   :  { %v47_v17 = vperm.slane %v41_v15, %v228_v12 }
  0x87   :  { %v49_v18 = vsel %vm48_vm1, %v47_v17, %v46_v16 }
  0x88   :  { %v52_v19 = vsel %vm51_vm2, %v49_v18, -inf }
  0x89   :  { %53 = vmax.xlane.f32.xlu1 %v52_v19 }
  0xfc   :  { %v54_v21 = vpop.xlane.xlu1 %53 }
  0xfd   :  { %v56_v22 = vperm.slane %v54_v21, 0  ;;  %v57_v23 = vperm.slane %v54_v21, 1 }
  0xff   :  { %v60_v24 = vsub.f32 %v40_v13, %v56_v22  ;;  %v61_v25 = vsub.f32 %v41_v15, %v57_v23 }
 0x101   :  { %v62_v26 = vmul.f32 1.442695, %v60_v24  ;;  %v64_v27 = vmul.f32 1.442695, %v61_v25 }
 0x103   :  { %158 = vpow2.f32 %v62_v26 }
 0x104   :  { %160 = vpow2.f32 %v64_v27 }
 0x109   :  { %v159_v28 = vpop.eup %158 }
 0x10a   :  { %v161_v29 = vpop.eup %160  ;;  %69 = vperm.xlu1 %155, %v159_v28  }
 0x10b   :  { %72 = vperm.xlu2 %156, %v161_v29  }
 0x134   :  { %91 = vmax.xlane.f32.xlu2 %v90_v31 }
 0x165   :  { %v73_v32 = vpop.permute.xlu2 %72 }
 0x166   :  { %v75_v34 = vperm.slane %v73_v32, %v228_v12 }
 0x17c   :  { %v70_v33 = vpop.permute.xlu1 %69 }
 0x17d   :  { %v74_v35 = vperm.slane %v70_v33, %v228_v12 }
 0x17f   :  { %v76_v36 = vsel %vm48_vm1, %v75_v34, %v74_v35 }
 0x180   :  { %v78_v37 = vsel %vm51_vm2, %v76_v36, 0.0 }
 0x181   :  { %79 = vadd.xlane.f32.xlu0 %v78_v37 }
 0x1a7   :  { %v92_v38 = vpop.xlane.xlu2 %91 }
 0x1a8   :  { %v93_v39 = vsub.f32 %v24_v30, %v92_v38 }
 0x1aa   :  { %v94_v40 = vmul.f32 1.442695, %v93_v39 }
 0x1ac   :  { %162 = vpow2.f32 %v94_v40 }
 0x1b2   :  { %v163_v41 = vpop.eup %162 }
 0x1b3   :  { %v96_v42 = vsel %vm51_vm2, %v163_v41, 0.0 }
 0x1b4   :  { %97 = vadd.xlane.f32.xlu0 %v96_v42 }
 0x1f4   :  { %v80_v43 = vpop.xlane.xlu0 %79 }
 0x1f5   :  { %164 = vlog2.f32 %v80_v43 }
 0x1fb   :  { %v165_v44 = vpop.eup %164 }
 0x1fc   :  { %v82_v45 = vmul.f32 0.6931472, %v165_v44 }
 0x1fe   :  { %v84_v46 = vperm.slane %v82_v45, 0  ;;  %v85_v47 = vperm.slane %v82_v45, 1 }
 0x200   :  { %v89_v48 = vsub.f32 %v61_v25, %v85_v47  ;;  %v88_v49 = vsub.f32 %v60_v24, %v84_v46 }
 0x202   :  { %110 = vperm.xlu1 %155, %v89_v48   ;;  %107 = vperm.xlu0 %157, %v88_v49  }
 0x227   :  { %v98_v50 = vpop.xlane.xlu0 %97 }
 0x228   :  { %166 = vlog2.f32 %v98_v50 }
 0x22e   :  { %v167_v51 = vpop.eup %166 }
 0x22f   :  { %v100_v52 = vmul.f32 0.6931472, %v167_v51 }
 0x231   :  { %v101_v53 = vsub.f32 %v93_v39, %v100_v52 }
 0x233   :  { %v102_v54 = vmul.f32 1.442695, %v101_v53 }
 0x235   :  { %168 = vpow2.f32 %v102_v54 }
 0x23b   :  { %v169_v61 = vpop.eup %168 }
 0x274   :  { %v111_v55 = vpop.permute.xlu1 %110  ;;  %v108_v56 = vpop.permute.xlu0 %107 }
 0x275   :  { %v113_v57 = vperm.slane %v111_v55, %v228_v12  ;;  %v112_v58 = vperm.slane %v108_v56, %v228_v12 }
 0x277   :  { %v114_v59 = vsel %vm48_vm1, %v113_v57, %v112_v58 }
 0x278   :  { %v116_v60 = vsub.f32 %v101_v53, %v114_v59 }
 0x27a   :  { %v117_v62 = vmul.f32 %v169_v61, %v116_v60 }
 0x27c   :  { %v118_v63 = vsel %vm51_vm2, %v117_v62, 0.0 }
 0x27d   :  { %119 = vadd.xlane.f32.xlu1 %v118_v63 }
 0x2f0   :  { %v120_v1 = vpop.xlane.xlu1 %119 }
 0x2f1   :  { %v121_v2 = vrot.slane %v120_v1, 4 }
 0x2f3   :  { %v122_v3 = vadd.f32 %v121_v2, %v120_v1 }
 0x2f5   :  { %v123_v4 = vrot.slane %v122_v3, 2 }
 0x2f7   :  { %v124_v5 = vadd.f32 %v123_v4, %v122_v3 }
 0x2f9   :  { %v125_v6 = vrot.slane %v124_v5, 1 }
 0x2fb   :  { %v126_v7 = vadd.f32 %v125_v6, %v124_v5 }
 0x2fd   :  { %150 = vpush %v126_v7 }
 0x32e   :  { %s151_s2 = spop %150 }
 0x32f   :  { %s128_s20 = smul.f32 0.5, %s151_s2 }
 0x331   :  { %v130_v9 = vstv %s128_s20 }
 0x332   :  { %v131_v10 = vadd.f32 %v130_v9, %v129_v8 }
 0x334   :  { %133 = vst.msk [vmem:[#allocation2] sm:$0x1] %vm19_vm3, %v131_v10 }
 0x335   :  { %144 = dma.vmem_to_hbm [thread:$0]  %s140_s19, 16, %s142_s23, [#allocation3]  }
 0x336   :  { %194 = dma.done.wait [#allocation3], 16  }
 0x337   :  { %195 = vsyncadd [#allocation3], 4294967280 }
 0x338   :  { %149 = vsyncpa [#allocation3], 1 }

// kernel: llama_bidense_kldiv_forward.3
= control target key start
LH: loop header
LB: loop body
LE: loop exit
PB: predicated region body
PF: predicated region fallthrough
CT: control target
= control target key end

     0   :  { %s1196_s9 = smov 0   ;;  %s1198_s10 = smov 0   ;;  %s1315_s0 = inlined_call_operand.vmem [shape: bf16[2,256,128], index: 0, kind: input, shape index: {}]   ;;  %s1316_s1 = inlined_call_operand.vmem [shape: f32[2,1,256], index: 1, kind: input, shape index: {}]   ;;  %s1317_s2 = inlined_call_operand.vmem [shape: f32[2,1,128], index: 2, kind: output, shape index: {}]  }
   0x1   :  { %s1200_s11 = smov 0   ;;  %s1202_s12 = smov 0  }
   0x2   :  { %s1204_s13 = smov 0  }
   0x3 LB: > { %s21_s14 = sadd.s32 1, %s1169_s11  ;;  %s24_s15 = sadd.s32 1, %s1173_s12  ;;  %s1177_s13 = sphi %s1204_s13, %s12_s13   ;;  %s1173_s12 = sphi %s1202_s12, %s1321_s12   ;;  %s1169_s11 = sphi %s1200_s11, %s1320_s11   ;;  %s1165_s10 = sphi %s1198_s10, %s1319_s10   ;;  %s1161_s9 = sphi %s1196_s9, %s1318_s9  }
   0x4   : > { %p22_p0 = scmp.ge.s32.totalorder %s21_s14, 2  ;;  %p1014_p1 = scmp.ge.s32.totalorder %s1177_s13, 1 }
   0x5   : > { %p145_p2 = scmp.lt.s32.totalorder %s1177_s13, 5 }
   0x6   : > { %s1323_s14 = smov (%p22_p0, %s21_s14), 0  ;;  %s1325_s15 = smov (!%p22_p0, %s24_s15), %s1173_s12 }
   0x7   : > { %p146_p3 = pnand %p1014_p1, %p145_p2  ;;  %p26_p4 = scmp.ge.s32.totalorder %s1325_s15, 2 }
   0x8   : > { %s1015_s16 = sshll.u32 (!%p146_p3), %s1161_s9, 4  ;;  %p177_p5 = scmp.lt.s32.totalorder (!%p146_p3), %s1165_s10, 1 }
   0x9   : > { %s1327_s15 = smov (%p26_p4, %s1325_s15), 0  ;;  %149 = sbr.rel (%p146_p3) target bundleno = 664 (0x298), region = 28 }
   0xa   : > { %p179_p6 = scmp.lt.s32.totalorder (!%p146_p3), %s1015_s16, 31  ;;  %p188_p7 = scmp.lt.s32.totalorder (!%p146_p3), %s1161_s9, 1 }
   0xb   : > { %p1019_p8 = scmp.ne.s32.totalorder (!%p146_p3), %s1161_s9, 0 }
   0xe   : > { %s1329_s10 = smov (!%p177_p5, %s1165_s10), 1  ;;  %s1331_s16 = smov (!%p179_p6, %s1015_s16), 31 }
   0xf   : > { %s1016_s17 = sshll.u32 %s1329_s10, 5  ;;  %s1233_s21 = scalar_lea.vmem %s1317_s2, %s1329_s10 }
  0x10   : > { %s182_s18 = sadd.s32 %s1016_s17, %s1331_s16  ;;  %s1018_s26 = sshll.u32 %s1329_s10, 1 }
  0x11   : > { %s1017_s22 = sshll.u32 %s182_s18, 2 }
  0x12   : > { %s1238_s25 = scalar_lea.vmem %s1315_s0, %s1017_s22  ;;  %199 = sbr.rel (%p1019_p8) target bundleno = 25 (0x19), region = 32 }
  0x13   : > { %s189_s27 = scalar_select %p188_p7, %s1161_s9, 1 }
  0x15   : > { %s1241_s28 = sadd.s32 %s1018_s26, %s189_s27 }
  0x16   : > { %s192_s3 = scalar_lea.vmem %s1316_s1, %s1241_s28 }
  0x17   : > { %v1179_v0 = vmov 0.0  }
  0x18   : > { %200 = vst [vmem:[%s1233_s21] sm:$0x1] %v1179_v0 }
  0x19 PF: > { %v201_v1 = vld [vmem:[%s1238_s25] sm:$0xff]   ;;  %v203_v2 = vld [vmem:[%s1238_s25 + $0x8] sm:$0xff]   ;;  %v205_v3 = vld [vmem:[%s1238_s25 + $0x10] sm:$0xff]  }
  0x1a   : > { %v217_v4 = vunpack.c.l.bf16 %v201_v1  ;;  %v219_v5 = vunpack.c.l.bf16 %v203_v2  ;;  %v221_v6 = vunpack.c.l.bf16 %v205_v3  ;;  %v218_v10 = vunpack.c.h.bf16 %v201_v1  ;;  %v207_v16 = vld [vmem:[%s1238_s25 + $0x18] sm:$0xff]   ;;  %v209_v17 = vld [vmem:[%s1238_s25 + $0x20] sm:$0xff]   ;;  %v211_v24 = vld [vmem:[%s1238_s25 + $0x28] sm:$0xff]  }
  0x1b   : > { %v220_v11 = vunpack.c.h.bf16 %v203_v2  ;;  %v222_v12 = vunpack.c.h.bf16 %v205_v3  ;;  %v223_v18 = vunpack.c.l.bf16 %v207_v16  ;;  %v224_v19 = vunpack.c.h.bf16 %v207_v16  ;;  %v213_v31 = vld [vmem:[%s1238_s25 + $0x30] sm:$0xff]   ;;  %v215_v32 = vld [vmem:[%s1238_s25 + $0x38] sm:$0xff]  }
  0x1c   : > { %v233_v7 = vmul.f32 %v217_v4, %v217_v4  ;;  %v235_v8 = vmul.f32 %v219_v5, %v219_v5  ;;  %v237_v9 = vmul.f32 %v221_v6, %v221_v6  ;;  %v234_v13 = vmul.f32 %v218_v10, %v218_v10 }
  0x1d   : > { %v236_v14 = vmul.f32 %v220_v11, %v220_v11  ;;  %v238_v15 = vmul.f32 %v222_v12, %v222_v12  ;;  %v225_v20 = vunpack.c.l.bf16 %v209_v17  ;;  %v239_v21 = vmul.f32 %v223_v18, %v223_v18 }
  0x1e   : > { %249 = vadd.xlane.f32.xlu0 %v233_v7  ;;  %253 = vadd.xlane.f32.xlu1 %v235_v8  ;;  %v240_v22 = vmul.f32 %v224_v19, %v224_v19  ;;  %v226_v25 = vunpack.c.h.bf16 %v209_v17  ;;  %v227_v26 = vunpack.c.l.bf16 %v211_v24  ;;  %v228_v27 = vunpack.c.h.bf16 %v211_v24 }
  0x1f   : > { %257 = vadd.xlane.f32.xlu2 %v237_v9  ;;  %v241_v23 = vmul.f32 %v225_v20, %v225_v20  ;;  %v229_v33 = vunpack.c.l.bf16 %v213_v31  ;;  %v230_v34 = vunpack.c.h.bf16 %v213_v31  ;;  %v231_v35 = vunpack.c.l.bf16 %v215_v32 }
  0x20   : > { %v242_v28 = vmul.f32 %v226_v25, %v226_v25  ;;  %v243_v29 = vmul.f32 %v227_v26, %v227_v26  ;;  %v244_v30 = vmul.f32 %v228_v27, %v228_v27  ;;  %v232_v39 = vunpack.c.h.bf16 %v215_v32 }
  0x21   : > { %v245_v36 = vmul.f32 %v229_v33, %v229_v33  ;;  %v246_v37 = vmul.f32 %v230_v34, %v230_v34  ;;  %v247_v38 = vmul.f32 %v231_v35, %v231_v35 }
  0x22   : > { %v248_v40 = vmul.f32 %v232_v39, %v232_v39 }
  0x26   : > { %251 = vadd.xlane.f32.xlu0 %v234_v13  ;;  %255 = vadd.xlane.f32.xlu1 %v236_v14 }
  0x27   : > { %259 = vadd.xlane.f32.xlu2 %v238_v15 }
  0x2e   : > { %261 = vadd.xlane.f32.xlu0 %v239_v21  ;;  %263 = vadd.xlane.f32.xlu1 %v240_v22  ;;  %v1180_v21 = vmov 0  }
  0x2f   : > { %265 = vadd.xlane.f32.xlu2 %v241_v23  ;;  %1104 = vset.pattern.permute.xlu1 %v1180_v21 }
  0x30   : > { %1105 = vset.pattern.permute.xlu2 %v1180_v21  ;;  %1106 = vset.pattern.permute.xlu0 %v1180_v21 }
  0x36   : > { %267 = vadd.xlane.f32.xlu0 %v242_v28  ;;  %269 = vadd.xlane.f32.xlu1 %v243_v29 }
  0x37   : > { %271 = vadd.xlane.f32.xlu2 %v244_v30 }
  0x3e   : > { %273 = vadd.xlane.f32.xlu0 %v245_v36  ;;  %275 = vadd.xlane.f32.xlu1 %v246_v37 }
  0x3f   : > { %277 = vadd.xlane.f32.xlu2 %v247_v38 }
  0x46   : > { %279 = vadd.xlane.f32.xlu0 %v248_v40 }
  0x91   : > { %v250_v41 = vpop.xlane.xlu0 %249  ;;  %v254_v48 = vpop.xlane.xlu1 %253 }
  0x92   : > { %v282_v42 = vmax.f32 %v250_v41, 1e-24  ;;  %v1257_v50 = vmax.f32 %v254_v48, 1e-24  ;;  %v258_v23 = vpop.xlane.xlu2 %257 }
  0x93   : > { %v286_v26 = vmax.f32 %v258_v23, 1e-24 }
  0x94   : > { %1107 = vrsqrt.f32 %v282_v42  ;;  %vm304_vm1 = vweird.f32 %v282_v42  ;;  %vm324_vm6 = vweird.f32 %v1257_v50 }
  0x95   : > { %vm344_vm12 = vweird.f32 %v286_v26 }
  0x99   : > { %v252_v43 = vpop.xlane.xlu0 %251  ;;  %v256_v4 = vpop.xlane.xlu1 %255 }
  0x9a   : > { %v1108_v44 = vpop.eup %1107  ;;  %v283_v45 = vmax.f32 %v252_v43, 1e-24  ;;  %v1261_v7 = vmax.f32 %v256_v4, 1e-24  ;;  %v260_v40 = vpop.xlane.xlu2 %259 }
  0x9b   : > { %v299_v46 = vmul.f32 %v1108_v44, %v282_v42  ;;  %vm305_vm0 = vweird.f32 %v1108_v44 }
  0x9c   : > { %1109 = vrsqrt.f32 %v283_v45  ;;  %vm306_vm2 = vmor %vm304_vm1, %vm305_vm0  ;;  %vm314_vm4 = vweird.f32 %v283_v45  ;;  %vm334_vm9 = vweird.f32 %v1261_v7 }
  0x9d   : > { %v300_v47 = vmul.f32 %v1108_v44, %v299_v46  ;;  %1111 = vrsqrt.f32 %v1257_v50 }
  0x9e   : > { %1113 = vrsqrt.f32 %v1261_v7 }
  0x9f   : > { %v301_v49 = vmul.f32 0.5, %v300_v47  ;;  %1115 = vrsqrt.f32 %v286_v26 }
  0xa1   : > { %v302_v51 = vsub.f32 1.5, %v301_v49 }
  0xa2   : > { %v1110_v52 = vpop.eup %1109 }
  0xa3   : > { %v303_v53 = vmul.f32 %v1108_v44, %v302_v51  ;;  %v309_v54 = vmul.f32 %v1110_v52, %v283_v45  ;;  %v1112_v0 = vpop.eup %1111  ;;  %vm315_vm3 = vweird.f32 %v1110_v52 }
  0xa4   : > { %v319_v5 = vmul.f32 %v1112_v0, %v1257_v50  ;;  %vm316_vm5 = vmor %vm314_vm4, %vm315_vm3  ;;  %v1114_v18 = vpop.eup %1113  ;;  %vm325_vm7 = vweird.f32 %v1112_v0 }
  0xa5   : > { %v307_v55 = vsel %vm306_vm2, %v1108_v44, %v303_v53  ;;  %v310_v56 = vmul.f32 %v1110_v52, %v309_v54  ;;  %v329_v24 = vmul.f32 %v1114_v18, %v1261_v7  ;;  %vm326_vm8 = vmor %vm324_vm6, %vm325_vm7  ;;  %v1116_v35 = vpop.eup %1115  ;;  %vm335_vm10 = vweird.f32 %v1114_v18 }
  0xa6   : > { %v474_v57 = vperm.slane %v307_v55, 0  ;;  %v475_v58 = vperm.slane %v307_v55, 1  ;;  %v476_v59 = vperm.slane %v307_v55, 2  ;;  %v477_v60 = vperm.slane %v307_v55, 3  ;;  %vm336_vm11 = vmor %vm334_vm9, %vm335_vm10 }
  0xa7   : > { %v478_v61 = vperm.slane %v307_v55, 4  ;;  %v311_v62 = vmul.f32 0.5, %v310_v56  ;;  %v479_v63 = vperm.slane %v307_v55, 5  ;;  %v480_v1 = vperm.slane %v307_v55, 6 }
  0xa8   : > { %602 = vst [vmem:[#allocation1] ss:$9 sm:$0xff] %v474_v57  ;;  %v481_v2 = vperm.slane %v307_v55, 7  ;;  %v320_v9 = vmul.f32 %v1112_v0, %v319_v5  ;;  %v330_v27 = vmul.f32 %v1114_v18, %v329_v24  ;;  %v339_v42 = vmul.f32 %v1116_v35, %v286_v26 }
  0xa9   : > { %604 = vst [vmem:[#allocation1 + $0x1] ss:$9 sm:$0xff] %v475_v58  ;;  %v312_v3 = vsub.f32 1.5, %v311_v62  ;;  %v287_v44 = vmax.f32 %v260_v40, 1e-24  ;;  %vm345_vm13 = vweird.f32 %v1116_v35  ;;  %v262_v58 = vpop.xlane.xlu0 %261 }
  0xaa   : > { %606 = vst [vmem:[#allocation1 + $0x2] ss:$9 sm:$0xff] %v476_v59  ;;  %v321_v12 = vmul.f32 0.5, %v320_v9  ;;  %v331_v30 = vmul.f32 0.5, %v330_v27  ;;  %v340_v45 = vmul.f32 %v1116_v35, %v339_v42  ;;  %vm346_vm14 = vmor %vm344_vm12, %vm345_vm13  ;;  %v288_v62 = vmax.f32 %v262_v58, 1e-24 }
  0xab   : > { %608 = vst [vmem:[#allocation1 + $0x3] ss:$9 sm:$0xff] %v477_v60  ;;  %v313_v6 = vmul.f32 %v1110_v52, %v312_v3  ;;  %1117 = vrsqrt.f32 %v287_v44  ;;  %vm354_vm15 = vweird.f32 %v287_v44 }
  0xac   : > { %610 = vst [vmem:[#allocation1 + $0x4] ss:$9 sm:$0xff] %v478_v61  ;;  %v322_v19 = vsub.f32 1.5, %v321_v12  ;;  %v332_v37 = vsub.f32 1.5, %v331_v30  ;;  %v341_v48 = vmul.f32 0.5, %v340_v45  ;;  %1119 = vrsqrt.f32 %v288_v62  ;;  %v264_v12 = vpop.xlane.xlu1 %263  ;;  %v266_v30 = vpop.xlane.xlu2 %265 }
  0xad   : > { %612 = vst [vmem:[#allocation1 + $0x5] ss:$9 sm:$0xff] %v479_v63  ;;  %v317_v8 = vsel %vm316_vm5, %v1110_v52, %v313_v6  ;;  %vm364_vm2 = vweird.f32 %v288_v62 }
  0xae   : > { %614 = vst [vmem:[#allocation1 + $0x6] ss:$9 sm:$0xff] %v480_v1  ;;  %v482_v10 = vperm.slane %v317_v8, 0  ;;  %v483_v11 = vperm.slane %v317_v8, 1  ;;  %v484_v13 = vperm.slane %v317_v8, 2  ;;  %v485_v15 = vperm.slane %v317_v8, 3 }
  0xaf   : > { %616 = vst [vmem:[#allocation1 + $0x7] ss:$9 sm:$0xff] %v481_v2  ;;  %v486_v16 = vperm.slane %v317_v8, 4  ;;  %v487_v17 = vperm.slane %v317_v8, 5  ;;  %v488_v20 = vperm.slane %v317_v8, 6  ;;  %v489_v22 = vperm.slane %v317_v8, 7 }
  0xb0   : > { %v323_v25 = vmul.f32 %v1112_v0, %v322_v19  ;;  %v333_v43 = vmul.f32 %v1114_v18, %v332_v37  ;;  %v342_v55 = vsub.f32 1.5, %v341_v48 }
  0xb1   : > { %v1118_v53 = vpop.eup %1117  ;;  %v268_v48 = vpop.xlane.xlu0 %267 }
  0xb2   : > { %v327_v28 = vsel %vm326_vm8, %v1112_v0, %v323_v25  ;;  %v337_v46 = vsel %vm336_vm11, %v1114_v18, %v333_v43  ;;  %v349_v60 = vmul.f32 %v1118_v53, %v287_v44  ;;  %v343_v61 = vmul.f32 %v1116_v35, %v342_v55  ;;  %v1120_v7 = vpop.eup %1119 }
  0xb3   : > { %v490_v29 = vperm.slane %v327_v28, 0  ;;  %v491_v31 = vperm.slane %v327_v28, 1  ;;  %v492_v33 = vperm.slane %v327_v28, 2  ;;  %v493_v34 = vperm.slane %v327_v28, 3 }
  0xb4   : > { %v494_v36 = vperm.slane %v327_v28, 4  ;;  %v495_v38 = vperm.slane %v327_v28, 5  ;;  %v496_v39 = vperm.slane %v327_v28, 6  ;;  %v497_v41 = vperm.slane %v327_v28, 7 }
  0xb5   : > { %v498_v47 = vperm.slane %v337_v46, 0  ;;  %v499_v50 = vperm.slane %v337_v46, 1  ;;  %v500_v51 = vperm.slane %v337_v46, 2  ;;  %v501_v52 = vperm.slane %v337_v46, 3 }
  0xb6   : > { %v617_v14 = vld [vmem:[#allocation1] sm:$0xff]  ;;  %v502_v54 = vperm.slane %v337_v46, 4  ;;  %v503_v56 = vperm.slane %v337_v46, 5  ;;  %v504_v57 = vperm.slane %v337_v46, 6  ;;  %v505_v59 = vperm.slane %v337_v46, 7 }
  0xb7   : > { %618 = vst [vmem:[#allocation1] ss:$9 sm:$0xff] %v482_v10  ;;  %754 = vperm.xlu1 %1104, %v617_v14   ;;  %v350_v63 = vmul.f32 %v1118_v53, %v349_v60  ;;  %v347_v0 = vsel %vm346_vm14, %v1116_v35, %v343_v61  ;;  %vm355_vm0 = vweird.f32 %v1118_v53  ;;  %v359_v14 = vmul.f32 %v1120_v7, %v288_v62 }
  0xb8   : > { %619 = vst [vmem:[#allocation1 + $0x1] ss:$9 sm:$0xff] %v483_v11  ;;  %v506_v1 = vperm.slane %v347_v0, 0  ;;  %v507_v4 = vperm.slane %v347_v0, 1  ;;  %v508_v5 = vperm.slane %v347_v0, 2  ;;  %v509_v6 = vperm.slane %v347_v0, 3  ;;  %vm356_vm1 = vmor %vm354_vm15, %vm355_vm0 }
  0xb9   : > { %620 = vst [vmem:[#allocation1 + $0x2] ss:$9 sm:$0xff] %v484_v13  ;;  %v351_v2 = vmul.f32 0.5, %v350_v63  ;;  %v510_v8 = vperm.slane %v347_v0, 4  ;;  %v511_v10 = vperm.slane %v347_v0, 5  ;;  %v512_v11 = vperm.slane %v347_v0, 6 }
  0xba   : > { %621 = vst [vmem:[#allocation1 + $0x3] ss:$9 sm:$0xff] %v485_v15  ;;  %v513_v13 = vperm.slane %v347_v0, 7  ;;  %vm365_vm3 = vweird.f32 %v1120_v7 }
  0xbb   : > { %622 = vst [vmem:[#allocation1 + $0x4] ss:$9 sm:$0xff] %v486_v16  ;;  %v352_v9 = vsub.f32 1.5, %v351_v2  ;;  %v289_v16 = vmax.f32 %v264_v12, 1e-24  ;;  %vm366_vm4 = vmor %vm364_vm2, %vm365_vm3  ;;  %v270_v2 = vpop.xlane.xlu1 %269 }
  0xbc   : > { %623 = vst [vmem:[#allocation1 + $0x5] ss:$9 sm:$0xff] %v487_v17  ;;  %v360_v17 = vmul.f32 %v1120_v7, %v359_v14 }
  0xbd   : > { %624 = vst [vmem:[#allocation1 + $0x6] ss:$9 sm:$0xff] %v488_v20  ;;  %v353_v15 = vmul.f32 %v1118_v53, %v352_v9  ;;  %1121 = vrsqrt.f32 %v289_v16  ;;  %vm374_vm5 = vweird.f32 %v289_v16 }
  0xbe   : > { %625 = vst [vmem:[#allocation1 + $0x7] ss:$9 sm:$0xff] %v489_v22  ;;  %v361_v20 = vmul.f32 0.5, %v360_v17 }
  0xbf   : > { %v357_v18 = vsel %vm356_vm1, %v1118_v53, %v353_v15 }
  0xc0   : > { %v514_v19 = vperm.slane %v357_v18, 0  ;;  %v515_v22 = vperm.slane %v357_v18, 1  ;;  %v516_v23 = vperm.slane %v357_v18, 2  ;;  %v517_v24 = vperm.slane %v357_v18, 3 }
  0xc1   : > { %v518_v26 = vperm.slane %v357_v18, 4  ;;  %v362_v27 = vsub.f32 1.5, %v361_v20  ;;  %v519_v28 = vperm.slane %v357_v18, 5  ;;  %v272_v20 = vpop.xlane.xlu2 %271 }
  0xc3   : > { %v1122_v25 = vpop.eup %1121 }
  0xc4   : > { %vm375_vm6 = vweird.f32 %v1122_v25 }
  0xc5   : > { %v626_v32 = vld [vmem:[#allocation1] sm:$0xff]  ;;  %vm376_vm7 = vmor %vm374_vm5, %vm375_vm6 }
  0xc6   : > { %627 = vst [vmem:[#allocation1] ss:$9 sm:$0xff] %v490_v29  ;;  %757 = vperm.xlu2 %1105, %v626_v32   ;;  %v520_v29 = vperm.slane %v357_v18, 6  ;;  %v369_v32 = vmul.f32 %v1122_v25, %v289_v16 }
  0xc7   : > { %628 = vst [vmem:[#allocation1 + $0x1] ss:$9 sm:$0xff] %v491_v31  ;;  %v521_v31 = vperm.slane %v357_v18, 7 }
  0xc8   : > { %629 = vst [vmem:[#allocation1 + $0x2] ss:$9 sm:$0xff] %v492_v33  ;;  %v363_v33 = vmul.f32 %v1120_v7, %v362_v27  ;;  %v370_v35 = vmul.f32 %v1122_v25, %v369_v32 }
  0xc9   : > { %630 = vst [vmem:[#allocation1 + $0x3] ss:$9 sm:$0xff] %v493_v34  ;;  %v290_v34 = vmax.f32 %v266_v30, 1e-24 }
  0xca   : > { %631 = vst [vmem:[#allocation1 + $0x4] ss:$9 sm:$0xff] %v494_v36  ;;  %v367_v36 = vsel %vm366_vm4, %v1120_v7, %v363_v33 }
  0xcb   : > { %632 = vst [vmem:[#allocation1 + $0x5] ss:$9 sm:$0xff] %v495_v38  ;;  %1123 = vrsqrt.f32 %v290_v34  ;;  %v522_v37 = vperm.slane %v367_v36, 0  ;;  %v371_v38 = vmul.f32 0.5, %v370_v35  ;;  %v523_v40 = vperm.slane %v367_v36, 1 }
  0xcc   : > { %633 = vst [vmem:[#allocation1 + $0x6] ss:$9 sm:$0xff] %v496_v39  ;;  %v525_v42 = vperm.slane %v367_v36, 3  ;;  %v526_v44 = vperm.slane %v367_v36, 4  ;;  %v527_v46 = vperm.slane %v367_v36, 5  ;;  %vm384_vm8 = vweird.f32 %v290_v34 }
  0xcd   : > { %634 = vst [vmem:[#allocation1 + $0x7] ss:$9 sm:$0xff] %v497_v41  ;;  %v524_v41 = vperm.slane %v367_v36, 2  ;;  %v372_v45 = vsub.f32 1.5, %v371_v38  ;;  %v274_v38 = vpop.xlane.xlu0 %273 }
  0xd1   : > { %v1124_v43 = vpop.eup %1123 }
  0xd2   : > { %vm385_vm9 = vweird.f32 %v1124_v43 }
  0xd3   : > { %vm386_vm10 = vmor %vm384_vm8, %vm385_vm9 }
  0xd4   : > { %v635_v49 = vld [vmem:[#allocation1] sm:$0xff] }
  0xd5   : > { %636 = vst [vmem:[#allocation1] ss:$9 sm:$0xff] %v498_v47  ;;  %760 = vperm.xlu0 %1106, %v635_v49   ;;  %v528_v47 = vperm.slane %v367_v36, 6  ;;  %v529_v49 = vperm.slane %v367_v36, 7 }
  0xd6   : > { %637 = vst [vmem:[#allocation1 + $0x1] ss:$9 sm:$0xff] %v499_v50  ;;  %v379_v50 = vmul.f32 %v1124_v43, %v290_v34 }
  0xd7   : > { %638 = vst [vmem:[#allocation1 + $0x2] ss:$9 sm:$0xff] %v500_v51  ;;  %v373_v51 = vmul.f32 %v1122_v25, %v372_v45 }
  0xd8   : > { %639 = vst [vmem:[#allocation1 + $0x3] ss:$9 sm:$0xff] %v501_v52  ;;  %v291_v52 = vmax.f32 %v268_v48, 1e-24  ;;  %v380_v53 = vmul.f32 %v1124_v43, %v379_v50 }
  0xd9   : > { %640 = vst [vmem:[#allocation1 + $0x4] ss:$9 sm:$0xff] %v502_v54  ;;  %v377_v54 = vsel %vm376_vm7, %v1122_v25, %v373_v51 }
  0xda   : > { %641 = vst [vmem:[#allocation1 + $0x5] ss:$9 sm:$0xff] %v503_v56  ;;  %1125 = vrsqrt.f32 %v291_v52  ;;  %v530_v55 = vperm.slane %v377_v54, 0  ;;  %v381_v56 = vmul.f32 0.5, %v380_v53  ;;  %v531_v58 = vperm.slane %v377_v54, 1 }
  0xdb   : > { %642 = vst [vmem:[#allocation1 + $0x6] ss:$9 sm:$0xff] %v504_v57  ;;  %v533_v60 = vperm.slane %v377_v54, 3  ;;  %v534_v62 = vperm.slane %v377_v54, 4  ;;  %v535_v0 = vperm.slane %v377_v54, 5  ;;  %vm394_vm11 = vweird.f32 %v291_v52 }
  0xdc   : > { %643 = vst [vmem:[#allocation1 + $0x7] ss:$9 sm:$0xff] %v505_v59  ;;  %v532_v59 = vperm.slane %v377_v54, 2  ;;  %v382_v63 = vsub.f32 1.5, %v381_v56  ;;  %v276_v56 = vpop.xlane.xlu1 %275 }
  0xe0   : > { %v1126_v61 = vpop.eup %1125 }
  0xe1   : > { %vm395_vm12 = vweird.f32 %v1126_v61 }
  0xe2   : > { %vm396_vm13 = vmor %vm394_vm11, %vm395_vm12 }
  0xe3   : > { %v644_v3 = vld [vmem:[#allocation1] sm:$0xff] }
  0xe4   : > { %645 = vst [vmem:[#allocation1] ss:$9 sm:$0xff] %v506_v1  ;;  %763 = vperm.xlu2 %1105, %v644_v3   ;;  %v536_v1 = vperm.slane %v377_v54, 6  ;;  %v537_v3 = vperm.slane %v377_v54, 7 }
  0xe5   : > { %646 = vst [vmem:[#allocation1 + $0x1] ss:$9 sm:$0xff] %v507_v4  ;;  %v389_v4 = vmul.f32 %v1126_v61, %v291_v52 }
  0xe6   : > { %647 = vst [vmem:[#allocation1 + $0x2] ss:$9 sm:$0xff] %v508_v5  ;;  %v383_v5 = vmul.f32 %v1124_v43, %v382_v63 }
  0xe7   : > { %648 = vst [vmem:[#allocation1 + $0x3] ss:$9 sm:$0xff] %v509_v6  ;;  %v292_v6 = vmax.f32 %v270_v2, 1e-24  ;;  %v390_v7 = vmul.f32 %v1126_v61, %v389_v4 }
  0xe8   : > { %649 = vst [vmem:[#allocation1 + $0x4] ss:$9 sm:$0xff] %v510_v8  ;;  %v387_v8 = vsel %vm386_vm10, %v1124_v43, %v383_v5 }
  0xe9   : > { %650 = vst [vmem:[#allocation1 + $0x5] ss:$9 sm:$0xff] %v511_v10  ;;  %1127 = vrsqrt.f32 %v292_v6  ;;  %v538_v9 = vperm.slane %v387_v8, 0  ;;  %v391_v10 = vmul.f32 0.5, %v390_v7  ;;  %v539_v12 = vperm.slane %v387_v8, 1 }
  0xea   : > { %651 = vst [vmem:[#allocation1 + $0x6] ss:$9 sm:$0xff] %v512_v11  ;;  %v541_v14 = vperm.slane %v387_v8, 3  ;;  %v542_v16 = vperm.slane %v387_v8, 4  ;;  %v543_v18 = vperm.slane %v387_v8, 5  ;;  %vm404_vm14 = vweird.f32 %v292_v6 }
  0xeb   : > { %652 = vst [vmem:[#allocation1 + $0x7] ss:$9 sm:$0xff] %v513_v13  ;;  %v540_v13 = vperm.slane %v387_v8, 2  ;;  %v392_v17 = vsub.f32 1.5, %v391_v10  ;;  %v278_v10 = vpop.xlane.xlu2 %277 }
  0xef   : > { %v1128_v15 = vpop.eup %1127 }
  0xf0   : > { %vm405_vm15 = vweird.f32 %v1128_v15 }
  0xf1   : > { %vm406_vm0 = vmor %vm404_vm14, %vm405_vm15 }
  0xf2   : > { %v653_v21 = vld [vmem:[#allocation1] sm:$0xff] }
  0xf3   : > { %654 = vst [vmem:[#allocation1] ss:$9 sm:$0xff] %v514_v19  ;;  %766 = vperm.xlu1 %1104, %v653_v21   ;;  %v544_v19 = vperm.slane %v387_v8, 6  ;;  %v545_v21 = vperm.slane %v387_v8, 7 }
  0xf4   : > { %655 = vst [vmem:[#allocation1 + $0x1] ss:$9 sm:$0xff] %v515_v22  ;;  %v399_v22 = vmul.f32 %v1128_v15, %v292_v6 }
  0xf5   : > { %656 = vst [vmem:[#allocation1 + $0x2] ss:$9 sm:$0xff] %v516_v23  ;;  %v393_v23 = vmul.f32 %v1126_v61, %v392_v17 }
  0xf6   : > { %657 = vst [vmem:[#allocation1 + $0x3] ss:$9 sm:$0xff] %v517_v24  ;;  %v293_v24 = vmax.f32 %v272_v20, 1e-24  ;;  %v400_v25 = vmul.f32 %v1128_v15, %v399_v22 }
  0xf7   : > { %658 = vst [vmem:[#allocation1 + $0x4] ss:$9 sm:$0xff] %v518_v26  ;;  %v397_v26 = vsel %vm396_vm13, %v1126_v61, %v393_v23 }
  0xf8   : > { %659 = vst [vmem:[#allocation1 + $0x5] ss:$9 sm:$0xff] %v519_v28  ;;  %1129 = vrsqrt.f32 %v293_v24  ;;  %v546_v27 = vperm.slane %v397_v26, 0  ;;  %v401_v28 = vmul.f32 0.5, %v400_v25  ;;  %v547_v30 = vperm.slane %v397_v26, 1 }
  0xf9   : > { %660 = vst [vmem:[#allocation1 + $0x6] ss:$9 sm:$0xff] %v520_v29  ;;  %v549_v32 = vperm.slane %v397_v26, 3  ;;  %v550_v34 = vperm.slane %v397_v26, 4  ;;  %v551_v36 = vperm.slane %v397_v26, 5  ;;  %vm414_vm1 = vweird.f32 %v293_v24 }
  0xfa   : > { %661 = vst [vmem:[#allocation1 + $0x7] ss:$9 sm:$0xff] %v521_v31  ;;  %v548_v31 = vperm.slane %v397_v26, 2  ;;  %v402_v35 = vsub.f32 1.5, %v401_v28  ;;  %v280_v28 = vpop.xlane.xlu0 %279 }
  0xfe   : > { %v1130_v33 = vpop.eup %1129 }
  0xff   : > { %vm415_vm2 = vweird.f32 %v1130_v33 }
 0x100   : > { %vm416_vm3 = vmor %vm414_vm1, %vm415_vm2  ;;  %vm810_vm1 = vcmask 195712   ;;  %vm814_vm2 = vcmask 261312  }
 0x101   : > { %v662_v39 = vld [vmem:[#allocation1] sm:$0xff] }
 0x102   : > { %663 = vst [vmem:[#allocation1] ss:$9 sm:$0xff] %v522_v37  ;;  %769 = vperm.xlu2 %1105, %v662_v39   ;;  %v552_v37 = vperm.slane %v397_v26, 6  ;;  %v553_v39 = vperm.slane %v397_v26, 7 }
 0x103   : > { %664 = vst [vmem:[#allocation1 + $0x1] ss:$9 sm:$0xff] %v523_v40  ;;  %v409_v40 = vmul.f32 %v1130_v33, %v293_v24 }
 0x104   : > { %665 = vst [vmem:[#allocation1 + $0x2] ss:$9 sm:$0xff] %v524_v41  ;;  %v403_v41 = vmul.f32 %v1128_v15, %v402_v35 }
 0x105   : > { %666 = vst [vmem:[#allocation1 + $0x3] ss:$9 sm:$0xff] %v525_v42  ;;  %v294_v42 = vmax.f32 %v274_v38, 1e-24  ;;  %v410_v43 = vmul.f32 %v1130_v33, %v409_v40 }
 0x106   : > { %667 = vst [vmem:[#allocation1 + $0x4] ss:$9 sm:$0xff] %v526_v44  ;;  %v407_v44 = vsel %vm406_vm0, %v1128_v15, %v403_v41  ;;  %vm806_vm0 = vcmask 130112  }
 0x107   : > { %668 = vst [vmem:[#allocation1 + $0x5] ss:$9 sm:$0xff] %v527_v46  ;;  %1131 = vrsqrt.f32 %v294_v42  ;;  %v554_v45 = vperm.slane %v407_v44, 0  ;;  %v411_v46 = vmul.f32 0.5, %v410_v43  ;;  %v555_v48 = vperm.slane %v407_v44, 1 }
 0x108   : > { %669 = vst [vmem:[#allocation1 + $0x6] ss:$9 sm:$0xff] %v528_v47  ;;  %v557_v50 = vperm.slane %v407_v44, 3  ;;  %v558_v52 = vperm.slane %v407_v44, 4  ;;  %v559_v54 = vperm.slane %v407_v44, 5  ;;  %vm424_vm4 = vweird.f32 %v294_v42 }
 0x109   : > { %670 = vst [vmem:[#allocation1 + $0x7] ss:$9 sm:$0xff] %v529_v49  ;;  %v556_v49 = vperm.slane %v407_v44, 2  ;;  %v412_v53 = vsub.f32 1.5, %v411_v46 }
 0x10d   : > { %v1132_v51 = vpop.eup %1131 }
 0x10e   : > { %vm425_vm5 = vweird.f32 %v1132_v51 }
 0x10f   : > { %vm426_vm6 = vmor %vm424_vm4, %vm425_vm5  ;;  %vm822_vm4 = vcmask 392512   ;;  %vm826_vm5 = vcmask 458112  }
 0x110   : > { %v671_v57 = vld [vmem:[#allocation1] sm:$0xff] }
 0x111   : > { %672 = vst [vmem:[#allocation1] ss:$9 sm:$0xff] %v530_v55  ;;  %772 = vperm.xlu1 %1104, %v671_v57   ;;  %v560_v55 = vperm.slane %v407_v44, 6  ;;  %v561_v57 = vperm.slane %v407_v44, 7 }
 0x112   : > { %673 = vst [vmem:[#allocation1 + $0x1] ss:$9 sm:$0xff] %v531_v58  ;;  %v419_v58 = vmul.f32 %v1132_v51, %v294_v42 }
 0x113   : > { %674 = vst [vmem:[#allocation1 + $0x2] ss:$9 sm:$0xff] %v532_v59  ;;  %v413_v59 = vmul.f32 %v1130_v33, %v412_v53 }
 0x114   : > { %675 = vst [vmem:[#allocation1 + $0x3] ss:$9 sm:$0xff] %v533_v60  ;;  %v295_v60 = vmax.f32 %v276_v56, 1e-24  ;;  %v420_v61 = vmul.f32 %v1132_v51, %v419_v58 }
 0x115   : > { %676 = vst [vmem:[#allocation1 + $0x4] ss:$9 sm:$0xff] %v534_v62  ;;  %v417_v62 = vsel %vm416_vm3, %v1130_v33, %v413_v59  ;;  %vm818_vm3 = vcmask 326912  }
 0x116   : > { %677 = vst [vmem:[#allocation1 + $0x5] ss:$9 sm:$0xff] %v535_v0  ;;  %1133 = vrsqrt.f32 %v295_v60  ;;  %v562_v63 = vperm.slane %v417_v62, 0  ;;  %v421_v0 = vmul.f32 0.5, %v420_v61  ;;  %v563_v2 = vperm.slane %v417_v62, 1 }
 0x117   : > { %678 = vst [vmem:[#allocation1 + $0x6] ss:$9 sm:$0xff] %v536_v1  ;;  %v565_v4 = vperm.slane %v417_v62, 3  ;;  %v566_v6 = vperm.slane %v417_v62, 4  ;;  %v567_v8 = vperm.slane %v417_v62, 5  ;;  %vm434_vm7 = vweird.f32 %v295_v60 }
 0x118   : > { %679 = vst [vmem:[#allocation1 + $0x7] ss:$9 sm:$0xff] %v537_v3  ;;  %v564_v3 = vperm.slane %v417_v62, 2  ;;  %v422_v7 = vsub.f32 1.5, %v421_v0 }
 0x11c   : > { %v1134_v5 = vpop.eup %1133 }
 0x11d   : > { %vm435_vm8 = vweird.f32 %v1134_v5 }
 0x11e   : > { %vm436_vm9 = vmor %vm434_vm7, %vm435_vm8  ;;  %vm834_vm7 = vcmask 589312   ;;  %vm838_vm8 = vcmask 654912  }
 0x11f   : > { %v680_v11 = vld [vmem:[#allocation1] sm:$0xff] }
 0x120   : > { %681 = vst [vmem:[#allocation1] ss:$9 sm:$0xff] %v538_v9  ;;  %775 = vperm.xlu2 %1105, %v680_v11   ;;  %v568_v9 = vperm.slane %v417_v62, 6  ;;  %v569_v11 = vperm.slane %v417_v62, 7 }
 0x121   : > { %682 = vst [vmem:[#allocation1 + $0x1] ss:$9 sm:$0xff] %v539_v12  ;;  %v429_v12 = vmul.f32 %v1134_v5, %v295_v60 }
 0x122   : > { %683 = vst [vmem:[#allocation1 + $0x2] ss:$9 sm:$0xff] %v540_v13  ;;  %v423_v13 = vmul.f32 %v1132_v51, %v422_v7 }
 0x123   : > { %684 = vst [vmem:[#allocation1 + $0x3] ss:$9 sm:$0xff] %v541_v14  ;;  %v296_v14 = vmax.f32 %v278_v10, 1e-24  ;;  %v430_v15 = vmul.f32 %v1134_v5, %v429_v12  ;;  %v1061_v10 = vld [vmem:[%s1238_s25 + $0x38] sm:$0xff]  ;;  %v1059_v12 = vld [vmem:[%s1238_s25 + $0x28] sm:$0xff] }
 0x124   : > { %685 = vst [vmem:[#allocation1 + $0x4] ss:$9 sm:$0xff] %v542_v16  ;;  %v427_v16 = vsel %vm426_vm6, %v1132_v51, %v423_v13  ;;  %915 = vmatpush.bf16.msra.mxu0 %v1061_v10  ;;  %v1058_v13 = vld [vmem:[%s1238_s25 + $0x20] sm:$0xff]  ;;  %vm830_vm6 = vcmask 523712  }
 0x125   : > { %686 = vst [vmem:[#allocation1 + $0x5] ss:$9 sm:$0xff] %v543_v18  ;;  %1135 = vrsqrt.f32 %v296_v14  ;;  %v570_v17 = vperm.slane %v427_v16, 0  ;;  %v431_v18 = vmul.f32 0.5, %v430_v15  ;;  %v571_v20 = vperm.slane %v427_v16, 1  ;;  %v758_v15 = vpop.permute.xlu2 %757 }
 0x126   : > { %687 = vst [vmem:[#allocation1 + $0x6] ss:$9 sm:$0xff] %v544_v19  ;;  %v573_v22 = vperm.slane %v427_v16, 3  ;;  %v574_v24 = vperm.slane %v427_v16, 4  ;;  %v575_v26 = vperm.slane %v427_v16, 5  ;;  %vm444_vm10 = vweird.f32 %v296_v14 }
 0x127   : > { %688 = vst [vmem:[#allocation1 + $0x7] ss:$9 sm:$0xff] %v545_v21  ;;  %v572_v21 = vperm.slane %v427_v16, 2  ;;  %v432_v25 = vsub.f32 1.5, %v431_v18 }
 0x12b   : > { %v1136_v23 = vpop.eup %1135 }
 0x12c   : > { %vm445_vm11 = vweird.f32 %v1136_v23 }
 0x12d   : > { %vm446_vm12 = vmor %vm444_vm10, %vm445_vm11  ;;  %vm846_vm10 = vcmask 786112   ;;  %vm850_vm11 = vcmask 851712  }
 0x12e   : > { %v689_v29 = vld [vmem:[#allocation1] sm:$0xff] }
 0x12f   : > { %690 = vst [vmem:[#allocation1] ss:$9 sm:$0xff] %v546_v27  ;;  %778 = vperm.xlu1 %1104, %v689_v29   ;;  %v576_v27 = vperm.slane %v427_v16, 6  ;;  %v577_v29 = vperm.slane %v427_v16, 7  ;;  %v1057_v16 = vld [vmem:[%s1238_s25 + $0x18] sm:$0xff] }
 0x130   : > { %691 = vst [vmem:[#allocation1 + $0x1] ss:$9 sm:$0xff] %v547_v30  ;;  %v439_v30 = vmul.f32 %v1136_v23, %v296_v14  ;;  %v755_v14 = vpop.permute.xlu1 %754 }
 0x131   : > { %692 = vst [vmem:[#allocation1 + $0x2] ss:$9 sm:$0xff] %v548_v31  ;;  %v433_v31 = vmul.f32 %v1134_v5, %v432_v25 }
 0x132   : > { %693 = vst [vmem:[#allocation1 + $0x3] ss:$9 sm:$0xff] %v549_v32  ;;  %v297_v32 = vmax.f32 %v280_v28, 1e-24  ;;  %v440_v33 = vmul.f32 %v1136_v23, %v439_v30 }
 0x133   : > { %694 = vst [vmem:[#allocation1 + $0x4] ss:$9 sm:$0xff] %v550_v34  ;;  %v437_v34 = vsel %vm436_vm9, %v1134_v5, %v433_v31  ;;  %vm842_vm9 = vcmask 720512  }
 0x134   : > { %695 = vst [vmem:[#allocation1 + $0x5] ss:$9 sm:$0xff] %v551_v36  ;;  %1137 = vrsqrt.f32 %v297_v32  ;;  %v578_v35 = vperm.slane %v437_v34, 0  ;;  %v441_v36 = vmul.f32 0.5, %v440_v33  ;;  %v579_v38 = vperm.slane %v437_v34, 1 }
 0x135   : > { %696 = vst [vmem:[#allocation1 + $0x6] ss:$9 sm:$0xff] %v552_v37  ;;  %v581_v40 = vperm.slane %v437_v34, 3  ;;  %v582_v42 = vperm.slane %v437_v34, 4  ;;  %v583_v44 = vperm.slane %v437_v34, 5  ;;  %v585_v46 = vperm.slane %v437_v34, 7 }
 0x136   : > { %697 = vst [vmem:[#allocation1 + $0x7] ss:$9 sm:$0xff] %v553_v39  ;;  %v580_v39 = vperm.slane %v437_v34, 2  ;;  %v442_v43 = vsub.f32 1.5, %v441_v36  ;;  %vm454_vm13 = vweird.f32 %v297_v32 }
 0x13a   : > { %v1138_v41 = vpop.eup %1137 }
 0x13b   : > { %vm455_vm14 = vweird.f32 %v1138_v41 }
 0x13c   : > { %vm456_vm15 = vmor %vm454_vm13, %vm455_vm14  ;;  %vm858_vm13 = vcmask 982912   ;;  %vm862_vm14 = vcmask 1048512  }
 0x13d   : > { %v698_v47 = vld [vmem:[#allocation1] sm:$0xff] }
 0x13e   : > { %699 = vst [vmem:[#allocation1] ss:$9 sm:$0xff] %v554_v45  ;;  %781 = vperm.xlu0 %1106, %v698_v47   ;;  %v584_v45 = vperm.slane %v437_v34, 6  ;;  %v449_v47 = vmul.f32 %v1138_v41, %v297_v32 }
 0x13f   : > { %700 = vst [vmem:[#allocation1 + $0x1] ss:$9 sm:$0xff] %v555_v48  ;;  %v443_v48 = vmul.f32 %v1136_v23, %v442_v43 }
 0x140   : > { %701 = vst [vmem:[#allocation1 + $0x2] ss:$9 sm:$0xff] %v556_v49  ;;  %v450_v49 = vmul.f32 %v1138_v41, %v449_v47 }
 0x141   : > { %702 = vst [vmem:[#allocation1 + $0x3] ss:$9 sm:$0xff] %v557_v50  ;;  %v447_v50 = vsel %vm446_vm12, %v1136_v23, %v443_v48  ;;  %v1054_v23 = vld [vmem:[%s1238_s25] sm:$0xff]  ;;  %vm854_vm12 = vcmask 917312  }
 0x142   : > { %703 = vst [vmem:[#allocation1 + $0x4] ss:$9 sm:$0xff] %v558_v52  ;;  %v586_v51 = vperm.slane %v447_v50, 0  ;;  %v451_v52 = vmul.f32 0.5, %v450_v49  ;;  %v587_v53 = vperm.slane %v447_v50, 1  ;;  %v589_v56 = vperm.slane %v447_v50, 3 }
 0x143   : > { %704 = vst [vmem:[#allocation1 + $0x5] ss:$9 sm:$0xff] %v559_v54  ;;  %v591_v59 = vperm.slane %v447_v50, 5  ;;  %v592_v60 = vperm.slane %v447_v50, 6  ;;  %v593_v61 = vperm.slane %v447_v50, 7 }
 0x144   : > { %705 = vst [vmem:[#allocation1 + $0x6] ss:$9 sm:$0xff] %v560_v55  ;;  %v588_v55 = vperm.slane %v447_v50, 2  ;;  %v452_v58 = vsub.f32 1.5, %v451_v52 }
 0x145   : > { %706 = vst [vmem:[#allocation1 + $0x7] ss:$9 sm:$0xff] %v561_v57  ;;  %v590_v57 = vperm.slane %v447_v50, 4 }
 0x146   : > { %v453_v62 = vmul.f32 %v1138_v41, %v452_v58 }
 0x147   : > { %v761_v28 = vpop.permute.xlu0 %760 }
 0x14c   : > { %v707_v1 = vld [vmem:[#allocation1] sm:$0xff] }
 0x14d   : > { %708 = vst [vmem:[#allocation1] ss:$9 sm:$0xff] %v562_v63  ;;  %784 = vperm.xlu2 %1105, %v707_v1   ;;  %v457_v63 = vsel %vm456_vm15, %v1138_v41, %v453_v62 }
 0x14e   : > { %709 = vst [vmem:[#allocation1 + $0x1] ss:$9 sm:$0xff] %v563_v2  ;;  %v594_v0 = vperm.slane %v457_v63, 0  ;;  %v595_v1 = vperm.slane %v457_v63, 1  ;;  %v598_v5 = vperm.slane %v457_v63, 4  ;;  %v600_v7 = vperm.slane %v457_v63, 6 }
 0x14f   : > { %710 = vst [vmem:[#allocation1 + $0x2] ss:$9 sm:$0xff] %v564_v3  ;;  %v596_v3 = vperm.slane %v457_v63, 2 }
 0x150   : > { %711 = vst [vmem:[#allocation1 + $0x3] ss:$9 sm:$0xff] %v565_v4  ;;  %v597_v4 = vperm.slane %v457_v63, 3 }
 0x151   : > { %712 = vst [vmem:[#allocation1 + $0x4] ss:$9 sm:$0xff] %v566_v6  ;;  %v599_v6 = vperm.slane %v457_v63, 5 }
 0x152   : > { %713 = vst [vmem:[#allocation1 + $0x5] ss:$9 sm:$0xff] %v567_v8  ;;  %v601_v8 = vperm.slane %v457_v63, 7 }
 0x153   : > { %714 = vst [vmem:[#allocation1 + $0x6] ss:$9 sm:$0xff] %v568_v9 }
 0x154   : > { %715 = vst [vmem:[#allocation1 + $0x7] ss:$9 sm:$0xff] %v569_v11  ;;  %v1060_v11 = vld [vmem:[%s1238_s25 + $0x30] sm:$0xff] }
 0x155   : > { %916 = vmatpush.bf16.msra.mxu0 %v1060_v11 }
 0x159   : > { %917 = vmatpush.bf16.msra.mxu0 %v1059_v12 }
 0x15b   : > { %v716_v19 = vld [vmem:[#allocation1] sm:$0xff] }
 0x15c   : > { %717 = vst [vmem:[#allocation1] ss:$9 sm:$0xff] %v570_v17  ;;  %787 = vperm.xlu1 %1104, %v716_v19   ;;  %v1056_v17 = vld [vmem:[%s1238_s25 + $0x10] sm:$0xff]  ;;  %v764_v19 = vpop.permute.xlu2 %763 }
 0x15d   : > { %718 = vst [vmem:[#allocation1 + $0x1] ss:$9 sm:$0xff] %v571_v20  ;;  %918 = vmatpush.bf16.msra.mxu0 %v1058_v13  ;;  %v801_v20 = vlaneseq }
 0x15e   : > { %719 = vst [vmem:[#allocation1 + $0x2] ss:$9 sm:$0xff] %v572_v21  ;;  %v1055_v21 = vld [vmem:[%s1238_s25 + $0x8] sm:$0xff] }
 0x15f   : > { %720 = vst [vmem:[#allocation1 + $0x3] ss:$9 sm:$0xff] %v573_v22  ;;  %v1274_v22 = vand.u32 127, %v801_v20 }
 0x160   : > { %721 = vst [vmem:[#allocation1 + $0x4] ss:$9 sm:$0xff] %v574_v24 }
 0x161   : > { %722 = vst [vmem:[#allocation1 + $0x5] ss:$9 sm:$0xff] %v575_v26  ;;  %919 = vmatpush.bf16.msra.mxu0 %v1057_v16  ;;  %v808_v26 = vadd.s32 4294967280, %v1274_v22  ;;  %v816_v31 = vadd.s32 4294967264, %v1274_v22  ;;  %v812_v33 = vadd.s32 4294967272, %v1274_v22  ;;  %v820_v41 = vadd.s32 4294967256, %v1274_v22 }
 0x162   : > { %723 = vst [vmem:[#allocation1 + $0x6] ss:$9 sm:$0xff] %v576_v27  ;;  %v804_v27 = vadd.s32 4294967288, %v1274_v22  ;;  %v828_v48 = vadd.s32 4294967240, %v1274_v22  ;;  %v836_v49 = vadd.s32 4294967224, %v1274_v22  ;;  %v840_v58 = vadd.s32 4294967216, %v1274_v22 }
 0x163   : > { %724 = vst [vmem:[#allocation1 + $0x7] ss:$9 sm:$0xff] %v577_v29  ;;  %v803_v29 = vperm.slane %v755_v14, %v1274_v22  ;;  %v809_v30 = vperm.slane %v761_v28, %v808_v26  ;;  %v281_v16 = vld [vmem:[%s192_s3] sm:$0x1] }
 0x164   : > { %v770_v25 = vpop.permute.xlu2 %769  ;;  %v805_v32 = vperm.slane %v758_v15, %v804_v27 }
 0x165   : > { %920 = vmatpush.bf16.msra.mxu0 %v1056_v17  ;;  %v767_v18 = vpop.permute.xlu1 %766  ;;  %v821_v47 = vperm.slane %v770_v25, %v820_v41 }
 0x166   : > { %v807_v34 = vsel %vm806_vm0, %v805_v32, %v803_v29 }
 0x167   : > { %v811_v36 = vsel %vm810_vm1, %v809_v30, %v807_v34 }
 0x169   : > { %921 = vmatpush.bf16.msra.mxu0 %v1055_v21  ;;  %v928_v21 = vld [vmem:[%s1233_s21] sm:$0x1] }
 0x16a   : > { %v725_v37 = vld [vmem:[#allocation1] sm:$0xff] }
 0x16b   : > { %726 = vst [vmem:[#allocation1] ss:$9 sm:$0xff] %v578_v35  ;;  %790 = vperm.xlu0 %1106, %v725_v37   ;;  %v817_v37 = vperm.slane %v767_v18, %v816_v31 }
 0x16c   : > { %727 = vst [vmem:[#allocation1 + $0x1] ss:$9 sm:$0xff] %v579_v38 }
 0x16d   : > { %728 = vst [vmem:[#allocation1 + $0x2] ss:$9 sm:$0xff] %v580_v39  ;;  %922 = vmatpush.bf16.msra.mxu0 %v1054_v23  ;;  %v824_v39 = vadd.s32 4294967248, %v1274_v22 }
 0x16e   : > { %729 = vst [vmem:[#allocation1 + $0x3] ss:$9 sm:$0xff] %v581_v40  ;;  %v813_v40 = vperm.slane %v764_v19, %v812_v33 }
 0x16f   : > { %730 = vst [vmem:[#allocation1 + $0x4] ss:$9 sm:$0xff] %v582_v42 }
 0x170   : > { %731 = vst [vmem:[#allocation1 + $0x5] ss:$9 sm:$0xff] %v583_v44  ;;  %v815_v42 = vsel %vm814_vm2, %v813_v40, %v811_v36 }
 0x171   : > { %732 = vst [vmem:[#allocation1 + $0x6] ss:$9 sm:$0xff] %v584_v45  ;;  %v819_v44 = vsel %vm818_vm3, %v817_v37, %v815_v42 }
 0x172   : > { %733 = vst [vmem:[#allocation1 + $0x7] ss:$9 sm:$0xff] %v585_v46  ;;  %v832_v46 = vadd.s32 4294967232, %v1274_v22  ;;  %v823_v50 = vsel %vm822_vm4, %v821_v47, %v819_v44 }
 0x179   : > { %v734_v54 = vld [vmem:[#allocation1] sm:$0xff] }
 0x17a   : > { %793 = vperm.xlu2 %1105, %v734_v54   ;;  %735 = vst [vmem:[#allocation1] ss:$9 sm:$0xff] %v586_v51  ;;  %v776_v38 = vpop.permute.xlu2 %775 }
 0x17b   : > { %736 = vst [vmem:[#allocation1 + $0x1] ss:$9 sm:$0xff] %v587_v53 }
 0x17c   : > { %737 = vst [vmem:[#allocation1 + $0x2] ss:$9 sm:$0xff] %v588_v55  ;;  %v829_v55 = vperm.slane %v776_v38, %v828_v48 }
 0x17d   : > { %738 = vst [vmem:[#allocation1 + $0x3] ss:$9 sm:$0xff] %v589_v56 }
 0x17e   : > { %739 = vst [vmem:[#allocation1 + $0x4] ss:$9 sm:$0xff] %v590_v57  ;;  %v844_v57 = vadd.s32 4294967208, %v1274_v22 }
 0x17f   : > { %740 = vst [vmem:[#allocation1 + $0x5] ss:$9 sm:$0xff] %v591_v59  ;;  %v848_v59 = vadd.s32 4294967200, %v1274_v22 }
 0x180   : > { %741 = vst [vmem:[#allocation1 + $0x6] ss:$9 sm:$0xff] %v592_v60 }
 0x181   : > { %742 = vst [vmem:[#allocation1 + $0x7] ss:$9 sm:$0xff] %v593_v61 }
 0x183   : > { %v773_v24 = vpop.permute.xlu1 %772 }
 0x184   : > { %v825_v45 = vperm.slane %v773_v24, %v824_v39 }
 0x186   : > { %v827_v52 = vsel %vm826_vm5, %v825_v45, %v823_v50 }
 0x187   : > { %v831_v60 = vsel %vm830_vm6, %v829_v55, %v827_v52 }
 0x188   : > { %v743_v2 = vld [vmem:[#allocation1] sm:$0xff] }
 0x189   : > { %796 = vperm.xlu1 %1104, %v743_v2   ;;  %744 = vst [vmem:[#allocation1] ss:$9 sm:$0xff] %v594_v0 }
 0x18a   : > { %745 = vst [vmem:[#allocation1 + $0x1] ss:$9 sm:$0xff] %v595_v1 }
 0x18b   : > { %746 = vst [vmem:[#allocation1 + $0x2] ss:$9 sm:$0xff] %v596_v3  ;;  %v856_v3 = vadd.s32 4294967184, %v1274_v22 }
 0x18c   : > { %747 = vst [vmem:[#allocation1 + $0x3] ss:$9 sm:$0xff] %v597_v4  ;;  %v852_v4 = vadd.s32 4294967192, %v1274_v22 }
 0x18d   : > { %748 = vst [vmem:[#allocation1 + $0x4] ss:$9 sm:$0xff] %v598_v5 }
 0x18e   : > { %749 = vst [vmem:[#allocation1 + $0x5] ss:$9 sm:$0xff] %v599_v6 }
 0x18f   : > { %750 = vst [vmem:[#allocation1 + $0x6] ss:$9 sm:$0xff] %v600_v7 }
 0x190   : > { %751 = vst [vmem:[#allocation1 + $0x7] ss:$9 sm:$0xff] %v601_v8 }
 0x197   : > { %v752_v9 = vld [vmem:[#allocation1] sm:$0xff] }
 0x198   : > { %799 = vperm.xlu0 %1106, %v752_v9   ;;  %v860_v9 = vadd.s32 4294967176, %v1274_v22 }
 0x1a1   : > { %v779_v35 = vpop.permute.xlu1 %778 }
 0x1a2   : > { %v833_v54 = vperm.slane %v779_v35, %v832_v46 }
 0x1a4   : > { %v835_v62 = vsel %vm834_vm7, %v833_v54, %v831_v60 }
 0x1a7   : > { %v785_v53 = vpop.permute.xlu2 %784 }
 0x1a8   : > { %v841_v1 = vperm.slane %v785_v53, %v840_v58 }
 0x1b0   : > { %v782_v43 = vpop.permute.xlu0 %781 }
 0x1b1   : > { %v837_v56 = vperm.slane %v782_v43, %v836_v49 }
 0x1b3   : > { %v839_v63 = vsel %vm838_vm8, %v837_v56, %v835_v62 }
 0x1b4   : > { %v843_v7 = vsel %vm842_vm9, %v841_v1, %v839_v63 }
 0x1ce   : > { %v788_v51 = vpop.permute.xlu1 %787 }
 0x1cf   : > { %v845_v0 = vperm.slane %v788_v51, %v844_v57 }
 0x1d1   : > { %v847_v8 = vsel %vm846_vm10, %v845_v0, %v843_v7 }
 0x1d4   : > { %v794_v6 = vpop.permute.xlu2 %793 }
 0x1d5   : > { %v853_v12 = vperm.slane %v794_v6, %v852_v4 }
 0x1dd   : > { %v791_v61 = vpop.permute.xlu0 %790 }
 0x1de   : > { %v849_v2 = vperm.slane %v791_v61, %v848_v59 }
 0x1e0   : > { %v851_v10 = vsel %vm850_vm11, %v849_v2, %v847_v8 }
 0x1e1   : > { %v855_v14 = vsel %vm854_vm12, %v853_v12, %v851_v10 }
 0x1fb   : > { %v797_v5 = vpop.permute.xlu1 %796 }
 0x1fc   : > { %v857_v11 = vperm.slane %v797_v5, %v856_v3 }
 0x1fe   : > { %v859_v17 = vsel %vm858_vm13, %v857_v11, %v855_v14 }
 0x20a   : > { %v800_v13 = vpop.permute.xlu0 %799 }
 0x20b   : > { %v861_v15 = vperm.slane %v800_v13, %v860_v9 }
 0x20d   : > { %v863_v18 = vsel %vm862_vm14, %v861_v15, %v859_v17 }
 0x20e   : > { %v865_v19 = vmul.f32 %v863_v18, %v281_v16 }
 0x210   : > { %v866_v20 = vpack.c.bf16 %v865_v19, %v865_v19 }
 0x212   : > { %923 = vmatmul.bf16.vlgmr.msra.gmra.mxu0 %v866_v20 }
 0x28f   : > { %v924_v22 = vpop.f32.mrf.mxu0 }
 0x290   : > { %v929_v23 = vadd.f32 %v928_v21, %v924_v22 }
 0x292   : > { %930 = vst [vmem:[%s1233_s21] sm:$0x1] %v929_v23 }
 0x297   : > { %v926_v24 = vpop.f32.mrf.mxu0 }
 0x298 PF: > { %s12_s13 = sadd.s32 1, %s1177_s13   ;;  %s1318_s9 = smov %s1169_s11 }
 0x299   : > { %p9_p9 = scmp.ge.s32.totalorder %s12_s13, 6   ;;  %s1319_s10 = smov %s1173_s12 }
 0x29a   : > { %s1320_s11 = smov %s1323_s14  ;;  %s1321_s12 = smov %s1327_s15 }
 0x29b   :  { %11 = sbr.rel (!%p9_p9) target bundleno = 3 (0x3), region = 72 }

// kernel: llama_bidense_kldiv_forward.4
= control target key start
LH: loop header
LB: loop body
LE: loop exit
PB: predicated region body
PF: predicated region fallthrough
CT: control target
= control target key end

     0   :  { %s5535_s9 = smov 0   ;;  %s5537_s10 = smov 0   ;;  %s6957_s0 = inlined_call_operand.vmem [shape: bf16[12,256,128], index: 0, kind: input, shape index: {}]   ;;  %s6958_s1 = inlined_call_operand.vmem [shape: f32[12,1,256], index: 1, kind: input, shape index: {}]   ;;  %s6959_s2 = inlined_call_operand.vmem [shape: f32[12,1,128], index: 2, kind: output, shape index: {}]  }
   0x1   :  { %s5539_s11 = smov 0   ;;  %s5541_s12 = smov 0  }
   0x2   :  { %s5543_s13 = smov 0   ;;  %s5545_s14 = smov 0  }
   0x3   :  { %s5547_s15 = smov 0  }
   0x4 LB: > { %s21_s16 = sadd.s32 1, %s5508_s13  ;;  %s24_s17 = sadd.s32 1, %s5512_s14  ;;  %s5516_s15 = sphi %s5547_s15, %s12_s15   ;;  %s5512_s14 = sphi %s5545_s14, %s7019_s14   ;;  %s5508_s13 = sphi %s5543_s13, %s7018_s13   ;;  %s5504_s12 = sphi %s5541_s12, %s7017_s12   ;;  %s5500_s11 = sphi %s5539_s11, %s7016_s11   ;;  %s5496_s10 = sphi %s5537_s10, %s7015_s10   ;;  %s5492_s9 = sphi %s5535_s9, %s7014_s9  }
   0x5   : > { %p22_p0 = scmp.ge.s32.totalorder %s21_s16, 2  ;;  %p40_p1 = scmp.ne.s32.totalorder %s5496_s10, %s5492_s9 }
   0x6   : > { %p41_p2 = scmp.eq.s32.totalorder %s5516_s15, 0  ;;  %s33_s22 = sadd.s32 1, %s5496_s10 }
   0x7   : > { %s7021_s16 = smov (%p22_p0, %s21_s16), 0  ;;  %s7023_s17 = smov (!%p22_p0, %s24_s17), %s5512_s14 }
   0x8   : > { %p5578_p3 = por %p41_p2, %p40_p1  ;;  %p26_p4 = scmp.ge.s32.totalorder %s7023_s17, 2 }
   0x9   : > { %s29_s19 = ssub.s32 %s5508_s13, %s7021_s16  ;;  %p4954_p6 = scmp.ge.s32.totalorder %s5516_s15, 4 }
   0xa   : > { %s7025_s17 = smov (%p26_p4, %s7023_s17), 0 }
   0xb   : > { %s28_s20 = ssub.s32 %s5512_s14, %s7025_s17  ;;  %120 = sbr.rel (%p4954_p6) target bundleno = 84 (0x54), region = 16 }
   0xc   : > { %s30_s21 = sor.u32 %s29_s19, %s28_s20 }
   0xd   : > { %p31_p5 = scmp.eq.s32.totalorder %s30_s21, 0 }
   0xf   : > { %s5590_s23 = scalar_select %p31_p5, %s5496_s10, %s33_s22  }
  0x10   : > { %123 = sbr.rel (!%p5578_p3) target bundleno = 72 (0x48), region = 20  ;;  %s125_s24 = sand.u32 (%p5578_p3), 1, %s5496_s10  }
  0x11   : > { %s5205_s25 = smul.u32 (%p5578_p3), 384, %s125_s24  ;;  %s4955_s26 = sshll.u32 (%p5578_p3), %s5508_s13, 4 }
  0x12   : > { %s5155_s27 = smul.u32 (%p5578_p3), 192, %s5512_s14 }
  0x13   : > { %s5606_s5 = scalar_lea.vmem (%p5578_p3), [#allocation2], %s5205_s25 }
  0x14   : > { %s131_s28 = sadd.s32 (%p5578_p3), %s5155_s27, %s4955_s26 }
  0x15   : > { %s4957_s29 = sshll.u32 %s131_s28, 2 }
  0x16   : > { %s5601_s4 = scalar_lea.vmem %s6957_s0, %s4957_s29 }
  0x17   : > { %v150_v0 = vld [vmem:[%s5601_s4] sm:$0xff]   ;;  %v154_v1 = vld [vmem:[%s5601_s4 + $0x8] sm:$0xff]   ;;  %v158_v2 = vld [vmem:[%s5601_s4 + $0x10] sm:$0xff]  }
  0x18   : > { %151 = vst [vmem:[%s5606_s5] sm:$0xff] %v150_v0   ;;  %v162_v3 = vld [vmem:[%s5601_s4 + $0x18] sm:$0xff]   ;;  %v166_v4 = vld [vmem:[%s5601_s4 + $0x20] sm:$0xff]   ;;  %v170_v5 = vld [vmem:[%s5601_s4 + $0x28] sm:$0xff]  }
  0x19   : > { %155 = vst [vmem:[%s5606_s5 + $0x8] sm:$0xff] %v154_v1   ;;  %v174_v6 = vld [vmem:[%s5601_s4 + $0x30] sm:$0xff]   ;;  %v178_v7 = vld [vmem:[%s5601_s4 + $0x38] sm:$0xff]   ;;  %v182_v8 = vld [vmem:[%s5601_s4 + $0x80] sm:$0xff]  }
  0x1a   : > { %159 = vst [vmem:[%s5606_s5 + $0x10] sm:$0xff] %v158_v2   ;;  %v186_v9 = vld [vmem:[%s5601_s4 + $0x88] sm:$0xff]   ;;  %v190_v10 = vld [vmem:[%s5601_s4 + $0x90] sm:$0xff]   ;;  %v194_v11 = vld [vmem:[%s5601_s4 + $0x98] sm:$0xff]  }
  0x1b   : > { %163 = vst [vmem:[%s5606_s5 + $0x18] sm:$0xff] %v162_v3   ;;  %v198_v12 = vld [vmem:[%s5601_s4 + $0xa0] sm:$0xff]   ;;  %v202_v13 = vld [vmem:[%s5601_s4 + $0xa8] sm:$0xff]   ;;  %v206_v14 = vld [vmem:[%s5601_s4 + $0xb0] sm:$0xff]  }
  0x1c   : > { %167 = vst [vmem:[%s5606_s5 + $0x20] sm:$0xff] %v166_v4   ;;  %v210_v15 = vld [vmem:[%s5601_s4 + $0xb8] sm:$0xff]   ;;  %v214_v16 = vld [vmem:[%s5601_s4 + $0x100] sm:$0xff]   ;;  %v218_v17 = vld [vmem:[%s5601_s4 + $0x108] sm:$0xff]  }
  0x1d   : > { %171 = vst [vmem:[%s5606_s5 + $0x28] sm:$0xff] %v170_v5   ;;  %v222_v18 = vld [vmem:[%s5601_s4 + $0x110] sm:$0xff]   ;;  %v226_v19 = vld [vmem:[%s5601_s4 + $0x118] sm:$0xff]   ;;  %v230_v20 = vld [vmem:[%s5601_s4 + $0x120] sm:$0xff]  }
  0x1e   : > { %175 = vst [vmem:[%s5606_s5 + $0x30] sm:$0xff] %v174_v6   ;;  %v234_v21 = vld [vmem:[%s5601_s4 + $0x128] sm:$0xff]   ;;  %v238_v22 = vld [vmem:[%s5601_s4 + $0x130] sm:$0xff]   ;;  %v242_v23 = vld [vmem:[%s5601_s4 + $0x138] sm:$0xff]  }
  0x1f   : > { %179 = vst [vmem:[%s5606_s5 + $0x38] sm:$0xff] %v178_v7   ;;  %v246_v24 = vld [vmem:[%s5601_s4 + $0x180] sm:$0xff]   ;;  %v250_v25 = vld [vmem:[%s5601_s4 + $0x188] sm:$0xff]   ;;  %v254_v26 = vld [vmem:[%s5601_s4 + $0x190] sm:$0xff]  }
  0x20   : > { %183 = vst [vmem:[%s5606_s5 + $0x40] sm:$0xff] %v182_v8   ;;  %v258_v27 = vld [vmem:[%s5601_s4 + $0x198] sm:$0xff]   ;;  %v262_v28 = vld [vmem:[%s5601_s4 + $0x1a0] sm:$0xff]   ;;  %v266_v29 = vld [vmem:[%s5601_s4 + $0x1a8] sm:$0xff]  }
  0x21   : > { %187 = vst [vmem:[%s5606_s5 + $0x48] sm:$0xff] %v186_v9   ;;  %v270_v30 = vld [vmem:[%s5601_s4 + $0x1b0] sm:$0xff]   ;;  %v274_v31 = vld [vmem:[%s5601_s4 + $0x1b8] sm:$0xff]   ;;  %v278_v32 = vld [vmem:[%s5601_s4 + $0x200] sm:$0xff]  }
  0x22   : > { %191 = vst [vmem:[%s5606_s5 + $0x50] sm:$0xff] %v190_v10   ;;  %v282_v33 = vld [vmem:[%s5601_s4 + $0x208] sm:$0xff]   ;;  %v286_v34 = vld [vmem:[%s5601_s4 + $0x210] sm:$0xff]   ;;  %v290_v35 = vld [vmem:[%s5601_s4 + $0x218] sm:$0xff]  }
  0x23   : > { %195 = vst [vmem:[%s5606_s5 + $0x58] sm:$0xff] %v194_v11   ;;  %v294_v36 = vld [vmem:[%s5601_s4 + $0x220] sm:$0xff]   ;;  %v298_v37 = vld [vmem:[%s5601_s4 + $0x228] sm:$0xff]   ;;  %v302_v38 = vld [vmem:[%s5601_s4 + $0x230] sm:$0xff]  }
  0x24   : > { %199 = vst [vmem:[%s5606_s5 + $0x60] sm:$0xff] %v198_v12   ;;  %v306_v39 = vld [vmem:[%s5601_s4 + $0x238] sm:$0xff]   ;;  %v310_v40 = vld [vmem:[%s5601_s4 + $0x280] sm:$0xff]   ;;  %v314_v41 = vld [vmem:[%s5601_s4 + $0x288] sm:$0xff]  }
  0x25   : > { %203 = vst [vmem:[%s5606_s5 + $0x68] sm:$0xff] %v202_v13   ;;  %v318_v42 = vld [vmem:[%s5601_s4 + $0x290] sm:$0xff]   ;;  %v322_v43 = vld [vmem:[%s5601_s4 + $0x298] sm:$0xff]   ;;  %v326_v44 = vld [vmem:[%s5601_s4 + $0x2a0] sm:$0xff]  }
  0x26   : > { %207 = vst [vmem:[%s5606_s5 + $0x70] sm:$0xff] %v206_v14   ;;  %v330_v45 = vld [vmem:[%s5601_s4 + $0x2a8] sm:$0xff]   ;;  %v334_v46 = vld [vmem:[%s5601_s4 + $0x2b0] sm:$0xff]   ;;  %v338_v47 = vld [vmem:[%s5601_s4 + $0x2b8] sm:$0xff]  }
  0x27   : > { %211 = vst [vmem:[%s5606_s5 + $0x78] sm:$0xff] %v210_v15  }
  0x28   : > { %215 = vst [vmem:[%s5606_s5 + $0x80] sm:$0xff] %v214_v16  }
  0x29   : > { %219 = vst [vmem:[%s5606_s5 + $0x88] sm:$0xff] %v218_v17  }
  0x2a   : > { %223 = vst [vmem:[%s5606_s5 + $0x90] sm:$0xff] %v222_v18  }
  0x2b   : > { %227 = vst [vmem:[%s5606_s5 + $0x98] sm:$0xff] %v226_v19  }
  0x2c   : > { %231 = vst [vmem:[%s5606_s5 + $0xa0] sm:$0xff] %v230_v20  }
  0x2d   : > { %235 = vst [vmem:[%s5606_s5 + $0xa8] sm:$0xff] %v234_v21  }
  0x2e   : > { %239 = vst [vmem:[%s5606_s5 + $0xb0] sm:$0xff] %v238_v22  }
  0x2f   : > { %243 = vst [vmem:[%s5606_s5 + $0xb8] sm:$0xff] %v242_v23  }
  0x30   : > { %247 = vst [vmem:[%s5606_s5 + $0xc0] sm:$0xff] %v246_v24  }
  0x31   : > { %251 = vst [vmem:[%s5606_s5 + $0xc8] sm:$0xff] %v250_v25  }
  0x32   : > { %255 = vst [vmem:[%s5606_s5 + $0xd0] sm:$0xff] %v254_v26  }
  0x33   : > { %259 = vst [vmem:[%s5606_s5 + $0xd8] sm:$0xff] %v258_v27  }
  0x34   : > { %263 = vst [vmem:[%s5606_s5 + $0xe0] sm:$0xff] %v262_v28  }
  0x35   : > { %267 = vst [vmem:[%s5606_s5 + $0xe8] sm:$0xff] %v266_v29  }
  0x36   : > { %271 = vst [vmem:[%s5606_s5 + $0xf0] sm:$0xff] %v270_v30  }
  0x37   : > { %275 = vst [vmem:[%s5606_s5 + $0xf8] sm:$0xff] %v274_v31  }
  0x38   : > { %279 = vst [vmem:[%s5606_s5 + $0x100] sm:$0xff] %v278_v32  }
  0x39   : > { %283 = vst [vmem:[%s5606_s5 + $0x108] sm:$0xff] %v282_v33  }
  0x3a   : > { %287 = vst [vmem:[%s5606_s5 + $0x110] sm:$0xff] %v286_v34  }
  0x3b   : > { %291 = vst [vmem:[%s5606_s5 + $0x118] sm:$0xff] %v290_v35  }
  0x3c   : > { %295 = vst [vmem:[%s5606_s5 + $0x120] sm:$0xff] %v294_v36  }
  0x3d   : > { %299 = vst [vmem:[%s5606_s5 + $0x128] sm:$0xff] %v298_v37  }
  0x3e   : > { %303 = vst [vmem:[%s5606_s5 + $0x130] sm:$0xff] %v302_v38  }
  0x3f   : > { %307 = vst [vmem:[%s5606_s5 + $0x138] sm:$0xff] %v306_v39  }
  0x40   : > { %311 = vst [vmem:[%s5606_s5 + $0x140] sm:$0xff] %v310_v40  }
  0x41   : > { %315 = vst [vmem:[%s5606_s5 + $0x148] sm:$0xff] %v314_v41  }
  0x42   : > { %319 = vst [vmem:[%s5606_s5 + $0x150] sm:$0xff] %v318_v42  }
  0x43   : > { %323 = vst [vmem:[%s5606_s5 + $0x158] sm:$0xff] %v322_v43  }
  0x44   : > { %327 = vst [vmem:[%s5606_s5 + $0x160] sm:$0xff] %v326_v44  }
  0x45   : > { %331 = vst [vmem:[%s5606_s5 + $0x168] sm:$0xff] %v330_v45  }
  0x46   : > { %335 = vst [vmem:[%s5606_s5 + $0x170] sm:$0xff] %v334_v46  }
  0x47   : > { %339 = vst [vmem:[%s5606_s5 + $0x178] sm:$0xff] %v338_v47  }
  0x48 PF: > { %557 = sbr.rel (!%p5578_p3) target bundleno = 84 (0x54), region = 61  ;;  %s559_s6 = sand.u32 (%p5578_p3), 1, %s5496_s10  }
  0x49   : > { %s5156_s7 = smul.u32 (%p5578_p3), 12, %s5512_s14 }
  0x4a   : > { %s5206_s8 = smul.u32 (%p5578_p3), 6, %s559_s6 }
  0x4b   : > { %s564_s19 = sadd.s32 (%p5578_p3), %s5508_s13, %s5156_s7 }
  0x4c   : > { %s565_s22 = scalar_lea.vmem (%p5578_p3), %s6958_s1, %s564_s19  ;;  %s561_s24 = scalar_lea.vmem (%p5578_p3), [#allocation3], %s5206_s8 }
  0x4d   : > { %v582_v48 = vld [vmem:[%s565_s22] sm:$0x1]  ;;  %v584_v49 = vld [vmem:[%s565_s22 + $0x2] sm:$0x1]  ;;  %v586_v50 = vld [vmem:[%s565_s22 + $0x4] sm:$0x1] }
  0x4e   : > { %583 = vst [vmem:[%s561_s24] sm:$0x1] %v582_v48  ;;  %v588_v51 = vld [vmem:[%s565_s22 + $0x6] sm:$0x1]  ;;  %v590_v52 = vld [vmem:[%s565_s22 + $0x8] sm:$0x1] }
  0x4f   : > { %585 = vst [vmem:[%s561_s24 + $0x1] sm:$0x1] %v584_v49  ;;  %v592_v53 = vld [vmem:[%s565_s22 + $0xa] sm:$0x1] }
  0x50   : > { %587 = vst [vmem:[%s561_s24 + $0x2] sm:$0x1] %v586_v50 }
  0x51   : > { %589 = vst [vmem:[%s561_s24 + $0x3] sm:$0x1] %v588_v51 }
  0x52   : > { %591 = vst [vmem:[%s561_s24 + $0x4] sm:$0x1] %v590_v52 }
  0x53   : > { %593 = vst [vmem:[%s561_s24 + $0x5] sm:$0x1] %v592_v53 }
  0x54 PF: > { %p4959_p7 = scmp.ge.s32.totalorder %s5516_s15, 1  ;;  %p620_p8 = scmp.lt.s32.totalorder %s5516_s15, 5 }
  0x56   : > { %p621_p9 = pnand %p4959_p7, %p620_p8 }
  0x58   : > { %624 = sbr.rel (%p621_p9) target bundleno = 1934 (0x78e), region = 95 }
  0x5d   : > { %s627_s18 = sand.u32 1, %s5492_s9   ;;  %s661_s25 = smul.u32 6, %s5504_s12 }
  0x5e   : > { %s5207_s26 = smul.u32 384, %s627_s18  ;;  %p4960_p11 = scmp.ne.s32.totalorder %s5500_s11, 0 }
  0x5f   : > { %s5208_s27 = smul.u32 6, %s627_s18  ;;  %p662_p10 = scmp.lt.s32.totalorder %s661_s25, 11 }
  0x60   : > { %s5718_s3 = scalar_lea.vmem [#allocation2], %s5207_s26  ;;  %669 = sbr.rel (%p4960_p11) target bundleno = 108 (0x6c), region = 107 }
  0x61   : > { %s7027_s25 = smov (!%p662_p10, %s661_s25), 11  ;;  %s5720_s4 = scalar_lea.vmem [#allocation3], %s5208_s27 }
  0x62   : > { %s5716_s30 = scalar_lea.vmem %s6959_s2, %s7027_s25 }
  0x65   : > { %v5518_v54 = vmov 0.0  }
  0x66   : > { %670 = vst [vmem:[%s5716_s30] sm:$0x1] %v5518_v54 }
  0x67   : > { %671 = vst [vmem:[%s5716_s30 + $0x1] sm:$0x1] %v5518_v54 }
  0x68   : > { %672 = vst [vmem:[%s5716_s30 + $0x2] sm:$0x1] %v5518_v54 }
  0x69   : > { %673 = vst [vmem:[%s5716_s30 + $0x3] sm:$0x1] %v5518_v54 }
  0x6a   : > { %674 = vst [vmem:[%s5716_s30 + $0x4] sm:$0x1] %v5518_v54 }
  0x6b   : > { %675 = vst [vmem:[%s5716_s30 + $0x5] sm:$0x1] %v5518_v54 }
  0x6c PF: > { %v680_v55 = vld [vmem:[%s5718_s3 + $0x10] sm:$0xff]   ;;  %v678_v56 = vld [vmem:[%s5718_s3 + $0x8] sm:$0xff]   ;;  %v676_v57 = vld [vmem:[%s5718_s3] sm:$0xff]  }
  0x6d   : > { %v776_v58 = vunpack.c.l.bf16 %v680_v55  ;;  %v774_v59 = vunpack.c.l.bf16 %v678_v56  ;;  %v772_v60 = vunpack.c.l.bf16 %v676_v57  ;;  %v777_v0 = vunpack.c.h.bf16 %v680_v55  ;;  %v684_v6 = vld [vmem:[%s5718_s3 + $0x20] sm:$0xff]   ;;  %v683_v7 = vld [vmem:[%s5718_s3 + $0x18] sm:$0xff]   ;;  %v687_v14 = vld [vmem:[%s5718_s3 + $0x2c] sm:$0xff]  }
  0x6e   : > { %v775_v1 = vunpack.c.h.bf16 %v678_v56  ;;  %v773_v2 = vunpack.c.h.bf16 %v676_v57  ;;  %v780_v8 = vunpack.c.l.bf16 %v684_v6  ;;  %v779_v9 = vunpack.c.h.bf16 %v683_v7  ;;  %v686_v15 = vld [vmem:[%s5718_s3 + $0x28] sm:$0xf]  ;;  %v690_v22 = vld [vmem:[%s5718_s3 + $0x38] sm:$0xff]   ;;  %v689_v23 = vld [vmem:[%s5718_s3 + $0x34] sm:$0xf] }
  0x6f   : > { %v872_v61 = vmul.f32 %v776_v58, %v776_v58  ;;  %v870_v62 = vmul.f32 %v774_v59, %v774_v59  ;;  %v868_v63 = vmul.f32 %v772_v60, %v772_v60  ;;  %v873_v3 = vmul.f32 %v777_v0, %v777_v0  ;;  %v693_v30 = vld [vmem:[%s5718_s3 + $0x44] sm:$0xff]   ;;  %v692_v31 = vld [vmem:[%s5718_s3 + $0x40] sm:$0xf]  ;;  %v696_v38 = vld [vmem:[%s5718_s3 + $0x50] sm:$0xff]  }
  0x70   : > { %v871_v4 = vmul.f32 %v775_v1, %v775_v1  ;;  %v869_v5 = vmul.f32 %v773_v2, %v773_v2  ;;  %v778_v10 = vunpack.c.l.bf16 %v683_v7  ;;  %v876_v11 = vmul.f32 %v780_v8, %v780_v8  ;;  %v695_v39 = vld [vmem:[%s5718_s3 + $0x4c] sm:$0xf]  ;;  %v699_v46 = vld [vmem:[%s5718_s3 + $0x5c] sm:$0xff]   ;;  %v698_v47 = vld [vmem:[%s5718_s3 + $0x58] sm:$0xf] }
  0x71   : > { %972 = vadd.xlane.f32.xlu2 %v872_v61  ;;  %968 = vadd.xlane.f32.xlu1 %v870_v62  ;;  %v875_v12 = vmul.f32 %v779_v9, %v779_v9  ;;  %v783_v16 = vunpack.c.l.bf16 %v687_v14  ;;  %v782_v17 = vunpack.c.l.bf16 %v686_v15  ;;  %v781_v18 = vunpack.c.h.bf16 %v684_v6  ;;  %v702_v54 = vld [vmem:[%s5718_s3 + $0x68] sm:$0xff]   ;;  %v701_v55 = vld [vmem:[%s5718_s3 + $0x64] sm:$0xf]  ;;  %v705_v62 = vld [vmem:[%s5718_s3 + $0x74] sm:$0xff]  }
  0x72   : > { %964 = vadd.xlane.f32.xlu0 %v868_v63  ;;  %v874_v13 = vmul.f32 %v778_v10, %v778_v10  ;;  %v786_v24 = vunpack.c.l.bf16 %v690_v22  ;;  %v785_v25 = vunpack.c.l.bf16 %v689_v23  ;;  %v784_v26 = vunpack.c.h.bf16 %v687_v14  ;;  %v704_v63 = vld [vmem:[%s5718_s3 + $0x70] sm:$0xf]  ;;  %v708_v6 = vld [vmem:[%s5718_s3 + $0x80] sm:$0xff]   ;;  %v707_v7 = vld [vmem:[%s5718_s3 + $0x7c] sm:$0xf] }
  0x73   : > { %v879_v19 = vmul.f32 %v783_v16, %v783_v16  ;;  %v878_v20 = vmul.f32 %v782_v17, %v782_v17  ;;  %v877_v21 = vmul.f32 %v781_v18, %v781_v18  ;;  %v789_v32 = vunpack.c.l.bf16 %v693_v30  ;;  %v711_v14 = vld [vmem:[%s5718_s3 + $0x8c] sm:$0xff]   ;;  %v710_v15 = vld [vmem:[%s5718_s3 + $0x88] sm:$0xf]  ;;  %v713_v23 = vld [vmem:[%s5718_s3 + $0x94] sm:$0xf] }
  0x74   : > { %v882_v27 = vmul.f32 %v786_v24, %v786_v24  ;;  %v881_v28 = vmul.f32 %v785_v25, %v785_v25  ;;  %v880_v29 = vmul.f32 %v784_v26, %v784_v26  ;;  %v788_v33 = vunpack.c.l.bf16 %v692_v31  ;;  %v716_v31 = vld [vmem:[%s5718_s3 + $0xa0] sm:$0xf] }
  0x75   : > { %v787_v34 = vunpack.c.h.bf16 %v690_v22  ;;  %v885_v35 = vmul.f32 %v789_v32, %v789_v32  ;;  %v792_v40 = vunpack.c.l.bf16 %v696_v38  ;;  %v791_v41 = vunpack.c.l.bf16 %v695_v39  ;;  %v714_v22 = vld [vmem:[%s5718_s3 + $0x98] sm:$0xff]   ;;  %v719_v39 = vld [vmem:[%s5718_s3 + $0xac] sm:$0xf] }
  0x76   : > { %v884_v36 = vmul.f32 %v788_v33, %v788_v33  ;;  %v790_v42 = vunpack.c.h.bf16 %v693_v30  ;;  %v795_v48 = vunpack.c.l.bf16 %v699_v46  ;;  %v794_v49 = vunpack.c.l.bf16 %v698_v47  ;;  %v717_v30 = vld [vmem:[%s5718_s3 + $0xa4] sm:$0xff]   ;;  %v722_v47 = vld [vmem:[%s5718_s3 + $0xb8] sm:$0xf] }
  0x77   : > { %v883_v37 = vmul.f32 %v787_v34, %v787_v34  ;;  %v888_v43 = vmul.f32 %v792_v40, %v792_v40  ;;  %v887_v44 = vmul.f32 %v791_v41, %v791_v41  ;;  %v793_v50 = vunpack.c.h.bf16 %v696_v38  ;;  %v720_v38 = vld [vmem:[%s5718_s3 + $0xb0] sm:$0xff]  }
  0x78   : > { %v886_v45 = vmul.f32 %v790_v42, %v790_v42  ;;  %v891_v51 = vmul.f32 %v795_v48, %v795_v48  ;;  %v890_v52 = vmul.f32 %v794_v49, %v794_v49  ;;  %v798_v56 = vunpack.c.l.bf16 %v702_v54 }
  0x79   : > { %974 = vadd.xlane.f32.xlu2 %v873_v3  ;;  %970 = vadd.xlane.f32.xlu1 %v871_v4  ;;  %v889_v53 = vmul.f32 %v793_v50, %v793_v50  ;;  %v797_v57 = vunpack.c.l.bf16 %v701_v55  ;;  %v796_v58 = vunpack.c.h.bf16 %v699_v46  ;;  %v801_v0 = vunpack.c.l.bf16 %v705_v62  ;;  %v5759_v46 = vld [vmem:[%s5718_s3 + $0xbc] sm:$0xff]  }
  0x7a   : > { %966 = vadd.xlane.f32.xlu0 %v869_v5  ;;  %v894_v59 = vmul.f32 %v798_v56, %v798_v56  ;;  %v800_v1 = vunpack.c.l.bf16 %v704_v63  ;;  %v799_v2 = vunpack.c.h.bf16 %v702_v54  ;;  %v804_v8 = vunpack.c.l.bf16 %v708_v6 }
  0x7b   : > { %v893_v60 = vmul.f32 %v797_v57, %v797_v57  ;;  %v892_v61 = vmul.f32 %v796_v58, %v796_v58  ;;  %v897_v3 = vmul.f32 %v801_v0, %v801_v0  ;;  %v803_v9 = vunpack.c.l.bf16 %v707_v7 }
  0x7c   : > { %v896_v4 = vmul.f32 %v800_v1, %v800_v1  ;;  %v895_v5 = vmul.f32 %v799_v2, %v799_v2  ;;  %v802_v10 = vunpack.c.h.bf16 %v705_v62  ;;  %v807_v16 = vunpack.c.l.bf16 %v711_v14 }
  0x7d   : > { %v806_v17 = vunpack.c.l.bf16 %v710_v15  ;;  %v805_v18 = vunpack.c.h.bf16 %v708_v6  ;;  %v810_v24 = vunpack.c.l.bf16 %v714_v22  ;;  %v809_v25 = vunpack.c.l.bf16 %v713_v23 }
  0x7e   : > { %v808_v26 = vunpack.c.h.bf16 %v711_v14  ;;  %v813_v32 = vunpack.c.l.bf16 %v717_v30  ;;  %v812_v33 = vunpack.c.l.bf16 %v716_v31  ;;  %v811_v34 = vunpack.c.h.bf16 %v714_v22 }
  0x7f   : > { %v816_v40 = vunpack.c.l.bf16 %v720_v38  ;;  %v815_v41 = vunpack.c.l.bf16 %v719_v39  ;;  %v814_v42 = vunpack.c.h.bf16 %v717_v30  ;;  %v819_v48 = vunpack.c.l.bf16 %v5759_v46 }
  0x80   : > { %v818_v49 = vunpack.c.l.bf16 %v722_v47  ;;  %v817_v50 = vunpack.c.h.bf16 %v720_v38 }
  0x81   : > { %980 = vadd.xlane.f32.xlu2 %v876_v11  ;;  %978 = vadd.xlane.f32.xlu1 %v875_v12  ;;  %v900_v11 = vmul.f32 %v804_v8, %v804_v8  ;;  %v899_v12 = vmul.f32 %v803_v9, %v803_v9 }
  0x82   : > { %976 = vadd.xlane.f32.xlu0 %v874_v13  ;;  %v898_v13 = vmul.f32 %v802_v10, %v802_v10  ;;  %v913_v55 = vmul.f32 %v817_v50, %v817_v50 }
  0x89   : > { %986 = vadd.xlane.f32.xlu2 %v879_v19  ;;  %984 = vadd.xlane.f32.xlu1 %v878_v20  ;;  %v903_v19 = vmul.f32 %v807_v16, %v807_v16  ;;  %v902_v20 = vmul.f32 %v806_v17, %v806_v17 }
  0x8a   : > { %982 = vadd.xlane.f32.xlu0 %v877_v21  ;;  %v901_v21 = vmul.f32 %v805_v18, %v805_v18 }
  0x91   : > { %992 = vadd.xlane.f32.xlu2 %v882_v27  ;;  %990 = vadd.xlane.f32.xlu1 %v881_v28  ;;  %v906_v27 = vmul.f32 %v810_v24, %v810_v24  ;;  %v905_v28 = vmul.f32 %v809_v25, %v809_v25  ;;  %v729_v24 = vld [vmem:[%s5718_s3 + $0xd4] sm:$0xff]   ;;  %v728_v25 = vld [vmem:[%s5718_s3 + $0xd0] sm:$0xf] }
  0x92   : > { %988 = vadd.xlane.f32.xlu0 %v880_v29  ;;  %v904_v29 = vmul.f32 %v808_v26, %v808_v26  ;;  %v825_v31 = vunpack.c.l.bf16 %v729_v24 }
  0x99   : > { %998 = vadd.xlane.f32.xlu2 %v885_v35  ;;  %996 = vadd.xlane.f32.xlu1 %v884_v36  ;;  %v909_v35 = vmul.f32 %v813_v32, %v813_v32  ;;  %v908_v36 = vmul.f32 %v812_v33, %v812_v33  ;;  %v824_v32 = vunpack.c.l.bf16 %v728_v25 }
  0x9a   : > { %994 = vadd.xlane.f32.xlu0 %v883_v37  ;;  %v907_v37 = vmul.f32 %v811_v34, %v811_v34 }
  0x9b   : > { %v920_v38 = vmul.f32 %v824_v32, %v824_v32 }
  0xa1   : > { %1004 = vadd.xlane.f32.xlu2 %v888_v43  ;;  %1002 = vadd.xlane.f32.xlu1 %v887_v44  ;;  %v912_v43 = vmul.f32 %v816_v40, %v816_v40  ;;  %v911_v44 = vmul.f32 %v815_v41, %v815_v41 }
  0xa2   : > { %1000 = vadd.xlane.f32.xlu0 %v886_v45  ;;  %v910_v45 = vmul.f32 %v814_v42, %v814_v42 }
  0xa9   : > { %1010 = vadd.xlane.f32.xlu2 %v891_v51  ;;  %1008 = vadd.xlane.f32.xlu1 %v890_v52  ;;  %v915_v52 = vmul.f32 %v819_v48, %v819_v48 }
  0xaa   : > { %1006 = vadd.xlane.f32.xlu0 %v889_v53  ;;  %v914_v53 = vmul.f32 %v818_v49, %v818_v49 }
  0xb1   : > { %1016 = vadd.xlane.f32.xlu2 %v894_v59  ;;  %1014 = vadd.xlane.f32.xlu1 %v893_v60 }
  0xb2   : > { %1012 = vadd.xlane.f32.xlu0 %v892_v61 }
  0xb9   : > { %1022 = vadd.xlane.f32.xlu2 %v897_v3  ;;  %1020 = vadd.xlane.f32.xlu1 %v896_v4 }
  0xba   : > { %1018 = vadd.xlane.f32.xlu0 %v895_v5 }
  0xc1   : > { %1028 = vadd.xlane.f32.xlu2 %v900_v11  ;;  %1026 = vadd.xlane.f32.xlu1 %v899_v12  ;;  %v726_v11 = vld [vmem:[%s5718_s3 + $0xc8] sm:$0xff]   ;;  %v725_v12 = vld [vmem:[%s5718_s3 + $0xc4] sm:$0xf] }
  0xc2   : > { %1024 = vadd.xlane.f32.xlu0 %v898_v13  ;;  %v822_v18 = vunpack.c.l.bf16 %v726_v11 }
  0xc4   : > { %v918_v26 = vmul.f32 %v822_v18, %v822_v18 }
  0xc9   : > { %1034 = vadd.xlane.f32.xlu2 %v903_v19  ;;  %1032 = vadd.xlane.f32.xlu1 %v902_v20  ;;  %v821_v19 = vunpack.c.l.bf16 %v725_v12  ;;  %v820_v20 = vunpack.c.h.bf16 %v5759_v46 }
  0xca   : > { %1030 = vadd.xlane.f32.xlu0 %v901_v21 }
  0xd1   : > { %1040 = vadd.xlane.f32.xlu2 %v906_v27  ;;  %1038 = vadd.xlane.f32.xlu1 %v905_v28  ;;  %v917_v27 = vmul.f32 %v821_v19, %v821_v19  ;;  %v916_v28 = vmul.f32 %v820_v20, %v820_v20 }
  0xd2   : > { %1036 = vadd.xlane.f32.xlu0 %v904_v29 }
  0xd9   : > { %1046 = vadd.xlane.f32.xlu2 %v909_v35  ;;  %1044 = vadd.xlane.f32.xlu1 %v908_v36  ;;  %v823_v35 = vunpack.c.h.bf16 %v726_v11 }
  0xda   : > { %1042 = vadd.xlane.f32.xlu0 %v907_v37  ;;  %v921_v37 = vmul.f32 %v825_v31, %v825_v31 }
  0xdb   : > { %v919_v40 = vmul.f32 %v823_v35, %v823_v35 }
  0xe1   : > { %1052 = vadd.xlane.f32.xlu2 %v912_v43  ;;  %1050 = vadd.xlane.f32.xlu1 %v911_v44 }
  0xe2   : > { %1048 = vadd.xlane.f32.xlu0 %v910_v45 }
  0xe4   : > { %v969_v61 = vpop.xlane.xlu1 %968 }
  0xe5   : > { %v965_v51 = vpop.xlane.xlu0 %964  ;;  %v5763_v0 = vmax.f32 %v969_v61, 1e-24 }
  0xe6   : > { %v1162_v54 = vmax.f32 %v965_v51, 1e-24  ;;  %v5783_v51 = vld [vmem:[%s5718_s3 + $0xe0] sm:$0xff]  }
  0xe7   : > { %vm1284_vm6 = vweird.f32 %v5763_v0 }
  0xe8   : > { %5270 = vrsqrt.f32 %v1162_v54  ;;  %vm1264_vm1 = vweird.f32 %v1162_v54 }
  0xe9   : > { %1058 = vadd.xlane.f32.xlu2 %v915_v52  ;;  %1056 = vadd.xlane.f32.xlu1 %v914_v53  ;;  %v731_v52 = vld [vmem:[%s5718_s3 + $0xdc] sm:$0xf]  ;;  %v973_v53 = vpop.xlane.xlu2 %972 }
  0xea   : > { %1054 = vadd.xlane.f32.xlu0 %v913_v55  ;;  %v827_v55 = vunpack.c.l.bf16 %v731_v52 }
  0xec   : > { %v971_v23 = vpop.xlane.xlu1 %970  ;;  %v923_v61 = vmul.f32 %v827_v55, %v827_v55 }
  0xed   : > { %v967_v56 = vpop.xlane.xlu0 %966  ;;  %v5775_v30 = vmax.f32 %v971_v23, 1e-24 }
  0xee   : > { %v5271_v57 = vpop.eup %5270  ;;  %v1163_v58 = vmax.f32 %v967_v56, 1e-24  ;;  %v826_v56 = vunpack.c.h.bf16 %v729_v24 }
  0xef   : > { %v1259_v59 = vmul.f32 %v5271_v57, %v1162_v54  ;;  %vm1265_vm0 = vweird.f32 %v5271_v57  ;;  %v828_v54 = vunpack.c.l.bf16 %v5783_v51  ;;  %vm1294_vm9 = vweird.f32 %v5775_v30 }
  0xf0   : > { %5272 = vrsqrt.f32 %v1163_v58  ;;  %vm1266_vm2 = vmor %vm1264_vm1, %vm1265_vm0  ;;  %vm1274_vm4 = vweird.f32 %v1163_v58 }
  0xf1   : > { %v1260_v60 = vmul.f32 %v5271_v57, %v1259_v59  ;;  %5274 = vrsqrt.f32 %v5763_v0  ;;  %1064 = vadd.xlane.f32.xlu2 %v918_v26  ;;  %1062 = vadd.xlane.f32.xlu1 %v917_v27 }
  0xf2   : > { %1060 = vadd.xlane.f32.xlu0 %v916_v28  ;;  %5276 = vrsqrt.f32 %v5775_v30  ;;  %v5812_v28 = vld [vmem:[%s5718_s3 + $0xec] sm:$0xff]  }
  0xf3   : > { %v1261_v62 = vmul.f32 0.5, %v1260_v60  ;;  %v924_v60 = vmul.f32 %v828_v54, %v828_v54  ;;  %v831_v31 = vunpack.c.l.bf16 %v5812_v28 }
  0xf5   : > { %v1262_v63 = vsub.f32 1.5, %v1261_v62  ;;  %v922_v62 = vmul.f32 %v826_v56, %v826_v56 }
  0xf6   : > { %v5273_v1 = vpop.eup %5272 }
  0xf7   : > { %v1263_v2 = vmul.f32 %v5271_v57, %v1262_v63  ;;  %v1269_v3 = vmul.f32 %v5273_v1, %v1163_v58  ;;  %v5768_v13 = vpop.eup %5274  ;;  %vm1275_vm3 = vweird.f32 %v5273_v1 }
  0xf8   : > { %v1279_v21 = vmul.f32 %v5768_v13, %v5763_v0  ;;  %vm1276_vm5 = vmor %vm1274_vm4, %vm1275_vm3  ;;  %v5277_v47 = vpop.eup %5276  ;;  %vm1285_vm7 = vweird.f32 %v5768_v13 }
  0xf9   : > { %v1267_v4 = vsel %vm1266_vm2, %v5271_v57, %v1263_v2  ;;  %v1270_v8 = vmul.f32 %v5273_v1, %v1269_v3  ;;  %1070 = vadd.xlane.f32.xlu2 %v921_v37  ;;  %1068 = vadd.xlane.f32.xlu1 %v920_v38  ;;  %v5788_v57 = vmax.f32 %v973_v53, 1e-24  ;;  %v1289_v58 = vmul.f32 %v5277_v47, %v5775_v30  ;;  %vm1286_vm8 = vmor %vm1284_vm6, %vm1285_vm7 }
  0xfa   : > { %v2314_v5 = vperm.slane %v1267_v4, 0  ;;  %v2315_v6 = vperm.slane %v1267_v4, 1  ;;  %v2316_v7 = vperm.slane %v1267_v4, 2  ;;  %v2317_v9 = vperm.slane %v1267_v4, 3  ;;  %1066 = vadd.xlane.f32.xlu0 %v919_v40 }
  0xfb   : > { %v2318_v10 = vperm.slane %v1267_v4, 4  ;;  %v2319_v14 = vperm.slane %v1267_v4, 5  ;;  %v2320_v15 = vperm.slane %v1267_v4, 6  ;;  %v1271_v16 = vmul.f32 0.5, %v1270_v8 }
  0xfc   : > { %3082 = vst [vmem:[#allocation1] ss:$9 sm:$0xff] %v2314_v5  ;;  %v2321_v17 = vperm.slane %v1267_v4, 7  ;;  %v1280_v33 = vmul.f32 %v5768_v13, %v1279_v21  ;;  %v1290_v63 = vmul.f32 %v5277_v47, %v1289_v58  ;;  %5278 = vrsqrt.f32 %v5788_v57 }
  0xfd   : > { %3084 = vst [vmem:[#allocation1 + $0x1] ss:$9 sm:$0xff] %v2315_v6  ;;  %v1272_v22 = vsub.f32 1.5, %v1271_v16  ;;  %vm1295_vm10 = vweird.f32 %v5277_v47  ;;  %vm1304_vm12 = vweird.f32 %v5788_v57  ;;  %v927_v37 = vmul.f32 %v831_v31, %v831_v31 }
  0xfe   : > { %3086 = vst [vmem:[#allocation1 + $0x2] ss:$9 sm:$0xff] %v2316_v7  ;;  %v1281_v41 = vmul.f32 0.5, %v1280_v33  ;;  %v1291_v3 = vmul.f32 0.5, %v1290_v63  ;;  %vm1296_vm11 = vmor %vm1294_vm9, %vm1295_vm10  ;;  %v829_v33 = vunpack.c.h.bf16 %v5783_v51 }
  0xff   : > { %3088 = vst [vmem:[#allocation1 + $0x3] ss:$9 sm:$0xff] %v2317_v9  ;;  %v1273_v29 = vmul.f32 %v5273_v1, %v1272_v22 }
 0x100   : > { %3090 = vst [vmem:[#allocation1 + $0x4] ss:$9 sm:$0xff] %v2318_v10  ;;  %v1282_v48 = vsub.f32 1.5, %v1281_v41  ;;  %v1292_v9 = vsub.f32 1.5, %v1291_v3  ;;  %v977_v41 = vpop.xlane.xlu0 %976 }
 0x101   : > { %3092 = vst [vmem:[#allocation1 + $0x5] ss:$9 sm:$0xff] %v2319_v14  ;;  %v1277_v34 = vsel %vm1276_vm5, %v5273_v1, %v1273_v29  ;;  %1076 = vadd.xlane.f32.xlu2 %v924_v60  ;;  %1074 = vadd.xlane.f32.xlu1 %v923_v61  ;;  %v975_v14 = vpop.xlane.xlu2 %974  ;;  %v734_v29 = vld [vmem:[%s5718_s3 + $0xe8] sm:$0xf]  ;;  %v979_v60 = vpop.xlane.xlu1 %978 }
 0x102   : > { %3094 = vst [vmem:[#allocation1 + $0x6] ss:$9 sm:$0xff] %v2320_v15  ;;  %v2322_v36 = vperm.slane %v1277_v34, 0  ;;  %v2323_v39 = vperm.slane %v1277_v34, 1  ;;  %v2324_v42 = vperm.slane %v1277_v34, 2  ;;  %v2325_v44 = vperm.slane %v1277_v34, 3  ;;  %1072 = vadd.xlane.f32.xlu0 %v922_v62  ;;  %v5798_v7 = vpop.eup %5278 }
 0x103   : > { %3096 = vst [vmem:[#allocation1 + $0x7] ss:$9 sm:$0xff] %v2321_v17  ;;  %v2326_v45 = vperm.slane %v1277_v34, 4  ;;  %v2327_v46 = vperm.slane %v1277_v34, 5  ;;  %v2328_v49 = vperm.slane %v1277_v34, 6  ;;  %v2329_v50 = vperm.slane %v1277_v34, 7 }
 0x104   : > { %v1283_v59 = vmul.f32 %v5768_v13, %v1282_v48  ;;  %v1299_v11 = vmul.f32 %v5798_v7, %v5788_v57  ;;  %v5803_v15 = vmax.f32 %v975_v14, 1e-24  ;;  %v1293_v16 = vmul.f32 %v5277_v47, %v1292_v9 }
 0x105   : > { %v830_v32 = vunpack.c.l.bf16 %v734_v29  ;;  %vm1305_vm13 = vweird.f32 %v5798_v7  ;;  %v5833_v61 = vmax.f32 %v979_v60, 1e-24 }
 0x106   : > { %v1287_v1 = vsel %vm1286_vm8, %v5768_v13, %v1283_v59  ;;  %v1300_v17 = vmul.f32 %v5798_v7, %v1299_v11  ;;  %5280 = vrsqrt.f32 %v5803_v15  ;;  %v1297_v18 = vsel %vm1296_vm11, %v5277_v47, %v1293_v16  ;;  %vm1306_vm14 = vmor %vm1304_vm12, %vm1305_vm13 }
 0x107   : > { %v2330_v2 = vperm.slane %v1287_v1, 0  ;;  %v2331_v4 = vperm.slane %v1287_v1, 1  ;;  %v2332_v6 = vperm.slane %v1287_v1, 2  ;;  %v2333_v0 = vperm.slane %v1287_v1, 3 }
 0x108   : > { %v2334_v8 = vperm.slane %v1287_v1, 4  ;;  %v2335_v10 = vperm.slane %v1287_v1, 5  ;;  %v2336_v12 = vperm.slane %v1287_v1, 6  ;;  %v2337_v13 = vperm.slane %v1287_v1, 7 }
 0x109   : > { %v1301_v19 = vmul.f32 0.5, %v1300_v17  ;;  %v2338_v20 = vperm.slane %v1297_v18, 0  ;;  %v2339_v22 = vperm.slane %v1297_v18, 1  ;;  %v2340_v23 = vperm.slane %v1297_v18, 2  ;;  %1082 = vadd.xlane.f32.xlu2 %v927_v37 }
 0x10a   : > { %v5779_v43 = vld [vmem:[#allocation1] sm:$0xff]  ;;  %v2341_v26 = vperm.slane %v1297_v18, 3  ;;  %v2342_v27 = vperm.slane %v1297_v18, 4  ;;  %v2343_v30 = vperm.slane %v1297_v18, 5  ;;  %v2344_v35 = vperm.slane %v1297_v18, 6 }
 0x10b   : > { %3098 = vst [vmem:[#allocation1] ss:$9 sm:$0xff] %v2322_v36  ;;  %v1302_v25 = vsub.f32 1.5, %v1301_v19  ;;  %v2345_v36 = vperm.slane %v1297_v18, 7  ;;  %v926_v38 = vmul.f32 %v830_v32, %v830_v32  ;;  %vm1314_vm15 = vweird.f32 %v5803_v15  ;;  %v981_v19 = vpop.xlane.xlu2 %980 }
 0x10c   : > { %3099 = vst [vmem:[#allocation1 + $0x1] ss:$9 sm:$0xff] %v2323_v39  ;;  %v5809_v24 = vpop.eup %5280  ;;  %v925_v39 = vmul.f32 %v829_v33, %v829_v33  ;;  %vm1334_vm5 = vweird.f32 %v5833_v61 }
 0x10d   : > { %3100 = vst [vmem:[#allocation1 + $0x2] ss:$9 sm:$0xff] %v2324_v42  ;;  %v1309_v34 = vmul.f32 %v5809_v24, %v5803_v15  ;;  %v1303_v40 = vmul.f32 %v5798_v7, %v1302_v25  ;;  %v5822_v42 = vmax.f32 %v977_v41, 1e-24  ;;  %1080 = vadd.xlane.f32.xlu1 %v926_v38  ;;  %vm1315_vm0 = vweird.f32 %v5809_v24 }
 0x10e   : > { %3101 = vst [vmem:[#allocation1 + $0x3] ss:$9 sm:$0xff] %v2325_v44  ;;  %1078 = vadd.xlane.f32.xlu0 %v925_v39  ;;  %vm1316_vm1 = vmor %vm1314_vm15, %vm1315_vm0  ;;  %v832_v15 = vunpack.c.h.bf16 %v5812_v28 }
 0x10f   : > { %3102 = vst [vmem:[#allocation1 + $0x4] ss:$9 sm:$0xff] %v2326_v45  ;;  %v1310_v44 = vmul.f32 %v5809_v24, %v1309_v34  ;;  %v1307_v45 = vsel %vm1306_vm14, %v5798_v7, %v1303_v40  ;;  %5282 = vrsqrt.f32 %v5822_v42  ;;  %vm1324_vm2 = vweird.f32 %v5822_v42 }
 0x110   : > { %3103 = vst [vmem:[#allocation1 + $0x5] ss:$9 sm:$0xff] %v2327_v46  ;;  %v2346_v46 = vperm.slane %v1307_v45, 0  ;;  %v2347_v48 = vperm.slane %v1307_v45, 1  ;;  %v2349_v51 = vperm.slane %v1307_v45, 3  ;;  %v2350_v53 = vperm.slane %v1307_v45, 4 }
 0x111   : > { %3104 = vst [vmem:[#allocation1 + $0x6] ss:$9 sm:$0xff] %v2328_v49  ;;  %v1311_v47 = vmul.f32 0.5, %v1310_v44  ;;  %v2351_v55 = vperm.slane %v1307_v45, 5  ;;  %v2352_v56 = vperm.slane %v1307_v45, 6  ;;  %v2353_v57 = vperm.slane %v1307_v45, 7 }
 0x112   : > { %3105 = vst [vmem:[#allocation1 + $0x7] ss:$9 sm:$0xff] %v2329_v50  ;;  %v2348_v50 = vperm.slane %v1307_v45, 2  ;;  %5284 = vrsqrt.f32 %v5833_v61  ;;  %v928_v25 = vmul.f32 %v832_v15, %v832_v15 }
 0x113   : > { %v1312_v54 = vsub.f32 1.5, %v1311_v47 }
 0x115   : > { %v5283_v52 = vpop.eup %5282  ;;  %v1313_v59 = vmul.f32 %v5809_v24, %v1312_v54  ;;  %v740_v54 = vld [vmem:[%s5718_s3 + $0x100] sm:$0xf] }
 0x116   : > { %v1319_v58 = vmul.f32 %v5283_v52, %v5822_v42  ;;  %vm1325_vm3 = vweird.f32 %v5283_v52  ;;  %1084 = vadd.xlane.f32.xlu0 %v928_v25  ;;  %v983_v42 = vpop.xlane.xlu0 %982 }
 0x117   : > { %v1317_v63 = vsel %vm1316_vm1, %v5809_v24, %v1313_v59  ;;  %vm1326_vm4 = vmor %vm1324_vm2, %vm1325_vm3  ;;  %v5854_v44 = vmax.f32 %v983_v42, 1e-24 }
 0x118   : > { %v1320_v62 = vmul.f32 %v5283_v52, %v1319_v58  ;;  %v2354_v1 = vperm.slane %v1317_v63, 0  ;;  %v2355_v3 = vperm.slane %v1317_v63, 1  ;;  %v2357_v7 = vperm.slane %v1317_v63, 3  ;;  %v5285_v9 = vpop.eup %5284 }
 0x119   : > { %v5796_v5 = vld [vmem:[#allocation1] sm:$0xff]  ;;  %v2360_v16 = vperm.slane %v1317_v63, 6  ;;  %v2361_v17 = vperm.slane %v1317_v63, 7  ;;  %v1329_v18 = vmul.f32 %v5285_v9, %v5833_v61  ;;  %vm1335_vm6 = vweird.f32 %v5285_v9 }
 0x11a   : > { %3107 = vst [vmem:[#allocation1] ss:$9 sm:$0xff] %v2330_v2  ;;  %v1321_v2 = vmul.f32 0.5, %v1320_v62  ;;  %vm1336_vm7 = vmor %vm1334_vm5, %vm1335_vm6  ;;  %vm1354_vm11 = vweird.f32 %v5854_v44 }
 0x11b   : > { %3108 = vst [vmem:[#allocation1 + $0x1] ss:$9 sm:$0xff] %v2331_v4 }
 0x11c   : > { %3109 = vst [vmem:[#allocation1 + $0x2] ss:$9 sm:$0xff] %v2332_v6  ;;  %v2356_v6 = vperm.slane %v1317_v63, 2  ;;  %v1322_v11 = vsub.f32 1.5, %v1321_v2 }
 0x11d   : > { %3110 = vst [vmem:[#allocation1 + $0x3] ss:$9 sm:$0xff] %v2333_v0  ;;  %v5840_v0 = vld [vmem:[%s5718_s3 + $0xf8] sm:$0xff]  }
 0x11e   : > { %3111 = vst [vmem:[#allocation1 + $0x4] ss:$9 sm:$0xff] %v2334_v8  ;;  %v737_v8 = vld [vmem:[%s5718_s3 + $0xf4] sm:$0xf]  ;;  %v835_v58 = vunpack.c.h.bf16 %v5840_v0 }
 0x11f   : > { %3112 = vst [vmem:[#allocation1 + $0x5] ss:$9 sm:$0xff] %v2335_v10  ;;  %v2358_v10 = vperm.slane %v1317_v63, 4  ;;  %v833_v14 = vunpack.c.l.bf16 %v737_v8  ;;  %v985_v8 = vpop.xlane.xlu1 %984 }
 0x120   : > { %3113 = vst [vmem:[#allocation1 + $0x6] ss:$9 sm:$0xff] %v2336_v12  ;;  %v2359_v12 = vperm.slane %v1317_v63, 5  ;;  %v931_v2 = vmul.f32 %v835_v58, %v835_v58 }
 0x121   : > { %3114 = vst [vmem:[#allocation1 + $0x7] ss:$9 sm:$0xff] %v2337_v13  ;;  %v834_v13 = vunpack.c.l.bf16 %v5840_v0  ;;  %v929_v24 = vmul.f32 %v833_v14, %v833_v14 }
 0x122   : > { %1090 = vadd.xlane.f32.xlu0 %v931_v2 }
 0x123   : > { %1086 = vadd.xlane.f32.xlu1 %v929_v24 }
 0x128   : > { %v5807_v21 = vld [vmem:[#allocation1] sm:$0xff] }
 0x129   : > { %3116 = vst [vmem:[#allocation1] ss:$9 sm:$0xff] %v2338_v20  ;;  %v1323_v20 = vmul.f32 %v5283_v52, %v1322_v11 }
 0x12a   : > { %3117 = vst [vmem:[#allocation1 + $0x1] ss:$9 sm:$0xff] %v2339_v22  ;;  %v5847_v22 = vmax.f32 %v981_v19, 1e-24 }
 0x12b   : > { %3118 = vst [vmem:[#allocation1 + $0x2] ss:$9 sm:$0xff] %v2340_v23  ;;  %v930_v23 = vmul.f32 %v834_v13, %v834_v13 }
 0x12c   : > { %3119 = vst [vmem:[#allocation1 + $0x3] ss:$9 sm:$0xff] %v2341_v26  ;;  %v1330_v26 = vmul.f32 %v5285_v9, %v1329_v18  ;;  %5286 = vrsqrt.f32 %v5847_v22  ;;  %vm1344_vm8 = vweird.f32 %v5847_v22 }
 0x12d   : > { %3120 = vst [vmem:[#allocation1 + $0x4] ss:$9 sm:$0xff] %v2342_v27  ;;  %1088 = vadd.xlane.f32.xlu2 %v930_v23  ;;  %v1327_v27 = vsel %vm1326_vm4, %v5283_v52, %v1323_v20  ;;  %5288 = vrsqrt.f32 %v5854_v44 }
 0x12e   : > { %3121 = vst [vmem:[#allocation1 + $0x5] ss:$9 sm:$0xff] %v2343_v30  ;;  %v2362_v28 = vperm.slane %v1327_v27, 0  ;;  %v1331_v29 = vmul.f32 0.5, %v1330_v26  ;;  %v2363_v31 = vperm.slane %v1327_v27, 1  ;;  %v2364_v32 = vperm.slane %v1327_v27, 2  ;;  %v987_v26 = vpop.xlane.xlu2 %986 }
 0x12f   : > { %3122 = vst [vmem:[#allocation1 + $0x6] ss:$9 sm:$0xff] %v2344_v35  ;;  %v2365_v33 = vperm.slane %v1327_v27, 3  ;;  %v2366_v35 = vperm.slane %v1327_v27, 4  ;;  %v2367_v37 = vperm.slane %v1327_v27, 5  ;;  %v2368_v38 = vperm.slane %v1327_v27, 6 }
 0x130   : > { %3123 = vst [vmem:[#allocation1 + $0x7] ss:$9 sm:$0xff] %v2345_v36  ;;  %v1332_v36 = vsub.f32 1.5, %v1331_v29  ;;  %v2369_v40 = vperm.slane %v1327_v27, 7 }
 0x132   : > { %v5287_v34 = vpop.eup %5286  ;;  %v1333_v41 = vmul.f32 %v5285_v9, %v1332_v36  ;;  %v5880_v36 = vld [vmem:[%s5718_s3 + $0x110] sm:$0xff]  }
 0x133   : > { %v1339_v39 = vmul.f32 %v5287_v34, %v5847_v22  ;;  %v5289_v59 = vpop.eup %5288  ;;  %vm1345_vm9 = vweird.f32 %v5287_v34 }
 0x134   : > { %vm1346_vm10 = vmor %vm1344_vm8, %vm1345_vm9  ;;  %vm1355_vm12 = vweird.f32 %v5289_v59 }
 0x135   : > { %v1340_v45 = vmul.f32 %v5287_v34, %v1339_v39  ;;  %vm1356_vm13 = vmor %vm1354_vm11, %vm1355_vm12  ;;  %v840_v39 = vunpack.c.l.bf16 %v5880_v36 }
 0x137   : > { %v5827_v49 = vld [vmem:[#allocation1] sm:$0xff]  ;;  %v1341_v47 = vmul.f32 0.5, %v1340_v45 }
 0x138   : > { %3125 = vst [vmem:[#allocation1] ss:$9 sm:$0xff] %v2346_v46  ;;  %v1337_v46 = vsel %vm1336_vm7, %v5285_v9, %v1333_v41  ;;  %v5867_v9 = vmax.f32 %v985_v8, 1e-24 }
 0x139   : > { %3126 = vst [vmem:[#allocation1 + $0x1] ss:$9 sm:$0xff] %v2347_v48  ;;  %v2370_v48 = vperm.slane %v1337_v46, 0  ;;  %v2372_v52 = vperm.slane %v1337_v46, 2  ;;  %v1342_v60 = vsub.f32 1.5, %v1341_v47  ;;  %v2374_v61 = vperm.slane %v1337_v46, 4 }
 0x13a   : > { %3127 = vst [vmem:[#allocation1 + $0x2] ss:$9 sm:$0xff] %v2348_v50  ;;  %v2375_v62 = vperm.slane %v1337_v46, 5  ;;  %5290 = vrsqrt.f32 %v5867_v9  ;;  %vm1364_vm14 = vweird.f32 %v5867_v9 }
 0x13b   : > { %3128 = vst [vmem:[#allocation1 + $0x3] ss:$9 sm:$0xff] %v2349_v51  ;;  %v2371_v51 = vperm.slane %v1337_v46, 1  ;;  %v1343_v0 = vmul.f32 %v5287_v34, %v1342_v60 }
 0x13c   : > { %3129 = vst [vmem:[#allocation1 + $0x4] ss:$9 sm:$0xff] %v2350_v53  ;;  %v5860_v53 = vld [vmem:[%s5718_s3 + $0x104] sm:$0xff]  }
 0x13d   : > { %3130 = vst [vmem:[#allocation1 + $0x5] ss:$9 sm:$0xff] %v2351_v55  ;;  %v2373_v55 = vperm.slane %v1337_v46, 3  ;;  %v1347_v11 = vsel %vm1346_vm10, %v5287_v34, %v1343_v0  ;;  %v838_v41 = vunpack.c.h.bf16 %v5860_v53 }
 0x13e   : > { %3131 = vst [vmem:[#allocation1 + $0x6] ss:$9 sm:$0xff] %v2352_v56  ;;  %v837_v56 = vunpack.c.l.bf16 %v5860_v53  ;;  %v2379_v14 = vperm.slane %v1347_v11, 1  ;;  %v2382_v19 = vperm.slane %v1347_v11, 4  ;;  %v2383_v22 = vperm.slane %v1347_v11, 5 }
 0x13f   : > { %3132 = vst [vmem:[#allocation1 + $0x7] ss:$9 sm:$0xff] %v2353_v57  ;;  %v836_v57 = vunpack.c.l.bf16 %v740_v54  ;;  %v2384_v23 = vperm.slane %v1347_v11, 6  ;;  %v2385_v24 = vperm.slane %v1347_v11, 7  ;;  %v934_v54 = vmul.f32 %v838_v41, %v838_v41  ;;  %v993_v41 = vpop.xlane.xlu2 %992 }
 0x140   : > { %v933_v63 = vmul.f32 %v837_v56, %v837_v56  ;;  %v5291_v18 = vpop.eup %5290 }
 0x141   : > { %v1359_v25 = vmul.f32 %v5291_v18, %v5867_v9  ;;  %vm1365_vm15 = vweird.f32 %v5291_v18  ;;  %1096 = vadd.xlane.f32.xlu0 %v934_v54 }
 0x142   : > { %1094 = vadd.xlane.f32.xlu2 %v933_v63  ;;  %vm1366_vm0 = vmor %vm1364_vm14, %vm1365_vm15 }
 0x143   : > { %v1360_v29 = vmul.f32 %v5291_v18, %v1359_v25 }
 0x146   : > { %v5837_v4 = vld [vmem:[#allocation1] sm:$0xff] }
 0x147   : > { %3134 = vst [vmem:[#allocation1] ss:$9 sm:$0xff] %v2354_v1  ;;  %v932_v1 = vmul.f32 %v836_v57, %v836_v57  ;;  %v989_v57 = vpop.xlane.xlu0 %988 }
 0x148   : > { %3135 = vst [vmem:[#allocation1 + $0x1] ss:$9 sm:$0xff] %v2355_v3  ;;  %v2376_v3 = vperm.slane %v1337_v46, 6  ;;  %v5889_v58 = vmax.f32 %v989_v57, 1e-24 }
 0x149   : > { %3136 = vst [vmem:[#allocation1 + $0x2] ss:$9 sm:$0xff] %v2356_v6  ;;  %v2377_v6 = vperm.slane %v1337_v46, 7  ;;  %1092 = vadd.xlane.f32.xlu1 %v932_v1 }
 0x14a   : > { %3137 = vst [vmem:[#allocation1 + $0x3] ss:$9 sm:$0xff] %v2357_v7  ;;  %v1349_v7 = vmul.f32 %v5289_v59, %v5854_v44  ;;  %vm1384_vm4 = vweird.f32 %v5889_v58 }
 0x14b   : > { %3138 = vst [vmem:[#allocation1 + $0x4] ss:$9 sm:$0xff] %v2358_v10 }
 0x14c   : > { %3139 = vst [vmem:[#allocation1 + $0x5] ss:$9 sm:$0xff] %v2359_v12  ;;  %v1350_v10 = vmul.f32 %v5289_v59, %v1349_v7  ;;  %v2378_v12 = vperm.slane %v1347_v11, 0 }
 0x14d   : > { %3140 = vst [vmem:[#allocation1 + $0x6] ss:$9 sm:$0xff] %v2360_v16  ;;  %v2380_v16 = vperm.slane %v1347_v11, 2 }
 0x14e   : > { %3141 = vst [vmem:[#allocation1 + $0x7] ss:$9 sm:$0xff] %v2361_v17  ;;  %v1351_v13 = vmul.f32 0.5, %v1350_v10  ;;  %v2381_v17 = vperm.slane %v1347_v11, 3 }
 0x150   : > { %v1352_v20 = vsub.f32 1.5, %v1351_v13  ;;  %v991_v13 = vpop.xlane.xlu1 %990 }
 0x152   : > { %v1353_v27 = vmul.f32 %v5289_v59, %v1352_v20  ;;  %v5904_v20 = vld [vmem:[%s5718_s3 + $0x11c] sm:$0xff]  }
 0x153   : > { %v843_v25 = vunpack.c.l.bf16 %v5904_v20 }
 0x155   : > { %v5850_v30 = vld [vmem:[#allocation1] sm:$0xff] }
 0x156   : > { %3143 = vst [vmem:[#allocation1] ss:$9 sm:$0xff] %v2362_v28  ;;  %v5874_v28 = vmax.f32 %v987_v26, 1e-24 }
 0x157   : > { %3144 = vst [vmem:[#allocation1 + $0x1] ss:$9 sm:$0xff] %v2363_v31  ;;  %v1357_v31 = vsel %vm1356_vm13, %v5289_v59, %v1353_v27 }
 0x158   : > { %3145 = vst [vmem:[#allocation1 + $0x2] ss:$9 sm:$0xff] %v2364_v32  ;;  %5292 = vrsqrt.f32 %v5874_v28  ;;  %v2386_v32 = vperm.slane %v1357_v31, 0  ;;  %v2389_v42 = vperm.slane %v1357_v31, 3  ;;  %v2390_v45 = vperm.slane %v1357_v31, 4 }
 0x159   : > { %3146 = vst [vmem:[#allocation1 + $0x3] ss:$9 sm:$0xff] %v2365_v33  ;;  %v1361_v33 = vmul.f32 0.5, %v1360_v29  ;;  %v2391_v47 = vperm.slane %v1357_v31, 5  ;;  %v2393_v56 = vperm.slane %v1357_v31, 7  ;;  %5294 = vrsqrt.f32 %v5889_v58 }
 0x15a   : > { %3147 = vst [vmem:[#allocation1 + $0x4] ss:$9 sm:$0xff] %v2366_v35  ;;  %v2387_v35 = vperm.slane %v1357_v31, 1  ;;  %vm1374_vm1 = vweird.f32 %v5874_v28 }
 0x15b   : > { %3148 = vst [vmem:[#allocation1 + $0x5] ss:$9 sm:$0xff] %v2367_v37  ;;  %v743_v37 = vld [vmem:[%s5718_s3 + $0x10c] sm:$0xf]  ;;  %v1362_v46 = vsub.f32 1.5, %v1361_v33 }
 0x15c   : > { %3149 = vst [vmem:[#allocation1 + $0x6] ss:$9 sm:$0xff] %v2368_v38  ;;  %v2388_v38 = vperm.slane %v1357_v31, 2 }
 0x15d   : > { %3150 = vst [vmem:[#allocation1 + $0x7] ss:$9 sm:$0xff] %v2369_v40  ;;  %v839_v40 = vunpack.c.l.bf16 %v743_v37  ;;  %v1363_v53 = vmul.f32 %v5291_v18, %v1362_v46 }
 0x15e   : > { %v5293_v44 = vpop.eup %5292 }
 0x15f   : > { %v1367_v60 = vsel %vm1366_vm0, %v5291_v18, %v1363_v53  ;;  %vm1375_vm2 = vweird.f32 %v5293_v44 }
 0x160   : > { %v2395_v1 = vperm.slane %v1367_v60, 1  ;;  %v2396_v2 = vperm.slane %v1367_v60, 2  ;;  %v2398_v0 = vperm.slane %v1367_v60, 4  ;;  %v2399_v8 = vperm.slane %v1367_v60, 5  ;;  %vm1376_vm3 = vmor %vm1374_vm1, %vm1375_vm2 }
 0x161   : > { %v2400_v9 = vperm.slane %v1367_v60, 6  ;;  %v2401_v10 = vperm.slane %v1367_v60, 7 }
 0x164   : > { %v5857_v50 = vld [vmem:[#allocation1] sm:$0xff] }
 0x165   : > { %3152 = vst [vmem:[#allocation1] ss:$9 sm:$0xff] %v2370_v48  ;;  %v2392_v48 = vperm.slane %v1357_v31, 6  ;;  %v939_v31 = vmul.f32 %v843_v25, %v843_v25 }
 0x166   : > { %3153 = vst [vmem:[#allocation1 + $0x1] ss:$9 sm:$0xff] %v2371_v51  ;;  %v936_v51 = vmul.f32 %v840_v39, %v840_v39 }
 0x167   : > { %3154 = vst [vmem:[#allocation1 + $0x2] ss:$9 sm:$0xff] %v2372_v52  ;;  %v935_v52 = vmul.f32 %v839_v40, %v839_v40 }
 0x168   : > { %3155 = vst [vmem:[#allocation1 + $0x3] ss:$9 sm:$0xff] %v2373_v55  ;;  %v1369_v55 = vmul.f32 %v5293_v44, %v5874_v28  ;;  %1100 = vadd.xlane.f32.xlu2 %v936_v51  ;;  %v841_v28 = vunpack.c.h.bf16 %v5880_v36 }
 0x169   : > { %3156 = vst [vmem:[#allocation1 + $0x4] ss:$9 sm:$0xff] %v2374_v61  ;;  %1098 = vadd.xlane.f32.xlu1 %v935_v52 }
 0x16a   : > { %3157 = vst [vmem:[#allocation1 + $0x5] ss:$9 sm:$0xff] %v2375_v62  ;;  %v1370_v59 = vmul.f32 %v5293_v44, %v1369_v55  ;;  %v2394_v62 = vperm.slane %v1367_v60, 0 }
 0x16b   : > { %3158 = vst [vmem:[#allocation1 + $0x6] ss:$9 sm:$0xff] %v2376_v3  ;;  %v2397_v3 = vperm.slane %v1367_v60, 3 }
 0x16c   : > { %3159 = vst [vmem:[#allocation1 + $0x7] ss:$9 sm:$0xff] %v2377_v6  ;;  %v1371_v61 = vmul.f32 0.5, %v1370_v59  ;;  %v5894_v6 = vpop.eup %5294 }
 0x16d   : > { %v1379_v11 = vmul.f32 %v5894_v6, %v5889_v58  ;;  %vm1385_vm5 = vweird.f32 %v5894_v6 }
 0x16e   : > { %v1372_v7 = vsub.f32 1.5, %v1371_v61  ;;  %vm1386_vm6 = vmor %vm1384_vm4, %vm1385_vm5 }
 0x170   : > { %1106 = vadd.xlane.f32.xlu2 %v939_v31 }
 0x173   : > { %v5870_v15 = vld [vmem:[#allocation1] sm:$0xff] }
 0x174   : > { %3161 = vst [vmem:[#allocation1] ss:$9 sm:$0xff] %v2378_v12  ;;  %v1373_v12 = vmul.f32 %v5293_v44, %v1372_v7 }
 0x175   : > { %3162 = vst [vmem:[#allocation1 + $0x1] ss:$9 sm:$0xff] %v2379_v14  ;;  %v5899_v14 = vmax.f32 %v991_v13, 1e-24 }
 0x176   : > { %3163 = vst [vmem:[#allocation1 + $0x2] ss:$9 sm:$0xff] %v2380_v16  ;;  %v1380_v16 = vmul.f32 %v5894_v6, %v1379_v11 }
 0x177   : > { %3164 = vst [vmem:[#allocation1 + $0x3] ss:$9 sm:$0xff] %v2381_v17  ;;  %v1377_v17 = vsel %vm1376_vm3, %v5293_v44, %v1373_v12  ;;  %5296 = vrsqrt.f32 %v5899_v14  ;;  %v5914_v44 = vmax.f32 %v993_v41, 1e-24  ;;  %vm1394_vm7 = vweird.f32 %v5899_v14 }
 0x178   : > { %3165 = vst [vmem:[#allocation1 + $0x4] ss:$9 sm:$0xff] %v2382_v19  ;;  %v2402_v18 = vperm.slane %v1377_v17, 0  ;;  %v1381_v19 = vmul.f32 0.5, %v1380_v16  ;;  %v2404_v27 = vperm.slane %v1377_v17, 2  ;;  %v2405_v29 = vperm.slane %v1377_v17, 3 }
 0x179   : > { %3166 = vst [vmem:[#allocation1 + $0x5] ss:$9 sm:$0xff] %v2383_v22  ;;  %v746_v22 = vld [vmem:[%s5718_s3 + $0x118] sm:$0xf]  ;;  %v2407_v39 = vperm.slane %v1377_v17, 5  ;;  %v2408_v40 = vperm.slane %v1377_v17, 6  ;;  %5298 = vrsqrt.f32 %v5914_v44  ;;  %vm1404_vm10 = vweird.f32 %v5914_v44 }
 0x17a   : > { %3167 = vst [vmem:[#allocation1 + $0x6] ss:$9 sm:$0xff] %v2384_v23  ;;  %v2403_v23 = vperm.slane %v1377_v17, 1  ;;  %v842_v26 = vunpack.c.l.bf16 %v746_v22  ;;  %v1382_v37 = vsub.f32 1.5, %v1381_v19  ;;  %v2409_v36 = vperm.slane %v1377_v17, 7 }
 0x17b   : > { %3168 = vst [vmem:[#allocation1 + $0x7] ss:$9 sm:$0xff] %v2385_v24 }
 0x17d   : > { %v5297_v33 = vpop.eup %5296 }
 0x17e   : > { %vm1395_vm8 = vweird.f32 %v5297_v33 }
 0x17f   : > { %vm1396_vm9 = vmor %vm1394_vm7, %vm1395_vm8 }
 0x182   : > { %v5877_v34 = vld [vmem:[#allocation1] sm:$0xff] }
 0x183   : > { %3170 = vst [vmem:[#allocation1] ss:$9 sm:$0xff] %v2386_v32  ;;  %v938_v32 = vmul.f32 %v842_v26, %v842_v26 }
 0x184   : > { %3171 = vst [vmem:[#allocation1 + $0x1] ss:$9 sm:$0xff] %v2387_v35  ;;  %v2406_v35 = vperm.slane %v1377_v17, 4  ;;  %v844_v17 = vunpack.c.h.bf16 %v5904_v20 }
 0x185   : > { %3172 = vst [vmem:[#allocation1 + $0x2] ss:$9 sm:$0xff] %v2388_v38  ;;  %v937_v38 = vmul.f32 %v841_v28, %v841_v28  ;;  %1104 = vadd.xlane.f32.xlu1 %v938_v32 }
 0x186   : > { %3173 = vst [vmem:[#allocation1 + $0x3] ss:$9 sm:$0xff] %v2389_v42  ;;  %v1389_v42 = vmul.f32 %v5297_v33, %v5899_v14 }
 0x187   : > { %3174 = vst [vmem:[#allocation1 + $0x4] ss:$9 sm:$0xff] %v2390_v45  ;;  %1102 = vadd.xlane.f32.xlu0 %v937_v38  ;;  %v1383_v45 = vmul.f32 %v5894_v6, %v1382_v37 }
 0x188   : > { %3175 = vst [vmem:[#allocation1 + $0x5] ss:$9 sm:$0xff] %v2391_v47  ;;  %v1390_v46 = vmul.f32 %v5297_v33, %v1389_v42 }
 0x189   : > { %3176 = vst [vmem:[#allocation1 + $0x6] ss:$9 sm:$0xff] %v2392_v48  ;;  %v1387_v47 = vsel %vm1386_vm6, %v5894_v6, %v1383_v45 }
 0x18a   : > { %3177 = vst [vmem:[#allocation1 + $0x7] ss:$9 sm:$0xff] %v2393_v56  ;;  %v2410_v48 = vperm.slane %v1387_v47, 0  ;;  %v1391_v51 = vmul.f32 0.5, %v1390_v46  ;;  %v2411_v54 = vperm.slane %v1387_v47, 1  ;;  %v2412_v55 = vperm.slane %v1387_v47, 2  ;;  %v5921_v56 = vpop.eup %5298 }
 0x18b   : > { %v2413_v53 = vperm.slane %v1387_v47, 3  ;;  %v2414_v57 = vperm.slane %v1387_v47, 4  ;;  %v2415_v59 = vperm.slane %v1387_v47, 5  ;;  %v1399_v60 = vmul.f32 %v5921_v56, %v5914_v44 }
 0x18c   : > { %v1392_v58 = vsub.f32 1.5, %v1391_v51  ;;  %v2416_v61 = vperm.slane %v1387_v47, 6  ;;  %vm1405_vm11 = vweird.f32 %v5921_v56 }
 0x18d   : > { %v1400_v6 = vmul.f32 %v5921_v56, %v1399_v60  ;;  %vm1406_vm12 = vmor %vm1404_vm10, %vm1405_vm11  ;;  %v5954_v60 = vld [vmem:[%s5718_s3 + $0x134] sm:$0xff]  }
 0x191   : > { %v5892_v63 = vld [vmem:[#allocation1] sm:$0xff] }
 0x192   : > { %3179 = vst [vmem:[#allocation1] ss:$9 sm:$0xff] %v2394_v62  ;;  %v2417_v62 = vperm.slane %v1387_v47, 7 }
 0x193   : > { %3180 = vst [vmem:[#allocation1 + $0x1] ss:$9 sm:$0xff] %v2395_v1  ;;  %v995_v1 = vpop.xlane.xlu0 %994 }
 0x194   : > { %3181 = vst [vmem:[#allocation1 + $0x2] ss:$9 sm:$0xff] %v2396_v2  ;;  %v1393_v2 = vmul.f32 %v5297_v33, %v1392_v58 }
 0x195   : > { %3182 = vst [vmem:[#allocation1 + $0x3] ss:$9 sm:$0xff] %v2397_v3  ;;  %v5926_v3 = vmax.f32 %v995_v1, 1e-24 }
 0x196   : > { %3183 = vst [vmem:[#allocation1 + $0x4] ss:$9 sm:$0xff] %v2398_v0  ;;  %v1397_v7 = vsel %vm1396_vm9, %v5297_v33, %v1393_v2  ;;  %v1401_v0 = vmul.f32 0.5, %v1400_v6  ;;  %v997_v33 = vpop.xlane.xlu1 %996  ;;  %v849_v2 = vunpack.c.l.bf16 %v5954_v60 }
 0x197   : > { %3184 = vst [vmem:[#allocation1 + $0x5] ss:$9 sm:$0xff] %v2399_v8  ;;  %5300 = vrsqrt.f32 %v5926_v3  ;;  %v5931_v8 = vld [vmem:[%s5718_s3 + $0x128] sm:$0xff]   ;;  %v2419_v12 = vperm.slane %v1397_v7, 1  ;;  %v2420_v13 = vperm.slane %v1397_v7, 2  ;;  %v2421_v22 = vperm.slane %v1397_v7, 3 }
 0x198   : > { %3185 = vst [vmem:[#allocation1 + $0x6] ss:$9 sm:$0xff] %v2400_v9  ;;  %v749_v9 = vld [vmem:[%s5718_s3 + $0x124] sm:$0xf]  ;;  %v846_v14 = vunpack.c.l.bf16 %v5931_v8  ;;  %v1402_v19 = vsub.f32 1.5, %v1401_v0  ;;  %v2423_v28 = vperm.slane %v1397_v7, 5  ;;  %vm1414_vm13 = vweird.f32 %v5926_v3 }
 0x199   : > { %3186 = vst [vmem:[#allocation1 + $0x7] ss:$9 sm:$0xff] %v2401_v10  ;;  %v2418_v10 = vperm.slane %v1397_v7, 0  ;;  %v845_v16 = vunpack.c.l.bf16 %v749_v9  ;;  %v2425_v20 = vperm.slane %v1397_v7, 7  ;;  %v847_v6 = vunpack.c.h.bf16 %v5931_v8 }
 0x19a   : > { %v942_v25 = vmul.f32 %v846_v14, %v846_v14  ;;  %v1403_v32 = vmul.f32 %v5921_v56, %v1402_v19 }
 0x19b   : > { %v941_v26 = vmul.f32 %v845_v16, %v845_v16 }
 0x19c   : > { %1112 = vadd.xlane.f32.xlu2 %v942_v25  ;;  %v1407_v38 = vsel %vm1406_vm12, %v5921_v56, %v1403_v32 }
 0x19d   : > { %1110 = vadd.xlane.f32.xlu1 %v941_v26  ;;  %v2428_v42 = vperm.slane %v1407_v38, 2  ;;  %v2429_v44 = vperm.slane %v1407_v38, 3  ;;  %v2430_v47 = vperm.slane %v1407_v38, 4  ;;  %v2432_v51 = vperm.slane %v1407_v38, 6  ;;  %v1001_v26 = vpop.xlane.xlu0 %1000 }
 0x1a0   : > { %v5907_v24 = vld [vmem:[#allocation1] sm:$0xff] }
 0x1a1   : > { %3188 = vst [vmem:[#allocation1] ss:$9 sm:$0xff] %v2402_v18  ;;  %v5301_v18 = vpop.eup %5300 }
 0x1a2   : > { %3189 = vst [vmem:[#allocation1 + $0x1] ss:$9 sm:$0xff] %v2403_v23  ;;  %v2422_v23 = vperm.slane %v1397_v7, 4  ;;  %v1409_v31 = vmul.f32 %v5301_v18, %v5926_v3  ;;  %vm1415_vm14 = vweird.f32 %v5301_v18 }
 0x1a3   : > { %3190 = vst [vmem:[#allocation1 + $0x2] ss:$9 sm:$0xff] %v2404_v27  ;;  %v940_v27 = vmul.f32 %v844_v17, %v844_v17  ;;  %vm1416_vm15 = vmor %vm1414_vm13, %vm1415_vm14 }
 0x1a4   : > { %3191 = vst [vmem:[#allocation1 + $0x3] ss:$9 sm:$0xff] %v2405_v29  ;;  %v2424_v29 = vperm.slane %v1397_v7, 6  ;;  %v1410_v37 = vmul.f32 %v5301_v18, %v1409_v31 }
 0x1a5   : > { %3192 = vst [vmem:[#allocation1 + $0x4] ss:$9 sm:$0xff] %v2406_v35  ;;  %1108 = vadd.xlane.f32.xlu0 %v940_v27  ;;  %v5942_v35 = vmax.f32 %v997_v33, 1e-24  ;;  %v5963_v27 = vmax.f32 %v1001_v26, 1e-24 }
 0x1a6   : > { %3193 = vst [vmem:[#allocation1 + $0x5] ss:$9 sm:$0xff] %v2407_v39  ;;  %v1411_v39 = vmul.f32 0.5, %v1410_v37 }
 0x1a7   : > { %3194 = vst [vmem:[#allocation1 + $0x6] ss:$9 sm:$0xff] %v2408_v40  ;;  %5302 = vrsqrt.f32 %v5942_v35  ;;  %v2426_v40 = vperm.slane %v1407_v38, 0  ;;  %vm1424_vm0 = vweird.f32 %v5942_v35  ;;  %vm1444_vm6 = vweird.f32 %v5963_v27 }
 0x1a8   : > { %3195 = vst [vmem:[#allocation1 + $0x7] ss:$9 sm:$0xff] %v2409_v36  ;;  %v2427_v36 = vperm.slane %v1407_v38, 1  ;;  %v1412_v45 = vsub.f32 1.5, %v1411_v39 }
 0x1aa   : > { %v1413_v56 = vmul.f32 %v5301_v18, %v1412_v45 }
 0x1ac   : > { %v1417_v58 = vsel %vm1416_vm15, %v5301_v18, %v1413_v56  ;;  %v755_v56 = vld [vmem:[%s5718_s3 + $0x13c] sm:$0xf] }
 0x1ad   : > { %v5303_v46 = vpop.eup %5302  ;;  %v2435_v0 = vperm.slane %v1417_v58, 1  ;;  %v2436_v9 = vperm.slane %v1417_v58, 2  ;;  %v2437_v16 = vperm.slane %v1417_v58, 3  ;;  %v2438_v17 = vperm.slane %v1417_v58, 4 }
 0x1ae   : > { %v2439_v19 = vperm.slane %v1417_v58, 5  ;;  %vm1425_vm1 = vweird.f32 %v5303_v46 }
 0x1af   : > { %v5919_v52 = vld [vmem:[#allocation1] sm:$0xff]  ;;  %vm1426_vm2 = vmor %vm1424_vm0, %vm1425_vm1 }
 0x1b0   : > { %3197 = vst [vmem:[#allocation1] ss:$9 sm:$0xff] %v2410_v48  ;;  %v2431_v48 = vperm.slane %v1407_v38, 5 }
 0x1b1   : > { %3198 = vst [vmem:[#allocation1 + $0x1] ss:$9 sm:$0xff] %v2411_v54  ;;  %v2433_v54 = vperm.slane %v1407_v38, 7 }
 0x1b2   : > { %3199 = vst [vmem:[#allocation1 + $0x2] ss:$9 sm:$0xff] %v2412_v55  ;;  %v999_v55 = vpop.xlane.xlu2 %998 }
 0x1b3   : > { %3200 = vst [vmem:[#allocation1 + $0x3] ss:$9 sm:$0xff] %v2413_v53  ;;  %v1419_v53 = vmul.f32 %v5303_v46, %v5942_v35 }
 0x1b4   : > { %3201 = vst [vmem:[#allocation1 + $0x4] ss:$9 sm:$0xff] %v2414_v57  ;;  %v5950_v57 = vmax.f32 %v999_v55, 1e-24  ;;  %v5973_v55 = vld [vmem:[%s5718_s3 + $0x140] sm:$0xff]  }
 0x1b5   : > { %3202 = vst [vmem:[#allocation1 + $0x5] ss:$9 sm:$0xff] %v2415_v59  ;;  %v1420_v59 = vmul.f32 %v5303_v46, %v1419_v53  ;;  %v852_v53 = vunpack.c.l.bf16 %v5973_v55 }
 0x1b6   : > { %3203 = vst [vmem:[#allocation1 + $0x6] ss:$9 sm:$0xff] %v2416_v61  ;;  %5304 = vrsqrt.f32 %v5950_v57  ;;  %v2434_v61 = vperm.slane %v1417_v58, 0  ;;  %vm1434_vm3 = vweird.f32 %v5950_v57 }
 0x1b7   : > { %3204 = vst [vmem:[#allocation1 + $0x7] ss:$9 sm:$0xff] %v2417_v62  ;;  %v752_v62 = vld [vmem:[%s5718_s3 + $0x130] sm:$0xf]  ;;  %v1421_v1 = vmul.f32 0.5, %v1420_v59  ;;  %5306 = vrsqrt.f32 %v5963_v27 }
 0x1b8   : > { %v848_v3 = vunpack.c.l.bf16 %v752_v62  ;;  %v948_v62 = vmul.f32 %v852_v53, %v852_v53 }
 0x1b9   : > { %v1422_v18 = vsub.f32 1.5, %v1421_v1 }
 0x1bb   : > { %v1423_v25 = vmul.f32 %v5303_v46, %v1422_v18  ;;  %v1005_v18 = vpop.xlane.xlu2 %1004 }
 0x1bc   : > { %v5305_v14 = vpop.eup %5304 }
 0x1bd   : > { %v1429_v8 = vmul.f32 %v5305_v14, %v5950_v57  ;;  %v5307_v39 = vpop.eup %5306  ;;  %vm1435_vm4 = vweird.f32 %v5305_v14  ;;  %v851_v57 = vunpack.c.l.bf16 %v755_v56  ;;  %v853_v56 = vunpack.c.h.bf16 %v5973_v55 }
 0x1be   : > { %v5934_v11 = vld [vmem:[#allocation1] sm:$0xff]  ;;  %vm1436_vm5 = vmor %vm1434_vm3, %vm1435_vm4  ;;  %vm1445_vm7 = vweird.f32 %v5307_v39 }
 0x1bf   : > { %3206 = vst [vmem:[#allocation1] ss:$9 sm:$0xff] %v2418_v10  ;;  %v945_v10 = vmul.f32 %v849_v2, %v849_v2  ;;  %v947_v1 = vmul.f32 %v851_v57, %v851_v57  ;;  %vm1446_vm8 = vmor %vm1444_vm6, %vm1445_vm7 }
 0x1c0   : > { %3207 = vst [vmem:[#allocation1 + $0x1] ss:$9 sm:$0xff] %v2419_v12  ;;  %v944_v12 = vmul.f32 %v848_v3, %v848_v3 }
 0x1c1   : > { %3208 = vst [vmem:[#allocation1 + $0x2] ss:$9 sm:$0xff] %v2420_v13  ;;  %v943_v13 = vmul.f32 %v847_v6, %v847_v6  ;;  %1118 = vadd.xlane.f32.xlu2 %v945_v10 }
 0x1c2   : > { %3209 = vst [vmem:[#allocation1 + $0x3] ss:$9 sm:$0xff] %v2421_v22  ;;  %1116 = vadd.xlane.f32.xlu1 %v944_v12  ;;  %v2440_v22 = vperm.slane %v1417_v58, 6 }
 0x1c3   : > { %3210 = vst [vmem:[#allocation1 + $0x4] ss:$9 sm:$0xff] %v2422_v23  ;;  %1114 = vadd.xlane.f32.xlu0 %v943_v13  ;;  %v2441_v23 = vperm.slane %v1417_v58, 7  ;;  %v850_v58 = vunpack.c.h.bf16 %v5954_v60 }
 0x1c4   : > { %3211 = vst [vmem:[#allocation1 + $0x5] ss:$9 sm:$0xff] %v2423_v28  ;;  %v1430_v28 = vmul.f32 %v5305_v14, %v1429_v8  ;;  %v5983_v8 = vmax.f32 %v1005_v18, 1e-24 }
 0x1c5   : > { %3212 = vst [vmem:[#allocation1 + $0x6] ss:$9 sm:$0xff] %v2424_v29  ;;  %v1427_v29 = vsel %vm1426_vm2, %v5303_v46, %v1423_v25  ;;  %v1439_v46 = vmul.f32 %v5307_v39, %v5963_v27  ;;  %v946_v2 = vmul.f32 %v850_v58, %v850_v58  ;;  %v949_v58 = vmul.f32 %v853_v56, %v853_v56 }
 0x1c6   : > { %3213 = vst [vmem:[#allocation1 + $0x7] ss:$9 sm:$0xff] %v2425_v20  ;;  %v1431_v31 = vmul.f32 0.5, %v1430_v28  ;;  %v2442_v20 = vperm.slane %v1427_v29, 0  ;;  %v2443_v33 = vperm.slane %v1427_v29, 1  ;;  %v2444_v35 = vperm.slane %v1427_v29, 2 }
 0x1c7   : > { %v2445_v38 = vperm.slane %v1427_v29, 3  ;;  %v2449_v45 = vperm.slane %v1427_v29, 7  ;;  %vm1464_vm12 = vweird.f32 %v5983_v8 }
 0x1c8   : > { %v1432_v37 = vsub.f32 1.5, %v1431_v31 }
 0x1c9   : > { %1124 = vadd.xlane.f32.xlu2 %v948_v62 }
 0x1ca   : > { %1122 = vadd.xlane.f32.xlu1 %v947_v1 }
 0x1cb   : > { %1120 = vadd.xlane.f32.xlu0 %v946_v2 }
 0x1cd   : > { %v5946_v41 = vld [vmem:[#allocation1] sm:$0xff] }
 0x1ce   : > { %3215 = vst [vmem:[#allocation1] ss:$9 sm:$0xff] %v2426_v40  ;;  %v2446_v40 = vperm.slane %v1427_v29, 4 }
 0x1cf   : > { %3216 = vst [vmem:[#allocation1 + $0x1] ss:$9 sm:$0xff] %v2427_v36  ;;  %v2447_v36 = vperm.slane %v1427_v29, 5 }
 0x1d0   : > { %3217 = vst [vmem:[#allocation1 + $0x2] ss:$9 sm:$0xff] %v2428_v42  ;;  %v2448_v42 = vperm.slane %v1427_v29, 6 }
 0x1d1   : > { %3218 = vst [vmem:[#allocation1 + $0x3] ss:$9 sm:$0xff] %v2429_v44  ;;  %v1433_v44 = vmul.f32 %v5305_v14, %v1432_v37 }
 0x1d2   : > { %3219 = vst [vmem:[#allocation1 + $0x4] ss:$9 sm:$0xff] %v2430_v47  ;;  %v1003_v47 = vpop.xlane.xlu1 %1002 }
 0x1d3   : > { %3220 = vst [vmem:[#allocation1 + $0x5] ss:$9 sm:$0xff] %v2431_v48  ;;  %v5970_v48 = vmax.f32 %v1003_v47, 1e-24  ;;  %v758_v47 = vld [vmem:[%s5718_s3 + $0x148] sm:$0xf]  ;;  %1126 = vadd.xlane.f32.xlu0 %v949_v58 }
 0x1d4   : > { %3221 = vst [vmem:[#allocation1 + $0x6] ss:$9 sm:$0xff] %v2432_v51  ;;  %v1437_v51 = vsel %vm1436_vm5, %v5305_v14, %v1433_v44 }
 0x1d5   : > { %3222 = vst [vmem:[#allocation1 + $0x7] ss:$9 sm:$0xff] %v2433_v54  ;;  %v1440_v54 = vmul.f32 %v5307_v39, %v1439_v46  ;;  %5308 = vrsqrt.f32 %v5970_v48  ;;  %v2450_v59 = vperm.slane %v1437_v51, 0  ;;  %v2451_v3 = vperm.slane %v1437_v51, 1  ;;  %v5994_v46 = vld [vmem:[%s5718_s3 + $0x14c] sm:$0xff]  }
 0x1d6   : > { %v2454_v12 = vperm.slane %v1437_v51, 4  ;;  %v2455_v60 = vperm.slane %v1437_v51, 5  ;;  %v2456_v14 = vperm.slane %v1437_v51, 6  ;;  %5310 = vrsqrt.f32 %v5983_v8 }
 0x1d7   : > { %vm1454_vm9 = vweird.f32 %v5970_v48 }
 0x1db   : > { %v5309_v10 = vpop.eup %5308 }
 0x1dc   : > { %v5959_v7 = vld [vmem:[#allocation1] sm:$0xff]  ;;  %vm1455_vm10 = vweird.f32 %v5309_v10 }
 0x1dd   : > { %3224 = vst [vmem:[#allocation1] ss:$9 sm:$0xff] %v2434_v61  ;;  %v1441_v61 = vmul.f32 0.5, %v1440_v54  ;;  %vm1456_vm11 = vmor %vm1454_vm9, %vm1455_vm10  ;;  %v854_v54 = vunpack.c.l.bf16 %v758_v47 }
 0x1de   : > { %3225 = vst [vmem:[#allocation1 + $0x1] ss:$9 sm:$0xff] %v2435_v0  ;;  %v2452_v0 = vperm.slane %v1437_v51, 2 }
 0x1df   : > { %3226 = vst [vmem:[#allocation1 + $0x2] ss:$9 sm:$0xff] %v2436_v9  ;;  %v2453_v9 = vperm.slane %v1437_v51, 3  ;;  %v1442_v13 = vsub.f32 1.5, %v1441_v61  ;;  %v950_v57 = vmul.f32 %v854_v54, %v854_v54  ;;  %v856_v54 = vunpack.c.h.bf16 %v5994_v46 }
 0x1e0   : > { %3227 = vst [vmem:[#allocation1 + $0x3] ss:$9 sm:$0xff] %v2437_v16  ;;  %v2457_v16 = vperm.slane %v1437_v51, 7 }
 0x1e1   : > { %3228 = vst [vmem:[#allocation1 + $0x4] ss:$9 sm:$0xff] %v2438_v17  ;;  %v1449_v17 = vmul.f32 %v5309_v10, %v5970_v48  ;;  %v855_v48 = vunpack.c.l.bf16 %v5994_v46  ;;  %1128 = vadd.xlane.f32.xlu1 %v950_v57 }
 0x1e2   : > { %3229 = vst [vmem:[#allocation1 + $0x5] ss:$9 sm:$0xff] %v2439_v19  ;;  %v1443_v19 = vmul.f32 %v5307_v39, %v1442_v13 }
 0x1e3   : > { %3230 = vst [vmem:[#allocation1 + $0x6] ss:$9 sm:$0xff] %v2440_v22  ;;  %v1450_v22 = vmul.f32 %v5309_v10, %v1449_v17  ;;  %v951_v53 = vmul.f32 %v855_v48, %v855_v48 }
 0x1e4   : > { %3231 = vst [vmem:[#allocation1 + $0x7] ss:$9 sm:$0xff] %v2441_v23  ;;  %v1447_v23 = vsel %vm1446_vm8, %v5307_v39, %v1443_v19  ;;  %v1007_v39 = vpop.xlane.xlu0 %1006 }
 0x1e5   : > { %v2458_v25 = vperm.slane %v1447_v23, 0  ;;  %v1451_v26 = vmul.f32 0.5, %v1450_v22  ;;  %v2459_v27 = vperm.slane %v1447_v23, 1  ;;  %v2460_v29 = vperm.slane %v1447_v23, 2  ;;  %1130 = vadd.xlane.f32.xlu2 %v951_v53 }
 0x1e6   : > { %v2461_v31 = vperm.slane %v1447_v23, 3  ;;  %v2463_v37 = vperm.slane %v1447_v23, 5 }
 0x1eb   : > { %v5966_v32 = vld [vmem:[#allocation1] sm:$0xff] }
 0x1ec   : > { %3233 = vst [vmem:[#allocation1] ss:$9 sm:$0xff] %v2442_v20  ;;  %v5311_v20 = vpop.eup %5310 }
 0x1ed   : > { %3234 = vst [vmem:[#allocation1 + $0x1] ss:$9 sm:$0xff] %v2443_v33  ;;  %v2462_v33 = vperm.slane %v1447_v23, 4  ;;  %vm1465_vm13 = vweird.f32 %v5311_v20 }
 0x1ee   : > { %3235 = vst [vmem:[#allocation1 + $0x2] ss:$9 sm:$0xff] %v2444_v35  ;;  %v1452_v35 = vsub.f32 1.5, %v1451_v26  ;;  %vm1466_vm14 = vmor %vm1464_vm12, %vm1465_vm13 }
 0x1ef   : > { %3236 = vst [vmem:[#allocation1 + $0x3] ss:$9 sm:$0xff] %v2445_v38  ;;  %v2464_v38 = vperm.slane %v1447_v23, 6 }
 0x1f0   : > { %3237 = vst [vmem:[#allocation1 + $0x4] ss:$9 sm:$0xff] %v2446_v40  ;;  %v1459_v40 = vmul.f32 %v5311_v20, %v5983_v8  ;;  %v1453_v44 = vmul.f32 %v5309_v10, %v1452_v35 }
 0x1f1   : > { %3238 = vst [vmem:[#allocation1 + $0x5] ss:$9 sm:$0xff] %v2447_v36  ;;  %v2465_v36 = vperm.slane %v1447_v23, 7 }
 0x1f2   : > { %3239 = vst [vmem:[#allocation1 + $0x6] ss:$9 sm:$0xff] %v2448_v42  ;;  %v5990_v42 = vmax.f32 %v1007_v39, 1e-24  ;;  %v1457_v51 = vsel %vm1456_vm11, %v5309_v10, %v1453_v44 }
 0x1f3   : > { %3240 = vst [vmem:[#allocation1 + $0x7] ss:$9 sm:$0xff] %v2449_v45  ;;  %v1460_v45 = vmul.f32 %v5311_v20, %v1459_v40  ;;  %v2466_v61 = vperm.slane %v1457_v51, 0  ;;  %v2467_v1 = vperm.slane %v1457_v51, 1  ;;  %v2470_v10 = vperm.slane %v1457_v51, 4  ;;  %v1011_v40 = vpop.xlane.xlu2 %1010 }
 0x1f4   : > { %5312 = vrsqrt.f32 %v5990_v42  ;;  %v2471_v55 = vperm.slane %v1457_v51, 5  ;;  %v2472_v13 = vperm.slane %v1457_v51, 6  ;;  %vm1474_vm15 = vweird.f32 %v5990_v42 }
 0x1fa   : > { %v5979_v6 = vld [vmem:[#allocation1] sm:$0xff]  ;;  %v5313_v2 = vpop.eup %5312 }
 0x1fb   : > { %3242 = vst [vmem:[#allocation1] ss:$9 sm:$0xff] %v2450_v59  ;;  %v1461_v59 = vmul.f32 0.5, %v1460_v45  ;;  %vm1475_vm0 = vweird.f32 %v5313_v2  ;;  %v761_v45 = vld [vmem:[%s5718_s3 + $0x154] sm:$0xf] }
 0x1fc   : > { %3243 = vst [vmem:[#allocation1 + $0x1] ss:$9 sm:$0xff] %v2451_v3  ;;  %v2468_v3 = vperm.slane %v1457_v51, 2  ;;  %vm1476_vm1 = vmor %vm1474_vm15, %vm1475_vm0  ;;  %v857_v48 = vunpack.c.l.bf16 %v761_v45  ;;  %v6033_v45 = vld [vmem:[%s5718_s3 + $0x164] sm:$0xff]  }
 0x1fd   : > { %3244 = vst [vmem:[#allocation1 + $0x2] ss:$9 sm:$0xff] %v2452_v0  ;;  %v2469_v0 = vperm.slane %v1457_v51, 3 }
 0x1fe   : > { %3245 = vst [vmem:[#allocation1 + $0x3] ss:$9 sm:$0xff] %v2453_v9  ;;  %v1462_v9 = vsub.f32 1.5, %v1461_v59  ;;  %v953_v58 = vmul.f32 %v857_v48, %v857_v48  ;;  %v952_v59 = vmul.f32 %v856_v54, %v856_v54 }
 0x1ff   : > { %3246 = vst [vmem:[#allocation1 + $0x4] ss:$9 sm:$0xff] %v2454_v12  ;;  %v1469_v12 = vmul.f32 %v5313_v2, %v5990_v42  ;;  %v6013_v42 = vld [vmem:[%s5718_s3 + $0x158] sm:$0xff]  }
 0x200   : > { %3247 = vst [vmem:[#allocation1 + $0x5] ss:$9 sm:$0xff] %v2455_v60  ;;  %v2473_v60 = vperm.slane %v1457_v51, 7  ;;  %v858_v51 = vunpack.c.l.bf16 %v6013_v42  ;;  %1134 = vadd.xlane.f32.xlu1 %v953_v58  ;;  %1132 = vadd.xlane.f32.xlu0 %v952_v59  ;;  %v859_v48 = vunpack.c.h.bf16 %v6013_v42 }
 0x201   : > { %3248 = vst [vmem:[#allocation1 + $0x6] ss:$9 sm:$0xff] %v2456_v14  ;;  %v1463_v14 = vmul.f32 %v5311_v20, %v1462_v9  ;;  %v1470_v17 = vmul.f32 %v5313_v2, %v1469_v12 }
 0x202   : > { %3249 = vst [vmem:[#allocation1 + $0x7] ss:$9 sm:$0xff] %v2457_v16  ;;  %v1009_v16 = vpop.xlane.xlu1 %1008  ;;  %v954_v57 = vmul.f32 %v858_v51, %v858_v51  ;;  %v861_v51 = vunpack.c.l.bf16 %v6033_v45  ;;  %v955_v58 = vmul.f32 %v859_v48, %v859_v48  ;;  %v767_v48 = vld [vmem:[%s5718_s3 + $0x16c] sm:$0xf] }
 0x203   : > { %v6003_v18 = vmax.f32 %v1009_v16, 1e-24  ;;  %v1467_v19 = vsel %vm1466_vm14, %v5311_v20, %v1463_v14  ;;  %v1471_v22 = vmul.f32 0.5, %v1470_v17  ;;  %v1013_v14 = vpop.xlane.xlu0 %1012 }
 0x204   : > { %v2474_v23 = vperm.slane %v1467_v19, 0  ;;  %v2476_v26 = vperm.slane %v1467_v19, 2  ;;  %v2479_v20 = vperm.slane %v1467_v19, 5  ;;  %v2480_v35 = vperm.slane %v1467_v19, 6  ;;  %1136 = vadd.xlane.f32.xlu2 %v954_v57 }
 0x205   : > { %5314 = vrsqrt.f32 %v6003_v18  ;;  %vm1484_vm2 = vweird.f32 %v6003_v18  ;;  %v6023_v16 = vmax.f32 %v1013_v14, 1e-24  ;;  %v1017_v14 = vpop.xlane.xlu2 %1016 }
 0x207   : > { %vm1504_vm8 = vweird.f32 %v6023_v16 }
 0x208   : > { %1138 = vadd.xlane.f32.xlu0 %v955_v58 }
 0x209   : > { %v5986_v28 = vld [vmem:[#allocation1] sm:$0xff] }
 0x20a   : > { %3251 = vst [vmem:[#allocation1] ss:$9 sm:$0xff] %v2458_v25  ;;  %v2475_v25 = vperm.slane %v1467_v19, 1 }
 0x20b   : > { %3252 = vst [vmem:[#allocation1 + $0x1] ss:$9 sm:$0xff] %v2459_v27  ;;  %v1472_v27 = vsub.f32 1.5, %v1471_v22 }
 0x20c   : > { %3253 = vst [vmem:[#allocation1 + $0x2] ss:$9 sm:$0xff] %v2460_v29  ;;  %v2477_v29 = vperm.slane %v1467_v19, 3 }
 0x20d   : > { %3254 = vst [vmem:[#allocation1 + $0x3] ss:$9 sm:$0xff] %v2461_v31  ;;  %v5315_v31 = vpop.eup %5314 }
 0x20e   : > { %3255 = vst [vmem:[#allocation1 + $0x4] ss:$9 sm:$0xff] %v2462_v33  ;;  %v2478_v33 = vperm.slane %v1467_v19, 4  ;;  %v1479_v39 = vmul.f32 %v5315_v31, %v6003_v18  ;;  %vm1485_vm3 = vweird.f32 %v5315_v31 }
 0x20f   : > { %3256 = vst [vmem:[#allocation1 + $0x5] ss:$9 sm:$0xff] %v2463_v37  ;;  %v1473_v37 = vmul.f32 %v5313_v2, %v1472_v27  ;;  %vm1486_vm4 = vmor %vm1484_vm2, %vm1485_vm3 }
 0x210   : > { %3257 = vst [vmem:[#allocation1 + $0x6] ss:$9 sm:$0xff] %v2464_v38  ;;  %v2481_v38 = vperm.slane %v1467_v19, 7  ;;  %v1480_v47 = vmul.f32 %v5315_v31, %v1479_v39  ;;  %v1015_v39 = vpop.xlane.xlu1 %1014 }
 0x211   : > { %3258 = vst [vmem:[#allocation1 + $0x7] ss:$9 sm:$0xff] %v2465_v36  ;;  %v6010_v36 = vmax.f32 %v1011_v40, 1e-24  ;;  %v1477_v44 = vsel %vm1476_vm1, %v5313_v2, %v1473_v37 }
 0x212   : > { %v2482_v56 = vperm.slane %v1477_v44, 0  ;;  %v1481_v53 = vmul.f32 0.5, %v1480_v47  ;;  %v2484_v2 = vperm.slane %v1477_v44, 2  ;;  %v2486_v9 = vperm.slane %v1477_v44, 4  ;;  %v764_v47 = vld [vmem:[%s5718_s3 + $0x160] sm:$0xf] }
 0x213   : > { %5316 = vrsqrt.f32 %v6010_v36  ;;  %vm1494_vm5 = vweird.f32 %v6010_v36 }
 0x214   : > { %v1482_v46 = vsub.f32 1.5, %v1481_v53  ;;  %5318 = vrsqrt.f32 %v6023_v16  ;;  %v957_v53 = vmul.f32 %v861_v51, %v861_v51  ;;  %v1019_v51 = vpop.xlane.xlu0 %1018 }
 0x216   : > { %1142 = vadd.xlane.f32.xlu2 %v957_v53  ;;  %v863_v53 = vunpack.c.l.bf16 %v767_v48 }
 0x218   : > { %v5999_v62 = vld [vmem:[#allocation1] sm:$0xff] }
 0x219   : > { %3260 = vst [vmem:[#allocation1] ss:$9 sm:$0xff] %v2466_v61 }
 0x21a   : > { %3261 = vst [vmem:[#allocation1 + $0x1] ss:$9 sm:$0xff] %v2467_v1  ;;  %v2483_v1 = vperm.slane %v1477_v44, 1 }
 0x21b   : > { %3262 = vst [vmem:[#allocation1 + $0x2] ss:$9 sm:$0xff] %v2468_v3  ;;  %v2485_v3 = vperm.slane %v1477_v44, 3 }
 0x21c   : > { %3263 = vst [vmem:[#allocation1 + $0x3] ss:$9 sm:$0xff] %v2469_v0  ;;  %v5317_v0 = vpop.eup %5316 }
 0x21d   : > { %3264 = vst [vmem:[#allocation1 + $0x4] ss:$9 sm:$0xff] %v2470_v10  ;;  %v2487_v10 = vperm.slane %v1477_v44, 5  ;;  %v1489_v12 = vmul.f32 %v5317_v0, %v6010_v36  ;;  %vm1495_vm6 = vweird.f32 %v5317_v0  ;;  %v860_v36 = vunpack.c.l.bf16 %v764_v47 }
 0x21e   : > { %3265 = vst [vmem:[#allocation1 + $0x5] ss:$9 sm:$0xff] %v2471_v55  ;;  %v2488_v55 = vperm.slane %v1477_v44, 6  ;;  %vm1496_vm7 = vmor %vm1494_vm5, %vm1495_vm6 }
 0x21f   : > { %3266 = vst [vmem:[#allocation1 + $0x6] ss:$9 sm:$0xff] %v2472_v13  ;;  %v2489_v13 = vperm.slane %v1477_v44, 7  ;;  %v1490_v17 = vmul.f32 %v5317_v0, %v1489_v12  ;;  %v6030_v44 = vmax.f32 %v1015_v39, 1e-24  ;;  %v956_v57 = vmul.f32 %v860_v36, %v860_v36  ;;  %v6051_v36 = vld [vmem:[%s5718_s3 + $0x170] sm:$0xff]  }
 0x220   : > { %3267 = vst [vmem:[#allocation1 + $0x7] ss:$9 sm:$0xff] %v2473_v60  ;;  %v1483_v60 = vmul.f32 %v5315_v31, %v1482_v46 }
 0x221   : > { %v1491_v22 = vmul.f32 0.5, %v1490_v17  ;;  %5320 = vrsqrt.f32 %v6030_v44  ;;  %1140 = vadd.xlane.f32.xlu1 %v956_v57  ;;  %vm1514_vm11 = vweird.f32 %v6030_v44 }
 0x222   : > { %v1487_v19 = vsel %vm1486_vm4, %v5315_v31, %v1483_v60 }
 0x223   : > { %v2491_v18 = vperm.slane %v1487_v19, 1  ;;  %v2493_v27 = vperm.slane %v1487_v19, 3  ;;  %v2496_v31 = vperm.slane %v1487_v19, 6  ;;  %v2497_v37 = vperm.slane %v1487_v19, 7 }
 0x227   : > { %v6006_v8 = vld [vmem:[#allocation1] sm:$0xff] }
 0x228   : > { %3269 = vst [vmem:[#allocation1] ss:$9 sm:$0xff] %v2474_v23  ;;  %v2490_v23 = vperm.slane %v1487_v19, 0 }
 0x229   : > { %3270 = vst [vmem:[#allocation1 + $0x1] ss:$9 sm:$0xff] %v2475_v25 }
 0x22a   : > { %3271 = vst [vmem:[#allocation1 + $0x2] ss:$9 sm:$0xff] %v2476_v26  ;;  %v2492_v26 = vperm.slane %v1487_v19, 2 }
 0x22b   : > { %3272 = vst [vmem:[#allocation1 + $0x3] ss:$9 sm:$0xff] %v2477_v29  ;;  %v5319_v29 = vpop.eup %5318 }
 0x22c   : > { %3273 = vst [vmem:[#allocation1 + $0x4] ss:$9 sm:$0xff] %v2478_v33  ;;  %v1492_v33 = vsub.f32 1.5, %v1491_v22  ;;  %v5321_v42 = vpop.eup %5320  ;;  %vm1505_vm9 = vweird.f32 %v5319_v29 }
 0x22d   : > { %3274 = vst [vmem:[#allocation1 + $0x5] ss:$9 sm:$0xff] %v2479_v20  ;;  %v2494_v20 = vperm.slane %v1487_v19, 4  ;;  %v1509_v60 = vmul.f32 %v5321_v42, %v6030_v44  ;;  %vm1506_vm10 = vmor %vm1504_vm8, %vm1505_vm9  ;;  %vm1515_vm12 = vweird.f32 %v5321_v42  ;;  %v862_v44 = vunpack.c.h.bf16 %v6033_v45 }
 0x22e   : > { %3275 = vst [vmem:[#allocation1 + $0x6] ss:$9 sm:$0xff] %v2480_v35  ;;  %v2495_v35 = vperm.slane %v1487_v19, 5  ;;  %v1493_v40 = vmul.f32 %v5317_v0, %v1492_v33  ;;  %v6043_v19 = vmax.f32 %v1017_v14, 1e-24  ;;  %vm1516_vm13 = vmor %vm1514_vm11, %vm1515_vm12 }
 0x22f   : > { %3276 = vst [vmem:[#allocation1 + $0x7] ss:$9 sm:$0xff] %v2481_v38  ;;  %v1499_v38 = vmul.f32 %v5319_v29, %v6023_v16  ;;  %v1510_v22 = vmul.f32 %v5321_v42, %v1509_v60 }
 0x230   : > { %5322 = vrsqrt.f32 %v6043_v19  ;;  %vm1524_vm14 = vweird.f32 %v6043_v19 }
 0x231   : > { %v1500_v54 = vmul.f32 %v5319_v29, %v1499_v38 }
 0x236   : > { %v6019_v61 = vld [vmem:[#allocation1] sm:$0xff] }
 0x237   : > { %3278 = vst [vmem:[#allocation1] ss:$9 sm:$0xff] %v2482_v56  ;;  %v1497_v56 = vsel %vm1496_vm7, %v5317_v0, %v1493_v40 }
 0x238   : > { %3279 = vst [vmem:[#allocation1 + $0x1] ss:$9 sm:$0xff] %v2483_v1  ;;  %v2498_v59 = vperm.slane %v1497_v56, 0  ;;  %v1501_v1 = vmul.f32 0.5, %v1500_v54  ;;  %v2501_v46 = vperm.slane %v1497_v56, 3  ;;  %v2504_v12 = vperm.slane %v1497_v56, 6 }
 0x239   : > { %3280 = vst [vmem:[#allocation1 + $0x2] ss:$9 sm:$0xff] %v2484_v2  ;;  %v2499_v2 = vperm.slane %v1497_v56, 1  ;;  %v6054_v54 = vmax.f32 %v1019_v51, 1e-24 }
 0x23a   : > { %3281 = vst [vmem:[#allocation1 + $0x3] ss:$9 sm:$0xff] %v2485_v3  ;;  %v1502_v0 = vsub.f32 1.5, %v1501_v1  ;;  %v958_v1 = vmul.f32 %v862_v44, %v862_v44  ;;  %v1023_v44 = vpop.xlane.xlu2 %1022 }
 0x23b   : > { %3282 = vst [vmem:[#allocation1 + $0x4] ss:$9 sm:$0xff] %v2486_v9  ;;  %v2500_v9 = vperm.slane %v1497_v56, 2  ;;  %5324 = vrsqrt.f32 %v6054_v54  ;;  %vm1534_vm1 = vweird.f32 %v6054_v54 }
 0x23c   : > { %3283 = vst [vmem:[#allocation1 + $0x5] ss:$9 sm:$0xff] %v2487_v10  ;;  %v2502_v10 = vperm.slane %v1497_v56, 4  ;;  %v1503_v17 = vmul.f32 %v5319_v29, %v1502_v0  ;;  %1144 = vadd.xlane.f32.xlu0 %v958_v1 }
 0x23d   : > { %3284 = vst [vmem:[#allocation1 + $0x6] ss:$9 sm:$0xff] %v2488_v55  ;;  %v2503_v55 = vperm.slane %v1497_v56, 5 }
 0x23e   : > { %3285 = vst [vmem:[#allocation1 + $0x7] ss:$9 sm:$0xff] %v2489_v13  ;;  %v2505_v13 = vperm.slane %v1497_v56, 7  ;;  %v864_v56 = vunpack.c.l.bf16 %v6051_v36 }
 0x240   : > { %v960_v58 = vmul.f32 %v864_v56, %v864_v56 }
 0x242   : > { %1148 = vadd.xlane.f32.xlu2 %v960_v58  ;;  %v6071_v58 = vmax.f32 %v1023_v44, 1e-24 }
 0x244   : > { %vm1554_vm7 = vweird.f32 %v6071_v58 }
 0x245   : > { %v6026_v25 = vld [vmem:[#allocation1] sm:$0xff] }
 0x246   : > { %3287 = vst [vmem:[#allocation1] ss:$9 sm:$0xff] %v2490_v23  ;;  %v1507_v23 = vsel %vm1506_vm10, %v5319_v29, %v1503_v17 }
 0x247   : > { %3288 = vst [vmem:[#allocation1 + $0x1] ss:$9 sm:$0xff] %v2491_v18  ;;  %v2506_v18 = vperm.slane %v1507_v23, 0  ;;  %v2507_v16 = vperm.slane %v1507_v23, 1  ;;  %v2508_v33 = vperm.slane %v1507_v23, 2  ;;  %v2511_v38 = vperm.slane %v1507_v23, 5 }
 0x248   : > { %3289 = vst [vmem:[#allocation1 + $0x2] ss:$9 sm:$0xff] %v2492_v26  ;;  %v1511_v26 = vmul.f32 0.5, %v1510_v22  ;;  %v2512_v29 = vperm.slane %v1507_v23, 6  ;;  %v2513_v40 = vperm.slane %v1507_v23, 7 }
 0x249   : > { %3290 = vst [vmem:[#allocation1 + $0x3] ss:$9 sm:$0xff] %v2493_v27 }
 0x24a   : > { %3291 = vst [vmem:[#allocation1 + $0x4] ss:$9 sm:$0xff] %v2494_v20  ;;  %v2509_v20 = vperm.slane %v1507_v23, 3 }
 0x24b   : > { %3292 = vst [vmem:[#allocation1 + $0x5] ss:$9 sm:$0xff] %v2495_v35  ;;  %v5323_v35 = vpop.eup %5322 }
 0x24c   : > { %3293 = vst [vmem:[#allocation1 + $0x6] ss:$9 sm:$0xff] %v2496_v31  ;;  %v2510_v31 = vperm.slane %v1507_v23, 4  ;;  %v1519_v39 = vmul.f32 %v5323_v35, %v6043_v19  ;;  %v5325_v45 = vpop.eup %5324  ;;  %vm1525_vm15 = vweird.f32 %v5323_v35 }
 0x24d   : > { %3294 = vst [vmem:[#allocation1 + $0x7] ss:$9 sm:$0xff] %v2497_v37  ;;  %v1512_v37 = vsub.f32 1.5, %v1511_v26  ;;  %v1529_v22 = vmul.f32 %v5325_v45, %v6054_v54  ;;  %vm1526_vm0 = vmor %vm1524_vm14, %vm1525_vm15  ;;  %vm1535_vm2 = vweird.f32 %v5325_v45 }
 0x24e   : > { %v1520_v57 = vmul.f32 %v5323_v35, %v1519_v39  ;;  %vm1536_vm3 = vmor %vm1534_vm1, %vm1535_vm2 }
 0x24f   : > { %v1513_v47 = vmul.f32 %v5321_v42, %v1512_v37 }
 0x254   : > { %v6039_v3 = vld [vmem:[#allocation1] sm:$0xff] }
 0x255   : > { %3296 = vst [vmem:[#allocation1] ss:$9 sm:$0xff] %v2498_v59  ;;  %v959_v59 = vmul.f32 %v863_v53, %v863_v53  ;;  %v771_v53 = vld [vmem:[%s5718_s3 + $0x178] sm:$0xff]  }
 0x256   : > { %3297 = vst [vmem:[#allocation1 + $0x1] ss:$9 sm:$0xff] %v2499_v2  ;;  %v1517_v2 = vsel %vm1516_vm13, %v5321_v42, %v1513_v47  ;;  %v866_v1 = vunpack.c.l.bf16 %v771_v53 }
 0x257   : > { %3298 = vst [vmem:[#allocation1 + $0x2] ss:$9 sm:$0xff] %v2500_v9  ;;  %1146 = vadd.xlane.f32.xlu1 %v959_v59  ;;  %v1521_v9 = vmul.f32 0.5, %v1520_v57  ;;  %v2515_v0 = vperm.slane %v1517_v2, 1  ;;  %v2518_v60 = vperm.slane %v1517_v2, 4  ;;  %v2519_v14 = vperm.slane %v1517_v2, 5 }
 0x258   : > { %3299 = vst [vmem:[#allocation1 + $0x3] ss:$9 sm:$0xff] %v2501_v46  ;;  %v2514_v46 = vperm.slane %v1517_v2, 0  ;;  %v2520_v42 = vperm.slane %v1517_v2, 6  ;;  %v2521_v17 = vperm.slane %v1517_v2, 7  ;;  %v867_v59 = vunpack.c.h.bf16 %v771_v53 }
 0x259   : > { %3300 = vst [vmem:[#allocation1 + $0x4] ss:$9 sm:$0xff] %v2502_v10  ;;  %v962_v54 = vmul.f32 %v866_v1, %v866_v1 }
 0x25a   : > { %3301 = vst [vmem:[#allocation1 + $0x5] ss:$9 sm:$0xff] %v2503_v55  ;;  %v2516_v55 = vperm.slane %v1517_v2, 2 }
 0x25b   : > { %3302 = vst [vmem:[#allocation1 + $0x6] ss:$9 sm:$0xff] %v2504_v12  ;;  %v2517_v12 = vperm.slane %v1517_v2, 3  ;;  %v865_v2 = vunpack.c.h.bf16 %v6051_v36 }
 0x25c   : > { %3303 = vst [vmem:[#allocation1 + $0x7] ss:$9 sm:$0xff] %v2505_v13  ;;  %v1522_v13 = vsub.f32 1.5, %v1521_v9 }
 0x25e   : > { %v1523_v23 = vmul.f32 %v5323_v35, %v1522_v13 }
 0x25f   : > { %1152 = vadd.xlane.f32.xlu1 %v962_v54 }
 0x263   : > { %v6046_v27 = vld [vmem:[#allocation1] sm:$0xff] }
 0x264   : > { %3305 = vst [vmem:[#allocation1] ss:$9 sm:$0xff] %v2506_v18  ;;  %v1021_v18 = vpop.xlane.xlu1 %1020 }
 0x265   : > { %3306 = vst [vmem:[#allocation1 + $0x1] ss:$9 sm:$0xff] %v2507_v16  ;;  %v6063_v26 = vmax.f32 %v1021_v18, 1e-24  ;;  %v1530_v16 = vmul.f32 %v5325_v45, %v1529_v22 }
 0x266   : > { %3307 = vst [vmem:[#allocation1 + $0x2] ss:$9 sm:$0xff] %v2508_v33  ;;  %v1527_v33 = vsel %vm1526_vm0, %v5323_v35, %v1523_v23 }
 0x267   : > { %3308 = vst [vmem:[#allocation1 + $0x3] ss:$9 sm:$0xff] %v2509_v20  ;;  %5326 = vrsqrt.f32 %v6063_v26  ;;  %v2522_v20 = vperm.slane %v1527_v33, 0  ;;  %v1531_v19 = vmul.f32 0.5, %v1530_v16  ;;  %v2527_v51 = vperm.slane %v1527_v33, 5 }
 0x268   : > { %3309 = vst [vmem:[#allocation1 + $0x4] ss:$9 sm:$0xff] %v2510_v31  ;;  %v2523_v31 = vperm.slane %v1527_v33, 1  ;;  %v2528_v48 = vperm.slane %v1527_v33, 6  ;;  %v2529_v35 = vperm.slane %v1527_v33, 7  ;;  %5328 = vrsqrt.f32 %v6071_v58 }
 0x269   : > { %3310 = vst [vmem:[#allocation1 + $0x5] ss:$9 sm:$0xff] %v2511_v38  ;;  %v2524_v38 = vperm.slane %v1527_v33, 2  ;;  %v1532_v47 = vsub.f32 1.5, %v1531_v19  ;;  %vm1544_vm4 = vweird.f32 %v6063_v26  ;;  %v1025_v19 = vpop.xlane.xlu0 %1024 }
 0x26a   : > { %3311 = vst [vmem:[#allocation1 + $0x6] ss:$9 sm:$0xff] %v2512_v29  ;;  %v2525_v29 = vperm.slane %v1527_v33, 3 }
 0x26b   : > { %3312 = vst [vmem:[#allocation1 + $0x7] ss:$9 sm:$0xff] %v2513_v40  ;;  %v2526_v40 = vperm.slane %v1527_v33, 4  ;;  %v1533_v57 = vmul.f32 %v5325_v45, %v1532_v47 }
 0x26d   : > { %v5327_v39 = vpop.eup %5326 }
 0x26e   : > { %v1539_v56 = vmul.f32 %v5327_v39, %v6063_v26  ;;  %v5329_v36 = vpop.eup %5328  ;;  %vm1545_vm5 = vweird.f32 %v5327_v39 }
 0x26f   : > { %v1549_v16 = vmul.f32 %v5329_v36, %v6071_v58  ;;  %vm1546_vm6 = vmor %vm1544_vm4, %vm1545_vm5  ;;  %vm1555_vm8 = vweird.f32 %v5329_v36 }
 0x270   : > { %v1540_v9 = vmul.f32 %v5327_v39, %v1539_v56  ;;  %vm1556_vm9 = vmor %vm1554_vm7, %vm1555_vm8 }
 0x272   : > { %v6059_v10 = vld [vmem:[#allocation1] sm:$0xff]  ;;  %v1541_v13 = vmul.f32 0.5, %v1540_v9  ;;  %v1027_v9 = vpop.xlane.xlu1 %1026 }
 0x273   : > { %3314 = vst [vmem:[#allocation1] ss:$9 sm:$0xff] %v2514_v46  ;;  %v963_v46 = vmul.f32 %v867_v59, %v867_v59 }
 0x274   : > { %3315 = vst [vmem:[#allocation1 + $0x1] ss:$9 sm:$0xff] %v2515_v0  ;;  %v961_v0 = vmul.f32 %v865_v2, %v865_v2  ;;  %v1542_v23 = vsub.f32 1.5, %v1541_v13 }
 0x275   : > { %3316 = vst [vmem:[#allocation1 + $0x2] ss:$9 sm:$0xff] %v2516_v55  ;;  %v1537_v55 = vsel %vm1536_vm3, %v5325_v45, %v1533_v57  ;;  %1154 = vadd.xlane.f32.xlu2 %v963_v46  ;;  %v1193_v46 = vmax.f32 %v1027_v9, 1e-24  ;;  %v1031_v9 = vpop.xlane.xlu0 %1030 }
 0x276   : > { %3317 = vst [vmem:[#allocation1 + $0x3] ss:$9 sm:$0xff] %v2517_v12  ;;  %1150 = vadd.xlane.f32.xlu0 %v961_v0  ;;  %v2530_v12 = vperm.slane %v1537_v55, 0  ;;  %v2534_v22 = vperm.slane %v1537_v55, 4  ;;  %v2535_v18 = vperm.slane %v1537_v55, 5  ;;  %v2536_v45 = vperm.slane %v1537_v55, 6 }
 0x277   : > { %3318 = vst [vmem:[#allocation1 + $0x4] ss:$9 sm:$0xff] %v2518_v60  ;;  %v2537_v33 = vperm.slane %v1537_v55, 7  ;;  %vm1574_vm13 = vweird.f32 %v1193_v46 }
 0x278   : > { %3319 = vst [vmem:[#allocation1 + $0x5] ss:$9 sm:$0xff] %v2519_v14  ;;  %v2531_v14 = vperm.slane %v1537_v55, 1 }
 0x279   : > { %3320 = vst [vmem:[#allocation1 + $0x6] ss:$9 sm:$0xff] %v2520_v42  ;;  %v2532_v42 = vperm.slane %v1537_v55, 2 }
 0x27a   : > { %3321 = vst [vmem:[#allocation1 + $0x7] ss:$9 sm:$0xff] %v2521_v17  ;;  %v2533_v17 = vperm.slane %v1537_v55, 3 }
 0x281   : > { %v6066_v37 = vld [vmem:[#allocation1] sm:$0xff] }
 0x282   : > { %3323 = vst [vmem:[#allocation1] ss:$9 sm:$0xff] %v2522_v20  ;;  %v1543_v20 = vmul.f32 %v5327_v39, %v1542_v23 }
 0x283   : > { %3324 = vst [vmem:[#allocation1 + $0x1] ss:$9 sm:$0xff] %v2523_v31  ;;  %v1192_v31 = vmax.f32 %v1025_v19, 1e-24 }
 0x284   : > { %3325 = vst [vmem:[#allocation1 + $0x2] ss:$9 sm:$0xff] %v2524_v38  ;;  %v1550_v38 = vmul.f32 %v5329_v36, %v1549_v16 }
 0x285   : > { %3326 = vst [vmem:[#allocation1 + $0x3] ss:$9 sm:$0xff] %v2525_v29  ;;  %v1547_v29 = vsel %vm1546_vm6, %v5327_v39, %v1543_v20  ;;  %5330 = vrsqrt.f32 %v1192_v31  ;;  %vm1564_vm10 = vweird.f32 %v1192_v31 }
 0x286   : > { %3327 = vst [vmem:[#allocation1 + $0x4] ss:$9 sm:$0xff] %v2526_v40  ;;  %v1551_v40 = vmul.f32 0.5, %v1550_v38  ;;  %v2538_v47 = vperm.slane %v1547_v29, 0  ;;  %v2540_v26 = vperm.slane %v1547_v29, 2  ;;  %v2542_v44 = vperm.slane %v1547_v29, 4 }
 0x287   : > { %3328 = vst [vmem:[#allocation1 + $0x5] ss:$9 sm:$0xff] %v2527_v51  ;;  %v2543_v57 = vperm.slane %v1547_v29, 5  ;;  %v2544_v39 = vperm.slane %v1547_v29, 6  ;;  %v2545_v59 = vperm.slane %v1547_v29, 7  ;;  %5332 = vrsqrt.f32 %v1193_v46 }
 0x288   : > { %3329 = vst [vmem:[#allocation1 + $0x6] ss:$9 sm:$0xff] %v2528_v48  ;;  %v2539_v48 = vperm.slane %v1547_v29, 1  ;;  %v1552_v53 = vsub.f32 1.5, %v1551_v40 }
 0x289   : > { %3330 = vst [vmem:[#allocation1 + $0x7] ss:$9 sm:$0xff] %v2529_v35  ;;  %v2541_v35 = vperm.slane %v1547_v29, 3 }
 0x28a   : > { %v1553_v2 = vmul.f32 %v5329_v36, %v1552_v53 }
 0x28b   : > { %v5331_v56 = vpop.eup %5330 }
 0x28c   : > { %v1559_v1 = vmul.f32 %v5331_v56, %v1192_v31  ;;  %v1557_v0 = vsel %vm1556_vm9, %v5329_v36, %v1553_v2  ;;  %vm1565_vm11 = vweird.f32 %v5331_v56 }
 0x28d   : > { %v2546_v55 = vperm.slane %v1557_v0, 0  ;;  %v2547_v13 = vperm.slane %v1557_v0, 1  ;;  %v2548_v58 = vperm.slane %v1557_v0, 2  ;;  %v2553_v36 = vperm.slane %v1557_v0, 7  ;;  %vm1566_vm12 = vmor %vm1564_vm10, %vm1565_vm11 }
 0x28e   : > { %v1560_v54 = vmul.f32 %v5331_v56, %v1559_v1 }
 0x290   : > { %v6075_v60 = vld [vmem:[#allocation1] sm:$0xff] }
 0x291   : > { %3332 = vst [vmem:[#allocation1] ss:$9 sm:$0xff] %v2530_v12  ;;  %v1561_v12 = vmul.f32 0.5, %v1560_v54  ;;  %v6090_v54 = vmax.f32 %v1031_v9, 1e-24 }
 0x292   : > { %3333 = vst [vmem:[#allocation1 + $0x1] ss:$9 sm:$0xff] %v2531_v14 }
 0x293   : > { %3334 = vst [vmem:[#allocation1 + $0x2] ss:$9 sm:$0xff] %v2532_v42  ;;  %v2549_v42 = vperm.slane %v1557_v0, 3  ;;  %v1562_v23 = vsub.f32 1.5, %v1561_v12  ;;  %v5519_v12 = vmov 0   ;;  %vm1594_vm3 = vweird.f32 %v6090_v54 }
 0x294   : > { %3335 = vst [vmem:[#allocation1 + $0x3] ss:$9 sm:$0xff] %v2533_v17  ;;  %v5333_v17 = vpop.eup %5332  ;;  %5267 = vset.pattern.permute.xlu0 %v5519_v12  ;;  %5269 = vset.pattern.permute.xlu2 %v5519_v12 }
 0x295   : > { %3336 = vst [vmem:[#allocation1 + $0x4] ss:$9 sm:$0xff] %v2534_v22  ;;  %v2550_v22 = vperm.slane %v1557_v0, 4  ;;  %v1569_v16 = vmul.f32 %v5333_v17, %v1193_v46  ;;  %v1563_v20 = vmul.f32 %v5331_v56, %v1562_v23  ;;  %vm1575_vm14 = vweird.f32 %v5333_v17  ;;  %3954 = vperm.xlu0 %5267, %v5779_v43   ;;  %5268 = vset.pattern.permute.xlu1 %v5519_v12 }
 0x296   : > { %3337 = vst [vmem:[#allocation1 + $0x5] ss:$9 sm:$0xff] %v2535_v18  ;;  %v2551_v18 = vperm.slane %v1557_v0, 5  ;;  %vm1576_vm15 = vmor %vm1574_vm13, %vm1575_vm14  ;;  %3960 = vperm.xlu2 %5269, %v5807_v21   ;;  %3957 = vperm.xlu1 %5268, %v5796_v5  }
 0x297   : > { %3338 = vst [vmem:[#allocation1 + $0x6] ss:$9 sm:$0xff] %v2536_v45  ;;  %v2552_v45 = vperm.slane %v1557_v0, 6  ;;  %v1570_v38 = vmul.f32 %v5333_v17, %v1569_v16  ;;  %v1567_v29 = vsel %vm1566_vm12, %v5331_v56, %v1563_v20 }
 0x298   : > { %3339 = vst [vmem:[#allocation1 + $0x7] ss:$9 sm:$0xff] %v2537_v33  ;;  %v1029_v33 = vpop.xlane.xlu2 %1028  ;;  %v2554_v40 = vperm.slane %v1567_v29, 0  ;;  %v2555_v31 = vperm.slane %v1567_v29, 1  ;;  %v2561_v1 = vperm.slane %v1567_v29, 7 }
 0x299   : > { %v6084_v19 = vmax.f32 %v1029_v33, 1e-24  ;;  %v1033_v33 = vpop.xlane.xlu1 %1032 }
 0x29a   : > { %v6103_v20 = vmax.f32 %v1033_v33, 1e-24 }
 0x29b   : > { %5334 = vrsqrt.f32 %v6084_v19  ;;  %vm1584_vm0 = vweird.f32 %v6084_v19 }
 0x29c   : > { %5336 = vrsqrt.f32 %v6090_v54  ;;  %vm1604_vm6 = vweird.f32 %v6103_v20 }
 0x29d   : > { %3975 = vperm.xlu0 %5267, %v5870_v15   ;;  %5338 = vrsqrt.f32 %v6103_v20 }
 0x29e   : > { %3963 = vperm.xlu2 %5269, %v5827_v49   ;;  %3966 = vperm.xlu1 %5268, %v5837_v4  }
 0x29f   : > { %v6079_v51 = vld [vmem:[#allocation1] sm:$0xff] }
 0x2a0   : > { %3341 = vst [vmem:[#allocation1] ss:$9 sm:$0xff] %v2538_v47  ;;  %v1571_v47 = vmul.f32 0.5, %v1570_v38 }
 0x2a1   : > { %3342 = vst [vmem:[#allocation1 + $0x1] ss:$9 sm:$0xff] %v2539_v48  ;;  %v5335_v53 = vpop.eup %5334 }
 0x2a2   : > { %3343 = vst [vmem:[#allocation1 + $0x2] ss:$9 sm:$0xff] %v2540_v26  ;;  %v2556_v26 = vperm.slane %v1567_v29, 2  ;;  %v1579_v56 = vmul.f32 %v5335_v53, %v6084_v19  ;;  %v5337_v23 = vpop.eup %5336  ;;  %vm1585_vm1 = vweird.f32 %v5335_v53 }
 0x2a3   : > { %3344 = vst [vmem:[#allocation1 + $0x3] ss:$9 sm:$0xff] %v2541_v35  ;;  %v2557_v35 = vperm.slane %v1567_v29, 3  ;;  %v1589_v5 = vmul.f32 %v5337_v23, %v6090_v54  ;;  %vm1586_vm2 = vmor %vm1584_vm0, %vm1585_vm1  ;;  %vm1595_vm4 = vweird.f32 %v5337_v23 }
 0x2a4   : > { %3345 = vst [vmem:[#allocation1 + $0x4] ss:$9 sm:$0xff] %v2542_v44  ;;  %v2558_v44 = vperm.slane %v1567_v29, 4  ;;  %v1580_v0 = vmul.f32 %v5335_v53, %v1579_v56  ;;  %vm1596_vm5 = vmor %vm1594_vm3, %vm1595_vm4 }
 0x2a5   : > { %3346 = vst [vmem:[#allocation1 + $0x5] ss:$9 sm:$0xff] %v2543_v57  ;;  %v1572_v57 = vsub.f32 1.5, %v1571_v47  ;;  %v1590_v19 = vmul.f32 %v5337_v23, %v1589_v5  ;;  %3984 = vperm.xlu0 %5267, %v5907_v24  }
 0x2a6   : > { %3347 = vst [vmem:[#allocation1 + $0x6] ss:$9 sm:$0xff] %v2544_v39  ;;  %v2559_v39 = vperm.slane %v1567_v29, 5  ;;  %v1581_v46 = vmul.f32 0.5, %v1580_v0  ;;  %3969 = vperm.xlu2 %5269, %v5850_v30   ;;  %3972 = vperm.xlu1 %5268, %v5857_v50   ;;  %v1035_v50 = vpop.xlane.xlu2 %1034 }
 0x2a7   : > { %3348 = vst [vmem:[#allocation1 + $0x7] ss:$9 sm:$0xff] %v2545_v59  ;;  %v2560_v59 = vperm.slane %v1567_v29, 6  ;;  %v1573_v2 = vmul.f32 %v5333_v17, %v1572_v57 }
 0x2ad   : > { %3993 = vperm.xlu0 %5267, %v5946_v41  }
 0x2ae   : > { %v6082_v14 = vld [vmem:[#allocation1] sm:$0xff]  ;;  %3978 = vperm.xlu2 %5269, %v5877_v34   ;;  %3981 = vperm.xlu1 %5268, %v5892_v63  }
 0x2af   : > { %3350 = vst [vmem:[#allocation1] ss:$9 sm:$0xff] %v2546_v55  ;;  %v1577_v55 = vsel %vm1576_vm15, %v5333_v17, %v1573_v2 }
 0x2b0   : > { %3351 = vst [vmem:[#allocation1 + $0x1] ss:$9 sm:$0xff] %v2547_v13  ;;  %v2562_v13 = vperm.slane %v1577_v55, 0  ;;  %v2565_v17 = vperm.slane %v1577_v55, 3  ;;  %v2568_v43 = vperm.slane %v1577_v55, 6  ;;  %v2569_v21 = vperm.slane %v1577_v55, 7 }
 0x2b1   : > { %3352 = vst [vmem:[#allocation1 + $0x2] ss:$9 sm:$0xff] %v2548_v58 }
 0x2b2   : > { %3353 = vst [vmem:[#allocation1 + $0x3] ss:$9 sm:$0xff] %v2549_v42  ;;  %v2563_v42 = vperm.slane %v1577_v55, 1 }
 0x2b3   : > { %3354 = vst [vmem:[#allocation1 + $0x4] ss:$9 sm:$0xff] %v2550_v22  ;;  %v2564_v22 = vperm.slane %v1577_v55, 2 }
 0x2b4   : > { %3355 = vst [vmem:[#allocation1 + $0x5] ss:$9 sm:$0xff] %v2551_v18  ;;  %v1582_v18 = vsub.f32 1.5, %v1581_v46 }
 0x2b5   : > { %3356 = vst [vmem:[#allocation1 + $0x6] ss:$9 sm:$0xff] %v2552_v45  ;;  %v2566_v45 = vperm.slane %v1577_v55, 4  ;;  %4002 = vperm.xlu0 %5267, %v5979_v6  }
 0x2b6   : > { %3357 = vst [vmem:[#allocation1 + $0x7] ss:$9 sm:$0xff] %v2553_v36  ;;  %v2567_v36 = vperm.slane %v1577_v55, 5  ;;  %v1583_v16 = vmul.f32 %v5335_v53, %v1582_v18  ;;  %3987 = vperm.xlu2 %5269, %v5919_v52   ;;  %3990 = vperm.xlu1 %5268, %v5934_v11   ;;  %v1037_v11 = vpop.xlane.xlu0 %1036 }
 0x2b8   : > { %v1587_v38 = vsel %vm1586_vm2, %v5335_v53, %v1583_v16 }
 0x2b9   : > { %v2570_v29 = vperm.slane %v1587_v38, 0  ;;  %v2571_v15 = vperm.slane %v1587_v38, 1  ;;  %v2572_v49 = vperm.slane %v1587_v38, 2  ;;  %v2573_v4 = vperm.slane %v1587_v38, 3 }
 0x2ba   : > { %v2575_v53 = vperm.slane %v1587_v38, 5  ;;  %v2577_v24 = vperm.slane %v1587_v38, 7 }
 0x2bd   : > { %v6087_v48 = vld [vmem:[#allocation1] sm:$0xff]  ;;  %4011 = vperm.xlu0 %5267, %v6006_v8  }
 0x2be   : > { %3359 = vst [vmem:[#allocation1] ss:$9 sm:$0xff] %v2554_v40  ;;  %v1591_v40 = vmul.f32 0.5, %v1590_v19  ;;  %3996 = vperm.xlu2 %5269, %v5959_v7   ;;  %3999 = vperm.xlu1 %5268, %v5966_v32  }
 0x2bf   : > { %3360 = vst [vmem:[#allocation1 + $0x1] ss:$9 sm:$0xff] %v2555_v31  ;;  %v5339_v31 = vpop.eup %5338 }
 0x2c0   : > { %3361 = vst [vmem:[#allocation1 + $0x2] ss:$9 sm:$0xff] %v2556_v26  ;;  %v2574_v26 = vperm.slane %v1587_v38, 4  ;;  %v1599_v30 = vmul.f32 %v5339_v31, %v6103_v20  ;;  %vm1605_vm7 = vweird.f32 %v5339_v31 }
 0x2c1   : > { %3362 = vst [vmem:[#allocation1 + $0x3] ss:$9 sm:$0xff] %v2557_v35  ;;  %v1592_v35 = vsub.f32 1.5, %v1591_v40  ;;  %vm1606_vm8 = vmor %vm1604_vm6, %vm1605_vm7 }
 0x2c2   : > { %3363 = vst [vmem:[#allocation1 + $0x4] ss:$9 sm:$0xff] %v2558_v44  ;;  %v2576_v44 = vperm.slane %v1587_v38, 6 }
 0x2c3   : > { %3364 = vst [vmem:[#allocation1 + $0x5] ss:$9 sm:$0xff] %v2559_v39  ;;  %v1593_v57 = vmul.f32 %v5337_v23, %v1592_v35  ;;  %v6114_v39 = vmax.f32 %v1035_v50, 1e-24 }
 0x2c4   : > { %3365 = vst [vmem:[#allocation1 + $0x6] ss:$9 sm:$0xff] %v2560_v59  ;;  %v1600_v59 = vmul.f32 %v5339_v31, %v1599_v30 }
 0x2c5   : > { %3366 = vst [vmem:[#allocation1 + $0x7] ss:$9 sm:$0xff] %v2561_v1  ;;  %v1597_v56 = vsel %vm1596_vm5, %v5337_v23, %v1593_v57  ;;  %5340 = vrsqrt.f32 %v6114_v39  ;;  %4020 = vperm.xlu0 %5267, %v6039_v3   ;;  %vm1614_vm9 = vweird.f32 %v6114_v39 }
 0x2c6   : > { %v2578_v1 = vperm.slane %v1597_v56, 0  ;;  %v1601_v2 = vmul.f32 0.5, %v1600_v59  ;;  %v2579_v54 = vperm.slane %v1597_v56, 1  ;;  %v2580_v41 = vperm.slane %v1597_v56, 2  ;;  %4005 = vperm.xlu2 %5269, %v5986_v28   ;;  %4008 = vperm.xlu1 %5268, %v5999_v62   ;;  %v1039_v28 = vpop.xlane.xlu1 %1038 }
 0x2c7   : > { %v2581_v34 = vperm.slane %v1597_v56, 3  ;;  %v2582_v0 = vperm.slane %v1597_v56, 4  ;;  %v2583_v12 = vperm.slane %v1597_v56, 5  ;;  %v2584_v46 = vperm.slane %v1597_v56, 6 }
 0x2c8   : > { %v1602_v55 = vsub.f32 1.5, %v1601_v2  ;;  %v6139_v62 = vmax.f32 %v1039_v28, 1e-24 }
 0x2ca   : > { %v1603_v52 = vmul.f32 %v5339_v31, %v1602_v55  ;;  %vm1634_vm15 = vweird.f32 %v6139_v62 }
 0x2cb   : > { %v5341_v63 = vpop.eup %5340 }
 0x2cc   : > { %v6096_v58 = vld [vmem:[#allocation1] sm:$0xff]  ;;  %v1609_v6 = vmul.f32 %v5341_v63, %v6114_v39  ;;  %vm1615_vm10 = vweird.f32 %v5341_v63 }
 0x2cd   : > { %3368 = vst [vmem:[#allocation1] ss:$9 sm:$0xff] %v2562_v13  ;;  %v2585_v13 = vperm.slane %v1597_v56, 7  ;;  %vm1616_vm11 = vmor %vm1614_vm9, %vm1615_vm10  ;;  %4029 = vperm.xlu0 %5267, %v6066_v37  }
 0x2ce   : > { %3369 = vst [vmem:[#allocation1 + $0x1] ss:$9 sm:$0xff] %v2563_v42  ;;  %v6126_v42 = vmax.f32 %v1037_v11, 1e-24  ;;  %4014 = vperm.xlu2 %5269, %v6019_v61   ;;  %4017 = vperm.xlu1 %5268, %v6026_v25  }
 0x2cf   : > { %3370 = vst [vmem:[#allocation1 + $0x2] ss:$9 sm:$0xff] %v2564_v22  ;;  %v1610_v22 = vmul.f32 %v5341_v63, %v1609_v6 }
 0x2d0   : > { %3371 = vst [vmem:[#allocation1 + $0x3] ss:$9 sm:$0xff] %v2565_v17  ;;  %v1607_v17 = vsel %vm1606_vm8, %v5339_v31, %v1603_v52  ;;  %5342 = vrsqrt.f32 %v6126_v42  ;;  %vm1624_vm12 = vweird.f32 %v6126_v42 }
 0x2d1   : > { %3372 = vst [vmem:[#allocation1 + $0x4] ss:$9 sm:$0xff] %v2566_v45  ;;  %v1611_v23 = vmul.f32 0.5, %v1610_v22  ;;  %v2586_v18 = vperm.slane %v1607_v17, 0  ;;  %v2590_v8 = vperm.slane %v1607_v17, 4  ;;  %v2591_v5 = vperm.slane %v1607_v17, 5 }
 0x2d2   : > { %3373 = vst [vmem:[#allocation1 + $0x5] ss:$9 sm:$0xff] %v2567_v36  ;;  %v2587_v36 = vperm.slane %v1607_v17, 1  ;;  %v2592_v16 = vperm.slane %v1607_v17, 6  ;;  %v2593_v33 = vperm.slane %v1607_v17, 7  ;;  %5344 = vrsqrt.f32 %v6139_v62 }
 0x2d3   : > { %3374 = vst [vmem:[#allocation1 + $0x6] ss:$9 sm:$0xff] %v2568_v43  ;;  %v2588_v43 = vperm.slane %v1607_v17, 2  ;;  %v1612_v32 = vsub.f32 1.5, %v1611_v23 }
 0x2d4   : > { %3375 = vst [vmem:[#allocation1 + $0x7] ss:$9 sm:$0xff] %v2569_v21  ;;  %v2589_v21 = vperm.slane %v1607_v17, 3 }
 0x2d5   : > { %v1613_v20 = vmul.f32 %v5341_v63, %v1612_v32  ;;  %4038 = vperm.xlu0 %5267, %v6082_v14   ;;  %v1041_v14 = vpop.xlane.xlu2 %1040 }
 0x2d6   : > { %v5343_v7 = vpop.eup %5342  ;;  %4023 = vperm.xlu2 %5269, %v6046_v27   ;;  %4026 = vperm.xlu1 %5268, %v6059_v10   ;;  %v6150_v30 = vmax.f32 %v1041_v14, 1e-24 }
 0x2d7   : > { %v1619_v3 = vmul.f32 %v5343_v7, %v6126_v42  ;;  %v1617_v38 = vsel %vm1616_vm11, %v5341_v63, %v1613_v20  ;;  %vm1625_vm13 = vweird.f32 %v5343_v7 }
 0x2d8   : > { %v2597_v31 = vperm.slane %v1617_v38, 3  ;;  %v2598_v37 = vperm.slane %v1617_v38, 4  ;;  %v2599_v61 = vperm.slane %v1617_v38, 5  ;;  %v2600_v25 = vperm.slane %v1617_v38, 6  ;;  %vm1626_vm14 = vmor %vm1624_vm12, %vm1625_vm13 }
 0x2d9   : > { %v1620_v19 = vmul.f32 %v5343_v7, %v1619_v3  ;;  %5346 = vrsqrt.f32 %v6150_v30  ;;  %vm1644_vm2 = vweird.f32 %v6150_v30 }
 0x2db   : > { %v6107_v47 = vld [vmem:[#allocation1] sm:$0xff]  ;;  %v1621_v40 = vmul.f32 0.5, %v1620_v19 }
 0x2dc   : > { %3377 = vst [vmem:[#allocation1] ss:$9 sm:$0xff] %v2570_v29  ;;  %v2594_v29 = vperm.slane %v1617_v38, 0 }
 0x2dd   : > { %3378 = vst [vmem:[#allocation1 + $0x1] ss:$9 sm:$0xff] %v2571_v15  ;;  %v2595_v15 = vperm.slane %v1617_v38, 1  ;;  %v1622_v35 = vsub.f32 1.5, %v1621_v40  ;;  %4047 = vperm.xlu0 %5267, %v6107_v47  }
 0x2de   : > { %3379 = vst [vmem:[#allocation1 + $0x2] ss:$9 sm:$0xff] %v2572_v49  ;;  %4032 = vperm.xlu2 %5269, %v6075_v60   ;;  %4035 = vperm.xlu1 %5268, %v6079_v51  }
 0x2df   : > { %3380 = vst [vmem:[#allocation1 + $0x3] ss:$9 sm:$0xff] %v2573_v4  ;;  %v2596_v4 = vperm.slane %v1617_v38, 2 }
 0x2e0   : > { %3381 = vst [vmem:[#allocation1 + $0x4] ss:$9 sm:$0xff] %v2574_v26  ;;  %v5345_v26 = vpop.eup %5344 }
 0x2e1   : > { %3382 = vst [vmem:[#allocation1 + $0x5] ss:$9 sm:$0xff] %v2575_v53  ;;  %v2601_v53 = vperm.slane %v1617_v38, 7  ;;  %v5347_v2 = vpop.eup %5346  ;;  %vm1635_vm0 = vweird.f32 %v5345_v26 }
 0x2e2   : > { %3383 = vst [vmem:[#allocation1 + $0x6] ss:$9 sm:$0xff] %v2576_v44  ;;  %v1629_v44 = vmul.f32 %v5345_v26, %v6139_v62  ;;  %v1639_v51 = vmul.f32 %v5347_v2, %v6150_v30  ;;  %vm1636_vm1 = vmor %vm1634_vm15, %vm1635_vm0  ;;  %vm1645_vm3 = vweird.f32 %v5347_v2 }
 0x2e3   : > { %3384 = vst [vmem:[#allocation1 + $0x7] ss:$9 sm:$0xff] %v2577_v24  ;;  %v1623_v24 = vmul.f32 %v5343_v7, %v1622_v35  ;;  %vm1646_vm4 = vmor %vm1644_vm2, %vm1645_vm3 }
 0x2e4   : > { %v1630_v27 = vmul.f32 %v5345_v26, %v1629_v44 }
 0x2e5   : > { %v1627_v10 = vsel %vm1626_vm14, %v5343_v7, %v1623_v24 }
 0x2e6   : > { %v2602_v50 = vperm.slane %v1627_v10, 0  ;;  %v1631_v57 = vmul.f32 0.5, %v1630_v27  ;;  %v2603_v59 = vperm.slane %v1627_v10, 1  ;;  %v2604_v56 = vperm.slane %v1627_v10, 2  ;;  %4041 = vperm.xlu2 %5269, %v6087_v48   ;;  %4044 = vperm.xlu1 %5268, %v6096_v58  }
 0x2e7   : > { %v2607_v47 = vperm.slane %v1627_v10, 5  ;;  %v2608_v60 = vperm.slane %v1627_v10, 6 }
 0x2ea   : > { %v6119_v9 = vld [vmem:[#allocation1] sm:$0xff] }
 0x2eb   : > { %3386 = vst [vmem:[#allocation1] ss:$9 sm:$0xff] %v2578_v1  ;;  %v2605_v1 = vperm.slane %v1627_v10, 3 }
 0x2ec   : > { %3387 = vst [vmem:[#allocation1 + $0x1] ss:$9 sm:$0xff] %v2579_v54  ;;  %v2606_v54 = vperm.slane %v1627_v10, 4 }
 0x2ed   : > { %3388 = vst [vmem:[#allocation1 + $0x2] ss:$9 sm:$0xff] %v2580_v41  ;;  %v1632_v41 = vsub.f32 1.5, %v1631_v57 }
 0x2ee   : > { %3389 = vst [vmem:[#allocation1 + $0x3] ss:$9 sm:$0xff] %v2581_v34  ;;  %v2609_v34 = vperm.slane %v1627_v10, 7  ;;  %4050 = vperm.xlu2 %5269, %v6119_v9  }
 0x2ef   : > { %3390 = vst [vmem:[#allocation1 + $0x4] ss:$9 sm:$0xff] %v2582_v0  ;;  %v1633_v63 = vmul.f32 %v5345_v26, %v1632_v41  ;;  %v1043_v0 = vpop.xlane.xlu0 %1042 }
 0x2f0   : > { %3391 = vst [vmem:[#allocation1 + $0x5] ss:$9 sm:$0xff] %v2583_v12  ;;  %v6160_v55 = vmax.f32 %v1043_v0, 1e-24  ;;  %v1640_v12 = vmul.f32 %v5347_v2, %v1639_v51 }
 0x2f1   : > { %3392 = vst [vmem:[#allocation1 + $0x6] ss:$9 sm:$0xff] %v2584_v46  ;;  %v1637_v48 = vsel %vm1636_vm1, %v5345_v26, %v1633_v63 }
 0x2f2   : > { %3393 = vst [vmem:[#allocation1 + $0x7] ss:$9 sm:$0xff] %v2585_v13  ;;  %5348 = vrsqrt.f32 %v6160_v55  ;;  %v1641_v58 = vmul.f32 0.5, %v1640_v12  ;;  %v2610_v46 = vperm.slane %v1637_v48, 0  ;;  %v2611_v13 = vperm.slane %v1637_v48, 1 }
 0x2f3   : > { %v2612_v52 = vperm.slane %v1637_v48, 2  ;;  %v2613_v11 = vperm.slane %v1637_v48, 3  ;;  %v2614_v17 = vperm.slane %v1637_v48, 4  ;;  %v2615_v23 = vperm.slane %v1637_v48, 5 }
 0x2f4   : > { %v1642_v22 = vsub.f32 1.5, %v1641_v58  ;;  %v2616_v9 = vperm.slane %v1637_v48, 6  ;;  %vm1654_vm5 = vweird.f32 %v6160_v55 }
 0x2f8   : > { %v5349_v42 = vpop.eup %5348 }
 0x2f9   : > { %v6132_v45 = vld [vmem:[#allocation1] sm:$0xff]  ;;  %vm1655_vm6 = vweird.f32 %v5349_v42 }
 0x2fa   : > { %3395 = vst [vmem:[#allocation1] ss:$9 sm:$0xff] %v2586_v18  ;;  %4053 = vperm.xlu1 %5268, %v6132_v45   ;;  %v2617_v18 = vperm.slane %v1637_v48, 7  ;;  %v1649_v45 = vmul.f32 %v5349_v42, %v6160_v55  ;;  %vm1656_vm7 = vmor %vm1654_vm5, %vm1655_vm6 }
 0x2fb   : > { %3396 = vst [vmem:[#allocation1 + $0x1] ss:$9 sm:$0xff] %v2587_v36  ;;  %v1643_v36 = vmul.f32 %v5347_v2, %v1642_v22 }
 0x2fc   : > { %3397 = vst [vmem:[#allocation1 + $0x2] ss:$9 sm:$0xff] %v2588_v43  ;;  %v1045_v43 = vpop.xlane.xlu1 %1044  ;;  %v1650_v7 = vmul.f32 %v5349_v42, %v1649_v45 }
 0x2fd   : > { %3398 = vst [vmem:[#allocation1 + $0x3] ss:$9 sm:$0xff] %v2589_v21  ;;  %v1202_v21 = vmax.f32 %v1045_v43, 1e-24  ;;  %v1647_v32 = vsel %vm1646_vm4, %v5347_v2, %v1643_v36 }
 0x2fe   : > { %3399 = vst [vmem:[#allocation1 + $0x4] ss:$9 sm:$0xff] %v2590_v8  ;;  %v2618_v8 = vperm.slane %v1647_v32, 0  ;;  %v2620_v3 = vperm.slane %v1647_v32, 2  ;;  %v2621_v20 = vperm.slane %v1647_v32, 3  ;;  %v2622_v62 = vperm.slane %v1647_v32, 4 }
 0x2ff   : > { %3400 = vst [vmem:[#allocation1 + $0x5] ss:$9 sm:$0xff] %v2591_v5  ;;  %5350 = vrsqrt.f32 %v1202_v21  ;;  %v1651_v5 = vmul.f32 0.5, %v1650_v7  ;;  %v2623_v38 = vperm.slane %v1647_v32, 5  ;;  %v2625_v40 = vperm.slane %v1647_v32, 7 }
 0x300   : > { %3401 = vst [vmem:[#allocation1 + $0x6] ss:$9 sm:$0xff] %v2592_v16  ;;  %v2619_v16 = vperm.slane %v1647_v32, 1  ;;  %vm1664_vm8 = vweird.f32 %v1202_v21 }
 0x301   : > { %3402 = vst [vmem:[#allocation1 + $0x7] ss:$9 sm:$0xff] %v2593_v33  ;;  %v1652_v19 = vsub.f32 1.5, %v1651_v5 }
 0x305   : > { %v5351_v28 = vpop.eup %5350 }
 0x306   : > { %vm1665_vm9 = vweird.f32 %v5351_v28 }
 0x307   : > { %vm1666_vm10 = vmor %vm1664_vm8, %vm1665_vm9 }
 0x308   : > { %v3403_v49 = vld [vmem:[#allocation1] sm:$0xff] }
 0x309   : > { %3404 = vst [vmem:[#allocation1] ss:$9 sm:$0xff] %v2594_v29  ;;  %4056 = vperm.xlu0 %5267, %v3403_v49   ;;  %v2624_v29 = vperm.slane %v1647_v32, 6  ;;  %v1047_v49 = vpop.xlane.xlu2 %1046 }
 0x30a   : > { %3405 = vst [vmem:[#allocation1 + $0x1] ss:$9 sm:$0xff] %v2595_v15  ;;  %v1659_v15 = vmul.f32 %v5351_v28, %v1202_v21 }
 0x30b   : > { %3406 = vst [vmem:[#allocation1 + $0x2] ss:$9 sm:$0xff] %v2596_v4  ;;  %v1653_v4 = vmul.f32 %v5349_v42, %v1652_v19 }
 0x30c   : > { %3407 = vst [vmem:[#allocation1 + $0x3] ss:$9 sm:$0xff] %v2597_v31  ;;  %v6168_v31 = vmax.f32 %v1047_v49, 1e-24  ;;  %v1660_v26 = vmul.f32 %v5351_v28, %v1659_v15 }
 0x30d   : > { %3408 = vst [vmem:[#allocation1 + $0x4] ss:$9 sm:$0xff] %v2598_v37  ;;  %v1657_v37 = vsel %vm1656_vm7, %v5349_v42, %v1653_v4  ;;  %v1051_v42 = vpop.xlane.xlu1 %1050 }
 0x30e   : > { %3409 = vst [vmem:[#allocation1 + $0x5] ss:$9 sm:$0xff] %v2599_v61  ;;  %5352 = vrsqrt.f32 %v6168_v31  ;;  %v2626_v35 = vperm.slane %v1657_v37, 0  ;;  %v1661_v61 = vmul.f32 0.5, %v1660_v26  ;;  %v2628_v44 = vperm.slane %v1657_v37, 2 }
 0x30f   : > { %3410 = vst [vmem:[#allocation1 + $0x6] ss:$9 sm:$0xff] %v2600_v25  ;;  %v2629_v14 = vperm.slane %v1657_v37, 3  ;;  %v2630_v30 = vperm.slane %v1657_v37, 4  ;;  %v2631_v10 = vperm.slane %v1657_v37, 5  ;;  %vm1674_vm11 = vweird.f32 %v6168_v31 }
 0x310   : > { %3411 = vst [vmem:[#allocation1 + $0x7] ss:$9 sm:$0xff] %v2601_v53  ;;  %v2627_v53 = vperm.slane %v1657_v37, 1  ;;  %v1662_v27 = vsub.f32 1.5, %v1661_v61  ;;  %v6179_v22 = vmax.f32 %v1051_v42, 1e-24 }
 0x312   : > { %vm1694_vm1 = vweird.f32 %v6179_v22 }
 0x314   : > { %v5353_v24 = vpop.eup %5352 }
 0x315   : > { %v1669_v57 = vmul.f32 %v5353_v24, %v6168_v31  ;;  %vm1675_vm12 = vweird.f32 %v5353_v24 }
 0x316   : > { %vm1676_vm13 = vmor %vm1674_vm11, %vm1675_vm12 }
 0x317   : > { %v3412_v39 = vld [vmem:[#allocation1] sm:$0xff]  ;;  %v1670_v2 = vmul.f32 %v5353_v24, %v1669_v57 }
 0x318   : > { %3413 = vst [vmem:[#allocation1] ss:$9 sm:$0xff] %v2602_v50  ;;  %4059 = vperm.xlu2 %5269, %v3412_v39   ;;  %v2632_v50 = vperm.slane %v1657_v37, 6  ;;  %v2633_v39 = vperm.slane %v1657_v37, 7 }
 0x319   : > { %3414 = vst [vmem:[#allocation1 + $0x1] ss:$9 sm:$0xff] %v2603_v59  ;;  %v1663_v59 = vmul.f32 %v5351_v28, %v1662_v27 }
 0x31a   : > { %3415 = vst [vmem:[#allocation1 + $0x2] ss:$9 sm:$0xff] %v2604_v56  ;;  %v1049_v56 = vpop.xlane.xlu0 %1048 }
 0x31b   : > { %3416 = vst [vmem:[#allocation1 + $0x3] ss:$9 sm:$0xff] %v2605_v1  ;;  %v6172_v1 = vmax.f32 %v1049_v56, 1e-24  ;;  %v1667_v41 = vsel %vm1666_vm10, %v5351_v28, %v1663_v59 }
 0x31c   : > { %3417 = vst [vmem:[#allocation1 + $0x4] ss:$9 sm:$0xff] %v2606_v54  ;;  %v1053_v54 = vpop.xlane.xlu2 %1052  ;;  %v2636_v63 = vperm.slane %v1667_v41, 2  ;;  %v2637_v0 = vperm.slane %v1667_v41, 3  ;;  %v2638_v48 = vperm.slane %v1667_v41, 4  ;;  %v2639_v58 = vperm.slane %v1667_v41, 5 }
 0x31d   : > { %3418 = vst [vmem:[#allocation1 + $0x5] ss:$9 sm:$0xff] %v2607_v47  ;;  %5354 = vrsqrt.f32 %v6172_v1  ;;  %v1671_v47 = vmul.f32 0.5, %v1670_v2  ;;  %vm1684_vm14 = vweird.f32 %v6172_v1  ;;  %v6186_v19 = vmax.f32 %v1053_v54, 1e-24 }
 0x31e   : > { %3419 = vst [vmem:[#allocation1 + $0x6] ss:$9 sm:$0xff] %v2608_v60  ;;  %v2634_v60 = vperm.slane %v1667_v41, 0  ;;  %5356 = vrsqrt.f32 %v6179_v22 }
 0x31f   : > { %3420 = vst [vmem:[#allocation1 + $0x7] ss:$9 sm:$0xff] %v2609_v34  ;;  %v2635_v34 = vperm.slane %v1667_v41, 1  ;;  %v1672_v12 = vsub.f32 1.5, %v1671_v47  ;;  %5358 = vrsqrt.f32 %v6186_v19  ;;  %vm1704_vm4 = vweird.f32 %v6186_v19 }
 0x323   : > { %v5355_v55 = vpop.eup %5354 }
 0x324   : > { %v5357_v32 = vpop.eup %5356  ;;  %vm1685_vm15 = vweird.f32 %v5355_v55 }
 0x325   : > { %vm1686_vm0 = vmor %vm1684_vm14, %vm1685_vm15  ;;  %vm1695_vm2 = vweird.f32 %v5357_v32 }
 0x326   : > { %v3421_v6 = vld [vmem:[#allocation1] sm:$0xff]  ;;  %vm1696_vm3 = vmor %vm1694_vm1, %vm1695_vm2 }
 0x327   : > { %3422 = vst [vmem:[#allocation1] ss:$9 sm:$0xff] %v2610_v46  ;;  %4062 = vperm.xlu1 %5268, %v3421_v6   ;;  %v6176_v46 = vpop.xlane.xlu2 %1058  ;;  %v2640_v6 = vperm.slane %v1667_v41, 6 }
 0x328   : > { %3423 = vst [vmem:[#allocation1 + $0x1] ss:$9 sm:$0xff] %v2611_v13  ;;  %v2641_v13 = vperm.slane %v1667_v41, 7 }
 0x329   : > { %3424 = vst [vmem:[#allocation1 + $0x2] ss:$9 sm:$0xff] %v2612_v52  ;;  %v1679_v52 = vmul.f32 %v5355_v55, %v6172_v1 }
 0x32a   : > { %3425 = vst [vmem:[#allocation1 + $0x3] ss:$9 sm:$0xff] %v2613_v11  ;;  %v1673_v11 = vmul.f32 %v5353_v24, %v1672_v12 }
 0x32b   : > { %3426 = vst [vmem:[#allocation1 + $0x4] ss:$9 sm:$0xff] %v2614_v17  ;;  %v1680_v17 = vmul.f32 %v5355_v55, %v1679_v52 }
 0x32c   : > { %3427 = vst [vmem:[#allocation1 + $0x5] ss:$9 sm:$0xff] %v2615_v23  ;;  %v1677_v23 = vsel %vm1676_vm13, %v5353_v24, %v1673_v11 }
 0x32d   : > { %3428 = vst [vmem:[#allocation1 + $0x6] ss:$9 sm:$0xff] %v2616_v9  ;;  %v2642_v9 = vperm.slane %v1677_v23, 0  ;;  %v2643_v45 = vperm.slane %v1677_v23, 1  ;;  %v2644_v21 = vperm.slane %v1677_v23, 2  ;;  %v2645_v7 = vperm.slane %v1677_v23, 3 }
 0x32e   : > { %3429 = vst [vmem:[#allocation1 + $0x7] ss:$9 sm:$0xff] %v2617_v18  ;;  %v1681_v18 = vmul.f32 0.5, %v1680_v17 }
 0x32f   : > { %v6182_v43 = vpop.xlane.xlu2 %1064 }
 0x330   : > { %v1682_v5 = vsub.f32 1.5, %v1681_v18 }
 0x332   : > { %v1683_v28 = vmul.f32 %v5355_v55, %v1682_v5 }
 0x334   : > { %v1687_v15 = vsel %vm1686_vm0, %v5355_v55, %v1683_v28 }
 0x335   : > { %v3430_v33 = vld [vmem:[#allocation1] sm:$0xff]  ;;  %v2650_v49 = vperm.slane %v1687_v15, 0  ;;  %v2651_v26 = vperm.slane %v1687_v15, 1  ;;  %v2652_v37 = vperm.slane %v1687_v15, 2  ;;  %v2656_v24 = vperm.slane %v1687_v15, 6 }
 0x336   : > { %3431 = vst [vmem:[#allocation1] ss:$9 sm:$0xff] %v2618_v8  ;;  %4065 = vperm.xlu0 %5267, %v3430_v33   ;;  %v2646_v8 = vperm.slane %v1677_v23, 4  ;;  %v2648_v33 = vperm.slane %v1677_v23, 6 }
 0x337   : > { %3432 = vst [vmem:[#allocation1 + $0x1] ss:$9 sm:$0xff] %v2619_v16  ;;  %v2647_v16 = vperm.slane %v1677_v23, 5 }
 0x338   : > { %3433 = vst [vmem:[#allocation1 + $0x2] ss:$9 sm:$0xff] %v2620_v3  ;;  %v2649_v3 = vperm.slane %v1677_v23, 7 }
 0x339   : > { %3434 = vst [vmem:[#allocation1 + $0x3] ss:$9 sm:$0xff] %v2621_v20  ;;  %v1689_v20 = vmul.f32 %v5357_v32, %v6179_v22 }
 0x33a   : > { %3435 = vst [vmem:[#allocation1 + $0x4] ss:$9 sm:$0xff] %v2622_v62  ;;  %v1055_v62 = vpop.xlane.xlu0 %1054 }
 0x33b   : > { %3436 = vst [vmem:[#allocation1 + $0x5] ss:$9 sm:$0xff] %v2623_v38  ;;  %v1690_v38 = vmul.f32 %v5357_v32, %v1689_v20 }
 0x33c   : > { %3437 = vst [vmem:[#allocation1 + $0x6] ss:$9 sm:$0xff] %v2624_v29  ;;  %v6188_v29 = vpop.xlane.xlu2 %1070 }
 0x33d   : > { %3438 = vst [vmem:[#allocation1 + $0x7] ss:$9 sm:$0xff] %v2625_v40  ;;  %v6190_v40 = vpop.xlane.xlu1 %1056  ;;  %v1691_v4 = vmul.f32 0.5, %v1690_v38 }
 0x33e   : > { %v6215_v42 = vmax.f32 %v6190_v40, 1e-24 }
 0x340   : > { %vm1724_vm10 = vweird.f32 %v6215_v42 }
 0x342   : > { %v6193_v61 = vpop.xlane.xlu0 %1060 }
 0x344   : > { %v3439_v25 = vld [vmem:[#allocation1] sm:$0xff] }
 0x345   : > { %3440 = vst [vmem:[#allocation1] ss:$9 sm:$0xff] %v2626_v35  ;;  %4068 = vperm.xlu2 %5269, %v3439_v25   ;;  %v2653_v35 = vperm.slane %v1687_v15, 3  ;;  %v5359_v25 = vpop.eup %5358  ;;  %v6198_v27 = vpop.xlane.xlu1 %1062 }
 0x346   : > { %3441 = vst [vmem:[#allocation1 + $0x1] ss:$9 sm:$0xff] %v2627_v53  ;;  %v2654_v53 = vperm.slane %v1687_v15, 4  ;;  %vm1705_vm5 = vweird.f32 %v5359_v25 }
 0x347   : > { %3442 = vst [vmem:[#allocation1 + $0x2] ss:$9 sm:$0xff] %v2628_v44  ;;  %v1692_v44 = vsub.f32 1.5, %v1691_v4  ;;  %vm1706_vm6 = vmor %vm1704_vm4, %vm1705_vm5 }
 0x348   : > { %3443 = vst [vmem:[#allocation1 + $0x3] ss:$9 sm:$0xff] %v2629_v14  ;;  %v2655_v14 = vperm.slane %v1687_v15, 5 }
 0x349   : > { %3444 = vst [vmem:[#allocation1 + $0x4] ss:$9 sm:$0xff] %v2630_v30  ;;  %v6196_v30 = vpop.xlane.xlu2 %1076  ;;  %v1693_v57 = vmul.f32 %v5357_v32, %v1692_v44 }
 0x34a   : > { %3445 = vst [vmem:[#allocation1 + $0x5] ss:$9 sm:$0xff] %v2631_v10  ;;  %v1699_v10 = vmul.f32 %v5359_v25, %v6186_v19  ;;  %v6204_v1 = vpop.xlane.xlu0 %1066 }
 0x34b   : > { %3446 = vst [vmem:[#allocation1 + $0x6] ss:$9 sm:$0xff] %v2632_v50  ;;  %v2657_v50 = vperm.slane %v1687_v15, 7  ;;  %v1697_v56 = vsel %vm1696_vm3, %v5357_v32, %v1693_v57  ;;  %v6231_v15 = vmax.f32 %v6176_v46, 1e-24 }
 0x34c   : > { %3447 = vst [vmem:[#allocation1 + $0x7] ss:$9 sm:$0xff] %v2633_v39  ;;  %v6201_v39 = vmax.f32 %v1055_v62, 1e-24  ;;  %v1700_v59 = vmul.f32 %v5359_v25, %v1699_v10  ;;  %v2658_v54 = vperm.slane %v1697_v56, 0  ;;  %v2659_v47 = vperm.slane %v1697_v56, 1 }
 0x34d   : > { %v2662_v12 = vperm.slane %v1697_v56, 4  ;;  %vm1734_vm13 = vweird.f32 %v6231_v15 }
 0x34e   : > { %5360 = vrsqrt.f32 %v6201_v39  ;;  %v1701_v2 = vmul.f32 0.5, %v1700_v59  ;;  %vm1714_vm7 = vweird.f32 %v6201_v39 }
 0x34f   : > { %5362 = vrsqrt.f32 %v6215_v42 }
 0x350   : > { %v1702_v55 = vsub.f32 1.5, %v1701_v2  ;;  %5364 = vrsqrt.f32 %v6231_v15 }
 0x352   : > { %v1703_v52 = vmul.f32 %v5359_v25, %v1702_v55  ;;  %v6212_v11 = vpop.xlane.xlu0 %1072 }
 0x353   : > { %v3448_v51 = vld [vmem:[#allocation1] sm:$0xff] }
 0x354   : > { %3449 = vst [vmem:[#allocation1] ss:$9 sm:$0xff] %v2634_v60  ;;  %4071 = vperm.xlu1 %5268, %v3448_v51   ;;  %v6206_v60 = vpop.xlane.xlu2 %1082  ;;  %v6208_v51 = vpop.xlane.xlu1 %1068 }
 0x355   : > { %3450 = vst [vmem:[#allocation1 + $0x1] ss:$9 sm:$0xff] %v2635_v34  ;;  %v2660_v34 = vperm.slane %v1697_v56, 2 }
 0x356   : > { %3451 = vst [vmem:[#allocation1 + $0x2] ss:$9 sm:$0xff] %v2636_v63  ;;  %v2661_v63 = vperm.slane %v1697_v56, 3 }
 0x357   : > { %3452 = vst [vmem:[#allocation1 + $0x3] ss:$9 sm:$0xff] %v2637_v0  ;;  %v5361_v0 = vpop.eup %5360 }
 0x358   : > { %3453 = vst [vmem:[#allocation1 + $0x4] ss:$9 sm:$0xff] %v2638_v48  ;;  %v2663_v48 = vperm.slane %v1697_v56, 5  ;;  %v5363_v5 = vpop.eup %5362  ;;  %vm1715_vm8 = vweird.f32 %v5361_v0 }
 0x359   : > { %3454 = vst [vmem:[#allocation1 + $0x5] ss:$9 sm:$0xff] %v2639_v58  ;;  %v2664_v58 = vperm.slane %v1697_v56, 6  ;;  %v1719_v38 = vmul.f32 %v5363_v5, %v6215_v42  ;;  %vm1716_vm9 = vmor %vm1714_vm7, %vm1715_vm8  ;;  %vm1725_vm11 = vweird.f32 %v5363_v5 }
 0x35a   : > { %3455 = vst [vmem:[#allocation1 + $0x6] ss:$9 sm:$0xff] %v2640_v6  ;;  %v2665_v6 = vperm.slane %v1697_v56, 7  ;;  %vm1726_vm12 = vmor %vm1724_vm10, %vm1725_vm11 }
 0x35b   : > { %3456 = vst [vmem:[#allocation1 + $0x7] ss:$9 sm:$0xff] %v2641_v13  ;;  %v1709_v13 = vmul.f32 %v5361_v0, %v6201_v39 }
 0x35c   : > { %v6217_v17 = vpop.xlane.xlu2 %1088  ;;  %v6219_v23 = vpop.xlane.xlu1 %1074 }
 0x35d   : > { %v1710_v22 = vmul.f32 %v5361_v0, %v1709_v13 }
 0x362   : > { %v3457_v36 = vld [vmem:[#allocation1] sm:$0xff] }
 0x363   : > { %3458 = vst [vmem:[#allocation1] ss:$9 sm:$0xff] %v2642_v9  ;;  %4074 = vperm.xlu0 %5267, %v3457_v36   ;;  %v1707_v9 = vsel %vm1706_vm6, %v5359_v25, %v1703_v52 }
 0x364   : > { %3459 = vst [vmem:[#allocation1 + $0x1] ss:$9 sm:$0xff] %v2643_v45  ;;  %v2666_v18 = vperm.slane %v1707_v9, 0  ;;  %v1711_v45 = vmul.f32 0.5, %v1710_v22  ;;  %v2667_v36 = vperm.slane %v1707_v9, 1  ;;  %v2669_v32 = vperm.slane %v1707_v9, 3  ;;  %v6225_v28 = vpop.xlane.xlu2 %1094  ;;  %v6227_v62 = vpop.xlane.xlu1 %1080 }
 0x365   : > { %3460 = vst [vmem:[#allocation1 + $0x2] ss:$9 sm:$0xff] %v2644_v21  ;;  %v2672_v20 = vperm.slane %v1707_v9, 6  ;;  %v2673_v19 = vperm.slane %v1707_v9, 7 }
 0x366   : > { %3461 = vst [vmem:[#allocation1 + $0x3] ss:$9 sm:$0xff] %v2645_v7  ;;  %v2668_v7 = vperm.slane %v1707_v9, 2 }
 0x367   : > { %3462 = vst [vmem:[#allocation1 + $0x4] ss:$9 sm:$0xff] %v2646_v8  ;;  %v6222_v8 = vpop.xlane.xlu0 %1078 }
 0x368   : > { %3463 = vst [vmem:[#allocation1 + $0x5] ss:$9 sm:$0xff] %v2647_v16  ;;  %v2670_v16 = vperm.slane %v1707_v9, 4 }
 0x369   : > { %3464 = vst [vmem:[#allocation1 + $0x6] ss:$9 sm:$0xff] %v2648_v33  ;;  %v1712_v33 = vsub.f32 1.5, %v1711_v45 }
 0x36a   : > { %3465 = vst [vmem:[#allocation1 + $0x7] ss:$9 sm:$0xff] %v2649_v3  ;;  %v2671_v3 = vperm.slane %v1707_v9, 5 }
 0x36b   : > { %v1713_v40 = vmul.f32 %v5361_v0, %v1712_v33 }
 0x36c   : > { %v6238_v44 = vpop.xlane.xlu1 %1086 }
 0x36d   : > { %v1717_v4 = vsel %vm1716_vm9, %v5361_v0, %v1713_v40 }
 0x36e   : > { %v2675_v25 = vperm.slane %v1717_v4, 1  ;;  %v2677_v46 = vperm.slane %v1717_v4, 3  ;;  %v2678_v10 = vperm.slane %v1717_v4, 4  ;;  %v2679_v57 = vperm.slane %v1717_v4, 5 }
 0x36f   : > { %v2680_v39 = vperm.slane %v1717_v4, 6  ;;  %v2681_v56 = vperm.slane %v1717_v4, 7 }
 0x371   : > { %v3466_v31 = vld [vmem:[#allocation1] sm:$0xff] }
 0x372   : > { %3467 = vst [vmem:[#allocation1] ss:$9 sm:$0xff] %v2650_v49  ;;  %4077 = vperm.xlu2 %5269, %v3466_v31   ;;  %v1720_v49 = vmul.f32 %v5363_v5, %v1719_v38  ;;  %v6234_v31 = vpop.xlane.xlu0 %1084 }
 0x373   : > { %3468 = vst [vmem:[#allocation1 + $0x1] ss:$9 sm:$0xff] %v2651_v26  ;;  %v2674_v26 = vperm.slane %v1717_v4, 0 }
 0x374   : > { %3469 = vst [vmem:[#allocation1 + $0x2] ss:$9 sm:$0xff] %v2652_v37  ;;  %v1721_v37 = vmul.f32 0.5, %v1720_v49 }
 0x375   : > { %3470 = vst [vmem:[#allocation1 + $0x3] ss:$9 sm:$0xff] %v2653_v35 }
 0x376   : > { %3471 = vst [vmem:[#allocation1 + $0x4] ss:$9 sm:$0xff] %v2654_v53  ;;  %v6236_v53 = vpop.xlane.xlu2 %1100 }
 0x377   : > { %3472 = vst [vmem:[#allocation1 + $0x5] ss:$9 sm:$0xff] %v2655_v14  ;;  %v2676_v14 = vperm.slane %v1717_v4, 2 }
 0x378   : > { %3473 = vst [vmem:[#allocation1 + $0x6] ss:$9 sm:$0xff] %v2656_v24  ;;  %v5365_v24 = vpop.eup %5364 }
 0x379   : > { %3474 = vst [vmem:[#allocation1 + $0x7] ss:$9 sm:$0xff] %v2657_v50  ;;  %v1722_v50 = vsub.f32 1.5, %v1721_v37  ;;  %v1729_v59 = vmul.f32 %v5365_v24, %v6231_v15  ;;  %vm1735_vm14 = vweird.f32 %v5365_v24 }
 0x37a   : > { %vm1736_vm15 = vmor %vm1734_vm13, %vm1735_vm14 }
 0x37b   : > { %v1723_v2 = vmul.f32 %v5363_v5, %v1722_v50 }
 0x37d   : > { %v1727_v0 = vsel %vm1726_vm12, %v5363_v5, %v1723_v2  ;;  %v6261_v5 = vmax.f32 %v6198_v27, 1e-24 }
 0x37e   : > { %v2685_v13 = vperm.slane %v1727_v0, 3  ;;  %v2686_v22 = vperm.slane %v1727_v0, 4  ;;  %v2687_v9 = vperm.slane %v1727_v0, 5 }
 0x37f   : > { %vm1754_vm3 = vweird.f32 %v6261_v5 }
 0x380   : > { %v3475_v41 = vld [vmem:[#allocation1] sm:$0xff] }
 0x381   : > { %3476 = vst [vmem:[#allocation1] ss:$9 sm:$0xff] %v2658_v54  ;;  %4080 = vperm.xlu1 %5268, %v3475_v41   ;;  %v6242_v54 = vpop.xlane.xlu0 %1090  ;;  %v6245_v41 = vmax.f32 %v6193_v61, 1e-24 }
 0x382   : > { %3477 = vst [vmem:[#allocation1 + $0x1] ss:$9 sm:$0xff] %v2659_v47  ;;  %v1730_v47 = vmul.f32 %v5365_v24, %v1729_v59 }
 0x383   : > { %3478 = vst [vmem:[#allocation1 + $0x2] ss:$9 sm:$0xff] %v2660_v34  ;;  %v6247_v34 = vpop.xlane.xlu2 %1106  ;;  %5366 = vrsqrt.f32 %v6245_v41  ;;  %vm1744_vm0 = vweird.f32 %v6245_v41 }
 0x384   : > { %3479 = vst [vmem:[#allocation1 + $0x3] ss:$9 sm:$0xff] %v2661_v63  ;;  %v6249_v63 = vpop.xlane.xlu1 %1092  ;;  %v1731_v55 = vmul.f32 0.5, %v1730_v47  ;;  %5368 = vrsqrt.f32 %v6261_v5 }
 0x385   : > { %3480 = vst [vmem:[#allocation1 + $0x4] ss:$9 sm:$0xff] %v2662_v12  ;;  %v2682_v12 = vperm.slane %v1727_v0, 0 }
 0x386   : > { %3481 = vst [vmem:[#allocation1 + $0x5] ss:$9 sm:$0xff] %v2663_v48  ;;  %v1732_v42 = vsub.f32 1.5, %v1731_v55 }
 0x387   : > { %3482 = vst [vmem:[#allocation1 + $0x6] ss:$9 sm:$0xff] %v2664_v58  ;;  %v2683_v58 = vperm.slane %v1727_v0, 1 }
 0x388   : > { %3483 = vst [vmem:[#allocation1 + $0x7] ss:$9 sm:$0xff] %v2665_v6  ;;  %v2684_v6 = vperm.slane %v1727_v0, 2 }
 0x389   : > { %v6252_v52 = vpop.xlane.xlu0 %1096  ;;  %v5367_v61 = vpop.eup %5366 }
 0x38a   : > { %v5369_v27 = vpop.eup %5368  ;;  %vm1745_vm1 = vweird.f32 %v5367_v61 }
 0x38b   : > { %v6255_v45 = vpop.xlane.xlu2 %1112  ;;  %vm1746_vm2 = vmor %vm1744_vm0, %vm1745_vm1  ;;  %vm1755_vm4 = vweird.f32 %v5369_v27 }
 0x38c   : > { %vm1756_vm5 = vmor %vm1754_vm3, %vm1755_vm4  ;;  %vm4250_vm3 = vcmask 195712  }
 0x38f   : > { %v3484_v21 = vld [vmem:[#allocation1] sm:$0xff] }
 0x390   : > { %3485 = vst [vmem:[#allocation1] ss:$9 sm:$0xff] %v2666_v18  ;;  %4083 = vperm.xlu0 %5267, %v3484_v21   ;;  %v2688_v18 = vperm.slane %v1727_v0, 6  ;;  %v2689_v21 = vperm.slane %v1727_v0, 7 }
 0x391   : > { %3486 = vst [vmem:[#allocation1 + $0x1] ss:$9 sm:$0xff] %v2667_v36  ;;  %v6257_v36 = vpop.xlane.xlu1 %1098 }
 0x392   : > { %3487 = vst [vmem:[#allocation1 + $0x2] ss:$9 sm:$0xff] %v2668_v7  ;;  %v1739_v7 = vmul.f32 %v5367_v61, %v6245_v41 }
 0x393   : > { %3488 = vst [vmem:[#allocation1 + $0x3] ss:$9 sm:$0xff] %v2669_v32  ;;  %v1733_v32 = vmul.f32 %v5365_v24, %v1732_v42  ;;  %v6266_v15 = vpop.xlane.xlu2 %1118 }
 0x394   : > { %3489 = vst [vmem:[#allocation1 + $0x4] ss:$9 sm:$0xff] %v2670_v16  ;;  %v1740_v16 = vmul.f32 %v5367_v61, %v1739_v7 }
 0x395   : > { %3490 = vst [vmem:[#allocation1 + $0x5] ss:$9 sm:$0xff] %v2671_v3  ;;  %v1737_v33 = vsel %vm1736_vm15, %v5365_v24, %v1733_v32  ;;  %v6264_v3 = vpop.xlane.xlu0 %1102  ;;  %v1749_v24 = vmul.f32 %v5369_v27, %v6261_v5  ;;  %v6291_v32 = vmax.f32 %v6204_v1, 1e-24 }
 0x396   : > { %3491 = vst [vmem:[#allocation1 + $0x6] ss:$9 sm:$0xff] %v2672_v20  ;;  %v2690_v20 = vperm.slane %v1737_v33, 0  ;;  %v2691_v38 = vperm.slane %v1737_v33, 1  ;;  %v2692_v4 = vperm.slane %v1737_v33, 2  ;;  %v2694_v37 = vperm.slane %v1737_v33, 4 }
 0x397   : > { %3492 = vst [vmem:[#allocation1 + $0x7] ss:$9 sm:$0xff] %v2673_v19  ;;  %v1741_v19 = vmul.f32 0.5, %v1740_v16  ;;  %vm1774_vm9 = vweird.f32 %v6291_v32 }
 0x399   : > { %v6268_v49 = vpop.xlane.xlu1 %1104 }
 0x39b   : > { %v6277_v59 = vpop.xlane.xlu2 %1124 }
 0x39d   : > { %v6272_v50 = vpop.xlane.xlu0 %1108 }
 0x39e   : > { %v3493_v35 = vld [vmem:[#allocation1] sm:$0xff] }
 0x39f   : > { %3494 = vst [vmem:[#allocation1] ss:$9 sm:$0xff] %v2674_v26  ;;  %4086 = vperm.xlu2 %5269, %v3493_v35   ;;  %v2693_v26 = vperm.slane %v1737_v33, 3  ;;  %v1742_v35 = vsub.f32 1.5, %v1741_v19 }
 0x3a0   : > { %3495 = vst [vmem:[#allocation1 + $0x1] ss:$9 sm:$0xff] %v2675_v25  ;;  %v2695_v25 = vperm.slane %v1737_v33, 5 }
 0x3a1   : > { %3496 = vst [vmem:[#allocation1 + $0x2] ss:$9 sm:$0xff] %v2676_v14  ;;  %v2696_v14 = vperm.slane %v1737_v33, 6 }
 0x3a2   : > { %3497 = vst [vmem:[#allocation1 + $0x3] ss:$9 sm:$0xff] %v2677_v46  ;;  %v2697_v46 = vperm.slane %v1737_v33, 7 }
 0x3a3   : > { %3498 = vst [vmem:[#allocation1 + $0x4] ss:$9 sm:$0xff] %v2678_v10  ;;  %v1743_v10 = vmul.f32 %v5367_v61, %v1742_v35 }
 0x3a4   : > { %3499 = vst [vmem:[#allocation1 + $0x5] ss:$9 sm:$0xff] %v2679_v57  ;;  %v6275_v57 = vmax.f32 %v6182_v43, 1e-24 }
 0x3a5   : > { %3500 = vst [vmem:[#allocation1 + $0x6] ss:$9 sm:$0xff] %v2680_v39  ;;  %v1750_v39 = vmul.f32 %v5369_v27, %v1749_v24  ;;  %v1747_v2 = vsel %vm1746_vm2, %v5367_v61, %v1743_v10  ;;  %v6282_v43 = vpop.xlane.xlu0 %1114  ;;  %vm4246_vm2 = vcmask 130112  }
 0x3a6   : > { %3501 = vst [vmem:[#allocation1 + $0x7] ss:$9 sm:$0xff] %v2681_v56  ;;  %v6279_v56 = vpop.xlane.xlu1 %1110  ;;  %5370 = vrsqrt.f32 %v6275_v57  ;;  %v2698_v41 = vperm.slane %v1747_v2, 0  ;;  %v2699_v55 = vperm.slane %v1747_v2, 1  ;;  %v2703_v42 = vperm.slane %v1747_v2, 5 }
 0x3a7   : > { %v1751_v47 = vmul.f32 0.5, %v1750_v39  ;;  %v2704_v61 = vperm.slane %v1747_v2, 6  ;;  %5372 = vrsqrt.f32 %v6291_v32  ;;  %vm1764_vm6 = vweird.f32 %v6275_v57 }
 0x3ad   : > { %v3502_v48 = vld [vmem:[#allocation1] sm:$0xff]  ;;  %v6294_v5 = vpop.xlane.xlu0 %1120 }
 0x3ae   : > { %3503 = vst [vmem:[#allocation1] ss:$9 sm:$0xff] %v2682_v12  ;;  %4089 = vperm.xlu1 %5268, %v3502_v48   ;;  %v2700_v12 = vperm.slane %v1747_v2, 2  ;;  %v2701_v48 = vperm.slane %v1747_v2, 3 }
 0x3af   : > { %3504 = vst [vmem:[#allocation1 + $0x1] ss:$9 sm:$0xff] %v2683_v58  ;;  %v5371_v58 = vpop.eup %5370 }
 0x3b0   : > { %3505 = vst [vmem:[#allocation1 + $0x2] ss:$9 sm:$0xff] %v2684_v6  ;;  %v2702_v6 = vperm.slane %v1747_v2, 4  ;;  %v5373_v1 = vpop.eup %5372  ;;  %vm1765_vm7 = vweird.f32 %v5371_v58 }
 0x3b1   : > { %3506 = vst [vmem:[#allocation1 + $0x3] ss:$9 sm:$0xff] %v2685_v13  ;;  %v1752_v13 = vsub.f32 1.5, %v1751_v47  ;;  %v1769_v10 = vmul.f32 %v5373_v1, %v6291_v32  ;;  %vm1766_vm8 = vmor %vm1764_vm6, %vm1765_vm7  ;;  %vm1775_vm10 = vweird.f32 %v5373_v1  ;;  %vm4254_vm6 = vcmask 261312  }
 0x3b2   : > { %3507 = vst [vmem:[#allocation1 + $0x4] ss:$9 sm:$0xff] %v2686_v22  ;;  %v6285_v22 = vpop.xlane.xlu2 %1130  ;;  %vm1776_vm11 = vmor %vm1774_vm9, %vm1775_vm10  ;;  %vm4262_vm9 = vcmask 392512   ;;  %vm4266_vm10 = vcmask 458112  }
 0x3b3   : > { %3508 = vst [vmem:[#allocation1 + $0x5] ss:$9 sm:$0xff] %v2687_v9  ;;  %v6287_v9 = vpop.xlane.xlu1 %1116  ;;  %v1753_v7 = vmul.f32 %v5369_v27, %v1752_v13  ;;  %v1770_v47 = vmul.f32 %v5373_v1, %v1769_v10 }
 0x3b4   : > { %3509 = vst [vmem:[#allocation1 + $0x6] ss:$9 sm:$0xff] %v2688_v18  ;;  %v1759_v18 = vmul.f32 %v5371_v58, %v6275_v57 }
 0x3b5   : > { %3510 = vst [vmem:[#allocation1 + $0x7] ss:$9 sm:$0xff] %v2689_v21  ;;  %v2705_v21 = vperm.slane %v1747_v2, 7  ;;  %v1757_v33 = vsel %vm1756_vm5, %v5369_v27, %v1753_v7  ;;  %v6302_v2 = vpop.xlane.xlu0 %1126 }
 0x3b6   : > { %6966 = vst [vmem:[#allocation4_spill] sm:$0xff] %v6285_v22  ;;  %v1760_v16 = vmul.f32 %v5371_v58, %v1759_v18  ;;  %v2706_v19 = vperm.slane %v1757_v33, 0  ;;  %v2709_v35 = vperm.slane %v1757_v33, 3  ;;  %v2710_v27 = vperm.slane %v1757_v33, 4  ;;  %v5171_v22 = vld [vmem:[%s5718_s3 + $0x70] sm:$0xff] }
 0x3b7   : > { %v2713_v24 = vperm.slane %v1757_v33, 7 }
 0x3bc   : > { %v3511_v40 = vld [vmem:[#allocation1] sm:$0xff] }
 0x3bd   : > { %3512 = vst [vmem:[#allocation1] ss:$9 sm:$0xff] %v2690_v20  ;;  %4092 = vperm.xlu0 %5267, %v3511_v40   ;;  %v1761_v20 = vmul.f32 0.5, %v1760_v16  ;;  %v2707_v40 = vperm.slane %v1757_v33, 1  ;;  %v6312_v18 = vpop.xlane.xlu0 %1132 }
 0x3be   : > { %3513 = vst [vmem:[#allocation1 + $0x1] ss:$9 sm:$0xff] %v2691_v38 }
 0x3bf   : > { %3514 = vst [vmem:[#allocation1 + $0x2] ss:$9 sm:$0xff] %v2692_v4  ;;  %v6296_v4 = vpop.xlane.xlu2 %1136 }
 0x3c0   : > { %3515 = vst [vmem:[#allocation1 + $0x3] ss:$9 sm:$0xff] %v2693_v26  ;;  %v6298_v26 = vpop.xlane.xlu1 %1122 }
 0x3c1   : > { %3516 = vst [vmem:[#allocation1 + $0x4] ss:$9 sm:$0xff] %v2694_v37  ;;  %v2708_v37 = vperm.slane %v1757_v33, 2 }
 0x3c2   : > { %3517 = vst [vmem:[#allocation1 + $0x5] ss:$9 sm:$0xff] %v2695_v25  ;;  %v1762_v25 = vsub.f32 1.5, %v1761_v20 }
 0x3c3   : > { %3518 = vst [vmem:[#allocation1 + $0x6] ss:$9 sm:$0xff] %v2696_v14  ;;  %v2711_v14 = vperm.slane %v1757_v33, 5 }
 0x3c4   : > { %3519 = vst [vmem:[#allocation1 + $0x7] ss:$9 sm:$0xff] %v2697_v46  ;;  %v2712_v46 = vperm.slane %v1757_v33, 6  ;;  %v1763_v39 = vmul.f32 %v5371_v58, %v1762_v25 }
 0x3c5   : > { %6967 = vst [vmem:[#allocation5_spill] sm:$0xff] %v6296_v4  ;;  %v6326_v32 = vpop.xlane.xlu0 %1138 }
 0x3c6   : > { %6970 = vst [vmem:[#allocation8_spill] sm:$0xff] %v6312_v18 }
 0x3c7   : > { %6974 = vst [vmem:[#allocation12_spill] sm:$0xff] %v6326_v32  ;;  %v5158_v32 = vld [vmem:[%s5718_s3 + $0x8] sm:$0xff] }
 0x3c8   : > { %v6309_v57 = vpop.xlane.xlu1 %1128 }
 0x3c9   : > { %6969 = vst [vmem:[#allocation7_spill] sm:$0xff] %v6309_v57 }
 0x3cb   : > { %v3520_v0 = vld [vmem:[#allocation1] sm:$0xff] }
 0x3cc   : > { %3521 = vst [vmem:[#allocation1] ss:$9 sm:$0xff] %v2698_v41  ;;  %4095 = vperm.xlu2 %5269, %v3520_v0   ;;  %v6305_v41 = vmax.f32 %v6208_v51, 1e-24  ;;  %v6307_v0 = vpop.xlane.xlu2 %1142 }
 0x3cd   : > { %3522 = vst [vmem:[#allocation1 + $0x1] ss:$9 sm:$0xff] %v2699_v55  ;;  %v1767_v55 = vsel %vm1766_vm8, %v5371_v58, %v1763_v39  ;;  %vm4258_vm8 = vcmask 326912  }
 0x3ce   : > { %3523 = vst [vmem:[#allocation1 + $0x2] ss:$9 sm:$0xff] %v2700_v12  ;;  %5374 = vrsqrt.f32 %v6305_v41  ;;  %v2714_v12 = vperm.slane %v1767_v55, 0  ;;  %v2719_v58 = vperm.slane %v1767_v55, 5  ;;  %v2720_v33 = vperm.slane %v1767_v55, 6 }
 0x3cf   : > { %3524 = vst [vmem:[#allocation1 + $0x3] ss:$9 sm:$0xff] %v2701_v48  ;;  %v1771_v48 = vmul.f32 0.5, %v1770_v47  ;;  %vm1784_vm12 = vweird.f32 %v6305_v41 }
 0x3d0   : > { %3525 = vst [vmem:[#allocation1 + $0x4] ss:$9 sm:$0xff] %v2702_v6  ;;  %v2715_v6 = vperm.slane %v1767_v55, 1  ;;  %v6314_v16 = vpop.xlane.xlu1 %1134 }
 0x3d1   : > { %3526 = vst [vmem:[#allocation1 + $0x5] ss:$9 sm:$0xff] %v2703_v42  ;;  %v2716_v42 = vperm.slane %v1767_v55, 2  ;;  %v1772_v7 = vsub.f32 1.5, %v1771_v48 }
 0x3d2   : > { %3527 = vst [vmem:[#allocation1 + $0x6] ss:$9 sm:$0xff] %v2704_v61  ;;  %v2717_v61 = vperm.slane %v1767_v55, 3 }
 0x3d3   : > { %3528 = vst [vmem:[#allocation1 + $0x7] ss:$9 sm:$0xff] %v2705_v21  ;;  %v2718_v21 = vperm.slane %v1767_v55, 4 }
 0x3d4   : > { %6968 = vst [vmem:[#allocation6_spill] sm:$0xff] %v6307_v0  ;;  %v5375_v51 = vpop.eup %5374  ;;  %v6317_v20 = vpop.xlane.xlu2 %1148 }
 0x3d5   : > { %6971 = vst [vmem:[#allocation9_spill] sm:$0xff] %v6314_v16  ;;  %vm1785_vm13 = vweird.f32 %v5375_v51 }
 0x3d6   : > { %6972 = vst [vmem:[#allocation10_spill] sm:$0xff] %v6317_v20  ;;  %vm1786_vm14 = vmor %vm1784_vm12, %vm1785_vm13  ;;  %vm4274_vm12 = vcmask 589312  }
 0x3da   : > { %v3529_v38 = vld [vmem:[#allocation1] sm:$0xff] }
 0x3db   : > { %3530 = vst [vmem:[#allocation1] ss:$9 sm:$0xff] %v2706_v19  ;;  %4098 = vperm.xlu1 %5268, %v3529_v38   ;;  %v2721_v19 = vperm.slane %v1767_v55, 7  ;;  %v1779_v38 = vmul.f32 %v5375_v51, %v6305_v41 }
 0x3dc   : > { %3531 = vst [vmem:[#allocation1 + $0x1] ss:$9 sm:$0xff] %v2707_v40  ;;  %v1773_v40 = vmul.f32 %v5373_v1, %v1772_v7  ;;  %v6328_v39 = vpop.xlane.xlu2 %1154  ;;  %v6334_v7 = vpop.xlane.xlu0 %1144 }
 0x3dd   : > { %3532 = vst [vmem:[#allocation1 + $0x2] ss:$9 sm:$0xff] %v2708_v37  ;;  %v6321_v37 = vmax.f32 %v6188_v29, 1e-24 }
 0x3de   : > { %3533 = vst [vmem:[#allocation1 + $0x3] ss:$9 sm:$0xff] %v2709_v35  ;;  %v1780_v35 = vmul.f32 %v5375_v51, %v1779_v38  ;;  %v1777_v25 = vsel %vm1776_vm11, %v5373_v1, %v1773_v40  ;;  %vm4270_vm11 = vcmask 523712  }
 0x3df   : > { %3534 = vst [vmem:[#allocation1 + $0x4] ss:$9 sm:$0xff] %v2710_v27  ;;  %v6323_v27 = vpop.xlane.xlu1 %1140  ;;  %5376 = vrsqrt.f32 %v6321_v37  ;;  %v2723_v10 = vperm.slane %v1777_v25, 1  ;;  %v2724_v47 = vperm.slane %v1777_v25, 2  ;;  %v2725_v29 = vperm.slane %v1777_v25, 3 }
 0x3e0   : > { %3535 = vst [vmem:[#allocation1 + $0x5] ss:$9 sm:$0xff] %v2711_v14  ;;  %v2722_v14 = vperm.slane %v1777_v25, 0  ;;  %v2727_v48 = vperm.slane %v1777_v25, 5  ;;  %vm1794_vm15 = vweird.f32 %v6321_v37 }
 0x3e1   : > { %3536 = vst [vmem:[#allocation1 + $0x6] ss:$9 sm:$0xff] %v2712_v46  ;;  %v1781_v46 = vmul.f32 0.5, %v1780_v35 }
 0x3e2   : > { %3537 = vst [vmem:[#allocation1 + $0x7] ss:$9 sm:$0xff] %v2713_v24 }
 0x3e3   : > { %6973 = vst [vmem:[#allocation11_spill] sm:$0xff] %v6323_v27  ;;  %v1782_v1 = vsub.f32 1.5, %v1781_v46 }
 0x3e4   : > { %6975 = vst [vmem:[#allocation13_spill] sm:$0xff] %v6328_v39 }
 0x3e5   : > { %v5377_v55 = vpop.eup %5376  ;;  %6977 = vst [vmem:[#allocation15_spill] sm:$0xff] %v6334_v7  ;;  %v5162_v7 = vld [vmem:[%s5718_s3 + $0x28] sm:$0xff] }
 0x3e6   : > { %vm1795_vm0 = vweird.f32 %v5377_v55 }
 0x3e7   : > { %vm1796_vm1 = vmor %vm1794_vm15, %vm1795_vm0  ;;  %vm6964_vm15 = vcmask 654912   ;;  %vm6962_vm0 = vcmask 720512  }
 0x3e9   : > { %v3538_v13 = vld [vmem:[#allocation1] sm:$0xff] }
 0x3ea   : > { %3539 = vst [vmem:[#allocation1] ss:$9 sm:$0xff] %v2714_v12  ;;  %4101 = vperm.xlu0 %5267, %v3538_v13   ;;  %v2726_v12 = vperm.slane %v1777_v25, 4  ;;  %v2728_v13 = vperm.slane %v1777_v25, 6 }
 0x3eb   : > { %3540 = vst [vmem:[#allocation1 + $0x1] ss:$9 sm:$0xff] %v2715_v6  ;;  %v6330_v6 = vpop.xlane.xlu1 %1146 }
 0x3ec   : > { %3541 = vst [vmem:[#allocation1 + $0x2] ss:$9 sm:$0xff] %v2716_v42  ;;  %v1789_v42 = vmul.f32 %v5377_v55, %v6321_v37 }
 0x3ed   : > { %3542 = vst [vmem:[#allocation1 + $0x3] ss:$9 sm:$0xff] %v2717_v61  ;;  %v2729_v61 = vperm.slane %v1777_v25, 7 }
 0x3ee   : > { %3543 = vst [vmem:[#allocation1 + $0x4] ss:$9 sm:$0xff] %v2718_v21  ;;  %v1783_v21 = vmul.f32 %v5375_v51, %v1782_v1  ;;  %v4241_v1 = vlaneseq }
 0x3ef   : > { %3544 = vst [vmem:[#allocation1 + $0x5] ss:$9 sm:$0xff] %v2719_v58  ;;  %v6337_v58 = vmax.f32 %v6212_v11, 1e-24 }
 0x3f0   : > { %3545 = vst [vmem:[#allocation1 + $0x6] ss:$9 sm:$0xff] %v2720_v33  ;;  %v1790_v33 = vmul.f32 %v5377_v55, %v1789_v42  ;;  %v1787_v38 = vsel %vm1786_vm14, %v5375_v51, %v1783_v21  ;;  %v6354_v21 = vmax.f32 %v6219_v23, 1e-24  ;;  %v6356_v37 = vand.u32 127, %v4241_v1 }
 0x3f1   : > { %3546 = vst [vmem:[#allocation1 + $0x7] ss:$9 sm:$0xff] %v2721_v19  ;;  %v6339_v19 = vpop.permute.xlu2 %3960  ;;  %5378 = vrsqrt.f32 %v6337_v58  ;;  %v2730_v35 = vperm.slane %v1787_v38, 0  ;;  %v2732_v46 = vperm.slane %v1787_v38, 2  ;;  %v2735_v51 = vperm.slane %v1787_v38, 5 }
 0x3f2   : > { %6976 = vst [vmem:[#allocation14_spill] sm:$0xff] %v6330_v6  ;;  %v1791_v40 = vmul.f32 0.5, %v1790_v33  ;;  %5380 = vrsqrt.f32 %v6354_v21  ;;  %vm1804_vm4 = vweird.f32 %v6337_v58  ;;  %v6408_v20 = vadd.s32 4294967240, %v6356_v37 }
 0x3f3   : > { %v6342_v41 = vpop.xlane.xlu1 %1152  ;;  %v6418_v6 = vadd.s32 4294967224, %v6356_v37  ;;  %v6426_v27 = vadd.s32 4294967216, %v6356_v37  ;;  %vm1814_vm13 = vweird.f32 %v6354_v21 }
 0x3f4   : > { %6978 = vst [vmem:[#allocation16_spill] sm:$0xff] %v6342_v41  ;;  %v6377_v41 = vadd.s32 4294967272, %v6356_v37 }
 0x3f7   : > { %v6346_v11 = vpop.eup %5378 }
 0x3f8   : > { %v3547_v24 = vld [vmem:[#allocation1] sm:$0xff]  ;;  %v1799_v42 = vmul.f32 %v6346_v11, %v6337_v58  ;;  %vm1805_vm5 = vweird.f32 %v6346_v11 }
 0x3f9   : > { %3548 = vst [vmem:[#allocation1] ss:$9 sm:$0xff] %v2722_v14  ;;  %4104 = vperm.xlu2 %5269, %v3547_v24   ;;  %v2731_v14 = vperm.slane %v1787_v38, 1  ;;  %v2733_v24 = vperm.slane %v1787_v38, 3  ;;  %vm1806_vm7 = vmor %vm1804_vm4, %vm1805_vm5  ;;  %vm6963_vm4 = vcmask 786112   ;;  %vm6961_vm5 = vcmask 851712  }
 0x3fa   : > { %3549 = vst [vmem:[#allocation1 + $0x1] ss:$9 sm:$0xff] %v2723_v10  ;;  %v6344_v10 = vpop.xlane.xlu0 %1150 }
 0x3fb   : > { %3550 = vst [vmem:[#allocation1 + $0x2] ss:$9 sm:$0xff] %v2724_v47  ;;  %v1792_v47 = vsub.f32 1.5, %v1791_v40  ;;  %v3958_v33 = vpop.permute.xlu1 %3957  ;;  %v1800_v40 = vmul.f32 %v6346_v11, %v1799_v42 }
 0x3fc   : > { %3551 = vst [vmem:[#allocation1 + $0x3] ss:$9 sm:$0xff] %v2725_v29  ;;  %v2734_v29 = vperm.slane %v1787_v38, 4 }
 0x3fd   : > { %3552 = vst [vmem:[#allocation1 + $0x4] ss:$9 sm:$0xff] %v2726_v12  ;;  %v2736_v12 = vperm.slane %v1787_v38, 6 }
 0x3fe   : > { %3553 = vst [vmem:[#allocation1 + $0x5] ss:$9 sm:$0xff] %v2727_v48  ;;  %v6349_v48 = vpop.permute.xlu2 %3963 }
 0x3ff   : > { %3554 = vst [vmem:[#allocation1 + $0x6] ss:$9 sm:$0xff] %v2728_v13  ;;  %v2737_v13 = vperm.slane %v1787_v38, 7 }
 0x400   : > { %3555 = vst [vmem:[#allocation1 + $0x7] ss:$9 sm:$0xff] %v2729_v61  ;;  %v1793_v61 = vmul.f32 %v5377_v55, %v1792_v47 }
 0x401   : > { %6979 = vst [vmem:[#allocation17_spill] sm:$0xff] %v6344_v10 }
 0x402   : > { %v3955_v38 = vpop.permute.xlu0 %3954 }
 0x403   : > { %v4243_v42 = vperm.slane %v3955_v38, %v6356_v37 }
 0x406   : > { %v3970_v23 = vpop.permute.xlu2 %3969 }
 0x407   : > { %v3556_v25 = vld [vmem:[#allocation1] sm:$0xff] }
 0x408   : > { %3557 = vst [vmem:[#allocation1] ss:$9 sm:$0xff] %v2730_v35  ;;  %4107 = vperm.xlu1 %5268, %v3556_v25   ;;  %v1797_v35 = vsel %vm1796_vm1, %v5377_v55, %v1793_v61  ;;  %v6360_v25 = vadd.s32 4294967288, %v6356_v37  ;;  %v3967_v55 = vpop.permute.xlu1 %3966  ;;  %v6371_v61 = vpop.eup %5380 }
 0x409   : > { %3558 = vst [vmem:[#allocation1 + $0x1] ss:$9 sm:$0xff] %v2731_v14  ;;  %v2738_v14 = vperm.slane %v1797_v35, 0  ;;  %v2741_v1 = vperm.slane %v1797_v35, 3  ;;  %v2743_v39 = vperm.slane %v1797_v35, 5  ;;  %vm1815_vm14 = vweird.f32 %v6371_v61 }
 0x40a   : > { %3559 = vst [vmem:[#allocation1 + $0x2] ss:$9 sm:$0xff] %v2732_v46  ;;  %v1801_v46 = vmul.f32 0.5, %v1800_v40  ;;  %v2742_v40 = vperm.slane %v1797_v35, 4  ;;  %vm1816_vm1 = vmor %vm1814_vm13, %vm1815_vm14  ;;  %vm4298_vm13 = vcmask 982912  }
 0x40b   : > { %3560 = vst [vmem:[#allocation1 + $0x3] ss:$9 sm:$0xff] %v2733_v24  ;;  %v2739_v24 = vperm.slane %v1797_v35, 1 }
 0x40c   : > { %3561 = vst [vmem:[#allocation1 + $0x4] ss:$9 sm:$0xff] %v2734_v29  ;;  %v4245_v29 = vperm.slane %v3958_v33, %v6360_v25  ;;  %v1802_v33 = vsub.f32 1.5, %v1801_v46  ;;  %v2745_v46 = vperm.slane %v1797_v35, 7 }
 0x40d   : > { %3562 = vst [vmem:[#allocation1 + $0x5] ss:$9 sm:$0xff] %v2735_v51  ;;  %v2740_v51 = vperm.slane %v1797_v35, 2 }
 0x40e   : > { %3563 = vst [vmem:[#allocation1 + $0x6] ss:$9 sm:$0xff] %v2736_v12  ;;  %v6365_v12 = vadd.s32 4294967280, %v6356_v37 }
 0x40f   : > { %3564 = vst [vmem:[#allocation1 + $0x7] ss:$9 sm:$0xff] %v2737_v13  ;;  %v6368_v13 = vmax.f32 %v6196_v30, 1e-24  ;;  %v4247_v30 = vsel %vm4246_vm2, %v4245_v29, %v4243_v42  ;;  %v1803_v29 = vmul.f32 %v6346_v11, %v1802_v33  ;;  %v5164_v42 = vld [vmem:[%s5718_s3 + $0x38] sm:$0xff] }
 0x410   : > { %v4249_v38 = vperm.slane %v6339_v19, %v6365_v12  ;;  %v4253_v19 = vperm.slane %v6349_v48, %v6377_v41  ;;  %4525 = vmatpush.bf16.msra.mxu0 %v5164_v42 }
 0x411   : > { %5382 = vrsqrt.f32 %v6368_v13  ;;  %vm1824_vm14 = vweird.f32 %v6368_v13 }
 0x416   : > { %v3565_v47 = vld [vmem:[#allocation1] sm:$0xff] }
 0x417   : > { %3566 = vst [vmem:[#allocation1] ss:$9 sm:$0xff] %v2738_v14  ;;  %4110 = vperm.xlu0 %5267, %v3565_v47   ;;  %v6374_v14 = vadd.s32 4294967264, %v6356_v37  ;;  %v2744_v47 = vperm.slane %v1797_v35, 6  ;;  %v6393_v35 = vadd.s32 4294967256, %v6356_v37 }
 0x418   : > { %3567 = vst [vmem:[#allocation1 + $0x1] ss:$9 sm:$0xff] %v2739_v24  ;;  %v1809_v24 = vmul.f32 %v6371_v61, %v6354_v21 }
 0x419   : > { %3568 = vst [vmem:[#allocation1 + $0x2] ss:$9 sm:$0xff] %v2740_v51  ;;  %v4251_v51 = vsel %vm4250_vm3, %v4249_v38, %v4247_v30  ;;  %v4257_v58 = vperm.slane %v3967_v55, %v6374_v14  ;;  %v3979_v55 = vpop.permute.xlu2 %3978  ;;  %v4261_v10 = vperm.slane %v3970_v23, %v6393_v35 }
 0x41a   : > { %3569 = vst [vmem:[#allocation1 + $0x3] ss:$9 sm:$0xff] %v2741_v1  ;;  %v3976_v1 = vpop.permute.xlu0 %3975  ;;  %v1810_v33 = vmul.f32 %v6371_v61, %v1809_v24  ;;  %v4255_v30 = vsel %vm4254_vm6, %v4253_v19, %v4251_v51  ;;  %v5163_v24 = vld [vmem:[%s5718_s3 + $0x30] sm:$0xff] }
 0x41b   : > { %3570 = vst [vmem:[#allocation1 + $0x4] ss:$9 sm:$0xff] %v2742_v40  ;;  %v3973_v40 = vpop.permute.xlu1 %3972  ;;  %v4259_v48 = vsel %vm4258_vm8, %v4257_v58, %v4255_v30  ;;  %4526 = vmatpush.bf16.msra.mxu0 %v5163_v24  ;;  %v6413_v58 = vadd.s32 4294967232, %v6356_v37  ;;  %v4269_v30 = vperm.slane %v3976_v1, %v6408_v20 }
 0x41c   : > { %3571 = vst [vmem:[#allocation1 + $0x5] ss:$9 sm:$0xff] %v2743_v39  ;;  %v6396_v39 = vadd.s32 4294967248, %v6356_v37  ;;  %v1811_v19 = vmul.f32 0.5, %v1810_v33  ;;  %v4263_v42 = vsel %vm4262_vm9, %v4261_v10, %v4259_v48 }
 0x41d   : > { %3572 = vst [vmem:[#allocation1 + $0x6] ss:$9 sm:$0xff] %v2744_v47  ;;  %v1807_v47 = vsel %vm1806_vm7, %v6346_v11, %v1803_v29  ;;  %vm6960_vm7 = vcmask 917312  }
 0x41e   : > { %3573 = vst [vmem:[#allocation1 + $0x7] ss:$9 sm:$0xff] %v2745_v46  ;;  %v4265_v38 = vperm.slane %v3973_v40, %v6396_v39  ;;  %v6404_v46 = vpop.eup %5382  ;;  %v2746_v51 = vperm.slane %v1807_v47, 0  ;;  %v2747_v29 = vperm.slane %v1807_v47, 1  ;;  %v2748_v23 = vperm.slane %v1807_v47, 2 }
 0x41f   : > { %v1819_v10 = vmul.f32 %v6404_v46, %v6368_v13  ;;  %v2749_v33 = vperm.slane %v1807_v47, 3  ;;  %v2750_v0 = vperm.slane %v1807_v47, 4  ;;  %4527 = vmatpush.bf16.msra.mxu0 %v5162_v7  ;;  %v2751_v1 = vperm.slane %v1807_v47, 5 }
 0x420   : > { %v4267_v40 = vsel %vm4266_vm10, %v4265_v38, %v4263_v42  ;;  %v1812_v38 = vsub.f32 1.5, %v1811_v19  ;;  %v2752_v42 = vperm.slane %v1807_v47, 6  ;;  %v2753_v7 = vperm.slane %v1807_v47, 7 }
 0x421   : > { %v6443_v47 = vmax.f32 %v6222_v8, 1e-24  ;;  %v6455_v8 = vadd.s32 4294967192, %v6356_v37 }
 0x422   : > { %v3985_v48 = vpop.permute.xlu0 %3984 }
 0x423   : > { %v3982_v24 = vpop.permute.xlu1 %3981  ;;  %5384 = vrsqrt.f32 %v6443_v47 }
 0x424   : > { %v4277_v19 = vperm.slane %v3982_v24, %v6418_v6  ;;  %v1820_v24 = vmul.f32 %v6404_v46, %v1819_v10 }
 0x425   : > { %v3574_v11 = vld [vmem:[#allocation1] sm:$0xff] }
 0x426   : > { %3575 = vst [vmem:[#allocation1] ss:$9 sm:$0xff] %v2746_v51  ;;  %4113 = vperm.xlu2 %5269, %v3574_v11   ;;  %v4271_v51 = vsel %vm4270_vm11, %v4269_v30, %v4267_v40  ;;  %v4273_v11 = vperm.slane %v3979_v55, %v6413_v58  ;;  %v5161_v40 = vld [vmem:[%s5718_s3 + $0x20] sm:$0xff]  ;;  %v1813_v55 = vmul.f32 %v6371_v61, %v1812_v38  ;;  %v6435_v30 = vadd.s32 4294967208, %v6356_v37 }
 0x427   : > { %3576 = vst [vmem:[#allocation1 + $0x1] ss:$9 sm:$0xff] %v2747_v29  ;;  %v3988_v29 = vpop.permute.xlu2 %3987  ;;  %4528 = vmatpush.bf16.msra.mxu0 %v5161_v40  ;;  %v6448_v38 = vadd.s32 4294967200, %v6356_v37 }
 0x428   : > { %3577 = vst [vmem:[#allocation1 + $0x2] ss:$9 sm:$0xff] %v2748_v23  ;;  %v4275_v23 = vsel %vm4274_vm12, %v4273_v11, %v4271_v51  ;;  %v5160_v51 = vld [vmem:[%s5718_s3 + $0x18] sm:$0xff]  ;;  %v1817_v11 = vsel %vm1816_vm1, %v6371_v61, %v1813_v55  ;;  %v4285_v21 = vperm.slane %v3988_v29, %v6435_v30  ;;  %v6462_v61 = vadd.s32 4294967184, %v6356_v37 }
 0x429   : > { %3578 = vst [vmem:[#allocation1 + $0x3] ss:$9 sm:$0xff] %v2749_v33  ;;  %v4281_v33 = vperm.slane %v3985_v48, %v6426_v27  ;;  %v6471_v4 = vpop.eup %5384  ;;  %vm1825_vm1 = vweird.f32 %v6404_v46 }
 0x42a   : > { %3579 = vst [vmem:[#allocation1 + $0x4] ss:$9 sm:$0xff] %v2750_v0  ;;  %v4279_v0 = vsel %vm6964_vm15, %v4277_v19, %v4275_v23  ;;  %v3994_v10 = vpop.permute.xlu0 %3993  ;;  %v1821_v19 = vmul.f32 0.5, %v1820_v24  ;;  %v2754_v23 = vperm.slane %v1817_v11, 0  ;;  %v2757_v24 = vperm.slane %v1817_v11, 3 }
 0x42b   : > { %3580 = vst [vmem:[#allocation1 + $0x5] ss:$9 sm:$0xff] %v2751_v1  ;;  %v4283_v1 = vsel %vm6962_vm0, %v4281_v33, %v4279_v0  ;;  %4529 = vmatpush.bf16.msra.mxu0 %v5160_v51  ;;  %v2755_v0 = vperm.slane %v1817_v11, 1  ;;  %v4293_v33 = vperm.slane %v3994_v10, %v6455_v8 }
 0x42c   : > { %3581 = vst [vmem:[#allocation1 + $0x6] ss:$9 sm:$0xff] %v2752_v42  ;;  %v3991_v42 = vpop.permute.xlu1 %3990  ;;  %v4287_v40 = vsel %vm6963_vm4, %v4285_v21, %v4283_v1  ;;  %v6468_v21 = vadd.s32 4294967176, %v6356_v37 }
 0x42d   : > { %3582 = vst [vmem:[#allocation1 + $0x7] ss:$9 sm:$0xff] %v2753_v7  ;;  %v4289_v48 = vperm.slane %v3991_v42, %v6448_v38  ;;  %v5159_v7 = vld [vmem:[%s5718_s3 + $0x10] sm:$0xff]  ;;  %v2756_v42 = vperm.slane %v1817_v11, 2 }
 0x42f   : > { %v4291_v29 = vsel %vm6961_vm5, %v4289_v48, %v4287_v40  ;;  %v3997_v51 = vpop.permute.xlu2 %3996  ;;  %4530 = vmatpush.bf16.msra.mxu0 %v5159_v7  ;;  %v1822_v48 = vsub.f32 1.5, %v1821_v19  ;;  %v2758_v40 = vperm.slane %v1817_v11, 4  ;;  %vm1826_vm5 = vmor %vm1824_vm14, %vm1825_vm1  ;;  %vm1835_vm14 = vweird.f32 %v6471_v4 }
 0x430   : > { %v4295_v1 = vsel %vm6960_vm7, %v4293_v33, %v4291_v29  ;;  %v4297_v10 = vperm.slane %v3997_v51, %v6462_v61  ;;  %vm4302_vm7 = vcmask 1048512   ;;  %v1829_v33 = vmul.f32 %v6471_v4, %v6443_v47  ;;  %v5157_v51 = vld [vmem:[%s5718_s3] sm:$0xff] }
 0x432   : > { %v4299_v19 = vsel %vm4298_vm13, %v4297_v10, %v4295_v1  ;;  %v1220_v1 = vmax.f32 %v6227_v62, 1e-24 }
 0x433   : > { %4531 = vmatpush.bf16.msra.mxu0 %v5158_v32 }
 0x434   : > { %v3583_v55 = vld [vmem:[#allocation1] sm:$0xff]  ;;  %v4000_v7 = vpop.permute.xlu1 %3999  ;;  %5386 = vrsqrt.f32 %v1220_v1 }
 0x435   : > { %3584 = vst [vmem:[#allocation1] ss:$9 sm:$0xff] %v2754_v23  ;;  %4116 = vperm.xlu1 %5268, %v3583_v55   ;;  %v2759_v23 = vperm.slane %v1817_v11, 5  ;;  %v4301_v29 = vperm.slane %v4000_v7, %v6468_v21  ;;  %v2760_v55 = vperm.slane %v1817_v11, 6 }
 0x436   : > { %3585 = vst [vmem:[#allocation1 + $0x1] ss:$9 sm:$0xff] %v2755_v0  ;;  %v2761_v0 = vperm.slane %v1817_v11, 7 }
 0x437   : > { %3586 = vst [vmem:[#allocation1 + $0x2] ss:$9 sm:$0xff] %v2756_v42  ;;  %v1156_v42 = vld [vmem:[%s5720_s4] sm:$0x1]  ;;  %v4303_v16 = vsel %vm4302_vm7, %v4301_v29, %v4299_v19  ;;  %4532 = vmatpush.bf16.msra.mxu0 %v5157_v51 }
 0x438   : > { %3587 = vst [vmem:[#allocation1 + $0x3] ss:$9 sm:$0xff] %v2757_v24  ;;  %v1823_v24 = vmul.f32 %v6404_v46, %v1822_v48  ;;  %v4465_v32 = vmul.f32 %v4303_v16, %v1156_v42 }
 0x439   : > { %3588 = vst [vmem:[#allocation1 + $0x4] ss:$9 sm:$0xff] %v2758_v40  ;;  %v1830_v40 = vmul.f32 %v6471_v4, %v1829_v33 }
 0x43a   : > { %3589 = vst [vmem:[#allocation1 + $0x5] ss:$9 sm:$0xff] %v2759_v23  ;;  %v4471_v11 = vpack.c.bf16 %v4465_v32, %v4465_v32  ;;  %v1827_v10 = vsel %vm1826_vm5, %v6404_v46, %v1823_v24  ;;  %v5387_v13 = vpop.eup %5386  ;;  %vm1834_vm5 = vweird.f32 %v6443_v47  ;;  %v6493_v24 = vmax.f32 %v6206_v60, 1e-24 }
 0x43b   : > { %3590 = vst [vmem:[#allocation1 + $0x6] ss:$9 sm:$0xff] %v2760_v55  ;;  %v2762_v7 = vperm.slane %v1827_v10, 0  ;;  %v1831_v23 = vmul.f32 0.5, %v1830_v40  ;;  %v2763_v29 = vperm.slane %v1827_v10, 1  ;;  %v2764_v55 = vperm.slane %v1827_v10, 2  ;;  %vm1836_vm1 = vmor %vm1834_vm5, %vm1835_vm14 }
 0x43c   : > { %3591 = vst [vmem:[#allocation1 + $0x7] ss:$9 sm:$0xff] %v2761_v0  ;;  %4533 = vmatmul.bf16.vlgmr.msra.gmra.mxu0 %v4471_v11  ;;  %v2765_v16 = vperm.slane %v1827_v10, 3  ;;  %v2766_v19 = vperm.slane %v1827_v10, 4  ;;  %v2767_v0 = vperm.slane %v1827_v10, 5  ;;  %v2768_v33 = vperm.slane %v1827_v10, 6 }
 0x43d   : > { %v1832_v62 = vsub.f32 1.5, %v1831_v23  ;;  %v2769_v46 = vperm.slane %v1827_v10, 7  ;;  %v1839_v51 = vmul.f32 %v5387_v13, %v1220_v1  ;;  %5388 = vrsqrt.f32 %v6493_v24 }
 0x43e   : > { %vm1844_vm5 = vweird.f32 %v1220_v1  ;;  %vm1845_vm14 = vweird.f32 %v5387_v13 }
 0x43f   : > { %v1833_v42 = vmul.f32 %v6471_v4, %v1832_v62  ;;  %v1840_v32 = vmul.f32 %v5387_v13, %v1839_v51 }
 0x441   : > { %v1837_v11 = vsel %vm1836_vm1, %v6471_v4, %v1833_v42  ;;  %v1841_v47 = vmul.f32 0.5, %v1840_v32  ;;  %vm1846_vm1 = vmor %vm1844_vm5, %vm1845_vm14  ;;  %v4003_v42 = vpop.permute.xlu0 %4002  ;;  %v4006_v32 = vpop.permute.xlu2 %4005  ;;  %vm1854_vm5 = vweird.f32 %v6493_v24 }
 0x442   : > { %v2770_v40 = vperm.slane %v1837_v11, 0  ;;  %v2771_v23 = vperm.slane %v1837_v11, 1  ;;  %v2772_v10 = vperm.slane %v1837_v11, 2  ;;  %v2777_v62 = vperm.slane %v1837_v11, 7 }
 0x443   : > { %v3592_v48 = vld [vmem:[#allocation1] sm:$0xff]  ;;  %v1842_v60 = vsub.f32 1.5, %v1841_v47 }
 0x444   : > { %3593 = vst [vmem:[#allocation1] ss:$9 sm:$0xff] %v2762_v7  ;;  %4119 = vperm.xlu0 %5267, %v3592_v48   ;;  %v5389_v48 = vpop.eup %5388 }
 0x445   : > { %3594 = vst [vmem:[#allocation1 + $0x1] ss:$9 sm:$0xff] %v2763_v29  ;;  %v2773_v29 = vperm.slane %v1837_v11, 3  ;;  %v1849_v4 = vmul.f32 %v5389_v48, %v6493_v24  ;;  %vm1855_vm14 = vweird.f32 %v5389_v48 }
 0x446   : > { %3595 = vst [vmem:[#allocation1 + $0x2] ss:$9 sm:$0xff] %v2764_v55  ;;  %v2774_v55 = vperm.slane %v1837_v11, 4 }
 0x447   : > { %3596 = vst [vmem:[#allocation1 + $0x3] ss:$9 sm:$0xff] %v2765_v16  ;;  %v2775_v16 = vperm.slane %v1837_v11, 5 }
 0x448   : > { %3597 = vst [vmem:[#allocation1 + $0x4] ss:$9 sm:$0xff] %v2766_v19  ;;  %v2776_v19 = vperm.slane %v1837_v11, 6 }
 0x449   : > { %3598 = vst [vmem:[#allocation1 + $0x5] ss:$9 sm:$0xff] %v2767_v0  ;;  %v1843_v0 = vmul.f32 %v5387_v13, %v1842_v60 }
 0x44a   : > { %3599 = vst [vmem:[#allocation1 + $0x6] ss:$9 sm:$0xff] %v2768_v33  ;;  %v6499_v33 = vmax.f32 %v6234_v31, 1e-24 }
 0x44b   : > { %3600 = vst [vmem:[#allocation1 + $0x7] ss:$9 sm:$0xff] %v2769_v46  ;;  %v1850_v46 = vmul.f32 %v5389_v48, %v1849_v4  ;;  %v1847_v51 = vsel %vm1846_vm1, %v5387_v13, %v1843_v0  ;;  %v4012_v4 = vpop.permute.xlu0 %4011  ;;  %v4015_v0 = vpop.permute.xlu2 %4014  ;;  %vm1856_vm1 = vmor %vm1854_vm5, %vm1855_vm14 }
 0x44c   : > { %5390 = vrsqrt.f32 %v6499_v33  ;;  %v2778_v47 = vperm.slane %v1847_v51, 0  ;;  %v2780_v11 = vperm.slane %v1847_v51, 2  ;;  %v2783_v13 = vperm.slane %v1847_v51, 5 }
 0x44d   : > { %v1851_v1 = vmul.f32 0.5, %v1850_v46  ;;  %v2784_v60 = vperm.slane %v1847_v51, 6  ;;  %v6508_v46 = vmax.f32 %v6238_v44, 1e-24  ;;  %vm1864_vm5 = vweird.f32 %v6499_v33 }
 0x44f   : > { %v1852_v31 = vsub.f32 1.5, %v1851_v1  ;;  %5392 = vrsqrt.f32 %v6508_v46 }
 0x452   : > { %v3601_v7 = vld [vmem:[#allocation1] sm:$0xff] }
 0x453   : > { %3602 = vst [vmem:[#allocation1] ss:$9 sm:$0xff] %v2770_v40  ;;  %4122 = vperm.xlu2 %5269, %v3601_v7   ;;  %v4009_v40 = vpop.permute.xlu1 %4008 }
 0x454   : > { %3603 = vst [vmem:[#allocation1 + $0x1] ss:$9 sm:$0xff] %v2771_v23  ;;  %v2779_v23 = vperm.slane %v1847_v51, 1 }
 0x455   : > { %3604 = vst [vmem:[#allocation1 + $0x2] ss:$9 sm:$0xff] %v2772_v10  ;;  %v2781_v10 = vperm.slane %v1847_v51, 3 }
 0x456   : > { %3605 = vst [vmem:[#allocation1 + $0x3] ss:$9 sm:$0xff] %v2773_v29  ;;  %v6502_v29 = vpop.eup %5390 }
 0x457   : > { %3606 = vst [vmem:[#allocation1 + $0x4] ss:$9 sm:$0xff] %v2774_v55  ;;  %v2782_v55 = vperm.slane %v1847_v51, 4  ;;  %vm1865_vm14 = vweird.f32 %v6502_v29 }
 0x458   : > { %3607 = vst [vmem:[#allocation1 + $0x5] ss:$9 sm:$0xff] %v2775_v16  ;;  %v2785_v16 = vperm.slane %v1847_v51, 7  ;;  %v4305_v51 = vperm.slane %v4006_v32, %v6360_v25 }
 0x459   : > { %3608 = vst [vmem:[#allocation1 + $0x6] ss:$9 sm:$0xff] %v2776_v19  ;;  %v1859_v19 = vmul.f32 %v6502_v29, %v6499_v33 }
 0x45a   : > { %3609 = vst [vmem:[#allocation1 + $0x7] ss:$9 sm:$0xff] %v2777_v62  ;;  %v1853_v62 = vmul.f32 %v5389_v48, %v1852_v31  ;;  %v4021_v31 = vpop.permute.xlu0 %4020 }
 0x45b   : > { %v4018_v1 = vpop.permute.xlu1 %4017  ;;  %v1860_v24 = vmul.f32 %v6502_v29, %v1859_v19  ;;  %v6518_v19 = vpop.eup %5392 }
 0x461   : > { %v3610_v7 = vld [vmem:[#allocation1] sm:$0xff] }
 0x462   : > { %3611 = vst [vmem:[#allocation1] ss:$9 sm:$0xff] %v2778_v47  ;;  %4125 = vperm.xlu1 %5268, %v3610_v7   ;;  %v1857_v47 = vsel %vm1856_vm1, %v5389_v48, %v1853_v62  ;;  %v4307_v7 = vperm.slane %v4009_v40, %v6365_v12  ;;  %v4024_v40 = vpop.permute.xlu2 %4023  ;;  %vm1866_vm1 = vmor %vm1864_vm5, %vm1865_vm14  ;;  %vm1874_vm5 = vweird.f32 %v6508_v46  ;;  %vm1875_vm14 = vweird.f32 %v6518_v19 }
 0x463   : > { %3612 = vst [vmem:[#allocation1 + $0x1] ss:$9 sm:$0xff] %v2779_v23  ;;  %v2786_v23 = vperm.slane %v1857_v47, 0  ;;  %v2788_v44 = vperm.slane %v1857_v47, 2  ;;  %v2789_v48 = vperm.slane %v1857_v47, 3  ;;  %v2790_v62 = vperm.slane %v1857_v47, 4  ;;  %v4027_v18 = vpop.permute.xlu1 %4026 }
 0x464   : > { %3613 = vst [vmem:[#allocation1 + $0x2] ss:$9 sm:$0xff] %v2780_v11  ;;  %v1861_v11 = vmul.f32 0.5, %v1860_v24  ;;  %v4309_v24 = vperm.slane %v4012_v4, %v6377_v41  ;;  %v2791_v57 = vperm.slane %v1857_v47, 5  ;;  %v1869_v4 = vmul.f32 %v6518_v19, %v6508_v46  ;;  %v5165_v46 = vld [vmem:[%s5718_s3 + $0x40] sm:$0xff] }
 0x465   : > { %3614 = vst [vmem:[#allocation1 + $0x3] ss:$9 sm:$0xff] %v2781_v10  ;;  %v4304_v10 = vperm.slane %v4003_v42, %v6356_v37 }
 0x466   : > { %3615 = vst [vmem:[#allocation1 + $0x4] ss:$9 sm:$0xff] %v2782_v55  ;;  %v5172_v55 = vld [vmem:[%s5718_s3 + $0x78] sm:$0xff]  ;;  %v1862_v42 = vsub.f32 1.5, %v1861_v11  ;;  %v4311_v11 = vperm.slane %v4015_v0, %v6374_v14  ;;  %v4315_v0 = vperm.slane %v4021_v31, %v6396_v39 }
 0x467   : > { %3616 = vst [vmem:[#allocation1 + $0x5] ss:$9 sm:$0xff] %v2783_v13  ;;  %v2787_v13 = vperm.slane %v1857_v47, 1  ;;  %4586 = vmatpush.bf16.msra.mxu1 %v5172_v55 }
 0x468   : > { %3617 = vst [vmem:[#allocation1 + $0x6] ss:$9 sm:$0xff] %v2784_v60  ;;  %v1863_v55 = vmul.f32 %v6502_v29, %v1862_v42 }
 0x469   : > { %3618 = vst [vmem:[#allocation1 + $0x7] ss:$9 sm:$0xff] %v2785_v16  ;;  %v4306_v16 = vsel %vm4246_vm2, %v4305_v51, %v4304_v10  ;;  %v2793_v10 = vperm.slane %v1857_v47, 7 }
 0x46a   : > { %v4308_v32 = vsel %vm4250_vm3, %v4307_v7, %v4306_v16  ;;  %v4313_v7 = vperm.slane %v4018_v1, %v6393_v35  ;;  %v1870_v1 = vmul.f32 %v6518_v19, %v1869_v4  ;;  %v4033_v33 = vpop.permute.xlu2 %4032 }
 0x46b   : > { %v4310_v51 = vsel %vm4254_vm6, %v4309_v24, %v4308_v32  ;;  %4587 = vmatpush.bf16.msra.mxu1 %v5171_v22  ;;  %v4036_v16 = vpop.permute.xlu1 %4035  ;;  %v4319_v32 = vperm.slane %v4027_v18, %v6413_v58 }
 0x46c   : > { %v4312_v22 = vsel %vm4258_vm8, %v4311_v11, %v4310_v51 }
 0x470   : > { %v3619_v60 = vld [vmem:[#allocation1] sm:$0xff] }
 0x471   : > { %3620 = vst [vmem:[#allocation1] ss:$9 sm:$0xff] %v2786_v23  ;;  %4128 = vperm.xlu0 %5267, %v3619_v60   ;;  %v2792_v23 = vperm.slane %v1857_v47, 6  ;;  %v5170_v60 = vld [vmem:[%s5718_s3 + $0x68] sm:$0xff]  ;;  %v1867_v47 = vsel %vm1866_vm1, %v6502_v29, %v1863_v55  ;;  %vm6980_vm1 = vcmask 851712  }
 0x472   : > { %3621 = vst [vmem:[#allocation1 + $0x1] ss:$9 sm:$0xff] %v2787_v13  ;;  %v4030_v13 = vpop.permute.xlu0 %4029  ;;  %4588 = vmatpush.bf16.msra.mxu1 %v5170_v60  ;;  %v2794_v24 = vperm.slane %v1867_v47, 0  ;;  %v2795_v51 = vperm.slane %v1867_v47, 1  ;;  %v2796_v4 = vperm.slane %v1867_v47, 2  ;;  %v2797_v55 = vperm.slane %v1867_v47, 3 }
 0x473   : > { %3622 = vst [vmem:[#allocation1 + $0x2] ss:$9 sm:$0xff] %v2788_v44  ;;  %v6532_v44 = vmax.f32 %v6217_v17, 1e-24  ;;  %v4321_v42 = vperm.slane %v4030_v13, %v6418_v6  ;;  %v2798_v60 = vperm.slane %v1867_v47, 4 }
 0x474   : > { %3623 = vst [vmem:[#allocation1 + $0x3] ss:$9 sm:$0xff] %v2789_v48  ;;  %v5169_v48 = vld [vmem:[%s5718_s3 + $0x60] sm:$0xff] }
 0x475   : > { %3624 = vst [vmem:[#allocation1 + $0x4] ss:$9 sm:$0xff] %v2790_v62  ;;  %5394 = vrsqrt.f32 %v6532_v44  ;;  %v4317_v62 = vperm.slane %v4024_v40, %v6408_v20  ;;  %v4325_v40 = vperm.slane %v4036_v16, %v6435_v30  ;;  %v4042_v16 = vpop.permute.xlu2 %4041 }
 0x476   : > { %3625 = vst [vmem:[#allocation1 + $0x5] ss:$9 sm:$0xff] %v2791_v57  ;;  %v4314_v57 = vsel %vm4262_vm9, %v4313_v7, %v4312_v22  ;;  %4589 = vmatpush.bf16.msra.mxu1 %v5169_v48  ;;  %v4045_v48 = vpop.permute.xlu1 %4044 }
 0x477   : > { %3626 = vst [vmem:[#allocation1 + $0x6] ss:$9 sm:$0xff] %v2792_v23  ;;  %v4316_v17 = vsel %vm4266_vm10, %v4315_v0, %v4314_v57  ;;  %v1871_v23 = vmul.f32 0.5, %v1870_v1  ;;  %v4323_v57 = vperm.slane %v4033_v33, %v6426_v27  ;;  %v2799_v0 = vperm.slane %v1867_v47, 5 }
 0x478   : > { %3627 = vst [vmem:[#allocation1 + $0x7] ss:$9 sm:$0xff] %v2793_v10  ;;  %v4318_v29 = vsel %vm4270_vm11, %v4317_v62, %v4316_v17  ;;  %v5168_v10 = vld [vmem:[%s5718_s3 + $0x58] sm:$0xff]  ;;  %v2800_v17 = vperm.slane %v1867_v47, 6  ;;  %v5167_v62 = vld [vmem:[%s5718_s3 + $0x50] sm:$0xff]  ;;  %v2801_v33 = vperm.slane %v1867_v47, 7  ;;  %v4329_v47 = vperm.slane %v4042_v16, %v6455_v8 }
 0x479   : > { %v4320_v11 = vsel %vm4274_vm12, %v4319_v32, %v4318_v29  ;;  %v1872_v22 = vsub.f32 1.5, %v1871_v23  ;;  %v6569_v29 = vmax.f32 %v6242_v54, 1e-24  ;;  %v1157_v54 = vld [vmem:[%s5720_s4 + $0x1] sm:$0x1] }
 0x47a   : > { %v4039_v7 = vpop.permute.xlu0 %4038  ;;  %v4322_v18 = vsel %vm6964_vm15, %v4321_v42, %v4320_v11  ;;  %4590 = vmatpush.bf16.msra.mxu1 %v5168_v10 }
 0x47b   : > { %v6552_v13 = vpop.eup %5394  ;;  %v4327_v1 = vperm.slane %v4039_v7, %v6448_v38  ;;  %v4324_v32 = vsel %vm6962_vm0, %v4323_v57, %v4322_v18  ;;  %v1873_v23 = vmul.f32 %v6518_v19, %v1872_v22  ;;  %vm1876_vm0 = vmor %vm1874_vm5, %vm1875_vm14  ;;  %v5166_v7 = vld [vmem:[%s5718_s3 + $0x48] sm:$0xff]  ;;  %5396 = vrsqrt.f32 %v6569_v29 }
 0x47c   : > { %v1879_v42 = vmul.f32 %v6552_v13, %v6532_v44  ;;  %vm1894_vm14 = vweird.f32 %v6569_v29 }
 0x47d   : > { %v1877_v18 = vsel %vm1876_vm0, %v6518_v19, %v1873_v23  ;;  %vm1884_vm0 = vweird.f32 %v6532_v44 }
 0x47e   : > { %4591 = vmatpush.bf16.msra.mxu1 %v5167_v62  ;;  %v2805_v19 = vperm.slane %v1877_v18, 3  ;;  %v2809_v23 = vperm.slane %v1877_v18, 7 }
 0x47f   : > { %v3628_v31 = vld [vmem:[#allocation1] sm:$0xff] }
 0x480   : > { %3629 = vst [vmem:[#allocation1] ss:$9 sm:$0xff] %v2794_v24  ;;  %4131 = vperm.xlu2 %5269, %v3628_v31   ;;  %v4326_v24 = vsel %vm6963_vm4, %v4325_v40, %v4324_v32  ;;  %vm6981_vm4 = vcmask 917312  }
 0x481   : > { %3630 = vst [vmem:[#allocation1 + $0x1] ss:$9 sm:$0xff] %v2795_v51  ;;  %v4328_v31 = vsel %vm6980_vm1, %v4327_v1, %v4326_v24  ;;  %v4331_v51 = vperm.slane %v4045_v48, %v6462_v61  ;;  %v2802_v1 = vperm.slane %v1877_v18, 0  ;;  %v2803_v48 = vperm.slane %v1877_v18, 1  ;;  %v5397_v32 = vpop.eup %5396 }
 0x482   : > { %3631 = vst [vmem:[#allocation1 + $0x2] ss:$9 sm:$0xff] %v2796_v4  ;;  %v4048_v10 = vpop.permute.xlu0 %4047  ;;  %v1880_v4 = vmul.f32 %v6552_v13, %v1879_v42  ;;  %v4330_v11 = vsel %vm6981_vm4, %v4329_v47, %v4328_v31  ;;  %4592 = vmatpush.bf16.msra.mxu1 %v5166_v7  ;;  %v2806_v42 = vperm.slane %v1877_v18, 4  ;;  %vm1885_vm4 = vweird.f32 %v6552_v13 }
 0x483   : > { %3632 = vst [vmem:[#allocation1 + $0x3] ss:$9 sm:$0xff] %v2797_v55  ;;  %v4333_v55 = vperm.slane %v4048_v10, %v6468_v21  ;;  %v4332_v40 = vsel %vm4298_vm13, %v4331_v51, %v4330_v11  ;;  %v2808_v24 = vperm.slane %v1877_v18, 6  ;;  %v1889_v31 = vmul.f32 %v5397_v32, %v6569_v29  ;;  %vm1886_vm5 = vmor %vm1884_vm0, %vm1885_vm4 }
 0x484   : > { %3633 = vst [vmem:[#allocation1 + $0x4] ss:$9 sm:$0xff] %v2798_v60  ;;  %v1881_v57 = vmul.f32 0.5, %v1880_v4  ;;  %v1226_v47 = vmax.f32 %v6249_v63, 1e-24  ;;  %vm1895_vm1 = vweird.f32 %v5397_v32 }
 0x485   : > { %3634 = vst [vmem:[#allocation1 + $0x5] ss:$9 sm:$0xff] %v2799_v0  ;;  %v4334_v60 = vsel %vm4302_vm7, %v4333_v55, %v4332_v40  ;;  %v1890_v7 = vmul.f32 %v5397_v32, %v1889_v31  ;;  %vm1896_vm0 = vmor %vm1894_vm14, %vm1895_vm1 }
 0x486   : > { %3635 = vst [vmem:[#allocation1 + $0x6] ss:$9 sm:$0xff] %v2800_v17  ;;  %v4466_v22 = vmul.f32 %v4334_v60, %v1157_v54  ;;  %4593 = vmatpush.bf16.msra.mxu1 %v5165_v46  ;;  %v2804_v17 = vperm.slane %v1877_v18, 2  ;;  %v1882_v62 = vsub.f32 1.5, %v1881_v57  ;;  %5398 = vrsqrt.f32 %v1226_v47 }
 0x487   : > { %3636 = vst [vmem:[#allocation1 + $0x7] ss:$9 sm:$0xff] %v2801_v33  ;;  %v2807_v33 = vperm.slane %v1877_v18, 5  ;;  %v1891_v4 = vmul.f32 0.5, %v1890_v7  ;;  %vm1904_vm4 = vweird.f32 %v1226_v47 }
 0x488   : > { %v4472_v16 = vpack.c.bf16 %v4466_v22, %v4466_v22  ;;  %v1883_v51 = vmul.f32 %v6552_v13, %v1882_v62 }
 0x489   : > { %v1892_v60 = vsub.f32 1.5, %v1891_v4 }
 0x48a   : > { %4594 = vmatmul.bf16.vlgmr.msra.gmra.mxu1 %v4472_v16  ;;  %v1887_v10 = vsel %vm1886_vm5, %v6552_v13, %v1883_v51 }
 0x48b   : > { %v2810_v44 = vperm.slane %v1887_v10, 0  ;;  %v2811_v11 = vperm.slane %v1887_v10, 1  ;;  %v2812_v40 = vperm.slane %v1887_v10, 2  ;;  %v2813_v18 = vperm.slane %v1887_v10, 3 }
 0x48c   : > { %v5399_v46 = vpop.eup %5398  ;;  %v2814_v54 = vperm.slane %v1887_v10, 4  ;;  %v2815_v22 = vperm.slane %v1887_v10, 5  ;;  %v2816_v63 = vperm.slane %v1887_v10, 6  ;;  %v2817_v13 = vperm.slane %v1887_v10, 7 }
 0x48d   : > { %v1899_v57 = vmul.f32 %v5399_v46, %v1226_v47  ;;  %vm1905_vm5 = vweird.f32 %v5399_v46 }
 0x48e   : > { %v3637_v0 = vld [vmem:[#allocation1] sm:$0xff]  ;;  %vm1906_vm14 = vmor %vm1904_vm4, %vm1905_vm5 }
 0x48f   : > { %3638 = vst [vmem:[#allocation1] ss:$9 sm:$0xff] %v2802_v1  ;;  %4134 = vperm.xlu1 %5268, %v3637_v0   ;;  %v1893_v1 = vmul.f32 %v5397_v32, %v1892_v60  ;;  %v6590_v0 = vmax.f32 %v6225_v28, 1e-24 }
 0x490   : > { %3639 = vst [vmem:[#allocation1 + $0x1] ss:$9 sm:$0xff] %v2803_v48  ;;  %v1900_v48 = vmul.f32 %v5399_v46, %v1899_v57 }
 0x491   : > { %3640 = vst [vmem:[#allocation1 + $0x2] ss:$9 sm:$0xff] %v2804_v17  ;;  %v1897_v17 = vsel %vm1896_vm0, %v5397_v32, %v1893_v1  ;;  %5400 = vrsqrt.f32 %v6590_v0  ;;  %vm1914_vm1 = vweird.f32 %v6590_v0 }
 0x492   : > { %3641 = vst [vmem:[#allocation1 + $0x3] ss:$9 sm:$0xff] %v2805_v19  ;;  %v2818_v16 = vperm.slane %v1897_v17, 0  ;;  %v1901_v19 = vmul.f32 0.5, %v1900_v48  ;;  %v2820_v29 = vperm.slane %v1897_v17, 2  ;;  %v2823_v31 = vperm.slane %v1897_v17, 5 }
 0x493   : > { %3642 = vst [vmem:[#allocation1 + $0x4] ss:$9 sm:$0xff] %v2806_v42  ;;  %v2819_v42 = vperm.slane %v1897_v17, 1  ;;  %v2824_v51 = vperm.slane %v1897_v17, 6  ;;  %v2825_v7 = vperm.slane %v1897_v17, 7 }
 0x494   : > { %3643 = vst [vmem:[#allocation1 + $0x5] ss:$9 sm:$0xff] %v2807_v33  ;;  %v2821_v33 = vperm.slane %v1897_v17, 3  ;;  %v1902_v28 = vsub.f32 1.5, %v1901_v19 }
 0x495   : > { %3644 = vst [vmem:[#allocation1 + $0x6] ss:$9 sm:$0xff] %v2808_v24 }
 0x496   : > { %3645 = vst [vmem:[#allocation1 + $0x7] ss:$9 sm:$0xff] %v2809_v23  ;;  %v2822_v23 = vperm.slane %v1897_v17, 4  ;;  %v1903_v10 = vmul.f32 %v5399_v46, %v1902_v28 }
 0x497   : > { %v5401_v24 = vpop.eup %5400 }
 0x498   : > { %v1909_v32 = vmul.f32 %v5401_v24, %v6590_v0  ;;  %vm1915_vm0 = vweird.f32 %v5401_v24 }
 0x499   : > { %vm1916_vm4 = vmor %vm1914_vm1, %vm1915_vm0 }
 0x49a   : > { %v1910_v4 = vmul.f32 %v5401_v24, %v1909_v32 }
 0x49d   : > { %v3646_v55 = vld [vmem:[#allocation1] sm:$0xff] }
 0x49e   : > { %3647 = vst [vmem:[#allocation1] ss:$9 sm:$0xff] %v2810_v44  ;;  %4137 = vperm.xlu0 %5267, %v3646_v55   ;;  %v6595_v44 = vmax.f32 %v6252_v52, 1e-24  ;;  %v1911_v55 = vmul.f32 0.5, %v1910_v4 }
 0x49f   : > { %3648 = vst [vmem:[#allocation1 + $0x1] ss:$9 sm:$0xff] %v2811_v11  ;;  %v1907_v11 = vsel %vm1906_vm14, %v5399_v46, %v1903_v10 }
 0x4a0   : > { %3649 = vst [vmem:[#allocation1 + $0x2] ss:$9 sm:$0xff] %v2812_v40  ;;  %5402 = vrsqrt.f32 %v6595_v44  ;;  %v2826_v40 = vperm.slane %v1907_v11, 0  ;;  %v1912_v57 = vsub.f32 1.5, %v1911_v55  ;;  %v2830_v1 = vperm.slane %v1907_v11, 4 }
 0x4a1   : > { %3650 = vst [vmem:[#allocation1 + $0x3] ss:$9 sm:$0xff] %v2813_v18  ;;  %v2827_v18 = vperm.slane %v1907_v11, 1  ;;  %v2831_v52 = vperm.slane %v1907_v11, 5  ;;  %v2832_v46 = vperm.slane %v1907_v11, 6  ;;  %v2833_v17 = vperm.slane %v1907_v11, 7 }
 0x4a2   : > { %3651 = vst [vmem:[#allocation1 + $0x4] ss:$9 sm:$0xff] %v2814_v54  ;;  %v2828_v54 = vperm.slane %v1907_v11, 2  ;;  %v1913_v19 = vmul.f32 %v5401_v24, %v1912_v57  ;;  %vm1924_vm5 = vweird.f32 %v6595_v44 }
 0x4a3   : > { %3652 = vst [vmem:[#allocation1 + $0x5] ss:$9 sm:$0xff] %v2815_v22  ;;  %v2829_v22 = vperm.slane %v1907_v11, 3 }
 0x4a4   : > { %3653 = vst [vmem:[#allocation1 + $0x6] ss:$9 sm:$0xff] %v2816_v63  ;;  %v4843_v63 = vld [vmem:[%s5716_s30] sm:$0x1] }
 0x4a5   : > { %3654 = vst [vmem:[#allocation1 + $0x7] ss:$9 sm:$0xff] %v2817_v13 }
 0x4a6   : > { %v5403_v13 = vpop.eup %5402 }
 0x4a7   : > { %vm1925_vm14 = vweird.f32 %v5403_v13 }
 0x4a8   : > { %vm1926_vm1 = vmor %vm1924_vm5, %vm1925_vm14 }
 0x4ac   : > { %v3655_v62 = vld [vmem:[#allocation1] sm:$0xff] }
 0x4ad   : > { %3656 = vst [vmem:[#allocation1] ss:$9 sm:$0xff] %v2818_v16  ;;  %4140 = vperm.xlu2 %5269, %v3655_v62   ;;  %v1919_v16 = vmul.f32 %v5403_v13, %v6595_v44  ;;  %v6602_v62 = vmax.f32 %v6257_v36, 1e-24 }
 0x4ae   : > { %3657 = vst [vmem:[#allocation1 + $0x1] ss:$9 sm:$0xff] %v2819_v42 }
 0x4af   : > { %3658 = vst [vmem:[#allocation1 + $0x2] ss:$9 sm:$0xff] %v2820_v29  ;;  %v1920_v29 = vmul.f32 %v5403_v13, %v1919_v16  ;;  %5404 = vrsqrt.f32 %v6602_v62  ;;  %vm1934_vm0 = vweird.f32 %v6602_v62  ;;  %v4054_v16 = vpop.permute.xlu1 %4053 }
 0x4b0   : > { %3659 = vst [vmem:[#allocation1 + $0x3] ss:$9 sm:$0xff] %v2821_v33  ;;  %v1917_v33 = vsel %vm1916_vm4, %v5401_v24, %v1913_v19 }
 0x4b1   : > { %3660 = vst [vmem:[#allocation1 + $0x4] ss:$9 sm:$0xff] %v2822_v23  ;;  %v2834_v0 = vperm.slane %v1917_v33, 0  ;;  %v1921_v23 = vmul.f32 0.5, %v1920_v29  ;;  %v2835_v28 = vperm.slane %v1917_v33, 1  ;;  %v2837_v32 = vperm.slane %v1917_v33, 3 }
 0x4b2   : > { %3661 = vst [vmem:[#allocation1 + $0x5] ss:$9 sm:$0xff] %v2823_v31  ;;  %v2838_v10 = vperm.slane %v1917_v33, 4  ;;  %v2839_v4 = vperm.slane %v1917_v33, 5  ;;  %v2840_v11 = vperm.slane %v1917_v33, 6  ;;  %v2841_v24 = vperm.slane %v1917_v33, 7 }
 0x4b3   : > { %3662 = vst [vmem:[#allocation1 + $0x6] ss:$9 sm:$0xff] %v2824_v51  ;;  %v2836_v51 = vperm.slane %v1917_v33, 2  ;;  %v1922_v36 = vsub.f32 1.5, %v1921_v23  ;;  %v4057_v33 = vpop.permute.xlu0 %4056 }
 0x4b4   : > { %3663 = vst [vmem:[#allocation1 + $0x7] ss:$9 sm:$0xff] %v2825_v7 }
 0x4b5   : > { %v5405_v7 = vpop.eup %5404 }
 0x4b6   : > { %v1929_v55 = vmul.f32 %v5405_v7, %v6602_v62  ;;  %vm1935_vm4 = vweird.f32 %v5405_v7 }
 0x4b7   : > { %vm1936_vm5 = vmor %vm1934_vm0, %vm1935_vm4 }
 0x4b9   : > { %v4534_v60 = vpop.f32.mrf.mxu0 }
 0x4ba   : > { %v4849_v48 = vadd.f32 %v4843_v63, %v4534_v60 }
 0x4bb   : > { %v3664_v47 = vld [vmem:[#allocation1] sm:$0xff] }
 0x4bc   : > { %3665 = vst [vmem:[#allocation1] ss:$9 sm:$0xff] %v2826_v40  ;;  %4143 = vperm.xlu1 %5268, %v3664_v47   ;;  %v1923_v40 = vmul.f32 %v5403_v13, %v1922_v36  ;;  %v6609_v47 = vmax.f32 %v6236_v53, 1e-24 }
 0x4bd   : > { %3666 = vst [vmem:[#allocation1 + $0x1] ss:$9 sm:$0xff] %v2827_v18  ;;  %v1930_v18 = vmul.f32 %v5405_v7, %v1929_v55 }
 0x4be   : > { %3667 = vst [vmem:[#allocation1 + $0x2] ss:$9 sm:$0xff] %v2828_v54  ;;  %v1927_v54 = vsel %vm1926_vm1, %v5403_v13, %v1923_v40  ;;  %5406 = vrsqrt.f32 %v6609_v47  ;;  %vm1944_vm14 = vweird.f32 %v6609_v47 }
 0x4bf   : > { %3668 = vst [vmem:[#allocation1 + $0x3] ss:$9 sm:$0xff] %v2829_v22  ;;  %v2842_v60 = vperm.slane %v1927_v54, 0  ;;  %v1931_v22 = vmul.f32 0.5, %v1930_v18  ;;  %v2843_v44 = vperm.slane %v1927_v54, 1  ;;  %v2844_v57 = vperm.slane %v1927_v54, 2 }
 0x4c0   : > { %3669 = vst [vmem:[#allocation1 + $0x4] ss:$9 sm:$0xff] %v2830_v1  ;;  %v2845_v1 = vperm.slane %v1927_v54, 3  ;;  %v2846_v53 = vperm.slane %v1927_v54, 4  ;;  %v2848_v13 = vperm.slane %v1927_v54, 6 }
 0x4c1   : > { %3670 = vst [vmem:[#allocation1 + $0x5] ss:$9 sm:$0xff] %v2831_v52  ;;  %v4536_v42 = vpop.f32.mrf.mxu0  ;;  %v6612_v52 = vpop.permute.xlu2 %4050 }
 0x4c2   : > { %3671 = vst [vmem:[#allocation1 + $0x6] ss:$9 sm:$0xff] %v2832_v46  ;;  %v2849_v42 = vperm.slane %v1927_v54, 7 }
 0x4c3   : > { %3672 = vst [vmem:[#allocation1 + $0x7] ss:$9 sm:$0xff] %v2833_v17  ;;  %v2847_v17 = vperm.slane %v1927_v54, 5 }
 0x4c4   : > { %4855 = vst [vmem:[%s5716_s30] sm:$0x1] %v4849_v48  ;;  %v6614_v46 = vpop.eup %5406  ;;  %v1932_v48 = vsub.f32 1.5, %v1931_v22 }
 0x4c5   : > { %v1939_v19 = vmul.f32 %v6614_v46, %v6609_v47  ;;  %vm1945_vm1 = vweird.f32 %v6614_v46  ;;  %v4335_v47 = vperm.slane %v6612_v52, %v6356_v37 }
 0x4c6   : > { %v1933_v29 = vmul.f32 %v5405_v7, %v1932_v48  ;;  %vm1946_vm0 = vmor %vm1944_vm14, %vm1945_vm1  ;;  %vm6982_vm1 = vcmask 720512  }
 0x4c7   : > { %v1940_v23 = vmul.f32 %v6614_v46, %v1939_v19 }
 0x4c8   : > { %v1937_v62 = vsel %vm1936_vm5, %v5405_v7, %v1933_v29 }
 0x4c9   : > { %v2851_v36 = vperm.slane %v1937_v62, 1  ;;  %v2853_v55 = vperm.slane %v1937_v62, 3  ;;  %v2854_v7 = vperm.slane %v1937_v62, 4  ;;  %v2855_v54 = vperm.slane %v1937_v62, 5 }
 0x4ca   : > { %v3673_v31 = vld [vmem:[#allocation1] sm:$0xff]  ;;  %v2856_v22 = vperm.slane %v1937_v62, 6 }
 0x4cb   : > { %3674 = vst [vmem:[#allocation1] ss:$9 sm:$0xff] %v2834_v0  ;;  %4146 = vperm.xlu0 %5267, %v3673_v31   ;;  %v6620_v0 = vmax.f32 %v6264_v3, 1e-24  ;;  %v4063_v31 = vpop.permute.xlu1 %4062 }
 0x4cc   : > { %3675 = vst [vmem:[#allocation1 + $0x1] ss:$9 sm:$0xff] %v2835_v28  ;;  %v4060_v28 = vpop.permute.xlu2 %4059 }
 0x4cd   : > { %3676 = vst [vmem:[#allocation1 + $0x2] ss:$9 sm:$0xff] %v2836_v51  ;;  %5408 = vrsqrt.f32 %v6620_v0  ;;  %v1941_v51 = vmul.f32 0.5, %v1940_v23  ;;  %v4340_v52 = vperm.slane %v4060_v28, %v6377_v41  ;;  %vm1954_vm4 = vweird.f32 %v6620_v0 }
 0x4ce   : > { %3677 = vst [vmem:[#allocation1 + $0x3] ss:$9 sm:$0xff] %v2837_v32  ;;  %v2850_v32 = vperm.slane %v1937_v62, 0 }
 0x4cf   : > { %3678 = vst [vmem:[#allocation1 + $0x4] ss:$9 sm:$0xff] %v2838_v10  ;;  %v1942_v40 = vsub.f32 1.5, %v1941_v51 }
 0x4d0   : > { %3679 = vst [vmem:[#allocation1 + $0x5] ss:$9 sm:$0xff] %v2839_v4  ;;  %v4066_v4 = vpop.permute.xlu0 %4065 }
 0x4d1   : > { %3680 = vst [vmem:[#allocation1 + $0x6] ss:$9 sm:$0xff] %v2840_v11  ;;  %v5180_v11 = vld [vmem:[%s5718_s3 + $0xb8] sm:$0xff]  ;;  %v1943_v48 = vmul.f32 %v6614_v46, %v1942_v40 }
 0x4d2   : > { %3681 = vst [vmem:[#allocation1 + $0x7] ss:$9 sm:$0xff] %v2841_v24  ;;  %v2852_v24 = vperm.slane %v1937_v62, 2  ;;  %4647 = vmatpush.bf16.msra.mxu2 %v5180_v11 }
 0x4d3   : > { %v6625_v3 = vpop.eup %5408  ;;  %v1947_v23 = vsel %vm1946_vm0, %v6614_v46, %v1943_v48  ;;  %vm6983_vm0 = vcmask 786112  }
 0x4d4   : > { %v4069_v18 = vpop.permute.xlu2 %4068  ;;  %v2864_v48 = vperm.slane %v1947_v23, 6  ;;  %vm1955_vm5 = vweird.f32 %v6625_v3 }
 0x4d5   : > { %v4346_v40 = vperm.slane %v4069_v18, %v6396_v39  ;;  %vm1956_vm14 = vmor %vm1954_vm4, %vm1955_vm5  ;;  %vm6984_vm4 = vcmask 851712   ;;  %vm6985_vm5 = vcmask 917312  }
 0x4d9   : > { %v3682_v63 = vld [vmem:[#allocation1] sm:$0xff] }
 0x4da   : > { %3683 = vst [vmem:[#allocation1] ss:$9 sm:$0xff] %v2842_v60  ;;  %4149 = vperm.xlu2 %5269, %v3682_v63   ;;  %v5179_v60 = vld [vmem:[%s5718_s3 + $0xb0] sm:$0xff]  ;;  %v4336_v63 = vperm.slane %v4054_v16, %v6360_v25  ;;  %v5178_v16 = vld [vmem:[%s5718_s3 + $0xa8] sm:$0xff] }
 0x4db   : > { %3684 = vst [vmem:[#allocation1 + $0x1] ss:$9 sm:$0xff] %v2843_v44  ;;  %v2857_v44 = vperm.slane %v1937_v62, 7  ;;  %4648 = vmatpush.bf16.msra.mxu2 %v5179_v60  ;;  %v4344_v62 = vperm.slane %v4066_v4, %v6393_v35  ;;  %v2860_v4 = vperm.slane %v1947_v23, 2  ;;  %v5176_v60 = vld [vmem:[%s5718_s3 + $0x98] sm:$0xff] }
 0x4dc   : > { %3685 = vst [vmem:[#allocation1 + $0x2] ss:$9 sm:$0xff] %v2844_v57  ;;  %v1949_v57 = vmul.f32 %v6625_v3, %v6620_v0  ;;  %v4337_v19 = vsel %vm4246_vm2, %v4336_v63, %v4335_v47  ;;  %v4078_v51 = vpop.permute.xlu2 %4077 }
 0x4dd   : > { %3686 = vst [vmem:[#allocation1 + $0x3] ss:$9 sm:$0xff] %v2845_v1  ;;  %v4338_v1 = vperm.slane %v4057_v33, %v6365_v12  ;;  %v4342_v33 = vperm.slane %v4063_v31, %v6374_v14  ;;  %v2859_v31 = vperm.slane %v1947_v23, 1 }
 0x4de   : > { %3687 = vst [vmem:[#allocation1 + $0x4] ss:$9 sm:$0xff] %v2846_v53  ;;  %v4072_v53 = vpop.permute.xlu1 %4071 }
 0x4df   : > { %3688 = vst [vmem:[#allocation1 + $0x5] ss:$9 sm:$0xff] %v2847_v17  ;;  %v6638_v17 = vmax.f32 %v6268_v49, 1e-24  ;;  %v4339_v29 = vsel %vm4250_vm3, %v4338_v1, %v4337_v19  ;;  %4649 = vmatpush.bf16.msra.mxu2 %v5178_v16  ;;  %v5177_v49 = vld [vmem:[%s5718_s3 + $0xa0] sm:$0xff]  ;;  %v4348_v28 = vperm.slane %v4072_v53, %v6408_v20  ;;  %v2863_v53 = vperm.slane %v1947_v23, 5 }
 0x4e0   : > { %3689 = vst [vmem:[#allocation1 + $0x6] ss:$9 sm:$0xff] %v2848_v13  ;;  %v4075_v13 = vpop.permute.xlu0 %4074  ;;  %v5175_v19 = vld [vmem:[%s5718_s3 + $0x90] sm:$0xff] }
 0x4e1   : > { %3690 = vst [vmem:[#allocation1 + $0x7] ss:$9 sm:$0xff] %v2849_v42  ;;  %v1950_v42 = vmul.f32 %v6625_v3, %v1949_v57  ;;  %5410 = vrsqrt.f32 %v6638_v17 }
 0x4e3   : > { %4650 = vmatpush.bf16.msra.mxu2 %v5177_v49 }
 0x4e4   : > { %v4087_v47 = vpop.permute.xlu2 %4086 }
 0x4e7   : > { %v6657_v63 = vpop.eup %5410  ;;  %4651 = vmatpush.bf16.msra.mxu2 %v5176_v60 }
 0x4e8   : > { %v3691_v10 = vld [vmem:[#allocation1] sm:$0xff] }
 0x4e9   : > { %3692 = vst [vmem:[#allocation1] ss:$9 sm:$0xff] %v2850_v32  ;;  %4152 = vperm.xlu2 %5269, %v3691_v10   ;;  %v4341_v32 = vsel %vm4254_vm6, %v4340_v52, %v4339_v29  ;;  %v2858_v10 = vperm.slane %v1947_v23, 0  ;;  %v1959_v29 = vmul.f32 %v6657_v63, %v6638_v17 }
 0x4ea   : > { %3693 = vst [vmem:[#allocation1 + $0x1] ss:$9 sm:$0xff] %v2851_v36  ;;  %v1951_v36 = vmul.f32 0.5, %v1950_v42  ;;  %v4343_v11 = vsel %vm4258_vm8, %v4342_v33, %v4341_v32  ;;  %v2865_v42 = vperm.slane %v1947_v23, 7  ;;  %v4352_v33 = vperm.slane %v4078_v51, %v6418_v6 }
 0x4eb   : > { %3694 = vst [vmem:[#allocation1 + $0x2] ss:$9 sm:$0xff] %v2852_v24  ;;  %v4081_v24 = vpop.permute.xlu1 %4080  ;;  %v4345_v46 = vsel %vm4262_vm9, %v4344_v62, %v4343_v11  ;;  %4652 = vmatpush.bf16.msra.mxu2 %v5175_v19  ;;  %v6672_v32 = vmax.f32 %v6247_v34, 1e-24  ;;  %v1960_v11 = vmul.f32 %v6657_v63, %v1959_v29 }
 0x4ec   : > { %3695 = vst [vmem:[#allocation1 + $0x3] ss:$9 sm:$0xff] %v2853_v55  ;;  %v1952_v57 = vsub.f32 1.5, %v1951_v36  ;;  %v4347_v1 = vsel %vm4266_vm10, %v4346_v40, %v4345_v46  ;;  %v4354_v16 = vperm.slane %v4081_v24, %v6426_v27  ;;  %v5174_v36 = vld [vmem:[%s5718_s3 + $0x88] sm:$0xff]  ;;  %v4096_v46 = vpop.permute.xlu2 %4095 }
 0x4ed   : > { %3696 = vst [vmem:[#allocation1 + $0x4] ss:$9 sm:$0xff] %v2854_v7  ;;  %v4350_v7 = vperm.slane %v4075_v13, %v6413_v58  ;;  %v4349_v18 = vsel %vm4270_vm11, %v4348_v28, %v4347_v1  ;;  %5412 = vrsqrt.f32 %v6672_v32 }
 0x4ee   : > { %3697 = vst [vmem:[#allocation1 + $0x5] ss:$9 sm:$0xff] %v2855_v54  ;;  %v4084_v54 = vpop.permute.xlu0 %4083  ;;  %v1953_v62 = vmul.f32 %v6625_v3, %v1952_v57  ;;  %v1158_v57 = vld [vmem:[%s5720_s4 + $0x2] sm:$0x1] }
 0x4ef   : > { %3698 = vst [vmem:[#allocation1 + $0x6] ss:$9 sm:$0xff] %v2856_v22  ;;  %v2861_v22 = vperm.slane %v1947_v23, 3  ;;  %v4351_v13 = vsel %vm4274_vm12, %v4350_v7, %v4349_v18  ;;  %v4356_v52 = vperm.slane %v4084_v54, %v6435_v30  ;;  %4653 = vmatpush.bf16.msra.mxu2 %v5174_v36  ;;  %v1961_v7 = vmul.f32 0.5, %v1960_v11 }
 0x4f0   : > { %3699 = vst [vmem:[#allocation1 + $0x7] ss:$9 sm:$0xff] %v2857_v44  ;;  %v2862_v44 = vperm.slane %v1947_v23, 4  ;;  %v4353_v23 = vsel %vm6964_vm15, %v4352_v33, %v4351_v13 }
 0x4f1   : > { %v4355_v51 = vsel %vm6982_vm1, %v4354_v16, %v4353_v23  ;;  %v1962_v13 = vsub.f32 1.5, %v1961_v7  ;;  %vm1965_vm1 = vweird.f32 %v6657_v63  ;;  %v6701_v23 = vmax.f32 %v6272_v50, 1e-24 }
 0x4f2   : > { %v4357_v24 = vsel %vm6983_vm0, %v4356_v52, %v4355_v51 }
 0x4f3   : > { %v4090_v49 = vpop.permute.xlu1 %4089  ;;  %v5413_v18 = vpop.eup %5412  ;;  %5414 = vrsqrt.f32 %v6701_v23 }
 0x4f4   : > { %v4360_v34 = vperm.slane %v4090_v49, %v6455_v8  ;;  %v1969_v33 = vmul.f32 %v5413_v18, %v6672_v32  ;;  %v4844_v49 = vld [vmem:[%s5716_s30 + $0x1] sm:$0x1] }
 0x4f7   : > { %v3700_v55 = vld [vmem:[#allocation1] sm:$0xff] }
 0x4f8   : > { %3701 = vst [vmem:[#allocation1] ss:$9 sm:$0xff] %v2858_v10  ;;  %4155 = vperm.xlu0 %5267, %v3700_v55   ;;  %v4093_v10 = vpop.permute.xlu0 %4092  ;;  %v4358_v55 = vperm.slane %v4087_v47, %v6448_v38 }
 0x4f9   : > { %3702 = vst [vmem:[#allocation1 + $0x1] ss:$9 sm:$0xff] %v2859_v31  ;;  %v1957_v31 = vsel %vm1956_vm14, %v6625_v3, %v1953_v62  ;;  %v4362_v0 = vperm.slane %v4093_v10, %v6462_v61  ;;  %v4364_v3 = vperm.slane %v4096_v46, %v6468_v21  ;;  %vm1964_vm14 = vweird.f32 %v6638_v17  ;;  %v5415_v50 = vpop.eup %5414 }
 0x4fa   : > { %3703 = vst [vmem:[#allocation1 + $0x2] ss:$9 sm:$0xff] %v2860_v4  ;;  %v4359_v28 = vsel %vm6984_vm4, %v4358_v55, %v4357_v24  ;;  %v5173_v4 = vld [vmem:[%s5718_s3 + $0x80] sm:$0xff]  ;;  %v2866_v40 = vperm.slane %v1957_v31, 0  ;;  %v2868_v1 = vperm.slane %v1957_v31, 2  ;;  %v2870_v47 = vperm.slane %v1957_v31, 4  ;;  %vm1966_vm0 = vmor %vm1964_vm14, %vm1965_vm1 }
 0x4fb   : > { %3704 = vst [vmem:[#allocation1 + $0x3] ss:$9 sm:$0xff] %v2861_v22  ;;  %v4361_v54 = vsel %vm6985_vm5, %v4360_v34, %v4359_v28  ;;  %v2867_v22 = vperm.slane %v1957_v31, 1  ;;  %4654 = vmatpush.bf16.msra.mxu2 %v5173_v4  ;;  %v2871_v19 = vperm.slane %v1957_v31, 5  ;;  %v2873_v52 = vperm.slane %v1957_v31, 7 }
 0x4fc   : > { %3705 = vst [vmem:[#allocation1 + $0x4] ss:$9 sm:$0xff] %v2862_v44  ;;  %v4363_v44 = vsel %vm4298_vm13, %v4362_v0, %v4361_v54  ;;  %v1963_v62 = vmul.f32 %v6657_v63, %v1962_v13  ;;  %v1970_v10 = vmul.f32 %v5413_v18, %v1969_v33  ;;  %vm1974_vm4 = vweird.f32 %v6672_v32 }
 0x4fd   : > { %3706 = vst [vmem:[#allocation1 + $0x5] ss:$9 sm:$0xff] %v2863_v53  ;;  %v2869_v53 = vperm.slane %v1957_v31, 3  ;;  %vm1975_vm5 = vweird.f32 %v5413_v18  ;;  %v1979_v54 = vmul.f32 %v5415_v50, %v6701_v23  ;;  %vm1984_vm1 = vweird.f32 %v6701_v23 }
 0x4fe   : > { %3707 = vst [vmem:[#allocation1 + $0x6] ss:$9 sm:$0xff] %v2864_v48  ;;  %v4365_v48 = vsel %vm4302_vm7, %v4364_v3, %v4363_v44  ;;  %v1967_v36 = vsel %vm1966_vm0, %v6657_v63, %v1963_v62  ;;  %v1971_v11 = vmul.f32 0.5, %v1970_v10  ;;  %vm1976_vm14 = vmor %vm1974_vm4, %vm1975_vm5  ;;  %vm1985_vm0 = vweird.f32 %v5415_v50 }
 0x4ff   : > { %3708 = vst [vmem:[#allocation1 + $0x7] ss:$9 sm:$0xff] %v2865_v42  ;;  %v4467_v16 = vmul.f32 %v4365_v48, %v1158_v57  ;;  %v2872_v42 = vperm.slane %v1957_v31, 6  ;;  %v2874_v24 = vperm.slane %v1967_v36, 0  ;;  %v2875_v31 = vperm.slane %v1967_v36, 1  ;;  %vm1986_vm4 = vmor %vm1984_vm1, %vm1985_vm0 }
 0x500   : > { %v2876_v55 = vperm.slane %v1967_v36, 2  ;;  %v2877_v46 = vperm.slane %v1967_v36, 3  ;;  %v1972_v28 = vsub.f32 1.5, %v1971_v11  ;;  %v2878_v4 = vperm.slane %v1967_v36, 4 }
 0x501   : > { %v4473_v29 = vpack.c.bf16 %v4467_v16, %v4467_v16  ;;  %v2880_v63 = vperm.slane %v1967_v36, 6  ;;  %v2881_v7 = vperm.slane %v1967_v36, 7  ;;  %v1980_v3 = vmul.f32 %v5415_v50, %v1979_v54 }
 0x503   : > { %4655 = vmatmul.bf16.vlgmr.msra.gmra.mxu2 %v4473_v29 }
 0x506   : > { %v3709_v60 = vld [vmem:[#allocation1] sm:$0xff] }
 0x507   : > { %3710 = vst [vmem:[#allocation1] ss:$9 sm:$0xff] %v2866_v40  ;;  %4158 = vperm.xlu1 %5268, %v3709_v60   ;;  %v4595_v51 = vpop.f32.mrf.mxu1  ;;  %v2879_v40 = vperm.slane %v1967_v36, 5  ;;  %v1973_v60 = vmul.f32 %v5413_v18, %v1972_v28  ;;  %v1237_v28 = vmax.f32 %v6282_v43, 1e-24 }
 0x508   : > { %3711 = vst [vmem:[#allocation1 + $0x1] ss:$9 sm:$0xff] %v2867_v22  ;;  %v4850_v17 = vadd.f32 %v4844_v49, %v4595_v51  ;;  %v1235_v22 = vmax.f32 %v6279_v56, 1e-24 }
 0x509   : > { %3712 = vst [vmem:[#allocation1 + $0x2] ss:$9 sm:$0xff] %v2868_v1  ;;  %v1977_v44 = vsel %vm1976_vm14, %v5413_v18, %v1973_v60  ;;  %v1981_v1 = vmul.f32 0.5, %v1980_v3 }
 0x50a   : > { %3713 = vst [vmem:[#allocation1 + $0x3] ss:$9 sm:$0xff] %v2869_v53  ;;  %5416 = vrsqrt.f32 %v1235_v22  ;;  %v2882_v57 = vperm.slane %v1977_v44, 0  ;;  %v2883_v53 = vperm.slane %v1977_v44, 1  ;;  %v2884_v48 = vperm.slane %v1977_v44, 2 }
 0x50b   : > { %3714 = vst [vmem:[#allocation1 + $0x4] ss:$9 sm:$0xff] %v2870_v47  ;;  %v2885_v47 = vperm.slane %v1977_v44, 3  ;;  %v2886_v16 = vperm.slane %v1977_v44, 4  ;;  %v2888_v29 = vperm.slane %v1977_v44, 6  ;;  %v2889_v56 = vperm.slane %v1977_v44, 7 }
 0x50c   : > { %3715 = vst [vmem:[#allocation1 + $0x5] ss:$9 sm:$0xff] %v2871_v19  ;;  %v1982_v19 = vsub.f32 1.5, %v1981_v1  ;;  %vm1994_vm5 = vweird.f32 %v1235_v22 }
 0x50d   : > { %3716 = vst [vmem:[#allocation1 + $0x6] ss:$9 sm:$0xff] %v2872_v42  ;;  %v2887_v42 = vperm.slane %v1977_v44, 5 }
 0x50e   : > { %3717 = vst [vmem:[#allocation1 + $0x7] ss:$9 sm:$0xff] %v2873_v52  ;;  %v1983_v33 = vmul.f32 %v5415_v50, %v1982_v19  ;;  %v1236_v52 = vmax.f32 %v6255_v45, 1e-24 }
 0x50f   : > { %4856 = vst [vmem:[%s5716_s30 + $0x1] sm:$0x1] %v4850_v17  ;;  %v4597_v0 = vpop.f32.mrf.mxu1 }
 0x510   : > { %v5417_v13 = vpop.eup %5416  ;;  %v1987_v49 = vsel %vm1986_vm4, %v5415_v50, %v1983_v33  ;;  %5418 = vrsqrt.f32 %v1236_v52  ;;  %vm2004_vm0 = vweird.f32 %v1236_v52 }
 0x511   : > { %v1989_v18 = vmul.f32 %v5417_v13, %v1235_v22  ;;  %v2890_v51 = vperm.slane %v1987_v49, 0  ;;  %v2891_v36 = vperm.slane %v1987_v49, 1  ;;  %v2892_v11 = vperm.slane %v1987_v49, 2 }
 0x512   : > { %v2893_v23 = vperm.slane %v1987_v49, 3  ;;  %v2896_v45 = vperm.slane %v1987_v49, 6  ;;  %vm1995_vm14 = vweird.f32 %v5417_v13  ;;  %5420 = vrsqrt.f32 %v1237_v28 }
 0x513   : > { %v1990_v62 = vmul.f32 %v5417_v13, %v1989_v18  ;;  %vm1996_vm1 = vmor %vm1994_vm5, %vm1995_vm14  ;;  %vm2014_vm14 = vweird.f32 %v1237_v28 }
 0x515   : > { %v3718_v34 = vld [vmem:[#allocation1] sm:$0xff]  ;;  %v1991_v17 = vmul.f32 0.5, %v1990_v62 }
 0x516   : > { %3719 = vst [vmem:[#allocation1] ss:$9 sm:$0xff] %v2874_v24  ;;  %4161 = vperm.xlu2 %5269, %v3718_v34   ;;  %v5419_v24 = vpop.eup %5418  ;;  %v2894_v34 = vperm.slane %v1987_v49, 4 }
 0x517   : > { %3720 = vst [vmem:[#allocation1 + $0x1] ss:$9 sm:$0xff] %v2875_v31  ;;  %v1992_v31 = vsub.f32 1.5, %v1991_v17  ;;  %v1999_v0 = vmul.f32 %v5419_v24, %v1236_v52  ;;  %vm2005_vm4 = vweird.f32 %v5419_v24 }
 0x518   : > { %3721 = vst [vmem:[#allocation1 + $0x2] ss:$9 sm:$0xff] %v2876_v55  ;;  %v2895_v55 = vperm.slane %v1987_v49, 5  ;;  %v5421_v44 = vpop.eup %5420  ;;  %vm2006_vm5 = vmor %vm2004_vm0, %vm2005_vm4 }
 0x519   : > { %3722 = vst [vmem:[#allocation1 + $0x3] ss:$9 sm:$0xff] %v2877_v46  ;;  %v2897_v46 = vperm.slane %v1987_v49, 7  ;;  %v1993_v50 = vmul.f32 %v5417_v13, %v1992_v31 }
 0x51a   : > { %3723 = vst [vmem:[#allocation1 + $0x4] ss:$9 sm:$0xff] %v2878_v4  ;;  %v2000_v4 = vmul.f32 %v5419_v24, %v1999_v0 }
 0x51b   : > { %3724 = vst [vmem:[#allocation1 + $0x5] ss:$9 sm:$0xff] %v2879_v40  ;;  %v1997_v40 = vsel %vm1996_vm1, %v5417_v13, %v1993_v50  ;;  %v1238_v13 = vmax.f32 %v6287_v9, 1e-24  ;;  %vm2015_vm1 = vweird.f32 %v5421_v44 }
 0x51c   : > { %3725 = vst [vmem:[#allocation1 + $0x6] ss:$9 sm:$0xff] %v2880_v63  ;;  %v2001_v63 = vmul.f32 0.5, %v2000_v4  ;;  %v2899_v60 = vperm.slane %v1997_v40, 1  ;;  %v2900_v3 = vperm.slane %v1997_v40, 2  ;;  %v2901_v22 = vperm.slane %v1997_v40, 3  ;;  %vm2016_vm0 = vmor %vm2014_vm14, %vm2015_vm1  ;;  %v4102_v4 = vpop.permute.xlu0 %4101 }
 0x51d   : > { %3726 = vst [vmem:[#allocation1 + $0x7] ss:$9 sm:$0xff] %v2881_v7  ;;  %v2898_v7 = vperm.slane %v1997_v40, 0  ;;  %v2902_v1 = vperm.slane %v1997_v40, 4  ;;  %v2904_v43 = vperm.slane %v1997_v40, 6  ;;  %5422 = vrsqrt.f32 %v1238_v13 }
 0x51e   : > { %vm2024_vm4 = vweird.f32 %v1238_v13 }
 0x523   : > { %v5423_v62 = vpop.eup %5422 }
 0x524   : > { %v3727_v32 = vld [vmem:[#allocation1] sm:$0xff] }
 0x525   : > { %3728 = vst [vmem:[#allocation1] ss:$9 sm:$0xff] %v2882_v57  ;;  %4164 = vperm.xlu0 %5267, %v3727_v32   ;;  %v2002_v57 = vsub.f32 1.5, %v2001_v63  ;;  %v2905_v32 = vperm.slane %v1997_v40, 7 }
 0x526   : > { %3729 = vst [vmem:[#allocation1 + $0x1] ss:$9 sm:$0xff] %v2883_v53  ;;  %v2903_v53 = vperm.slane %v1997_v40, 5 }
 0x527   : > { %3730 = vst [vmem:[#allocation1 + $0x2] ss:$9 sm:$0xff] %v2884_v48  ;;  %v2009_v48 = vmul.f32 %v5421_v44, %v1237_v28 }
 0x528   : > { %3731 = vst [vmem:[#allocation1 + $0x3] ss:$9 sm:$0xff] %v2885_v47  ;;  %v2003_v47 = vmul.f32 %v5419_v24, %v2002_v57  ;;  %v6724_v57 = vmax.f32 %v6294_v5, 1e-24 }
 0x529   : > { %3732 = vst [vmem:[#allocation1 + $0x4] ss:$9 sm:$0xff] %v2886_v16  ;;  %v2010_v16 = vmul.f32 %v5421_v44, %v2009_v48 }
 0x52a   : > { %3733 = vst [vmem:[#allocation1 + $0x5] ss:$9 sm:$0xff] %v2887_v42  ;;  %v2007_v19 = vsel %vm2006_vm5, %v5419_v24, %v2003_v47  ;;  %vm2025_vm5 = vweird.f32 %v5423_v62 }
 0x52b   : > { %3734 = vst [vmem:[#allocation1 + $0x6] ss:$9 sm:$0xff] %v2888_v29  ;;  %v2906_v42 = vperm.slane %v2007_v19, 0  ;;  %v2011_v29 = vmul.f32 0.5, %v2010_v16  ;;  %v2908_v33 = vperm.slane %v2007_v19, 2  ;;  %v2909_v52 = vperm.slane %v2007_v19, 3  ;;  %vm2026_vm14 = vmor %vm2024_vm4, %vm2025_vm5 }
 0x52c   : > { %3735 = vst [vmem:[#allocation1 + $0x7] ss:$9 sm:$0xff] %v2889_v56  ;;  %v2907_v56 = vperm.slane %v2007_v19, 1  ;;  %v2910_v49 = vperm.slane %v2007_v19, 4  ;;  %v2911_v17 = vperm.slane %v2007_v19, 5  ;;  %v2913_v9 = vperm.slane %v2007_v19, 7 }
 0x52d   : > { %vm2044_vm5 = vweird.f32 %v6724_v57 }
 0x533   : > { %v3736_v10 = vld [vmem:[#allocation1] sm:$0xff] }
 0x534   : > { %3737 = vst [vmem:[#allocation1] ss:$9 sm:$0xff] %v2890_v51  ;;  %4167 = vperm.xlu1 %5268, %v3736_v10   ;;  %v2012_v51 = vsub.f32 1.5, %v2011_v29  ;;  %v2912_v10 = vperm.slane %v2007_v19, 6 }
 0x535   : > { %3738 = vst [vmem:[#allocation1 + $0x1] ss:$9 sm:$0xff] %v2891_v36  ;;  %v2019_v36 = vmul.f32 %v5423_v62, %v1238_v13 }
 0x536   : > { %3739 = vst [vmem:[#allocation1 + $0x2] ss:$9 sm:$0xff] %v2892_v11  ;;  %v2013_v11 = vmul.f32 %v5421_v44, %v2012_v51 }
 0x537   : > { %3740 = vst [vmem:[#allocation1 + $0x3] ss:$9 sm:$0xff] %v2893_v23  ;;  %v6714_v23 = vmax.f32 %v6266_v15, 1e-24  ;;  %v2020_v24 = vmul.f32 %v5423_v62, %v2019_v36 }
 0x538   : > { %3741 = vst [vmem:[#allocation1 + $0x4] ss:$9 sm:$0xff] %v2894_v34  ;;  %v2017_v34 = vsel %vm2016_vm0, %v5421_v44, %v2013_v11  ;;  %v4105_v44 = vpop.permute.xlu2 %4104 }
 0x539   : > { %3742 = vst [vmem:[#allocation1 + $0x5] ss:$9 sm:$0xff] %v2895_v55  ;;  %5424 = vrsqrt.f32 %v6714_v23  ;;  %v2914_v31 = vperm.slane %v2017_v34, 0  ;;  %v2021_v55 = vmul.f32 0.5, %v2020_v24  ;;  %v2915_v0 = vperm.slane %v2017_v34, 1 }
 0x53a   : > { %3743 = vst [vmem:[#allocation1 + $0x6] ss:$9 sm:$0xff] %v2896_v45  ;;  %v2916_v50 = vperm.slane %v2017_v34, 2  ;;  %v2917_v28 = vperm.slane %v2017_v34, 3  ;;  %v2918_v40 = vperm.slane %v2017_v34, 4  ;;  %5426 = vrsqrt.f32 %v6724_v57 }
 0x53b   : > { %3744 = vst [vmem:[#allocation1 + $0x7] ss:$9 sm:$0xff] %v2897_v46  ;;  %v6717_v46 = vpop.permute.xlu1 %4098  ;;  %v2022_v63 = vsub.f32 1.5, %v2021_v55  ;;  %vm2034_vm1 = vweird.f32 %v6714_v23 }
 0x53f   : > { %v6719_v15 = vpop.eup %5424 }
 0x540   : > { %v4114_v19 = vpop.permute.xlu2 %4113  ;;  %vm2035_vm0 = vweird.f32 %v6719_v15 }
 0x541   : > { %vm2036_vm4 = vmor %vm2034_vm1, %vm2035_vm0  ;;  %vm6986_vm1 = vcmask 720512  }
 0x542   : > { %v3745_v54 = vld [vmem:[#allocation1] sm:$0xff] }
 0x543   : > { %3746 = vst [vmem:[#allocation1] ss:$9 sm:$0xff] %v2898_v7  ;;  %4170 = vperm.xlu2 %5269, %v3745_v54   ;;  %v2919_v7 = vperm.slane %v2017_v34, 5  ;;  %v2920_v54 = vperm.slane %v2017_v34, 6 }
 0x544   : > { %3747 = vst [vmem:[#allocation1 + $0x1] ss:$9 sm:$0xff] %v2899_v60  ;;  %v2029_v60 = vmul.f32 %v6719_v15, %v6714_v23  ;;  %v4369_v23 = vperm.slane %v4105_v44, %v6365_v12 }
 0x545   : > { %3748 = vst [vmem:[#allocation1 + $0x2] ss:$9 sm:$0xff] %v2900_v3  ;;  %v2921_v3 = vperm.slane %v2017_v34, 7 }
 0x546   : > { %3749 = vst [vmem:[#allocation1 + $0x3] ss:$9 sm:$0xff] %v2901_v22  ;;  %v2023_v22 = vmul.f32 %v5423_v62, %v2022_v63 }
 0x547   : > { %3750 = vst [vmem:[#allocation1 + $0x4] ss:$9 sm:$0xff] %v2902_v1  ;;  %v4108_v1 = vpop.permute.xlu1 %4107 }
 0x548   : > { %3751 = vst [vmem:[#allocation1 + $0x5] ss:$9 sm:$0xff] %v2903_v53  ;;  %v2030_v53 = vmul.f32 %v6719_v15, %v2029_v60  ;;  %v4371_v34 = vperm.slane %v4108_v1, %v6377_v41 }
 0x549   : > { %3752 = vst [vmem:[#allocation1 + $0x6] ss:$9 sm:$0xff] %v2904_v43  ;;  %v4111_v43 = vpop.permute.xlu0 %4110 }
 0x54a   : > { %3753 = vst [vmem:[#allocation1 + $0x7] ss:$9 sm:$0xff] %v2905_v32  ;;  %v2027_v32 = vsel %vm2026_vm14, %v5423_v62, %v2023_v22  ;;  %v2031_v48 = vmul.f32 0.5, %v2030_v53  ;;  %v4373_v55 = vperm.slane %v4111_v43, %v6374_v14  ;;  %v5185_v22 = vld [vmem:[%s5718_s3 + $0xe0] sm:$0xff] }
 0x54b   : > { %v2922_v47 = vperm.slane %v2027_v32, 0  ;;  %v2923_v16 = vperm.slane %v2027_v32, 1  ;;  %v2924_v29 = vperm.slane %v2027_v32, 2  ;;  %v2925_v5 = vperm.slane %v2027_v32, 3 }
 0x54c   : > { %v2926_v62 = vperm.slane %v2027_v32, 4  ;;  %v2927_v51 = vperm.slane %v2027_v32, 5  ;;  %v2929_v36 = vperm.slane %v2027_v32, 7 }
 0x551   : > { %v3754_v18 = vld [vmem:[#allocation1] sm:$0xff] }
 0x552   : > { %3755 = vst [vmem:[#allocation1] ss:$9 sm:$0xff] %v2906_v42  ;;  %4173 = vperm.xlu0 %5267, %v3754_v18   ;;  %v5188_v42 = vld [vmem:[%s5718_s3 + $0xf8] sm:$0xff]  ;;  %v4367_v18 = vperm.slane %v4102_v4, %v6360_v25 }
 0x553   : > { %3756 = vst [vmem:[#allocation1 + $0x1] ss:$9 sm:$0xff] %v2907_v56  ;;  %v4117_v56 = vpop.permute.xlu1 %4116  ;;  %4708 = vmatpush.bf16.msra.mxu3 %v5188_v42 }
 0x554   : > { %3757 = vst [vmem:[#allocation1 + $0x2] ss:$9 sm:$0xff] %v2908_v33  ;;  %v6730_v33 = vpop.eup %5426 }
 0x555   : > { %3758 = vst [vmem:[#allocation1 + $0x3] ss:$9 sm:$0xff] %v2909_v52  ;;  %v2032_v52 = vsub.f32 1.5, %v2031_v48  ;;  %v2039_v11 = vmul.f32 %v6730_v33, %v6724_v57  ;;  %vm2045_vm14 = vweird.f32 %v6730_v33 }
 0x556   : > { %3759 = vst [vmem:[#allocation1 + $0x4] ss:$9 sm:$0xff] %v2910_v49  ;;  %v4120_v49 = vpop.permute.xlu0 %4119  ;;  %vm2046_vm0 = vmor %vm2044_vm5, %vm2045_vm14 }
 0x557   : > { %3760 = vst [vmem:[#allocation1 + $0x5] ss:$9 sm:$0xff] %v2911_v17  ;;  %v4366_v17 = vperm.slane %v6717_v46, %v6356_v37  ;;  %v5186_v46 = vld [vmem:[%s5718_s3 + $0xe8] sm:$0xff]  ;;  %v2040_v4 = vmul.f32 %v6730_v33, %v2039_v11 }
 0x558   : > { %3761 = vst [vmem:[#allocation1 + $0x6] ss:$9 sm:$0xff] %v2912_v10  ;;  %v5187_v10 = vld [vmem:[%s5718_s3 + $0xf0] sm:$0xff] }
 0x559   : > { %3762 = vst [vmem:[#allocation1 + $0x7] ss:$9 sm:$0xff] %v2913_v9  ;;  %v2928_v9 = vperm.slane %v2027_v32, 6  ;;  %v4368_v24 = vsel %vm4246_vm2, %v4367_v18, %v4366_v17  ;;  %4709 = vmatpush.bf16.msra.mxu3 %v5187_v10  ;;  %v2041_v1 = vmul.f32 0.5, %v2040_v4  ;;  %v5182_v4 = vld [vmem:[%s5718_s3 + $0xc8] sm:$0xff] }
 0x55d   : > { %4710 = vmatpush.bf16.msra.mxu3 %v5186_v46  ;;  %v6780_v46 = vmax.f32 %v6277_v59, 1e-24 }
 0x55e   : > { %v4129_v60 = vpop.permute.xlu0 %4128 }
 0x560   : > { %v3763_v45 = vld [vmem:[#allocation1] sm:$0xff] }
 0x561   : > { %3764 = vst [vmem:[#allocation1] ss:$9 sm:$0xff] %v2914_v31  ;;  %4176 = vperm.xlu1 %5268, %v3763_v45   ;;  %v2033_v31 = vmul.f32 %v6719_v15, %v2032_v52  ;;  %v6745_v45 = vmax.f32 %v6298_v26, 1e-24  ;;  %v4375_v26 = vperm.slane %v4114_v19, %v6393_v35  ;;  %4711 = vmatpush.bf16.msra.mxu3 %v5185_v22  ;;  %v5184_v19 = vld [vmem:[%s5718_s3 + $0xd8] sm:$0xff] }
 0x562   : > { %3765 = vst [vmem:[#allocation1 + $0x1] ss:$9 sm:$0xff] %v2915_v0  ;;  %v4123_v0 = vpop.permute.xlu2 %4122 }
 0x563   : > { %3766 = vst [vmem:[#allocation1 + $0x2] ss:$9 sm:$0xff] %v2916_v50  ;;  %v4370_v50 = vsel %vm4250_vm3, %v4369_v23, %v4368_v24  ;;  %v2037_v63 = vsel %vm2036_vm4, %v6719_v15, %v2033_v31  ;;  %5428 = vrsqrt.f32 %v6745_v45  ;;  %v5183_v31 = vld [vmem:[%s5718_s3 + $0xd0] sm:$0xff]  ;;  %vm6987_vm4 = vcmask 786112  }
 0x564   : > { %3767 = vst [vmem:[#allocation1 + $0x3] ss:$9 sm:$0xff] %v2917_v28  ;;  %v4126_v28 = vpop.permute.xlu1 %4125  ;;  %v2930_v44 = vperm.slane %v2037_v63, 0  ;;  %v2931_v43 = vperm.slane %v2037_v63, 1  ;;  %v2932_v48 = vperm.slane %v2037_v63, 2  ;;  %v2933_v42 = vperm.slane %v2037_v63, 3 }
 0x565   : > { %3768 = vst [vmem:[#allocation1 + $0x4] ss:$9 sm:$0xff] %v2918_v40  ;;  %v4372_v40 = vsel %vm4254_vm6, %v4371_v34, %v4370_v50  ;;  %v2934_v52 = vperm.slane %v2037_v63, 4  ;;  %4712 = vmatpush.bf16.msra.mxu3 %v5184_v19  ;;  %v2936_v10 = vperm.slane %v2037_v63, 6  ;;  %5430 = vrsqrt.f32 %v6780_v46 }
 0x566   : > { %3769 = vst [vmem:[#allocation1 + $0x5] ss:$9 sm:$0xff] %v2919_v7  ;;  %v4374_v7 = vsel %vm4258_vm8, %v4373_v55, %v4372_v40  ;;  %v4138_v17 = vpop.permute.xlu0 %4137 }
 0x567   : > { %3770 = vst [vmem:[#allocation1 + $0x6] ss:$9 sm:$0xff] %v2920_v54  ;;  %v4377_v54 = vperm.slane %v4117_v56, %v6396_v39  ;;  %v4376_v53 = vsel %vm4262_vm9, %v4375_v26, %v4374_v7  ;;  %v4385_v56 = vperm.slane %v4129_v60, %v6426_v27  ;;  %v5181_v26 = vld [vmem:[%s5718_s3 + $0xc0] sm:$0xff] }
 0x568   : > { %3771 = vst [vmem:[#allocation1 + $0x7] ss:$9 sm:$0xff] %v2921_v3  ;;  %v4379_v3 = vperm.slane %v4120_v49, %v6408_v20  ;;  %v2935_v49 = vperm.slane %v2037_v63, 5 }
 0x569   : > { %v4378_v32 = vsel %vm4266_vm10, %v4377_v54, %v4376_v53  ;;  %v6765_v18 = vpop.eup %5428  ;;  %4713 = vmatpush.bf16.msra.mxu3 %v5183_v31 }
 0x56a   : > { %v2049_v11 = vmul.f32 %v6765_v18, %v6745_v45  ;;  %vm2055_vm5 = vweird.f32 %v6765_v18 }
 0x56c   : > { %v2050_v40 = vmul.f32 %v6765_v18, %v2049_v11 }
 0x56d   : > { %4714 = vmatpush.bf16.msra.mxu3 %v5182_v4 }
 0x56f   : > { %v3772_v13 = vld [vmem:[#allocation1] sm:$0xff] }
 0x570   : > { %3773 = vst [vmem:[#allocation1] ss:$9 sm:$0xff] %v2922_v47  ;;  %4179 = vperm.xlu2 %5269, %v3772_v13   ;;  %v4380_v47 = vsel %vm4270_vm11, %v4379_v3, %v4378_v32  ;;  %v4132_v13 = vpop.permute.xlu2 %4131  ;;  %v1159_v3 = vld [vmem:[%s5720_s4 + $0x3] sm:$0x1] }
 0x571   : > { %3774 = vst [vmem:[#allocation1 + $0x1] ss:$9 sm:$0xff] %v2923_v16  ;;  %v4383_v16 = vperm.slane %v4126_v28, %v6418_v6  ;;  %v4387_v55 = vperm.slane %v4132_v13, %v6435_v30  ;;  %4715 = vmatpush.bf16.msra.mxu3 %v5181_v26  ;;  %v5431_v13 = vpop.eup %5430 }
 0x572   : > { %3775 = vst [vmem:[#allocation1 + $0x2] ss:$9 sm:$0xff] %v2924_v29  ;;  %v4381_v29 = vperm.slane %v4123_v0, %v6413_v58  ;;  %v4391_v0 = vperm.slane %v4138_v17, %v6455_v8  ;;  %v1243_v17 = vmax.f32 %v6302_v2, 1e-24 }
 0x573   : > { %3776 = vst [vmem:[#allocation1 + $0x3] ss:$9 sm:$0xff] %v2925_v5  ;;  %v4135_v5 = vpop.permute.xlu1 %4134 }
 0x574   : > { %3777 = vst [vmem:[#allocation1 + $0x4] ss:$9 sm:$0xff] %v2926_v62  ;;  %v2042_v62 = vsub.f32 1.5, %v2041_v1  ;;  %v4389_v34 = vperm.slane %v4135_v5, %v6448_v38  ;;  %5432 = vrsqrt.f32 %v1243_v17 }
 0x575   : > { %3778 = vst [vmem:[#allocation1 + $0x5] ss:$9 sm:$0xff] %v2927_v51  ;;  %v4382_v51 = vsel %vm4274_vm12, %v4381_v29, %v4380_v47  ;;  %v4845_v47 = vld [vmem:[%s5716_s30 + $0x2] sm:$0x1] }
 0x576   : > { %3779 = vst [vmem:[#allocation1 + $0x6] ss:$9 sm:$0xff] %v2928_v9  ;;  %v4384_v9 = vsel %vm6964_vm15, %v4383_v16, %v4382_v51  ;;  %v2043_v23 = vmul.f32 %v6730_v33, %v2042_v62  ;;  %vm6989_vm15 = vcmask 917312   ;;  %v2059_v62 = vmul.f32 %v5431_v13, %v6780_v46 }
 0x577   : > { %3780 = vst [vmem:[#allocation1 + $0x7] ss:$9 sm:$0xff] %v2929_v36  ;;  %v2937_v36 = vperm.slane %v2037_v63, 7  ;;  %v4386_v24 = vsel %vm6986_vm1, %v4385_v56, %v4384_v9  ;;  %vm6988_vm1 = vcmask 851712  }
 0x578   : > { %v4141_v50 = vpop.permute.xlu2 %4140  ;;  %v4388_v28 = vsel %vm6987_vm4, %v4387_v55, %v4386_v24  ;;  %v2047_v54 = vsel %vm2046_vm0, %v6730_v33, %v2043_v23  ;;  %vm2064_vm0 = vweird.f32 %v6780_v46  ;;  %vm2065_vm4 = vweird.f32 %v5431_v13 }
 0x579   : > { %v4390_v63 = vsel %vm6988_vm1, %v4389_v34, %v4388_v28  ;;  %v4393_v57 = vperm.slane %v4141_v50, %v6462_v61  ;;  %v2938_v22 = vperm.slane %v2047_v54, 0  ;;  %v2942_v16 = vperm.slane %v2047_v54, 4  ;;  %vm2066_vm1 = vmor %vm2064_vm0, %vm2065_vm4 }
 0x57a   : > { %v4392_v59 = vsel %vm6989_vm15, %v4391_v0, %v4390_v63  ;;  %v2943_v56 = vperm.slane %v2047_v54, 5  ;;  %v2944_v5 = vperm.slane %v2047_v54, 6  ;;  %vm2054_vm15 = vweird.f32 %v6745_v45  ;;  %v5433_v55 = vpop.eup %5432  ;;  %v6990_v63 = vld [vmem:[#allocation7_spill] sm:$0xff] }
 0x57b   : > { %v4144_v7 = vpop.permute.xlu1 %4143  ;;  %v4394_v1 = vsel %vm4298_vm13, %v4393_v57, %v4392_v59  ;;  %vm2056_vm14 = vmor %vm2054_vm15, %vm2055_vm5  ;;  %v2069_v4 = vmul.f32 %v5433_v55, %v1243_v17  ;;  %vm2074_vm15 = vweird.f32 %v1243_v17  ;;  %vm2075_vm5 = vweird.f32 %v5433_v55 }
 0x57c   : > { %v4395_v60 = vperm.slane %v4144_v7, %v6468_v21  ;;  %v1244_v7 = vmax.f32 %v6990_v63, 1e-24 }
 0x57e   : > { %v3781_v15 = vld [vmem:[#allocation1] sm:$0xff]  ;;  %v4396_v33 = vsel %vm4302_vm7, %v4395_v60, %v4394_v1  ;;  %5434 = vrsqrt.f32 %v1244_v7  ;;  %vm2084_vm0 = vweird.f32 %v1244_v7 }
 0x57f   : > { %3782 = vst [vmem:[#allocation1] ss:$9 sm:$0xff] %v2930_v44  ;;  %4182 = vperm.xlu0 %5267, %v3781_v15   ;;  %v2051_v44 = vmul.f32 0.5, %v2050_v40  ;;  %v2940_v15 = vperm.slane %v2047_v54, 2  ;;  %v4468_v32 = vmul.f32 %v4396_v33, %v1159_v3 }
 0x580   : > { %3783 = vst [vmem:[#allocation1 + $0x1] ss:$9 sm:$0xff] %v2931_v43  ;;  %v2939_v43 = vperm.slane %v2047_v54, 1 }
 0x581   : > { %3784 = vst [vmem:[#allocation1 + $0x2] ss:$9 sm:$0xff] %v2932_v48  ;;  %v2941_v48 = vperm.slane %v2047_v54, 3  ;;  %v2052_v19 = vsub.f32 1.5, %v2051_v44  ;;  %v4474_v29 = vpack.c.bf16 %v4468_v32, %v4468_v32 }
 0x582   : > { %3785 = vst [vmem:[#allocation1 + $0x3] ss:$9 sm:$0xff] %v2933_v42 }
 0x583   : > { %3786 = vst [vmem:[#allocation1 + $0x4] ss:$9 sm:$0xff] %v2934_v52  ;;  %4716 = vmatmul.bf16.vlgmr.msra.gmra.mxu3 %v4474_v29  ;;  %v2053_v51 = vmul.f32 %v6765_v18, %v2052_v19 }
 0x584   : > { %3787 = vst [vmem:[#allocation1 + $0x5] ss:$9 sm:$0xff] %v2935_v49  ;;  %v2945_v49 = vperm.slane %v2047_v54, 7  ;;  %v2070_v54 = vmul.f32 %v5433_v55, %v2069_v4  ;;  %v5435_v44 = vpop.eup %5434 }
 0x585   : > { %3788 = vst [vmem:[#allocation1 + $0x6] ss:$9 sm:$0xff] %v2936_v10  ;;  %v2060_v10 = vmul.f32 %v5431_v13, %v2059_v62  ;;  %v2057_v9 = vsel %vm2056_vm14, %v6765_v18, %v2053_v51  ;;  %v2079_v32 = vmul.f32 %v5435_v44, %v1244_v7  ;;  %vm2076_vm14 = vmor %vm2074_vm15, %vm2075_vm5  ;;  %vm2085_vm4 = vweird.f32 %v5435_v44 }
 0x586   : > { %3789 = vst [vmem:[#allocation1 + $0x7] ss:$9 sm:$0xff] %v2937_v36  ;;  %v4656_v42 = vpop.f32.mrf.mxu2  ;;  %v2946_v11 = vperm.slane %v2057_v9, 0  ;;  %v2947_v34 = vperm.slane %v2057_v9, 1  ;;  %v2948_v31 = vperm.slane %v2057_v9, 2  ;;  %v2949_v23 = vperm.slane %v2057_v9, 3 }
 0x587   : > { %v4851_v52 = vadd.f32 %v4845_v47, %v4656_v42  ;;  %v2061_v36 = vmul.f32 0.5, %v2060_v10  ;;  %v2950_v50 = vperm.slane %v2057_v9, 4  ;;  %v2951_v2 = vperm.slane %v2057_v9, 5  ;;  %v6991_v47 = vld [vmem:[#allocation4_spill] sm:$0xff] }
 0x588   : > { %v2952_v18 = vperm.slane %v2057_v9, 6  ;;  %v2953_v28 = vperm.slane %v2057_v9, 7  ;;  %v2071_v60 = vmul.f32 0.5, %v2070_v54 }
 0x589   : > { %4857 = vst [vmem:[%s5716_s30 + $0x2] sm:$0x1] %v4851_v52  ;;  %v2062_v0 = vsub.f32 1.5, %v2061_v36 }
 0x58b   : > { %v2063_v40 = vmul.f32 %v5431_v13, %v2062_v0 }
 0x58d   : > { %v3790_v53 = vld [vmem:[#allocation1] sm:$0xff]  ;;  %v2067_v59 = vsel %vm2066_vm1, %v5431_v13, %v2063_v40  ;;  %v1245_v13 = vmax.f32 %v6991_v47, 1e-24  ;;  %vm2086_vm1 = vmor %vm2084_vm0, %vm2085_vm4 }
 0x58e   : > { %3791 = vst [vmem:[#allocation1] ss:$9 sm:$0xff] %v2938_v22  ;;  %4185 = vperm.xlu1 %5268, %v3790_v53   ;;  %v4658_v45 = vpop.f32.mrf.mxu2  ;;  %v2954_v57 = vperm.slane %v2067_v59, 0  ;;  %v2955_v26 = vperm.slane %v2067_v59, 1  ;;  %v2956_v46 = vperm.slane %v2067_v59, 2  ;;  %v2957_v22 = vperm.slane %v2067_v59, 3 }
 0x58f   : > { %3792 = vst [vmem:[#allocation1 + $0x1] ss:$9 sm:$0xff] %v2939_v43  ;;  %v2958_v1 = vperm.slane %v2067_v59, 4  ;;  %v2072_v53 = vsub.f32 1.5, %v2071_v60  ;;  %v2959_v43 = vperm.slane %v2067_v59, 5  ;;  %v2960_v33 = vperm.slane %v2067_v59, 6 }
 0x590   : > { %3793 = vst [vmem:[#allocation1 + $0x2] ss:$9 sm:$0xff] %v2940_v15  ;;  %v2961_v15 = vperm.slane %v2067_v59, 7  ;;  %5436 = vrsqrt.f32 %v1245_v13  ;;  %vm2094_vm15 = vweird.f32 %v1245_v13 }
 0x591   : > { %3794 = vst [vmem:[#allocation1 + $0x3] ss:$9 sm:$0xff] %v2941_v48  ;;  %v2073_v48 = vmul.f32 %v5433_v55, %v2072_v53 }
 0x592   : > { %3795 = vst [vmem:[#allocation1 + $0x4] ss:$9 sm:$0xff] %v2942_v16  ;;  %v2080_v16 = vmul.f32 %v5435_v44, %v2079_v32 }
 0x593   : > { %3796 = vst [vmem:[#allocation1 + $0x5] ss:$9 sm:$0xff] %v2943_v56  ;;  %v2077_v19 = vsel %vm2076_vm14, %v5433_v55, %v2073_v48 }
 0x594   : > { %3797 = vst [vmem:[#allocation1 + $0x6] ss:$9 sm:$0xff] %v2944_v5  ;;  %v2962_v42 = vperm.slane %v2077_v19, 0  ;;  %v2081_v29 = vmul.f32 0.5, %v2080_v16  ;;  %v2963_v56 = vperm.slane %v2077_v19, 1  ;;  %v2964_v52 = vperm.slane %v2077_v19, 2 }
 0x595   : > { %3798 = vst [vmem:[#allocation1 + $0x7] ss:$9 sm:$0xff] %v2945_v49  ;;  %v2965_v62 = vperm.slane %v2077_v19, 3  ;;  %v2966_v51 = vperm.slane %v2077_v19, 4  ;;  %v2967_v10 = vperm.slane %v2077_v19, 5  ;;  %v2968_v9 = vperm.slane %v2077_v19, 6 }
 0x596   : > { %v5437_v49 = vpop.eup %5436  ;;  %v2082_v17 = vsub.f32 1.5, %v2081_v29  ;;  %v2969_v36 = vperm.slane %v2077_v19, 7 }
 0x597   : > { %v2089_v45 = vmul.f32 %v5437_v49, %v1245_v13  ;;  %vm2095_vm5 = vweird.f32 %v5437_v49 }
 0x598   : > { %vm2096_vm14 = vmor %vm2094_vm15, %vm2095_vm5 }
 0x59c   : > { %v3799_v24 = vld [vmem:[#allocation1] sm:$0xff] }
 0x59d   : > { %3800 = vst [vmem:[#allocation1] ss:$9 sm:$0xff] %v2946_v11  ;;  %4188 = vperm.xlu2 %5269, %v3799_v24   ;;  %v2083_v11 = vmul.f32 %v5435_v44, %v2082_v17  ;;  %v6992_v24 = vld [vmem:[#allocation8_spill] sm:$0xff] }
 0x59e   : > { %3801 = vst [vmem:[#allocation1 + $0x1] ss:$9 sm:$0xff] %v2947_v34  ;;  %v1246_v34 = vmax.f32 %v6992_v24, 1e-24 }
 0x59f   : > { %3802 = vst [vmem:[#allocation1 + $0x2] ss:$9 sm:$0xff] %v2948_v31  ;;  %v2090_v31 = vmul.f32 %v5437_v49, %v2089_v45 }
 0x5a0   : > { %3803 = vst [vmem:[#allocation1 + $0x3] ss:$9 sm:$0xff] %v2949_v23  ;;  %v2087_v23 = vsel %vm2086_vm1, %v5435_v44, %v2083_v11  ;;  %5438 = vrsqrt.f32 %v1246_v34  ;;  %vm2104_vm0 = vweird.f32 %v1246_v34 }
 0x5a1   : > { %3804 = vst [vmem:[#allocation1 + $0x4] ss:$9 sm:$0xff] %v2950_v50  ;;  %v2091_v55 = vmul.f32 0.5, %v2090_v31  ;;  %v2970_v0 = vperm.slane %v2087_v23, 0  ;;  %v2971_v50 = vperm.slane %v2087_v23, 1  ;;  %v2974_v63 = vperm.slane %v2087_v23, 4 }
 0x5a2   : > { %3805 = vst [vmem:[#allocation1 + $0x5] ss:$9 sm:$0xff] %v2951_v2  ;;  %v2975_v7 = vperm.slane %v2087_v23, 5  ;;  %v2976_v54 = vperm.slane %v2087_v23, 6  ;;  %v2977_v59 = vperm.slane %v2087_v23, 7 }
 0x5a3   : > { %3806 = vst [vmem:[#allocation1 + $0x6] ss:$9 sm:$0xff] %v2952_v18  ;;  %v2972_v18 = vperm.slane %v2087_v23, 2  ;;  %v2092_v40 = vsub.f32 1.5, %v2091_v55 }
 0x5a4   : > { %3807 = vst [vmem:[#allocation1 + $0x7] ss:$9 sm:$0xff] %v2953_v28  ;;  %v2973_v28 = vperm.slane %v2087_v23, 3 }
 0x5a5   : > { %v2093_v60 = vmul.f32 %v5437_v49, %v2092_v40 }
 0x5a6   : > { %v5439_v4 = vpop.eup %5438 }
 0x5a7   : > { %v2097_v44 = vsel %vm2096_vm14, %v5437_v49, %v2093_v60  ;;  %vm2105_vm4 = vweird.f32 %v5439_v4 }
 0x5a8   : > { %v2981_v32 = vperm.slane %v2097_v44, 3  ;;  %v2982_v47 = vperm.slane %v2097_v44, 4  ;;  %v2983_v16 = vperm.slane %v2097_v44, 5  ;;  %v2984_v19 = vperm.slane %v2097_v44, 6  ;;  %vm2106_vm1 = vmor %vm2104_vm0, %vm2105_vm4 }
 0x5ab   : > { %v6807_v3 = vld [vmem:[#allocation1] sm:$0xff] }
 0x5ac   : > { %3809 = vst [vmem:[#allocation1] ss:$9 sm:$0xff] %v2954_v57  ;;  %v2099_v57 = vmul.f32 %v5439_v4, %v1246_v34 }
 0x5ad   : > { %3810 = vst [vmem:[#allocation1 + $0x1] ss:$9 sm:$0xff] %v2955_v26  ;;  %v6993_v26 = vld [vmem:[#allocation9_spill] sm:$0xff] }
 0x5ae   : > { %3811 = vst [vmem:[#allocation1 + $0x2] ss:$9 sm:$0xff] %v2956_v46  ;;  %v1247_v46 = vmax.f32 %v6993_v26, 1e-24 }
 0x5af   : > { %3812 = vst [vmem:[#allocation1 + $0x3] ss:$9 sm:$0xff] %v2957_v22  ;;  %v2100_v22 = vmul.f32 %v5439_v4, %v2099_v57 }
 0x5b0   : > { %3813 = vst [vmem:[#allocation1 + $0x4] ss:$9 sm:$0xff] %v2958_v1  ;;  %5440 = vrsqrt.f32 %v1247_v46  ;;  %v2978_v1 = vperm.slane %v2097_v44, 0  ;;  %vm2114_vm15 = vweird.f32 %v1247_v46 }
 0x5b1   : > { %3814 = vst [vmem:[#allocation1 + $0x5] ss:$9 sm:$0xff] %v2959_v43  ;;  %v2101_v53 = vmul.f32 0.5, %v2100_v22  ;;  %v2979_v43 = vperm.slane %v2097_v44, 1 }
 0x5b2   : > { %3815 = vst [vmem:[#allocation1 + $0x6] ss:$9 sm:$0xff] %v2960_v33 }
 0x5b3   : > { %3816 = vst [vmem:[#allocation1 + $0x7] ss:$9 sm:$0xff] %v2961_v15  ;;  %v2980_v15 = vperm.slane %v2097_v44, 2  ;;  %v2102_v13 = vsub.f32 1.5, %v2101_v53 }
 0x5b6   : > { %v5441_v48 = vpop.eup %5440 }
 0x5b7   : > { %v2109_v29 = vmul.f32 %v5441_v48, %v1247_v46  ;;  %vm2115_vm5 = vweird.f32 %v5441_v48 }
 0x5b8   : > { %vm2116_vm14 = vmor %vm2114_vm15, %vm2115_vm5 }
 0x5ba   : > { %v3817_v5 = vld [vmem:[#allocation1] sm:$0xff] }
 0x5bb   : > { %4194 = vperm.xlu1 %5268, %v3817_v5   ;;  %3818 = vst [vmem:[#allocation1] ss:$9 sm:$0xff] %v2962_v42  ;;  %v2985_v42 = vperm.slane %v2097_v44, 7  ;;  %v6994_v5 = vld [vmem:[#allocation5_spill] sm:$0xff] }
 0x5bc   : > { %3819 = vst [vmem:[#allocation1 + $0x1] ss:$9 sm:$0xff] %v2963_v56  ;;  %v2103_v56 = vmul.f32 %v5439_v4, %v2102_v13 }
 0x5bd   : > { %3820 = vst [vmem:[#allocation1 + $0x2] ss:$9 sm:$0xff] %v2964_v52  ;;  %v1248_v52 = vmax.f32 %v6994_v5, 1e-24 }
 0x5be   : > { %3821 = vst [vmem:[#allocation1 + $0x3] ss:$9 sm:$0xff] %v2965_v62  ;;  %v2110_v62 = vmul.f32 %v5441_v48, %v2109_v29  ;;  %v2107_v49 = vsel %vm2106_vm1, %v5439_v4, %v2103_v56 }
 0x5bf   : > { %3822 = vst [vmem:[#allocation1 + $0x4] ss:$9 sm:$0xff] %v2966_v51  ;;  %5442 = vrsqrt.f32 %v1248_v52  ;;  %v2986_v51 = vperm.slane %v2107_v49, 0  ;;  %v2988_v45 = vperm.slane %v2107_v49, 2  ;;  %v2990_v24 = vperm.slane %v2107_v49, 4 }
 0x5c0   : > { %3823 = vst [vmem:[#allocation1 + $0x5] ss:$9 sm:$0xff] %v2967_v10  ;;  %v2111_v17 = vmul.f32 0.5, %v2110_v62  ;;  %v2987_v10 = vperm.slane %v2107_v49, 1  ;;  %v2991_v31 = vperm.slane %v2107_v49, 5  ;;  %v2992_v23 = vperm.slane %v2107_v49, 6 }
 0x5c1   : > { %3824 = vst [vmem:[#allocation1 + $0x6] ss:$9 sm:$0xff] %v2968_v9  ;;  %vm2124_vm0 = vweird.f32 %v1248_v52 }
 0x5c2   : > { %3825 = vst [vmem:[#allocation1 + $0x7] ss:$9 sm:$0xff] %v2969_v36  ;;  %v2989_v36 = vperm.slane %v2107_v49, 3  ;;  %v2112_v34 = vsub.f32 1.5, %v2111_v17 }
 0x5c5   : > { %v5443_v11 = vpop.eup %5442 }
 0x5c6   : > { %v2119_v55 = vmul.f32 %v5443_v11, %v1248_v52  ;;  %vm2125_vm4 = vweird.f32 %v5443_v11 }
 0x5c7   : > { %vm2126_vm1 = vmor %vm2124_vm0, %vm2125_vm4 }
 0x5c9   : > { %v3826_v2 = vld [vmem:[#allocation1] sm:$0xff] }
 0x5ca   : > { %4197 = vperm.xlu0 %5267, %v3826_v2   ;;  %3827 = vst [vmem:[#allocation1] ss:$9 sm:$0xff] %v2970_v0  ;;  %v2993_v0 = vperm.slane %v2107_v49, 7  ;;  %v6995_v2 = vld [vmem:[#allocation12_spill] sm:$0xff] }
 0x5cb   : > { %3828 = vst [vmem:[#allocation1 + $0x1] ss:$9 sm:$0xff] %v2971_v50  ;;  %v2113_v50 = vmul.f32 %v5441_v48, %v2112_v34 }
 0x5cc   : > { %3829 = vst [vmem:[#allocation1 + $0x2] ss:$9 sm:$0xff] %v2972_v18  ;;  %v1249_v18 = vmax.f32 %v6995_v2, 1e-24 }
 0x5cd   : > { %3830 = vst [vmem:[#allocation1 + $0x3] ss:$9 sm:$0xff] %v2973_v28  ;;  %v2120_v28 = vmul.f32 %v5443_v11, %v2119_v55  ;;  %v2117_v4 = vsel %vm2116_vm14, %v5441_v48, %v2113_v50 }
 0x5ce   : > { %3831 = vst [vmem:[#allocation1 + $0x4] ss:$9 sm:$0xff] %v2974_v63  ;;  %5444 = vrsqrt.f32 %v1249_v18  ;;  %v2994_v63 = vperm.slane %v2117_v4, 0  ;;  %v2997_v57 = vperm.slane %v2117_v4, 3  ;;  %v2998_v46 = vperm.slane %v2117_v4, 4 }
 0x5cf   : > { %3832 = vst [vmem:[#allocation1 + $0x5] ss:$9 sm:$0xff] %v2975_v7  ;;  %v2121_v40 = vmul.f32 0.5, %v2120_v28  ;;  %v2995_v7 = vperm.slane %v2117_v4, 1  ;;  %v2999_v22 = vperm.slane %v2117_v4, 5  ;;  %v3000_v44 = vperm.slane %v2117_v4, 6 }
 0x5d0   : > { %3833 = vst [vmem:[#allocation1 + $0x6] ss:$9 sm:$0xff] %v2976_v54  ;;  %vm2134_vm15 = vweird.f32 %v1249_v18 }
 0x5d1   : > { %3834 = vst [vmem:[#allocation1 + $0x7] ss:$9 sm:$0xff] %v2977_v59  ;;  %v2996_v59 = vperm.slane %v2117_v4, 2  ;;  %v2122_v26 = vsub.f32 1.5, %v2121_v40 }
 0x5d4   : > { %v5445_v60 = vpop.eup %5444 }
 0x5d5   : > { %v2129_v53 = vmul.f32 %v5445_v60, %v1249_v18  ;;  %vm2135_vm5 = vweird.f32 %v5445_v60 }
 0x5d6   : > { %vm2136_vm14 = vmor %vm2134_vm15, %vm2135_vm5 }
 0x5d8   : > { %v3835_v33 = vld [vmem:[#allocation1] sm:$0xff] }
 0x5d9   : > { %4200 = vperm.xlu1 %5268, %v3835_v33   ;;  %3836 = vst [vmem:[#allocation1] ss:$9 sm:$0xff] %v2978_v1  ;;  %v3001_v1 = vperm.slane %v2117_v4, 7  ;;  %v6996_v33 = vld [vmem:[#allocation11_spill] sm:$0xff] }
 0x5da   : > { %3837 = vst [vmem:[#allocation1 + $0x1] ss:$9 sm:$0xff] %v2979_v43  ;;  %v2123_v43 = vmul.f32 %v5443_v11, %v2122_v26 }
 0x5db   : > { %3838 = vst [vmem:[#allocation1 + $0x2] ss:$9 sm:$0xff] %v2980_v15  ;;  %v1250_v15 = vmax.f32 %v6996_v33, 1e-24 }
 0x5dc   : > { %3839 = vst [vmem:[#allocation1 + $0x3] ss:$9 sm:$0xff] %v2981_v32  ;;  %v2130_v32 = vmul.f32 %v5445_v60, %v2129_v53  ;;  %v2127_v48 = vsel %vm2126_vm1, %v5443_v11, %v2123_v43 }
 0x5dd   : > { %3840 = vst [vmem:[#allocation1 + $0x4] ss:$9 sm:$0xff] %v2982_v47  ;;  %5446 = vrsqrt.f32 %v1250_v15  ;;  %v3002_v47 = vperm.slane %v2127_v48, 0  ;;  %v3005_v29 = vperm.slane %v2127_v48, 3  ;;  %v3006_v5 = vperm.slane %v2127_v48, 4 }
 0x5de   : > { %3841 = vst [vmem:[#allocation1 + $0x5] ss:$9 sm:$0xff] %v2983_v16  ;;  %v2131_v13 = vmul.f32 0.5, %v2130_v32  ;;  %v3003_v16 = vperm.slane %v2127_v48, 1  ;;  %v3007_v62 = vperm.slane %v2127_v48, 5  ;;  %v3008_v49 = vperm.slane %v2127_v48, 6 }
 0x5df   : > { %3842 = vst [vmem:[#allocation1 + $0x6] ss:$9 sm:$0xff] %v2984_v19  ;;  %vm2144_vm0 = vweird.f32 %v1250_v15 }
 0x5e0   : > { %3843 = vst [vmem:[#allocation1 + $0x7] ss:$9 sm:$0xff] %v2985_v42  ;;  %v3004_v42 = vperm.slane %v2127_v48, 2  ;;  %v2132_v52 = vsub.f32 1.5, %v2131_v13 }
 0x5e3   : > { %v5447_v56 = vpop.eup %5446 }
 0x5e4   : > { %v2139_v17 = vmul.f32 %v5447_v56, %v1250_v15  ;;  %vm2145_vm4 = vweird.f32 %v5447_v56 }
 0x5e5   : > { %vm2146_vm1 = vmor %vm2144_vm0, %vm2145_vm4 }
 0x5e7   : > { %v3844_v9 = vld [vmem:[#allocation1] sm:$0xff] }
 0x5e8   : > { %4203 = vperm.xlu2 %5269, %v3844_v9   ;;  %3845 = vst [vmem:[#allocation1] ss:$9 sm:$0xff] %v2986_v51  ;;  %v3009_v51 = vperm.slane %v2127_v48, 7  ;;  %v6997_v9 = vld [vmem:[#allocation6_spill] sm:$0xff] }
 0x5e9   : > { %3846 = vst [vmem:[#allocation1 + $0x1] ss:$9 sm:$0xff] %v2987_v10  ;;  %v2133_v10 = vmul.f32 %v5445_v60, %v2132_v52 }
 0x5ea   : > { %3847 = vst [vmem:[#allocation1 + $0x2] ss:$9 sm:$0xff] %v2988_v45  ;;  %v1251_v45 = vmax.f32 %v6997_v9, 1e-24 }
 0x5eb   : > { %3848 = vst [vmem:[#allocation1 + $0x3] ss:$9 sm:$0xff] %v2989_v36  ;;  %v2140_v36 = vmul.f32 %v5447_v56, %v2139_v17  ;;  %v2137_v11 = vsel %vm2136_vm14, %v5445_v60, %v2133_v10 }
 0x5ec   : > { %3849 = vst [vmem:[#allocation1 + $0x4] ss:$9 sm:$0xff] %v2990_v24  ;;  %5448 = vrsqrt.f32 %v1251_v45  ;;  %v3010_v24 = vperm.slane %v2137_v11, 0  ;;  %v3012_v55 = vperm.slane %v2137_v11, 2  ;;  %v3014_v2 = vperm.slane %v2137_v11, 4 }
 0x5ed   : > { %3850 = vst [vmem:[#allocation1 + $0x5] ss:$9 sm:$0xff] %v2991_v31  ;;  %v2141_v34 = vmul.f32 0.5, %v2140_v36  ;;  %v3011_v31 = vperm.slane %v2137_v11, 1  ;;  %v3015_v28 = vperm.slane %v2137_v11, 5  ;;  %v3016_v4 = vperm.slane %v2137_v11, 6 }
 0x5ee   : > { %3851 = vst [vmem:[#allocation1 + $0x6] ss:$9 sm:$0xff] %v2992_v23  ;;  %vm2154_vm15 = vweird.f32 %v1251_v45 }
 0x5ef   : > { %3852 = vst [vmem:[#allocation1 + $0x7] ss:$9 sm:$0xff] %v2993_v0  ;;  %v3013_v0 = vperm.slane %v2137_v11, 3  ;;  %v2142_v18 = vsub.f32 1.5, %v2141_v34 }
 0x5f2   : > { %v5449_v50 = vpop.eup %5448 }
 0x5f3   : > { %v2149_v40 = vmul.f32 %v5449_v50, %v1251_v45  ;;  %vm2155_vm5 = vweird.f32 %v5449_v50 }
 0x5f4   : > { %vm2156_vm14 = vmor %vm2154_vm15, %vm2155_vm5 }
 0x5f6   : > { %v3853_v54 = vld [vmem:[#allocation1] sm:$0xff] }
 0x5f7   : > { %4206 = vperm.xlu0 %5267, %v3853_v54   ;;  %3854 = vst [vmem:[#allocation1] ss:$9 sm:$0xff] %v2994_v63  ;;  %v3017_v63 = vperm.slane %v2137_v11, 7  ;;  %v6998_v54 = vld [vmem:[#allocation15_spill] sm:$0xff] }
 0x5f8   : > { %3855 = vst [vmem:[#allocation1 + $0x1] ss:$9 sm:$0xff] %v2995_v7  ;;  %v2143_v7 = vmul.f32 %v5447_v56, %v2142_v18 }
 0x5f9   : > { %3856 = vst [vmem:[#allocation1 + $0x2] ss:$9 sm:$0xff] %v2996_v59  ;;  %v1252_v59 = vmax.f32 %v6998_v54, 1e-24 }
 0x5fa   : > { %3857 = vst [vmem:[#allocation1 + $0x3] ss:$9 sm:$0xff] %v2997_v57  ;;  %v2150_v57 = vmul.f32 %v5449_v50, %v2149_v40  ;;  %v2147_v60 = vsel %vm2146_vm1, %v5447_v56, %v2143_v7 }
 0x5fb   : > { %3858 = vst [vmem:[#allocation1 + $0x4] ss:$9 sm:$0xff] %v2998_v46  ;;  %5450 = vrsqrt.f32 %v1252_v59  ;;  %v3018_v46 = vperm.slane %v2147_v60, 0  ;;  %v3021_v53 = vperm.slane %v2147_v60, 3  ;;  %v3022_v15 = vperm.slane %v2147_v60, 4 }
 0x5fc   : > { %3859 = vst [vmem:[#allocation1 + $0x5] ss:$9 sm:$0xff] %v2999_v22  ;;  %v2151_v26 = vmul.f32 0.5, %v2150_v57  ;;  %v3019_v22 = vperm.slane %v2147_v60, 1  ;;  %v3023_v32 = vperm.slane %v2147_v60, 5  ;;  %v3024_v48 = vperm.slane %v2147_v60, 6 }
 0x5fd   : > { %3860 = vst [vmem:[#allocation1 + $0x6] ss:$9 sm:$0xff] %v3000_v44  ;;  %vm2164_vm0 = vweird.f32 %v1252_v59 }
 0x5fe   : > { %3861 = vst [vmem:[#allocation1 + $0x7] ss:$9 sm:$0xff] %v3001_v1  ;;  %v3020_v1 = vperm.slane %v2147_v60, 2  ;;  %v2152_v33 = vsub.f32 1.5, %v2151_v26 }
 0x601   : > { %v5451_v43 = vpop.eup %5450 }
 0x602   : > { %v2159_v13 = vmul.f32 %v5451_v43, %v1252_v59  ;;  %vm2165_vm4 = vweird.f32 %v5451_v43 }
 0x603   : > { %vm2166_vm1 = vmor %vm2164_vm0, %vm2165_vm4 }
 0x605   : > { %v3862_v19 = vld [vmem:[#allocation1] sm:$0xff] }
 0x606   : > { %4209 = vperm.xlu1 %5268, %v3862_v19   ;;  %3863 = vst [vmem:[#allocation1] ss:$9 sm:$0xff] %v3002_v47  ;;  %v3025_v47 = vperm.slane %v2147_v60, 7  ;;  %v6999_v19 = vld [vmem:[#allocation14_spill] sm:$0xff] }
 0x607   : > { %3864 = vst [vmem:[#allocation1 + $0x1] ss:$9 sm:$0xff] %v3003_v16  ;;  %v2153_v16 = vmul.f32 %v5449_v50, %v2152_v33 }
 0x608   : > { %3865 = vst [vmem:[#allocation1 + $0x2] ss:$9 sm:$0xff] %v3004_v42  ;;  %v1253_v42 = vmax.f32 %v6999_v19, 1e-24 }
 0x609   : > { %3866 = vst [vmem:[#allocation1 + $0x3] ss:$9 sm:$0xff] %v3005_v29  ;;  %v2160_v29 = vmul.f32 %v5451_v43, %v2159_v13  ;;  %v2157_v56 = vsel %vm2156_vm14, %v5449_v50, %v2153_v16 }
 0x60a   : > { %3867 = vst [vmem:[#allocation1 + $0x4] ss:$9 sm:$0xff] %v3006_v5  ;;  %5452 = vrsqrt.f32 %v1253_v42  ;;  %v3026_v5 = vperm.slane %v2157_v56, 0  ;;  %v3029_v17 = vperm.slane %v2157_v56, 3  ;;  %v3030_v9 = vperm.slane %v2157_v56, 4 }
 0x60b   : > { %3868 = vst [vmem:[#allocation1 + $0x5] ss:$9 sm:$0xff] %v3007_v62  ;;  %v2161_v52 = vmul.f32 0.5, %v2160_v29  ;;  %v3027_v62 = vperm.slane %v2157_v56, 1  ;;  %v3031_v36 = vperm.slane %v2157_v56, 5  ;;  %v3032_v11 = vperm.slane %v2157_v56, 6 }
 0x60c   : > { %3869 = vst [vmem:[#allocation1 + $0x6] ss:$9 sm:$0xff] %v3008_v49  ;;  %vm2174_vm15 = vweird.f32 %v1253_v42 }
 0x60d   : > { %3870 = vst [vmem:[#allocation1 + $0x7] ss:$9 sm:$0xff] %v3009_v51  ;;  %v3028_v51 = vperm.slane %v2157_v56, 2  ;;  %v2162_v45 = vsub.f32 1.5, %v2161_v52 }
 0x610   : > { %v5453_v10 = vpop.eup %5452 }
 0x611   : > { %v2169_v34 = vmul.f32 %v5453_v10, %v1253_v42  ;;  %vm2175_vm5 = vweird.f32 %v5453_v10 }
 0x612   : > { %vm2176_vm14 = vmor %vm2174_vm15, %vm2175_vm5 }
 0x614   : > { %v3871_v23 = vld [vmem:[#allocation1] sm:$0xff] }
 0x615   : > { %4212 = vperm.xlu2 %5269, %v3871_v23   ;;  %3872 = vst [vmem:[#allocation1] ss:$9 sm:$0xff] %v3010_v24  ;;  %v3033_v24 = vperm.slane %v2157_v56, 7  ;;  %v7000_v23 = vld [vmem:[#allocation10_spill] sm:$0xff] }
 0x616   : > { %3873 = vst [vmem:[#allocation1 + $0x1] ss:$9 sm:$0xff] %v3011_v31  ;;  %v2163_v31 = vmul.f32 %v5451_v43, %v2162_v45 }
 0x617   : > { %3874 = vst [vmem:[#allocation1 + $0x2] ss:$9 sm:$0xff] %v3012_v55  ;;  %v1254_v55 = vmax.f32 %v7000_v23, 1e-24 }
 0x618   : > { %3875 = vst [vmem:[#allocation1 + $0x3] ss:$9 sm:$0xff] %v3013_v0  ;;  %v2170_v0 = vmul.f32 %v5453_v10, %v2169_v34  ;;  %v2167_v50 = vsel %vm2166_vm1, %v5451_v43, %v2163_v31 }
 0x619   : > { %3876 = vst [vmem:[#allocation1 + $0x4] ss:$9 sm:$0xff] %v3014_v2  ;;  %5454 = vrsqrt.f32 %v1254_v55  ;;  %v3034_v2 = vperm.slane %v2167_v50, 0  ;;  %v3036_v40 = vperm.slane %v2167_v50, 2  ;;  %v3038_v54 = vperm.slane %v2167_v50, 4 }
 0x61a   : > { %3877 = vst [vmem:[#allocation1 + $0x5] ss:$9 sm:$0xff] %v3015_v28  ;;  %v2171_v18 = vmul.f32 0.5, %v2170_v0  ;;  %v3035_v28 = vperm.slane %v2167_v50, 1  ;;  %v3039_v57 = vperm.slane %v2167_v50, 5  ;;  %v3040_v60 = vperm.slane %v2167_v50, 6 }
 0x61b   : > { %3878 = vst [vmem:[#allocation1 + $0x6] ss:$9 sm:$0xff] %v3016_v4  ;;  %vm2184_vm0 = vweird.f32 %v1254_v55 }
 0x61c   : > { %3879 = vst [vmem:[#allocation1 + $0x7] ss:$9 sm:$0xff] %v3017_v63  ;;  %v3037_v63 = vperm.slane %v2167_v50, 3  ;;  %v2172_v59 = vsub.f32 1.5, %v2171_v18 }
 0x61f   : > { %v5455_v7 = vpop.eup %5454 }
 0x620   : > { %v2179_v26 = vmul.f32 %v5455_v7, %v1254_v55  ;;  %vm2185_vm4 = vweird.f32 %v5455_v7 }
 0x621   : > { %vm2186_vm1 = vmor %vm2184_vm0, %vm2185_vm4 }
 0x623   : > { %v3880_v44 = vld [vmem:[#allocation1] sm:$0xff] }
 0x624   : > { %4215 = vperm.xlu0 %5267, %v3880_v44   ;;  %3881 = vst [vmem:[#allocation1] ss:$9 sm:$0xff] %v3018_v46  ;;  %v3041_v46 = vperm.slane %v2167_v50, 7  ;;  %v7001_v44 = vld [vmem:[#allocation17_spill] sm:$0xff] }
 0x625   : > { %3882 = vst [vmem:[#allocation1 + $0x1] ss:$9 sm:$0xff] %v3019_v22  ;;  %v2173_v22 = vmul.f32 %v5453_v10, %v2172_v59 }
 0x626   : > { %3883 = vst [vmem:[#allocation1 + $0x2] ss:$9 sm:$0xff] %v3020_v1  ;;  %v1255_v1 = vmax.f32 %v7001_v44, 1e-24 }
 0x627   : > { %3884 = vst [vmem:[#allocation1 + $0x3] ss:$9 sm:$0xff] %v3021_v53  ;;  %v2180_v53 = vmul.f32 %v5455_v7, %v2179_v26  ;;  %v2177_v43 = vsel %vm2176_vm14, %v5453_v10, %v2173_v22 }
 0x628   : > { %3885 = vst [vmem:[#allocation1 + $0x4] ss:$9 sm:$0xff] %v3022_v15  ;;  %5456 = vrsqrt.f32 %v1255_v1  ;;  %v3042_v15 = vperm.slane %v2177_v43, 0  ;;  %v3045_v13 = vperm.slane %v2177_v43, 3  ;;  %v3046_v42 = vperm.slane %v2177_v43, 4 }
 0x629   : > { %3886 = vst [vmem:[#allocation1 + $0x5] ss:$9 sm:$0xff] %v3023_v32  ;;  %v2181_v33 = vmul.f32 0.5, %v2180_v53  ;;  %v3043_v32 = vperm.slane %v2177_v43, 1  ;;  %v3047_v29 = vperm.slane %v2177_v43, 5  ;;  %v3048_v56 = vperm.slane %v2177_v43, 6 }
 0x62a   : > { %3887 = vst [vmem:[#allocation1 + $0x6] ss:$9 sm:$0xff] %v3024_v48  ;;  %vm2194_vm15 = vweird.f32 %v1255_v1 }
 0x62b   : > { %3888 = vst [vmem:[#allocation1 + $0x7] ss:$9 sm:$0xff] %v3025_v47  ;;  %v3044_v47 = vperm.slane %v2177_v43, 2  ;;  %v2182_v19 = vsub.f32 1.5, %v2181_v33 }
 0x62e   : > { %v5457_v16 = vpop.eup %5456 }
 0x62f   : > { %v2189_v52 = vmul.f32 %v5457_v16, %v1255_v1  ;;  %vm2195_vm5 = vweird.f32 %v5457_v16 }
 0x630   : > { %vm2196_vm14 = vmor %vm2194_vm15, %vm2195_vm5 }
 0x632   : > { %v3889_v49 = vld [vmem:[#allocation1] sm:$0xff] }
 0x633   : > { %4218 = vperm.xlu1 %5268, %v3889_v49   ;;  %3890 = vst [vmem:[#allocation1] ss:$9 sm:$0xff] %v3026_v5  ;;  %v3049_v5 = vperm.slane %v2177_v43, 7  ;;  %v7002_v49 = vld [vmem:[#allocation16_spill] sm:$0xff] }
 0x634   : > { %3891 = vst [vmem:[#allocation1 + $0x1] ss:$9 sm:$0xff] %v3027_v62  ;;  %v2183_v62 = vmul.f32 %v5455_v7, %v2182_v19 }
 0x635   : > { %3892 = vst [vmem:[#allocation1 + $0x2] ss:$9 sm:$0xff] %v3028_v51  ;;  %v1256_v51 = vmax.f32 %v7002_v49, 1e-24 }
 0x636   : > { %3893 = vst [vmem:[#allocation1 + $0x3] ss:$9 sm:$0xff] %v3029_v17  ;;  %v2190_v17 = vmul.f32 %v5457_v16, %v2189_v52  ;;  %v2187_v10 = vsel %vm2186_vm1, %v5455_v7, %v2183_v62 }
 0x637   : > { %3894 = vst [vmem:[#allocation1 + $0x4] ss:$9 sm:$0xff] %v3030_v9  ;;  %5458 = vrsqrt.f32 %v1256_v51  ;;  %v3050_v9 = vperm.slane %v2187_v10, 0  ;;  %v3053_v34 = vperm.slane %v2187_v10, 3  ;;  %v3054_v23 = vperm.slane %v2187_v10, 4 }
 0x638   : > { %3895 = vst [vmem:[#allocation1 + $0x5] ss:$9 sm:$0xff] %v3031_v36  ;;  %v2191_v45 = vmul.f32 0.5, %v2190_v17  ;;  %v3051_v36 = vperm.slane %v2187_v10, 1  ;;  %v3055_v0 = vperm.slane %v2187_v10, 5  ;;  %v3056_v50 = vperm.slane %v2187_v10, 6 }
 0x639   : > { %3896 = vst [vmem:[#allocation1 + $0x6] ss:$9 sm:$0xff] %v3032_v11  ;;  %vm2204_vm0 = vweird.f32 %v1256_v51 }
 0x63a   : > { %3897 = vst [vmem:[#allocation1 + $0x7] ss:$9 sm:$0xff] %v3033_v24  ;;  %v3052_v24 = vperm.slane %v2187_v10, 2  ;;  %v2192_v55 = vsub.f32 1.5, %v2191_v45 }
 0x63d   : > { %v5459_v31 = vpop.eup %5458 }
 0x63e   : > { %v2199_v18 = vmul.f32 %v5459_v31, %v1256_v51  ;;  %vm2205_vm4 = vweird.f32 %v5459_v31 }
 0x63f   : > { %vm2206_vm1 = vmor %vm2204_vm0, %vm2205_vm4  ;;  %vm7005_vm0 = vcmask 720512  }
 0x641   : > { %v3898_v4 = vld [vmem:[#allocation1] sm:$0xff] }
 0x642   : > { %4221 = vperm.xlu2 %5269, %v3898_v4   ;;  %3899 = vst [vmem:[#allocation1] ss:$9 sm:$0xff] %v3034_v2  ;;  %v3057_v2 = vperm.slane %v2187_v10, 7  ;;  %v7003_v4 = vld [vmem:[#allocation13_spill] sm:$0xff] }
 0x643   : > { %3900 = vst [vmem:[#allocation1 + $0x1] ss:$9 sm:$0xff] %v3035_v28  ;;  %v2193_v28 = vmul.f32 %v5457_v16, %v2192_v55 }
 0x644   : > { %3901 = vst [vmem:[#allocation1 + $0x2] ss:$9 sm:$0xff] %v3036_v40  ;;  %v1257_v40 = vmax.f32 %v7003_v4, 1e-24  ;;  %v4150_v4 = vpop.permute.xlu2 %4149 }
 0x645   : > { %3902 = vst [vmem:[#allocation1 + $0x3] ss:$9 sm:$0xff] %v3037_v63  ;;  %v2200_v63 = vmul.f32 %v5459_v31, %v2199_v18  ;;  %v2197_v7 = vsel %vm2196_vm14, %v5457_v16, %v2193_v28  ;;  %v4147_v28 = vpop.permute.xlu0 %4146 }
 0x646   : > { %3903 = vst [vmem:[#allocation1 + $0x4] ss:$9 sm:$0xff] %v3038_v54  ;;  %5460 = vrsqrt.f32 %v1257_v40  ;;  %v3058_v54 = vperm.slane %v2197_v7, 0  ;;  %v3060_v26 = vperm.slane %v2197_v7, 2  ;;  %v3062_v44 = vperm.slane %v2197_v7, 4 }
 0x647   : > { %3904 = vst [vmem:[#allocation1 + $0x5] ss:$9 sm:$0xff] %v3039_v57  ;;  %v2201_v59 = vmul.f32 0.5, %v2200_v63  ;;  %v3059_v57 = vperm.slane %v2197_v7, 1  ;;  %v3063_v53 = vperm.slane %v2197_v7, 5  ;;  %v3064_v43 = vperm.slane %v2197_v7, 6 }
 0x648   : > { %3905 = vst [vmem:[#allocation1 + $0x6] ss:$9 sm:$0xff] %v3040_v60  ;;  %vm2214_vm15 = vweird.f32 %v1257_v40  ;;  %v5196_v63 = vld [vmem:[%s5718_s3 + $0x138] sm:$0xff] }
 0x649   : > { %3906 = vst [vmem:[#allocation1 + $0x7] ss:$9 sm:$0xff] %v3041_v46  ;;  %v3061_v46 = vperm.slane %v2197_v7, 3  ;;  %v2202_v1 = vsub.f32 1.5, %v2201_v59  ;;  %v4159_v59 = vpop.permute.xlu1 %4158  ;;  %4769 = vmatpush.bf16.msrb.mxu0 %v5196_v63 }
 0x64c   : > { %v5461_v22 = vpop.eup %5460 }
 0x64d   : > { %v2209_v33 = vmul.f32 %v5461_v22, %v1257_v40  ;;  %vm2215_vm5 = vweird.f32 %v5461_v22  ;;  %v4156_v40 = vpop.permute.xlu0 %4155 }
 0x64e   : > { %vm2216_vm14 = vmor %vm2214_vm15, %vm2215_vm5 }
 0x64f   : > { %v2210_v16 = vmul.f32 %v5461_v22, %v2209_v33 }
 0x650   : > { %v3907_v48 = vld [vmem:[#allocation1] sm:$0xff] }
 0x651   : > { %4224 = vperm.xlu0 %5267, %v3907_v48   ;;  %3908 = vst [vmem:[#allocation1] ss:$9 sm:$0xff] %v3042_v15  ;;  %v3065_v15 = vperm.slane %v2197_v7, 7  ;;  %v2203_v48 = vmul.f32 %v5459_v31, %v2202_v1  ;;  %v5204_v7 = vld [vmem:[%s5718_s3 + $0x178] sm:$0xff] }
 0x652   : > { %3909 = vst [vmem:[#allocation1 + $0x1] ss:$9 sm:$0xff] %v3043_v32  ;;  %v4846_v32 = vld [vmem:[%s5716_s30 + $0x3] sm:$0x1]  ;;  %4830 = vmatpush.bf16.msrb.mxu1 %v5204_v7 }
 0x653   : > { %3910 = vst [vmem:[#allocation1 + $0x2] ss:$9 sm:$0xff] %v3044_v47  ;;  %v4717_v47 = vpop.f32.mrf.mxu3  ;;  %v2207_v19 = vsel %vm2206_vm1, %v5459_v31, %v2203_v48  ;;  %v5194_v48 = vld [vmem:[%s5718_s3 + $0x128] sm:$0xff] }
 0x654   : > { %3911 = vst [vmem:[#allocation1 + $0x3] ss:$9 sm:$0xff] %v3045_v13  ;;  %v4852_v13 = vadd.f32 %v4846_v32, %v4717_v47  ;;  %v3068_v62 = vperm.slane %v2207_v19, 2  ;;  %v3069_v49 = vperm.slane %v2207_v19, 3  ;;  %v3070_v17 = vperm.slane %v2207_v19, 4 }
 0x655   : > { %3912 = vst [vmem:[#allocation1 + $0x4] ss:$9 sm:$0xff] %v3046_v42  ;;  %v2211_v42 = vmul.f32 0.5, %v2210_v16  ;;  %v3071_v10 = vperm.slane %v2207_v19, 5  ;;  %v3073_v45 = vperm.slane %v2207_v19, 7  ;;  %v5202_v16 = vld [vmem:[%s5718_s3 + $0x168] sm:$0xff] }
 0x656   : > { %3913 = vst [vmem:[#allocation1 + $0x5] ss:$9 sm:$0xff] %v3047_v29  ;;  %v3066_v29 = vperm.slane %v2207_v19, 0 }
 0x657   : > { %3914 = vst [vmem:[#allocation1 + $0x6] ss:$9 sm:$0xff] %v3048_v56  ;;  %v3067_v56 = vperm.slane %v2207_v19, 1  ;;  %v2212_v51 = vsub.f32 1.5, %v2211_v42 }
 0x658   : > { %3915 = vst [vmem:[#allocation1 + $0x7] ss:$9 sm:$0xff] %v3049_v5 }
 0x659   : > { %4858 = vst [vmem:[%s5716_s30 + $0x3] sm:$0x1] %v4852_v13 }
 0x65b   : > { %v4719_v52 = vpop.f32.mrf.mxu3 }
 0x65f   : > { %v3916_v11 = vld [vmem:[#allocation1] sm:$0xff] }
 0x660   : > { %4227 = vperm.xlu1 %5268, %v3916_v11   ;;  %3917 = vst [vmem:[#allocation1] ss:$9 sm:$0xff] %v3050_v9  ;;  %v3072_v9 = vperm.slane %v2207_v19, 6  ;;  %v5193_v19 = vld [vmem:[%s5718_s3 + $0x120] sm:$0xff] }
 0x661   : > { %3918 = vst [vmem:[#allocation1 + $0x1] ss:$9 sm:$0xff] %v3051_v36  ;;  %v2213_v36 = vmul.f32 %v5461_v22, %v2212_v51  ;;  %v5191_v51 = vld [vmem:[%s5718_s3 + $0x110] sm:$0xff] }
 0x662   : > { %3919 = vst [vmem:[#allocation1 + $0x2] ss:$9 sm:$0xff] %v3052_v24 }
 0x663   : > { %3920 = vst [vmem:[#allocation1 + $0x3] ss:$9 sm:$0xff] %v3053_v34  ;;  %v2217_v11 = vsel %vm2216_vm14, %v5461_v22, %v2213_v36  ;;  %v4168_v22 = vpop.permute.xlu1 %4167  ;;  %v4402_v36 = vperm.slane %v4156_v40, %v6377_v41 }
 0x664   : > { %3921 = vst [vmem:[#allocation1 + $0x4] ss:$9 sm:$0xff] %v3054_v23  ;;  %v3074_v24 = vperm.slane %v2217_v11, 0  ;;  %v3075_v34 = vperm.slane %v2217_v11, 1  ;;  %v3076_v23 = vperm.slane %v2217_v11, 2  ;;  %v3077_v55 = vperm.slane %v2217_v11, 3 }
 0x665   : > { %3922 = vst [vmem:[#allocation1 + $0x5] ss:$9 sm:$0xff] %v3055_v0  ;;  %v3078_v0 = vperm.slane %v2217_v11, 4  ;;  %v3081_v18 = vperm.slane %v2217_v11, 7  ;;  %v4410_v63 = vperm.slane %v4168_v22, %v6408_v20 }
 0x666   : > { %3923 = vst [vmem:[#allocation1 + $0x6] ss:$9 sm:$0xff] %v3056_v50  ;;  %v3079_v50 = vperm.slane %v2217_v11, 5 }
 0x667   : > { %3924 = vst [vmem:[#allocation1 + $0x7] ss:$9 sm:$0xff] %v3057_v2  ;;  %v3080_v2 = vperm.slane %v2217_v11, 6  ;;  %v5190_v11 = vld [vmem:[%s5718_s3 + $0x108] sm:$0xff] }
 0x66e   : > { %v3925_v60 = vld [vmem:[#allocation1] sm:$0xff] }
 0x66f   : > { %4230 = vperm.xlu2 %5269, %v3925_v60   ;;  %3926 = vst [vmem:[#allocation1] ss:$9 sm:$0xff] %v3058_v54  ;;  %v4153_v54 = vpop.permute.xlu2 %4152  ;;  %v5203_v60 = vld [vmem:[%s5718_s3 + $0x170] sm:$0xff] }
 0x670   : > { %3927 = vst [vmem:[#allocation1 + $0x1] ss:$9 sm:$0xff] %v3059_v57  ;;  %v5195_v57 = vld [vmem:[%s5718_s3 + $0x130] sm:$0xff]  ;;  %4831 = vmatpush.bf16.msrb.mxu1 %v5203_v60 }
 0x671   : > { %3928 = vst [vmem:[#allocation1 + $0x2] ss:$9 sm:$0xff] %v3060_v26  ;;  %v4165_v26 = vpop.permute.xlu0 %4164  ;;  %4770 = vmatpush.bf16.msrb.mxu0 %v5195_v57 }
 0x672   : > { %3929 = vst [vmem:[#allocation1 + $0x3] ss:$9 sm:$0xff] %v3061_v46 }
 0x673   : > { %3930 = vst [vmem:[#allocation1 + $0x4] ss:$9 sm:$0xff] %v3062_v44 }
 0x674   : > { %3931 = vst [vmem:[#allocation1 + $0x5] ss:$9 sm:$0xff] %v3063_v53  ;;  %v6833_v53 = vpop.permute.xlu1 %4176  ;;  %4832 = vmatpush.bf16.msrb.mxu1 %v5202_v16 }
 0x675   : > { %3932 = vst [vmem:[#allocation1 + $0x6] ss:$9 sm:$0xff] %v3064_v43  ;;  %4771 = vmatpush.bf16.msrb.mxu0 %v5194_v48 }
 0x676   : > { %3933 = vst [vmem:[#allocation1 + $0x7] ss:$9 sm:$0xff] %v3065_v15 }
 0x677   : > { %v4162_v46 = vpop.permute.xlu2 %4161 }
 0x678   : > { %v4406_v40 = vperm.slane %v4162_v46, %v6393_v35 }
 0x679   : > { %v6829_v44 = vpop.permute.xlu0 %4173  ;;  %4772 = vmatpush.bf16.msrb.mxu0 %v5193_v19 }
 0x67a   : > { %v4414_v48 = vperm.slane %v6829_v44, %v6418_v6 }
 0x67c   : > { %v6839_v15 = vpop.permute.xlu1 %4185 }
 0x67d   : > { %v3934_v5 = vld [vmem:[#allocation1] sm:$0xff] }
 0x67e   : > { %4233 = vperm.xlu0 %5267, %v3934_v5   ;;  %3935 = vst [vmem:[#allocation1] ss:$9 sm:$0xff] %v3066_v29  ;;  %v5201_v29 = vld [vmem:[%s5718_s3 + $0x160] sm:$0xff]  ;;  %v5200_v5 = vld [vmem:[%s5718_s3 + $0x158] sm:$0xff] }
 0x67f   : > { %3936 = vst [vmem:[#allocation1 + $0x1] ss:$9 sm:$0xff] %v3067_v56  ;;  %v6831_v1 = vpop.permute.xlu2 %4170  ;;  %v5192_v56 = vld [vmem:[%s5718_s3 + $0x118] sm:$0xff]  ;;  %4833 = vmatpush.bf16.msrb.mxu1 %v5201_v29 }
 0x680   : > { %3937 = vst [vmem:[#allocation1 + $0x2] ss:$9 sm:$0xff] %v3068_v62  ;;  %4773 = vmatpush.bf16.msrb.mxu0 %v5192_v56 }
 0x681   : > { %3938 = vst [vmem:[#allocation1 + $0x3] ss:$9 sm:$0xff] %v3069_v49  ;;  %v6835_v43 = vpop.permute.xlu0 %4182  ;;  %v4397_v49 = vperm.slane %v4147_v28, %v6356_v37 }
 0x682   : > { %3939 = vst [vmem:[#allocation1 + $0x4] ss:$9 sm:$0xff] %v3070_v17 }
 0x683   : > { %3940 = vst [vmem:[#allocation1 + $0x5] ss:$9 sm:$0xff] %v3071_v10  ;;  %4834 = vmatpush.bf16.msrb.mxu1 %v5200_v5  ;;  %v5199_v10 = vld [vmem:[%s5718_s3 + $0x150] sm:$0xff]  ;;  %v4420_v5 = vperm.slane %v6835_v43, %v6448_v38 }
 0x684   : > { %3941 = vst [vmem:[#allocation1 + $0x6] ss:$9 sm:$0xff] %v3072_v9  ;;  %v4195_v13 = vpop.permute.xlu1 %4194  ;;  %v4398_v9 = vperm.slane %v4150_v4, %v6360_v25  ;;  %4774 = vmatpush.bf16.msrb.mxu0 %v5191_v51  ;;  %v5197_v4 = vld [vmem:[%s5718_s3 + $0x140] sm:$0xff] }
 0x685   : > { %3942 = vst [vmem:[#allocation1 + $0x7] ss:$9 sm:$0xff] %v3073_v45  ;;  %v4428_v57 = vperm.slane %v4195_v13, %v6356_v37 }
 0x686   : > { %4191 = vperm.xlu0 %5267, %v6807_v3   ;;  %v4399_v45 = vsel %vm4246_vm2, %v4398_v9, %v4397_v49 }
 0x687   : > { %v6837_v33 = vpop.permute.xlu2 %4179  ;;  %4835 = vmatpush.bf16.msrb.mxu1 %v5199_v10 }
 0x688   : > { %4775 = vmatpush.bf16.msrb.mxu0 %v5190_v11 }
 0x689   : > { %v4198_v32 = vpop.permute.xlu0 %4197 }
 0x68a   : > { %v4429_v7 = vperm.slane %v4198_v32, %v6360_v25  ;;  %v4412_v25 = vperm.slane %v6831_v1, %v6413_v58 }
 0x68c   : > { %v3943_v31 = vld [vmem:[#allocation1] sm:$0xff]  ;;  %v4201_v62 = vpop.permute.xlu1 %4200  ;;  %v4430_v46 = vsel %vm4246_vm2, %v4429_v7, %v4428_v57  ;;  %vm7004_vm2 = vcmask 654912  }
 0x68d   : > { %4236 = vperm.xlu1 %5268, %v3943_v31   ;;  %3944 = vst [vmem:[#allocation1] ss:$9 sm:$0xff] %v3074_v24  ;;  %v4400_v24 = vperm.slane %v4153_v54, %v6365_v12  ;;  %v5198_v31 = vld [vmem:[%s5718_s3 + $0x148] sm:$0xff]  ;;  %v4431_v54 = vperm.slane %v4201_v62, %v6365_v12  ;;  %v4416_v12 = vperm.slane %v6833_v53, %v6426_v27 }
 0x68e   : > { %3945 = vst [vmem:[#allocation1 + $0x1] ss:$9 sm:$0xff] %v3075_v34  ;;  %v4404_v34 = vperm.slane %v4159_v59, %v6374_v14  ;;  %4836 = vmatpush.bf16.msrb.mxu1 %v5198_v31 }
 0x68f   : > { %3946 = vst [vmem:[#allocation1 + $0x2] ss:$9 sm:$0xff] %v3076_v23  ;;  %v6842_v47 = vpop.permute.xlu2 %4188  ;;  %v4401_v23 = vsel %vm4250_vm3, %v4400_v24, %v4399_v45  ;;  %v4432_v22 = vsel %vm4250_vm3, %v4431_v54, %v4430_v46  ;;  %vm7006_vm3 = vcmask 786112  }
 0x690   : > { %3947 = vst [vmem:[#allocation1 + $0x3] ss:$9 sm:$0xff] %v3077_v55 }
 0x691   : > { %3948 = vst [vmem:[#allocation1 + $0x4] ss:$9 sm:$0xff] %v3078_v0  ;;  %v6846_v42 = vpop.permute.xlu0 %4206 }
 0x692   : > { %3949 = vst [vmem:[#allocation1 + $0x5] ss:$9 sm:$0xff] %v3079_v50  ;;  %v4403_v50 = vsel %vm4254_vm6, %v4402_v36, %v4401_v23  ;;  %4837 = vmatpush.bf16.msrb.mxu1 %v5197_v4  ;;  %v4435_v37 = vperm.slane %v6846_v42, %v6374_v14  ;;  %v4418_v42 = vperm.slane %v6837_v33, %v6435_v30 }
 0x693   : > { %3950 = vst [vmem:[#allocation1 + $0x6] ss:$9 sm:$0xff] %v3080_v2  ;;  %v5189_v2 = vld [vmem:[%s5718_s3 + $0x100] sm:$0xff] }
 0x694   : > { %3951 = vst [vmem:[#allocation1 + $0x7] ss:$9 sm:$0xff] %v3081_v18  ;;  %v4210_v0 = vpop.permute.xlu1 %4209  ;;  %v4405_v18 = vsel %vm4258_vm8, %v4404_v34, %v4403_v50  ;;  %4776 = vmatpush.bf16.msrb.mxu0 %v5189_v2  ;;  %v1160_v34 = vld [vmem:[%s5720_s4 + $0x4] sm:$0x1] }
 0x695   : > { %v4407_v59 = vsel %vm4262_vm9, %v4406_v40, %v4405_v18  ;;  %v4437_v19 = vperm.slane %v4210_v0, %v6393_v35 }
 0x697   : > { %v4204_v52 = vpop.permute.xlu2 %4203 }
 0x698   : > { %v4433_v16 = vperm.slane %v4204_v52, %v6377_v41  ;;  %v4422_v41 = vperm.slane %v6839_v15, %v6455_v8 }
 0x699   : > { %v6853_v17 = vpop.permute.xlu0 %4215 }
 0x69a   : > { %v4434_v1 = vsel %vm4254_vm6, %v4433_v16, %v4432_v22  ;;  %v4441_v52 = vperm.slane %v6853_v17, %v6408_v20  ;;  %vm7007_vm6 = vcmask 851712   ;;  %v4424_v20 = vperm.slane %v6842_v47, %v6462_v61 }
 0x69b   : > { %v3952_v3 = vld [vmem:[#allocation1] sm:$0xff]  ;;  %v4436_v14 = vsel %vm4258_vm8, %v4435_v37, %v4434_v1  ;;  %vm7008_vm8 = vcmask 917312  }
 0x69c   : > { %4239 = vperm.xlu2 %5269, %v3952_v3   ;;  %v4408_v3 = vperm.slane %v4165_v26, %v6396_v39  ;;  %v4438_v35 = vsel %vm4262_vm9, %v4437_v19, %v4436_v14  ;;  %vm7009_vm9 = vmmov %vm7004_vm2 }
 0x69d   : > { %vm7013_vm4 = vmmov %vm7008_vm8 }
 0x69e   : > { %v4409_v60 = vsel %vm4266_vm10, %v4408_v3, %v4407_v59  ;;  %v4847_v59 = vld [vmem:[%s5716_s30 + $0x4] sm:$0x1] }
 0x69f   : > { %v4213_v55 = vpop.permute.xlu2 %4212  ;;  %v4411_v26 = vsel %vm4270_vm11, %v4410_v63, %v4409_v60  ;;  %v1161_v63 = vld [vmem:[%s5720_s4 + $0x5] sm:$0x1] }
 0x6a0   : > { %v4413_v44 = vsel %vm4274_vm12, %v4412_v25, %v4411_v26  ;;  %v4439_v62 = vperm.slane %v4213_v55, %v6396_v39  ;;  %v4848_v26 = vld [vmem:[%s5716_s30 + $0x5] sm:$0x1] }
 0x6a1   : > { %v4415_v56 = vsel %vm7004_vm2, %v4414_v48, %v4413_v44 }
 0x6a2   : > { %v4417_v53 = vsel %vm7005_vm0, %v4416_v12, %v4415_v56  ;;  %v4440_v10 = vsel %vm4266_vm10, %v4439_v62, %v4438_v35  ;;  %vm7010_vm10 = vmmov %vm7005_vm0 }
 0x6a3   : > { %v4419_v43 = vsel %vm7006_vm3, %v4418_v42, %v4417_v53  ;;  %v4442_v45 = vsel %vm4270_vm11, %v4441_v52, %v4440_v10  ;;  %vm7011_vm11 = vmmov %vm7006_vm3 }
 0x6a4   : > { %v4421_v51 = vsel %vm7007_vm6, %v4420_v5, %v4419_v43 }
 0x6a5   : > { %v4219_v13 = vpop.permute.xlu1 %4218  ;;  %v4423_v15 = vsel %vm7008_vm8, %v4422_v41, %v4421_v51 }
 0x6a6   : > { %v4443_v49 = vperm.slane %v4219_v13, %v6413_v58  ;;  %v4425_v31 = vsel %vm4298_vm13, %v4424_v20, %v4423_v15 }
 0x6a7   : > { %v4222_v32 = vpop.permute.xlu2 %4221 }
 0x6a8   : > { %v4444_v39 = vsel %vm4274_vm12, %v4443_v49, %v4442_v45  ;;  %v4445_v36 = vperm.slane %v4222_v32, %v6418_v6  ;;  %vm7012_vm12 = vmmov %vm7007_vm6 }
 0x6aa   : > { %v4446_v23 = vsel %vm7009_vm9, %v4445_v36, %v4444_v39 }
 0x6c3   : > { %v4225_v28 = vpop.permute.xlu0 %4224 }
 0x6c4   : > { %v4447_v17 = vperm.slane %v4225_v28, %v6426_v27 }
 0x6c6   : > { %v4448_v47 = vsel %vm7010_vm10, %v4447_v17, %v4446_v23 }
 0x6c9   : > { %v4231_v33 = vpop.permute.xlu2 %4230 }
 0x6ca   : > { %v4451_v6 = vperm.slane %v4231_v33, %v6448_v38 }
 0x6d2   : > { %v4228_v9 = vpop.permute.xlu1 %4227 }
 0x6d3   : > { %v4449_v11 = vperm.slane %v4228_v9, %v6435_v30 }
 0x6d5   : > { %v4450_v27 = vsel %vm7011_vm11, %v4449_v11, %v4448_v47 }
 0x6d6   : > { %v4452_v3 = vsel %vm7012_vm12, %v4451_v6, %v4450_v27 }
 0x6f0   : > { %v4234_v29 = vpop.permute.xlu0 %4233 }
 0x6f1   : > { %v4453_v50 = vperm.slane %v4234_v29, %v6455_v8 }
 0x6f3   : > { %v4454_v40 = vsel %vm7013_vm4, %v4453_v50, %v4452_v3 }
 0x6f6   : > { %v4240_v30 = vpop.permute.xlu2 %4239 }
 0x6f7   : > { %v4457_v4 = vperm.slane %v4240_v30, %v6468_v21 }
 0x6f8   : > { %v4192_v58 = vpop.permute.xlu0 %4191 }
 0x6f9   : > { %v4426_v24 = vperm.slane %v4192_v58, %v6468_v21 }
 0x6fb   : > { %v4427_v55 = vsel %vm4302_vm7, %v4426_v24, %v4425_v31 }
 0x6fc   : > { %v4469_v0 = vmul.f32 %v4427_v55, %v1160_v34 }
 0x6fe   : > { %v4475_v2 = vpack.c.bf16 %v4469_v0, %v4469_v0 }
 0x6ff   : > { %v4237_v18 = vpop.permute.xlu1 %4236 }
 0x700   : > { %v4455_v28 = vperm.slane %v4237_v18, %v6462_v61  ;;  %4777 = vmatmul.bf16.vlgmr.msrb.gmra.mxu0 %v4475_v2 }
 0x702   : > { %v4456_v8 = vsel %vm4298_vm13, %v4455_v28, %v4454_v40 }
 0x703   : > { %v4458_v38 = vsel %vm4302_vm7, %v4457_v4, %v4456_v8 }
 0x704   : > { %v4470_v7 = vmul.f32 %v4458_v38, %v1161_v63 }
 0x706   : > { %v4476_v54 = vpack.c.bf16 %v4470_v7, %v4470_v7 }
 0x708   : > { %4838 = vmatmul.bf16.vlgmr.msrb.gmra.mxu1 %v4476_v54 }
 0x77d   : > { %v4778_v57 = vpop.f32.mrf.mxu0 }
 0x77e   : > { %v4853_v60 = vadd.f32 %v4847_v59, %v4778_v57 }
 0x780   : > { %4859 = vst [vmem:[%s5716_s30 + $0x4] sm:$0x1] %v4853_v60 }
 0x785   : > { %v4839_v61 = vpop.f32.mrf.mxu1  ;;  %v4780_v48 = vpop.f32.mrf.mxu0 }
 0x786   : > { %v4854_v46 = vadd.f32 %v4848_v26, %v4839_v61 }
 0x788   : > { %4860 = vst [vmem:[%s5716_s30 + $0x5] sm:$0x1] %v4854_v46 }
 0x78d   : > { %v4841_v21 = vpop.f32.mrf.mxu1 }
 0x78e PF: > { %s12_s15 = sadd.s32 1, %s5516_s15   ;;  %s7014_s9 = smov %s5496_s10 }
 0x78f   : > { %p9_p12 = scmp.ge.s32.totalorder %s12_s15, 6   ;;  %s7015_s10 = smov %s5590_s23 }
 0x790   : > { %s7016_s11 = smov %s5508_s13  ;;  %s7017_s12 = smov %s5512_s14 }
 0x791   : > { %s7018_s13 = smov %s7021_s16  ;;  %s7019_s14 = smov %s7025_s17 }
 0x792   :  { %11 = sbr.rel (!%p9_p12) target bundleno = 4 (0x4), region = 157 }

</bundles_post_ra>
